<compile_context>
chip_gen: v7x
topology: tpu7x:2x2x1
jax: 0.10.0
libtpu: 0.0.40
codegen_flags: <defaults>
</compile_context>

<pallas_src>
import functools

import jax
import jax.numpy as jnp
from jax.experimental import pallas as pl
from jax.experimental.pallas import tpu as pltpu


IN_WIDTH = 28
IMG_CHANNELS = 1
Z_DIM = 20
H_DIM = 980          # 20 * 7 * 7
C3 = 20              # conv3 output channels
S3 = 7               # conv3 output spatial size
LANE = 128           # mu / logvar each occupy one full 128-lane group
TM_MAX = 512         # rows per grid step (mem-bound tiling sweet spot)


# ----------------------------------------------------------------------------
# Pallas kernels
# ----------------------------------------------------------------------------
def _matmul_bias_act_kernel(a_ref, w_ref, b_ref, o_ref, *, act):
    """o = act(a @ w + b).  a:(tm,K) bf16, w:(K,N) bf16, b:(1,N) f32.

    f32 MXU accumulate, f32 epilogue (v5e-safe), cast only at the store.
    """
    acc = jnp.dot(a_ref[...], w_ref[...], preferred_element_type=jnp.float32)
    acc = acc + b_ref[...]
    if act == "relu":
        acc = jnp.maximum(acc, 0.0)
    elif act == "sigmoid":
        # sigmoid(x) = 0.5*(tanh(x/2)+1): EUP path, no divide, no overflow.
        acc = 0.5 * (jnp.tanh(0.5 * acc) + 1.0)
    o_ref[...] = acc.astype(o_ref.dtype)


def _pick_tm(m, tm_max=TM_MAX):
    if m <= tm_max:
        return m                    # single / full block (always legal)
    return (tm_max // 8) * 8        # multiple of 8; edge block is partial


def pallas_linear(a, w, b, act="none", out_dtype=jnp.bfloat16, tm_max=TM_MAX):
    """act(a @ w + b), rows tiled over the MXU. Narrow (N = w.shape[1]) output."""
    M, K = a.shape
    K2, N = w.shape
    assert K == K2
    tm = _pick_tm(M, tm_max)
    grid_m = pl.cdiv(M, tm)
    return pl.pallas_call(
        functools.partial(_matmul_bias_act_kernel, act=act),
        out_shape=jax.ShapeDtypeStruct((M, N), out_dtype),
        grid=(grid_m,),
        in_specs=[
            pl.BlockSpec((tm, K), lambda i: (i, 0)),
            pl.BlockSpec((K, N), lambda i: (0, 0)),
            pl.BlockSpec((1, N), lambda i: (0, 0)),
        ],
        out_specs=pl.BlockSpec((tm, N), lambda i: (i, 0)),
        compiler_params=pltpu.CompilerParams(
            dimension_semantics=("parallel",)),
    )(a, w, b)


def _latent_kernel(h_ref, wml_ref, bml_ref, eps_ref, w2_ref, b2_ref,
                   ml_ref, h2_ref):
    """Fused fc11 + fc12 + reparameterize + fc2 for one batch tile.

    wml lanes [0,128) = mu columns (20 real + zero pad), lanes [128,256) =
    logvar columns; the mu/logvar split is therefore vreg-aligned.
    Padded lanes stay exactly 0 through the reparameterization.
    """
    ml = jnp.dot(h_ref[...], wml_ref[...], preferred_element_type=jnp.float32)
    ml = ml + bml_ref[...]                               # (tb, 256) f32
    mu = ml[:, :LANE]
    logvar = ml[:, LANE:]
    z = mu + eps_ref[...] * jnp.exp(0.5 * logvar)        # (tb, 128) f32
    h2 = jnp.dot(z.astype(w2_ref.dtype), w2_ref[...],
                 preferred_element_type=jnp.float32)
    h2 = h2 + b2_ref[...]                                # (tb, 980) f32
    ml_ref[...] = ml
    h2_ref[...] = h2.astype(h2_ref.dtype)


def pallas_latent(h, wml, bml, eps_pad, w2, b2, tb_max=TM_MAX):
    """Batch-tiled latent block.  h bf16 (B,980), eps_pad f32 (B,128)."""
    B = h.shape[0]
    tb = B if B <= tb_max else (tb_max // 8) * 8
    grid_b = pl.cdiv(B, tb)
    ml, h2 = pl.pallas_call(
        _latent_kernel,
        out_shape=(jax.ShapeDtypeStruct((B, 2 * LANE), jnp.float32),
                   jax.ShapeDtypeStruct((B, H_DIM), jnp.bfloat16)),
        grid=(grid_b,),
        in_specs=[
            pl.BlockSpec((tb, H_DIM), lambda i: (i, 0)),
            pl.BlockSpec((H_DIM, 2 * LANE), lambda i: (0, 0)),
            pl.BlockSpec((1, 2 * LANE), lambda i: (0, 0)),
            pl.BlockSpec((tb, LANE), lambda i: (i, 0)),
            pl.BlockSpec((LANE, H_DIM), lambda i: (0, 0)),
            pl.BlockSpec((1, H_DIM), lambda i: (0, 0)),
        ],
        out_specs=(pl.BlockSpec((tb, 2 * LANE), lambda i: (i, 0)),
                   pl.BlockSpec((tb, H_DIM), lambda i: (i, 0))),
        compiler_params=pltpu.CompilerParams(
            dimension_semantics=("parallel",)),
    )(h, wml, bml, eps_pad, w2, b2)
    mu = ml[:, :Z_DIM]
    logvar = ml[:, LANE:LANE + Z_DIM]
    return mu, logvar, h2


# ----------------------------------------------------------------------------
# im2col glue (XLA slicing / reshaping only, no arithmetic, bf16 throughout)
# ----------------------------------------------------------------------------
def _im2col(x_nhwc, k, stride):
    """x_nhwc already spatially padded. Returns (B*Ho*Wo, k*k*C), Ho, Wo."""
    B, Hp, Wp, C = x_nhwc.shape
    Ho = (Hp - k) // stride + 1
    Wo = (Wp - k) // stride + 1
    cols = []
    for i in range(k):
        for j in range(k):
            cols.append(
                x_nhwc[:, i:i + (Ho - 1) * stride + 1:stride,
                          j:j + (Wo - 1) * stride + 1:stride, :])
    cols = jnp.concatenate(cols, axis=-1)          # (B, Ho, Wo, k*k*C)
    return cols.reshape(B * Ho * Wo, k * k * C), Ho, Wo


def conv2d(x_nhwc, wm, bm, k, cout, stride, pad, act, out_dtype=jnp.bfloat16):
    """PyTorch Conv2d semantics; wm/bm are pre-folded im2col matrices."""
    B = x_nhwc.shape[0]
    xp = jnp.pad(x_nhwc, ((0, 0), (pad, pad), (pad, pad), (0, 0)))
    cols, Ho, Wo = _im2col(xp, k, stride)
    out = pallas_linear(cols, wm, bm, act, out_dtype)   # (B*Ho*Wo, >=cout)
    return out[:, :cout].reshape(B, Ho, Wo, cout)


def conv_transpose2d(x_nhwc, wm, bm, k, cout, stride, pad, act,
                     out_dtype=jnp.bfloat16):
    """PyTorch ConvTranspose2d semantics via the equivalent stride-1 conv."""
    B = x_nhwc.shape[0]
    ep = k - 1 - pad
    xd = jax.lax.pad(
        x_nhwc, jnp.zeros((), dtype=x_nhwc.dtype),
        [(0, 0, 0), (ep, ep, stride - 1), (ep, ep, stride - 1), (0, 0, 0)])
    cols, Ho, Wo = _im2col(xd, k, 1)
    out = pallas_linear(cols, wm, bm, act, out_dtype)
    return out[:, :cout].reshape(B, Ho, Wo, cout)


# ----------------------------------------------------------------------------
# Parameters: synthetic PyTorch-layout init + one-time folding / padding
# ----------------------------------------------------------------------------
def init_params(key):
    shapes = {
        "conv1_w": (10, IMG_CHANNELS, 3, 3), "conv1_b": (10,),
        "conv2_w": (10, 10, 4, 4),           "conv2_b": (10,),
        "conv3_w": (20, 10, 5, 5),           "conv3_b": (20,),
        "fc11_w": (Z_DIM, H_DIM),            "fc11_b": (Z_DIM,),
        "fc12_w": (Z_DIM, H_DIM),            "fc12_b": (Z_DIM,),
        "fc2_w": (H_DIM, Z_DIM),             "fc2_b": (H_DIM,),
        "deconv1_w": (20, 10, 5, 5),         "deconv1_b": (10,),
        "deconv2_w": (10, 10, 5, 5),         "deconv2_b": (10,),
        "deconv3_w": (10, IMG_CHANNELS, 6, 6), "deconv3_b": (IMG_CHANNELS,),
    }
    params = {}
    keys = jax.random.split(key, len(shapes))
    for k_, (name, shp) in zip(keys, sorted(shapes.items())):
        params[name] = 0.05 * jax.random.normal(k_, shp, dtype=jnp.float32)
    return params


def _conv_mat(w, n_min=0, dtype=jnp.bfloat16):
    """Conv2d weight (Cout,Cin,k,k) -> im2col matrix (k*k*Cin, max(Cout,n_min))."""
    cout, cin, k, _ = w.shape
    wm = jnp.transpose(w, (2, 3, 1, 0)).reshape(k * k * cin, cout)
    if cout < n_min:
        wm = jnp.pad(wm, ((0, 0), (0, n_min - cout)))
    return wm.astype(dtype)


def _deconv_mat(wt, n_min=0, dtype=jnp.bfloat16):
    """ConvTranspose2d weight (Cin,Cout,k,k) -> equivalent-conv im2col matrix."""
    w_conv = jnp.transpose(jnp.flip(wt, axis=(2, 3)), (1, 0, 2, 3))
    return _conv_mat(w_conv, n_min, dtype)


def _bias_row(b, n_min=0):
    n = b.shape[0]
    if n < n_min:
        b = jnp.pad(b, (0, n_min - n))
    return b.reshape(1, -1).astype(jnp.float32)


def _fold_fc_in(w):
    """fc11/fc12 weight (Z,H): permute input rows NCHW-flat -> NHWC-flat."""
    z = w.shape[0]
    return (w.T.reshape(C3, S3, S3, z)
               .transpose(1, 2, 0, 3)
               .reshape(H_DIM, z))


def _fold_fc_out(w, b):
    """fc2 weight (H,Z), bias (H,): permute output cols NCHW-flat -> NHWC-flat."""
    z = w.shape[1]
    wt = (w.T.reshape(z, C3, S3, S3)
             .transpose(0, 2, 3, 1)
             .reshape(z, H_DIM))
    bp = b.reshape(C3, S3, S3).transpose(1, 2, 0).reshape(1, H_DIM)
    return wt, bp


def prepare_params(p):
    """One-time (outside jit) weight folding / padding / matrix layout."""
    w_mu = _fold_fc_in(p["fc11_w"])                       # (980, 20)
    w_lv = _fold_fc_in(p["fc12_w"])                       # (980, 20)
    # mu columns in lanes [0,128), logvar columns in lanes [128,256).
    wml = jnp.concatenate(
        [jnp.pad(w_mu, ((0, 0), (0, LANE - Z_DIM))),
         jnp.pad(w_lv, ((0, 0), (0, LANE - Z_DIM)))],
        axis=1).astype(jnp.bfloat16)                      # (980, 256)
    bml = jnp.concatenate(
        [jnp.pad(p["fc11_b"], (0, LANE - Z_DIM)),
         jnp.pad(p["fc12_b"], (0, LANE - Z_DIM))]
    ).reshape(1, 2 * LANE).astype(jnp.float32)            # (1, 256)
    w2, b2 = _fold_fc_out(p["fc2_w"], p["fc2_b"])         # (20, 980), (1, 980)
    w2 = jnp.pad(w2, ((0, LANE - Z_DIM), (0, 0))).astype(jnp.bfloat16)  # (128, 980)
    b2 = b2.astype(jnp.float32)
    return {
        "conv1_w": _conv_mat(p["conv1_w"]), "conv1_b": _bias_row(p["conv1_b"]),
        "conv2_w": _conv_mat(p["conv2_w"]), "conv2_b": _bias_row(p["conv2_b"]),
        "conv3_w": _conv_mat(p["conv3_w"]), "conv3_b": _bias_row(p["conv3_b"]),
        "latent_w": wml, "latent_b": bml,
        "fc2_w": w2, "fc2_b": b2,
        "deconv1_w": _deconv_mat(p["deconv1_w"]), "deconv1_b": _bias_row(p["deconv1_b"]),
        "deconv2_w": _deconv_mat(p["deconv2_w"]), "deconv2_b": _bias_row(p["deconv2_b"]),
        # final layer: pad the single output channel to 16 columns (avoids a
        # 1-wide matmul/store; ~100 KB extra writeback, sliced off outside).
        "deconv3_w": _deconv_mat(p["deconv3_w"], n_min=16),
        "deconv3_b": _bias_row(p["deconv3_b"], n_min=16),
    }


# ----------------------------------------------------------------------------
# Forward pass
# ----------------------------------------------------------------------------
def vae_forward(pp, x, eps):
    # x = torch.reshape(x, (-1, C, 28, 28))
    x = x.reshape(-1, IMG_CHANNELS, IN_WIDTH, IN_WIDTH)
    x_nhwc = jnp.transpose(x, (0, 2, 3, 1)).astype(jnp.bfloat16)
    B = x_nhwc.shape[0]

    # ----- encode (bf16 activations, f32 accumulate/epilogue in-kernel) -----
    a1 = conv2d(x_nhwc, pp["conv1_w"], pp["conv1_b"], 3, 10, 1, 1, "relu")   # 28x28x10
    a2 = conv2d(a1, pp["conv2_w"], pp["conv2_b"], 4, 10, 2, 1, "relu")       # 14x14x10
    a3 = conv2d(a2, pp["conv3_w"], pp["conv3_b"], 5, 20, 2, 2, "relu")       # 7x7x20

    # NHWC flatten; the NCHW permutation is folded into latent_w / fc2_w.
    h = a3.reshape(B, H_DIM)                                                 # bf16

    # ----- fc11 + fc12 + reparameterize + fc2 (one fused, batch-tiled kernel)
    eps_pad = jnp.pad(eps.astype(jnp.float32), ((0, 0), (0, LANE - Z_DIM)))
    mu, logvar, h2 = pallas_latent(h, pp["latent_w"], pp["latent_b"],
                                   eps_pad, pp["fc2_w"], pp["fc2_b"])

    # ----- decode -----
    d0 = h2.reshape(B, S3, S3, C3)                                           # UnFlatten (NHWC)
    d1 = conv_transpose2d(d0, pp["deconv1_w"], pp["deconv1_b"], 5, 10, 2, 2, "relu")  # 13x13x10
    d2 = conv_transpose2d(d1, pp["deconv2_w"], pp["deconv2_b"], 5, 10, 2, 1, "relu")  # 27x27x10
    d3 = conv_transpose2d(d2, pp["deconv3_w"], pp["deconv3_b"], 6, IMG_CHANNELS, 1, 2,
                          "sigmoid", out_dtype=jnp.float32)                            # 28x28x1
    recon = jnp.transpose(d3, (0, 3, 1, 2))                                  # NCHW, f32
    return recon, mu, logvar


if __name__ == "__main__":
    B = 2
    key = jax.random.PRNGKey(0)
    pkey, xkey, ekey = jax.random.split(key, 3)

    params = init_params(pkey)
    pp = prepare_params(params)          # one-time weight folding / padding
    x = jax.random.normal(xkey, (B, IMG_CHANNELS, IN_WIDTH, IN_WIDTH),
                          dtype=jnp.float32)
    # deterministic reparameterization noise (stands in for torch.randn_like)
    eps = jax.random.normal(ekey, (B, Z_DIM), dtype=jnp.float32)

    recon, mu, logvar = jax.jit(vae_forward)(pp, x, eps)
    jax.block_until_ready((recon, mu, logvar))

    assert recon.shape == (B, IMG_CHANNELS, IN_WIDTH, IN_WIDTH)
    assert mu.shape == (B, Z_DIM) and logvar.shape == (B, Z_DIM)
    assert bool(jnp.all(jnp.isfinite(recon)))
    assert bool(jnp.all(jnp.isfinite(mu))) and bool(jnp.all(jnp.isfinite(logvar)))
    assert bool(jnp.all((recon >= 0.0) & (recon <= 1.0)))  # sigmoid output
    print("KERNEL_OK")
</pallas_src>

<mosaic_0001>
module attributes {stable_mosaic.version = 11 : i64} {
  func.func @_matmul_bias_act_kernel(%arg0: i32, %arg1: memref<512x9xbf16, #tpu.memory_space<vmem>>, %arg2: memref<9x10xbf16, #tpu.memory_space<vmem>>, %arg3: memref<1x10xf32, #tpu.memory_space<vmem>>, %arg4: memref<512x10xbf16, #tpu.memory_space<vmem>>) attributes {dimension_semantics = [#tpu.dimension_semantics<parallel>], iteration_bounds = array<i64: 4>, scalar_prefetch = 0 : i64, scratch_operands = 0 : i64, tpu.core_type = #tpu.core_type<tc>, window_params = [{transform_indices = @transform_0, window_bounds = array<i64: 512, 9>}, {pipeline_mode = #tpu.pipeline_mode<synchronous>, transform_indices = @transform_1, window_bounds = array<i64: 9, 10>}, {pipeline_mode = #tpu.pipeline_mode<synchronous>, transform_indices = @transform_2, window_bounds = array<i64: 1, 10>}, {transform_indices = @transform_3, window_bounds = array<i64: 512, 10>}]} {
    %c0 = arith.constant 0 : index
    %c0_0 = arith.constant 0 : index
    %0 = vector.load %arg1[%c0, %c0_0] : memref<512x9xbf16, #tpu.memory_space<vmem>>, vector<512x9xbf16>
    %c0_1 = arith.constant 0 : index
    %c0_2 = arith.constant 0 : index
    %1 = vector.load %arg2[%c0_1, %c0_2] : memref<9x10xbf16, #tpu.memory_space<vmem>>, vector<9x10xbf16>
    %cst = arith.constant dense<0.000000e+00> : vector<512x10xf32>
    %2 = tpu.matmul %0, %1, %cst {dimension_numbers = #tpu.dot_dimension_numbers<[1], [0], [0], [1], [0, 0, 1, 1], [], []>} : vector<512x9xbf16>, vector<9x10xbf16>, vector<512x10xf32> -> vector<512x10xf32>
    %c0_3 = arith.constant 0 : index
    %c0_4 = arith.constant 0 : index
    %3 = vector.load %arg3[%c0_3, %c0_4] : memref<1x10xf32, #tpu.memory_space<vmem>>, vector<1x10xf32>
    %4 = vector.broadcast %3 : vector<1x10xf32> to vector<512x10xf32>
    %5 = arith.addf %2, %4 : vector<512x10xf32>
    %cst_5 = arith.constant 0.000000e+00 : f32
    %6 = vector.broadcast %cst_5 : f32 to vector<512x10xf32>
    %7 = arith.maximumf %5, %6 : vector<512x10xf32>
    %8 = arith.truncf %7 : vector<512x10xf32> to vector<512x10xbf16>
    %c0_6 = arith.constant 0 : index
    %c0_7 = arith.constant 0 : index
    %9 = vector.load %arg4[%c0_6, %c0_7] : memref<512x10xbf16, #tpu.memory_space<vmem>>, vector<512x10xbf16>
    tpu.vector_store %arg4[%c0_6, %c0_7], %8 {strides = array<i32>} : memref<512x10xbf16, #tpu.memory_space<vmem>>, vector<512x10xbf16>,
    return
  }
  func.func @transform_0(%arg0: i32) -> (i32, i32) {
    %c0_i32 = arith.constant 0 : i32
    %c0_i32_0 = arith.constant 0 : i32
    return %arg0, %c0_i32 : i32, i32
  }
  func.func @transform_1(%arg0: i32) -> (i32, i32) {
    %c0_i32 = arith.constant 0 : i32
    %c0_i32_0 = arith.constant 0 : i32
    %c0_i32_1 = arith.constant 0 : i32
    return %c0_i32, %c0_i32_0 : i32, i32
  }
  func.func @transform_2(%arg0: i32) -> (i32, i32) {
    %c0_i32 = arith.constant 0 : i32
    %c0_i32_0 = arith.constant 0 : i32
    %c0_i32_1 = arith.constant 0 : i32
    return %c0_i32, %c0_i32_0 : i32, i32
  }
  func.func @transform_3(%arg0: i32) -> (i32, i32) {
    %c0_i32 = arith.constant 0 : i32
    %c0_i32_0 = arith.constant 0 : i32
    return %arg0, %c0_i32 : i32, i32
  }
}

module attributes {stable_mosaic.version = 11 : i64} {
  func.func @_matmul_bias_act_kernel(%arg0: i32, %arg1: memref<392x160xbf16, #tpu.memory_space<vmem>>, %arg2: memref<160x10xbf16, #tpu.memory_space<vmem>>, %arg3: memref<1x10xf32, #tpu.memory_space<vmem>>, %arg4: memref<392x10xbf16, #tpu.memory_space<vmem>>) attributes {dimension_semantics = [#tpu.dimension_semantics<parallel>], iteration_bounds = array<i64: 1>, scalar_prefetch = 0 : i64, scratch_operands = 0 : i64, tpu.core_type = #tpu.core_type<tc>, window_params = [{transform_indices = @transform_0, window_bounds = array<i64: 392, 160>}, {pipeline_mode = #tpu.pipeline_mode<synchronous>, transform_indices = @transform_1, window_bounds = array<i64: 160, 10>}, {pipeline_mode = #tpu.pipeline_mode<synchronous>, transform_indices = @transform_2, window_bounds = array<i64: 1, 10>}, {transform_indices = @transform_3, window_bounds = array<i64: 392, 10>}]} {
    %c0 = arith.constant 0 : index
    %c0_0 = arith.constant 0 : index
    %0 = vector.load %arg1[%c0, %c0_0] : memref<392x160xbf16, #tpu.memory_space<vmem>>, vector<392x160xbf16>
    %c0_1 = arith.constant 0 : index
    %c0_2 = arith.constant 0 : index
    %1 = vector.load %arg2[%c0_1, %c0_2] : memref<160x10xbf16, #tpu.memory_space<vmem>>, vector<160x10xbf16>
    %cst = arith.constant dense<0.000000e+00> : vector<392x10xf32>
    %2 = tpu.matmul %0, %1, %cst {dimension_numbers = #tpu.dot_dimension_numbers<[1], [0], [0], [1], [0, 0, 1, 1], [], []>} : vector<392x160xbf16>, vector<160x10xbf16>, vector<392x10xf32> -> vector<392x10xf32>
    %c0_3 = arith.constant 0 : index
    %c0_4 = arith.constant 0 : index
    %3 = vector.load %arg3[%c0_3, %c0_4] : memref<1x10xf32, #tpu.memory_space<vmem>>, vector<1x10xf32>
    %4 = vector.broadcast %3 : vector<1x10xf32> to vector<392x10xf32>
    %5 = arith.addf %2, %4 : vector<392x10xf32>
    %cst_5 = arith.constant 0.000000e+00 : f32
    %6 = vector.broadcast %cst_5 : f32 to vector<392x10xf32>
    %7 = arith.maximumf %5, %6 : vector<392x10xf32>
    %8 = arith.truncf %7 : vector<392x10xf32> to vector<392x10xbf16>
    %c0_6 = arith.constant 0 : index
    %c0_7 = arith.constant 0 : index
    %9 = vector.load %arg4[%c0_6, %c0_7] : memref<392x10xbf16, #tpu.memory_space<vmem>>, vector<392x10xbf16>
    tpu.vector_store %arg4[%c0_6, %c0_7], %8 {strides = array<i32>} : memref<392x10xbf16, #tpu.memory_space<vmem>>, vector<392x10xbf16>,
    return
  }
  func.func @transform_0(%arg0: i32) -> (i32, i32) {
    %c0_i32 = arith.constant 0 : i32
    %c0_i32_0 = arith.constant 0 : i32
    return %arg0, %c0_i32 : i32, i32
  }
  func.func @transform_1(%arg0: i32) -> (i32, i32) {
    %c0_i32 = arith.constant 0 : i32
    %c0_i32_0 = arith.constant 0 : i32
    %c0_i32_1 = arith.constant 0 : i32
    return %c0_i32, %c0_i32_0 : i32, i32
  }
  func.func @transform_2(%arg0: i32) -> (i32, i32) {
    %c0_i32 = arith.constant 0 : i32
    %c0_i32_0 = arith.constant 0 : i32
    %c0_i32_1 = arith.constant 0 : i32
    return %c0_i32, %c0_i32_0 : i32, i32
  }
  func.func @transform_3(%arg0: i32) -> (i32, i32) {
    %c0_i32 = arith.constant 0 : i32
    %c0_i32_0 = arith.constant 0 : i32
    return %arg0, %c0_i32 : i32, i32
  }
}

module attributes {stable_mosaic.version = 11 : i64} {
  func.func @_matmul_bias_act_kernel(%arg0: i32, %arg1: memref<98x250xbf16, #tpu.memory_space<vmem>>, %arg2: memref<250x20xbf16, #tpu.memory_space<vmem>>, %arg3: memref<1x20xf32, #tpu.memory_space<vmem>>, %arg4: memref<98x20xbf16, #tpu.memory_space<vmem>>) attributes {dimension_semantics = [#tpu.dimension_semantics<parallel>], iteration_bounds = array<i64: 1>, scalar_prefetch = 0 : i64, scratch_operands = 0 : i64, tpu.core_type = #tpu.core_type<tc>, window_params = [{transform_indices = @transform_0, window_bounds = array<i64: 98, 250>}, {pipeline_mode = #tpu.pipeline_mode<synchronous>, transform_indices = @transform_1, window_bounds = array<i64: 250, 20>}, {pipeline_mode = #tpu.pipeline_mode<synchronous>, transform_indices = @transform_2, window_bounds = array<i64: 1, 20>}, {transform_indices = @transform_3, window_bounds = array<i64: 98, 20>}]} {
    %c0 = arith.constant 0 : index
    %c0_0 = arith.constant 0 : index
    %0 = vector.load %arg1[%c0, %c0_0] : memref<98x250xbf16, #tpu.memory_space<vmem>>, vector<98x250xbf16>
    %c0_1 = arith.constant 0 : index
    %c0_2 = arith.constant 0 : index
    %1 = vector.load %arg2[%c0_1, %c0_2] : memref<250x20xbf16, #tpu.memory_space<vmem>>, vector<250x20xbf16>
    %cst = arith.constant dense<0.000000e+00> : vector<98x20xf32>
    %2 = tpu.matmul %0, %1, %cst {dimension_numbers = #tpu.dot_dimension_numbers<[1], [0], [0], [1], [0, 0, 1, 1], [], []>} : vector<98x250xbf16>, vector<250x20xbf16>, vector<98x20xf32> -> vector<98x20xf32>
    %c0_3 = arith.constant 0 : index
    %c0_4 = arith.constant 0 : index
    %3 = vector.load %arg3[%c0_3, %c0_4] : memref<1x20xf32, #tpu.memory_space<vmem>>, vector<1x20xf32>
    %4 = vector.broadcast %3 : vector<1x20xf32> to vector<98x20xf32>
    %5 = arith.addf %2, %4 : vector<98x20xf32>
    %cst_5 = arith.constant 0.000000e+00 : f32
    %6 = vector.broadcast %cst_5 : f32 to vector<98x20xf32>
    %7 = arith.maximumf %5, %6 : vector<98x20xf32>
    %8 = arith.truncf %7 : vector<98x20xf32> to vector<98x20xbf16>
    %c0_6 = arith.constant 0 : index
    %c0_7 = arith.constant 0 : index
    %9 = vector.load %arg4[%c0_6, %c0_7] : memref<98x20xbf16, #tpu.memory_space<vmem>>, vector<98x20xbf16>
    tpu.vector_store %arg4[%c0_6, %c0_7], %8 {strides = array<i32>} : memref<98x20xbf16, #tpu.memory_space<vmem>>, vector<98x20xbf16>,
    return
  }
  func.func @transform_0(%arg0: i32) -> (i32, i32) {
    %c0_i32 = arith.constant 0 : i32
    %c0_i32_0 = arith.constant 0 : i32
    return %arg0, %c0_i32 : i32, i32
  }
  func.func @transform_1(%arg0: i32) -> (i32, i32) {
    %c0_i32 = arith.constant 0 : i32
    %c0_i32_0 = arith.constant 0 : i32
    %c0_i32_1 = arith.constant 0 : i32
    return %c0_i32, %c0_i32_0 : i32, i32
  }
  func.func @transform_2(%arg0: i32) -> (i32, i32) {
    %c0_i32 = arith.constant 0 : i32
    %c0_i32_0 = arith.constant 0 : i32
    %c0_i32_1 = arith.constant 0 : i32
    return %c0_i32, %c0_i32_0 : i32, i32
  }
  func.func @transform_3(%arg0: i32) -> (i32, i32) {
    %c0_i32 = arith.constant 0 : i32
    %c0_i32_0 = arith.constant 0 : i32
    return %arg0, %c0_i32 : i32, i32
  }
}

module attributes {stable_mosaic.version = 11 : i64} {
  func.func @_latent_kernel(%arg0: i32, %arg1: memref<2x980xbf16, #tpu.memory_space<vmem>>, %arg2: memref<980x256xbf16, #tpu.memory_space<vmem>>, %arg3: memref<1x256xf32, #tpu.memory_space<vmem>>, %arg4: memref<2x128xf32, #tpu.memory_space<vmem>>, %arg5: memref<128x980xbf16, #tpu.memory_space<vmem>>, %arg6: memref<1x980xf32, #tpu.memory_space<vmem>>, %arg7: memref<2x256xf32, #tpu.memory_space<vmem>>, %arg8: memref<2x980xbf16, #tpu.memory_space<vmem>>) attributes {dimension_semantics = [#tpu.dimension_semantics<parallel>], iteration_bounds = array<i64: 1>, scalar_prefetch = 0 : i64, scratch_operands = 0 : i64, tpu.core_type = #tpu.core_type<tc>, window_params = [{transform_indices = @transform_0, window_bounds = array<i64: 2, 980>}, {pipeline_mode = #tpu.pipeline_mode<synchronous>, transform_indices = @transform_1, window_bounds = array<i64: 980, 256>}, {pipeline_mode = #tpu.pipeline_mode<synchronous>, transform_indices = @transform_2, window_bounds = array<i64: 1, 256>}, {transform_indices = @transform_3, window_bounds = array<i64: 2, 128>}, {pipeline_mode = #tpu.pipeline_mode<synchronous>, transform_indices = @transform_4, window_bounds = array<i64: 128, 980>}, {pipeline_mode = #tpu.pipeline_mode<synchronous>, transform_indices = @transform_5, window_bounds = array<i64: 1, 980>}, {transform_indices = @transform_6, window_bounds = array<i64: 2, 256>}, {transform_indices = @transform_7, window_bounds = array<i64: 2, 980>}]} {
    %c0 = arith.constant 0 : index
    %c0_0 = arith.constant 0 : index
    %0 = vector.load %arg1[%c0, %c0_0] : memref<2x980xbf16, #tpu.memory_space<vmem>>, vector<2x980xbf16>
    %c0_1 = arith.constant 0 : index
    %c0_2 = arith.constant 0 : index
    %1 = vector.load %arg2[%c0_1, %c0_2] : memref<980x256xbf16, #tpu.memory_space<vmem>>, vector<980x256xbf16>
    %cst = arith.constant dense<0.000000e+00> : vector<2x256xf32>
    %2 = tpu.matmul %0, %1, %cst {dimension_numbers = #tpu.dot_dimension_numbers<[1], [0], [0], [1], [0, 0, 1, 1], [], []>} : vector<2x980xbf16>, vector<980x256xbf16>, vector<2x256xf32> -> vector<2x256xf32>
    %c0_3 = arith.constant 0 : index
    %c0_4 = arith.constant 0 : index
    %3 = vector.load %arg3[%c0_3, %c0_4] : memref<1x256xf32, #tpu.memory_space<vmem>>, vector<1x256xf32>
    %4 = vector.broadcast %3 : vector<1x256xf32> to vector<2x256xf32>
    %5 = arith.addf %2, %4 : vector<2x256xf32>
    %6 = vector.extract_strided_slice %5 {offsets = [0, 0], sizes = [2, 128], strides = [1, 1]} : vector<2x256xf32> to vector<2x128xf32>
    %7 = vector.extract_strided_slice %5 {offsets = [0, 128], sizes = [2, 128], strides = [1, 1]} : vector<2x256xf32> to vector<2x128xf32>
    %c0_5 = arith.constant 0 : index
    %c0_6 = arith.constant 0 : index
    %8 = vector.load %arg4[%c0_5, %c0_6] : memref<2x128xf32, #tpu.memory_space<vmem>>, vector<2x128xf32>
    %cst_7 = arith.constant 5.000000e-01 : f32
    %9 = vector.broadcast %cst_7 : f32 to vector<2x128xf32>
    %10 = arith.mulf %9, %7 : vector<2x128xf32>
    %11 = math.exp %10 : vector<2x128xf32>
    %12 = arith.mulf %8, %11 : vector<2x128xf32>
    %13 = arith.addf %6, %12 : vector<2x128xf32>
    %14 = arith.truncf %13 : vector<2x128xf32> to vector<2x128xbf16>
    %c0_8 = arith.constant 0 : index
    %c0_9 = arith.constant 0 : index
    %15 = vector.load %arg5[%c0_8, %c0_9] : memref<128x980xbf16, #tpu.memory_space<vmem>>, vector<128x980xbf16>
    %cst_10 = arith.constant dense<0.000000e+00> : vector<2x980xf32>
    %16 = tpu.matmul %14, %15, %cst_10 {dimension_numbers = #tpu.dot_dimension_numbers<[1], [0], [0], [1], [0, 0, 1, 1], [], []>} : vector<2x128xbf16>, vector<128x980xbf16>, vector<2x980xf32> -> vector<2x980xf32>
    %c0_11 = arith.constant 0 : index
    %c0_12 = arith.constant 0 : index
    %17 = vector.load %arg6[%c0_11, %c0_12] : memref<1x980xf32, #tpu.memory_space<vmem>>, vector<1x980xf32>
    %18 = vector.broadcast %17 : vector<1x980xf32> to vector<2x980xf32>
    %19 = arith.addf %16, %18 : vector<2x980xf32>
    %c0_13 = arith.constant 0 : index
    %c0_14 = arith.constant 0 : index
    %20 = vector.load %arg7[%c0_13, %c0_14] : memref<2x256xf32, #tpu.memory_space<vmem>>, vector<2x256xf32>
    tpu.vector_store %arg7[%c0_13, %c0_14], %5 {strides = array<i32>} : memref<2x256xf32, #tpu.memory_space<vmem>>, vector<2x256xf32>,
    %21 = arith.truncf %19 : vector<2x980xf32> to vector<2x980xbf16>
    %c0_15 = arith.constant 0 : index
    %c0_16 = arith.constant 0 : index
    %22 = vector.load %arg8[%c0_15, %c0_16] : memref<2x980xbf16, #tpu.memory_space<vmem>>, vector<2x980xbf16>
    tpu.vector_store %arg8[%c0_15, %c0_16], %21 {strides = array<i32>} : memref<2x980xbf16, #tpu.memory_space<vmem>>, vector<2x980xbf16>,
    return
  }
  func.func @transform_0(%arg0: i32) -> (i32, i32) {
    %c0_i32 = arith.constant 0 : i32
    %c0_i32_0 = arith.constant 0 : i32
    return %arg0, %c0_i32 : i32, i32
  }
  func.func @transform_1(%arg0: i32) -> (i32, i32) {
    %c0_i32 = arith.constant 0 : i32
    %c0_i32_0 = arith.constant 0 : i32
    %c0_i32_1 = arith.constant 0 : i32
    return %c0_i32, %c0_i32_0 : i32, i32
  }
  func.func @transform_2(%arg0: i32) -> (i32, i32) {
    %c0_i32 = arith.constant 0 : i32
    %c0_i32_0 = arith.constant 0 : i32
    %c0_i32_1 = arith.constant 0 : i32
    return %c0_i32, %c0_i32_0 : i32, i32
  }
  func.func @transform_3(%arg0: i32) -> (i32, i32) {
    %c0_i32 = arith.constant 0 : i32
    %c0_i32_0 = arith.constant 0 : i32
    return %arg0, %c0_i32 : i32, i32
  }
  func.func @transform_4(%arg0: i32) -> (i32, i32) {
    %c0_i32 = arith.constant 0 : i32
    %c0_i32_0 = arith.constant 0 : i32
    %c0_i32_1 = arith.constant 0 : i32
    return %c0_i32, %c0_i32_0 : i32, i32
  }
  func.func @transform_5(%arg0: i32) -> (i32, i32) {
    %c0_i32 = arith.constant 0 : i32
    %c0_i32_0 = arith.constant 0 : i32
    %c0_i32_1 = arith.constant 0 : i32
    return %c0_i32, %c0_i32_0 : i32, i32
  }
  func.func @transform_6(%arg0: i32) -> (i32, i32) {
    %c0_i32 = arith.constant 0 : i32
    %c0_i32_0 = arith.constant 0 : i32
    return %arg0, %c0_i32 : i32, i32
  }
  func.func @transform_7(%arg0: i32) -> (i32, i32) {
    %c0_i32 = arith.constant 0 : i32
    %c0_i32_0 = arith.constant 0 : i32
    return %arg0, %c0_i32 : i32, i32
  }
}

module attributes {stable_mosaic.version = 11 : i64} {
  func.func @_matmul_bias_act_kernel(%arg0: i32, %arg1: memref<338x500xbf16, #tpu.memory_space<vmem>>, %arg2: memref<500x10xbf16, #tpu.memory_space<vmem>>, %arg3: memref<1x10xf32, #tpu.memory_space<vmem>>, %arg4: memref<338x10xbf16, #tpu.memory_space<vmem>>) attributes {dimension_semantics = [#tpu.dimension_semantics<parallel>], iteration_bounds = array<i64: 1>, scalar_prefetch = 0 : i64, scratch_operands = 0 : i64, tpu.core_type = #tpu.core_type<tc>, window_params = [{transform_indices = @transform_0, window_bounds = array<i64: 338, 500>}, {pipeline_mode = #tpu.pipeline_mode<synchronous>, transform_indices = @transform_1, window_bounds = array<i64: 500, 10>}, {pipeline_mode = #tpu.pipeline_mode<synchronous>, transform_indices = @transform_2, window_bounds = array<i64: 1, 10>}, {transform_indices = @transform_3, window_bounds = array<i64: 338, 10>}]} {
    %c0 = arith.constant 0 : index
    %c0_0 = arith.constant 0 : index
    %0 = vector.load %arg1[%c0, %c0_0] : memref<338x500xbf16, #tpu.memory_space<vmem>>, vector<338x500xbf16>
    %c0_1 = arith.constant 0 : index
    %c0_2 = arith.constant 0 : index
    %1 = vector.load %arg2[%c0_1, %c0_2] : memref<500x10xbf16, #tpu.memory_space<vmem>>, vector<500x10xbf16>
    %cst = arith.constant dense<0.000000e+00> : vector<338x10xf32>
    %2 = tpu.matmul %0, %1, %cst {dimension_numbers = #tpu.dot_dimension_numbers<[1], [0], [0], [1], [0, 0, 1, 1], [], []>} : vector<338x500xbf16>, vector<500x10xbf16>, vector<338x10xf32> -> vector<338x10xf32>
    %c0_3 = arith.constant 0 : index
    %c0_4 = arith.constant 0 : index
    %3 = vector.load %arg3[%c0_3, %c0_4] : memref<1x10xf32, #tpu.memory_space<vmem>>, vector<1x10xf32>
    %4 = vector.broadcast %3 : vector<1x10xf32> to vector<338x10xf32>
    %5 = arith.addf %2, %4 : vector<338x10xf32>
    %cst_5 = arith.constant 0.000000e+00 : f32
    %6 = vector.broadcast %cst_5 : f32 to vector<338x10xf32>
    %7 = arith.maximumf %5, %6 : vector<338x10xf32>
    %8 = arith.truncf %7 : vector<338x10xf32> to vector<338x10xbf16>
    %c0_6 = arith.constant 0 : index
    %c0_7 = arith.constant 0 : index
    %9 = vector.load %arg4[%c0_6, %c0_7] : memref<338x10xbf16, #tpu.memory_space<vmem>>, vector<338x10xbf16>
    tpu.vector_store %arg4[%c0_6, %c0_7], %8 {strides = array<i32>} : memref<338x10xbf16, #tpu.memory_space<vmem>>, vector<338x10xbf16>,
    return
  }
  func.func @transform_0(%arg0: i32) -> (i32, i32) {
    %c0_i32 = arith.constant 0 : i32
    %c0_i32_0 = arith.constant 0 : i32
    return %arg0, %c0_i32 : i32, i32
  }
  func.func @transform_1(%arg0: i32) -> (i32, i32) {
    %c0_i32 = arith.constant 0 : i32
    %c0_i32_0 = arith.constant 0 : i32
    %c0_i32_1 = arith.constant 0 : i32
    return %c0_i32, %c0_i32_0 : i32, i32
  }
  func.func @transform_2(%arg0: i32) -> (i32, i32) {
    %c0_i32 = arith.constant 0 : i32
    %c0_i32_0 = arith.constant 0 : i32
    %c0_i32_1 = arith.constant 0 : i32
    return %c0_i32, %c0_i32_0 : i32, i32
  }
  func.func @transform_3(%arg0: i32) -> (i32, i32) {
    %c0_i32 = arith.constant 0 : i32
    %c0_i32_0 = arith.constant 0 : i32
    return %arg0, %c0_i32 : i32, i32
  }
}

module attributes {stable_mosaic.version = 11 : i64} {
  func.func @_matmul_bias_act_kernel(%arg0: i32, %arg1: memref<512x250xbf16, #tpu.memory_space<vmem>>, %arg2: memref<250x10xbf16, #tpu.memory_space<vmem>>, %arg3: memref<1x10xf32, #tpu.memory_space<vmem>>, %arg4: memref<512x10xbf16, #tpu.memory_space<vmem>>) attributes {dimension_semantics = [#tpu.dimension_semantics<parallel>], iteration_bounds = array<i64: 3>, scalar_prefetch = 0 : i64, scratch_operands = 0 : i64, tpu.core_type = #tpu.core_type<tc>, window_params = [{transform_indices = @transform_0, window_bounds = array<i64: 512, 250>}, {pipeline_mode = #tpu.pipeline_mode<synchronous>, transform_indices = @transform_1, window_bounds = array<i64: 250, 10>}, {pipeline_mode = #tpu.pipeline_mode<synchronous>, transform_indices = @transform_2, window_bounds = array<i64: 1, 10>}, {transform_indices = @transform_3, window_bounds = array<i64: 512, 10>}]} {
    %c0 = arith.constant 0 : index
    %c0_0 = arith.constant 0 : index
    %0 = vector.load %arg1[%c0, %c0_0] : memref<512x250xbf16, #tpu.memory_space<vmem>>, vector<512x250xbf16>
    %c0_1 = arith.constant 0 : index
    %c0_2 = arith.constant 0 : index
    %1 = vector.load %arg2[%c0_1, %c0_2] : memref<250x10xbf16, #tpu.memory_space<vmem>>, vector<250x10xbf16>
    %cst = arith.constant dense<0.000000e+00> : vector<512x10xf32>
    %2 = tpu.matmul %0, %1, %cst {dimension_numbers = #tpu.dot_dimension_numbers<[1], [0], [0], [1], [0, 0, 1, 1], [], []>} : vector<512x250xbf16>, vector<250x10xbf16>, vector<512x10xf32> -> vector<512x10xf32>
    %c0_3 = arith.constant 0 : index
    %c0_4 = arith.constant 0 : index
    %3 = vector.load %arg3[%c0_3, %c0_4] : memref<1x10xf32, #tpu.memory_space<vmem>>, vector<1x10xf32>
    %4 = vector.broadcast %3 : vector<1x10xf32> to vector<512x10xf32>
    %5 = arith.addf %2, %4 : vector<512x10xf32>
    %cst_5 = arith.constant 0.000000e+00 : f32
    %6 = vector.broadcast %cst_5 : f32 to vector<512x10xf32>
    %7 = arith.maximumf %5, %6 : vector<512x10xf32>
    %8 = arith.truncf %7 : vector<512x10xf32> to vector<512x10xbf16>
    %c0_6 = arith.constant 0 : index
    %c0_7 = arith.constant 0 : index
    %9 = vector.load %arg4[%c0_6, %c0_7] : memref<512x10xbf16, #tpu.memory_space<vmem>>, vector<512x10xbf16>
    tpu.vector_store %arg4[%c0_6, %c0_7], %8 {strides = array<i32>} : memref<512x10xbf16, #tpu.memory_space<vmem>>, vector<512x10xbf16>,
    return
  }
  func.func @transform_0(%arg0: i32) -> (i32, i32) {
    %c0_i32 = arith.constant 0 : i32
    %c0_i32_0 = arith.constant 0 : i32
    return %arg0, %c0_i32 : i32, i32
  }
  func.func @transform_1(%arg0: i32) -> (i32, i32) {
    %c0_i32 = arith.constant 0 : i32
    %c0_i32_0 = arith.constant 0 : i32
    %c0_i32_1 = arith.constant 0 : i32
    return %c0_i32, %c0_i32_0 : i32, i32
  }
  func.func @transform_2(%arg0: i32) -> (i32, i32) {
    %c0_i32 = arith.constant 0 : i32
    %c0_i32_0 = arith.constant 0 : i32
    %c0_i32_1 = arith.constant 0 : i32
    return %c0_i32, %c0_i32_0 : i32, i32
  }
  func.func @transform_3(%arg0: i32) -> (i32, i32) {
    %c0_i32 = arith.constant 0 : i32
    %c0_i32_0 = arith.constant 0 : i32
    return %arg0, %c0_i32 : i32, i32
  }
}

module attributes {stable_mosaic.version = 11 : i64} {
  func.func @_matmul_bias_act_kernel(%arg0: i32, %arg1: memref<512x360xbf16, #tpu.memory_space<vmem>>, %arg2: memref<360x16xbf16, #tpu.memory_space<vmem>>, %arg3: memref<1x16xf32, #tpu.memory_space<vmem>>, %arg4: memref<512x16xf32, #tpu.memory_space<vmem>>) attributes {dimension_semantics = [#tpu.dimension_semantics<parallel>], iteration_bounds = array<i64: 4>, scalar_prefetch = 0 : i64, scratch_operands = 0 : i64, tpu.core_type = #tpu.core_type<tc>, window_params = [{transform_indices = @transform_0, window_bounds = array<i64: 512, 360>}, {pipeline_mode = #tpu.pipeline_mode<synchronous>, transform_indices = @transform_1, window_bounds = array<i64: 360, 16>}, {pipeline_mode = #tpu.pipeline_mode<synchronous>, transform_indices = @transform_2, window_bounds = array<i64: 1, 16>}, {transform_indices = @transform_3, window_bounds = array<i64: 512, 16>}]} {
    %c0 = arith.constant 0 : index
    %c0_0 = arith.constant 0 : index
    %0 = vector.load %arg1[%c0, %c0_0] : memref<512x360xbf16, #tpu.memory_space<vmem>>, vector<512x360xbf16>
    %c0_1 = arith.constant 0 : index
    %c0_2 = arith.constant 0 : index
    %1 = vector.load %arg2[%c0_1, %c0_2] : memref<360x16xbf16, #tpu.memory_space<vmem>>, vector<360x16xbf16>
    %cst = arith.constant dense<0.000000e+00> : vector<512x16xf32>
    %2 = tpu.matmul %0, %1, %cst {dimension_numbers = #tpu.dot_dimension_numbers<[1], [0], [0], [1], [0, 0, 1, 1], [], []>} : vector<512x360xbf16>, vector<360x16xbf16>, vector<512x16xf32> -> vector<512x16xf32>
    %c0_3 = arith.constant 0 : index
    %c0_4 = arith.constant 0 : index
    %3 = vector.load %arg3[%c0_3, %c0_4] : memref<1x16xf32, #tpu.memory_space<vmem>>, vector<1x16xf32>
    %4 = vector.broadcast %3 : vector<1x16xf32> to vector<512x16xf32>
    %5 = arith.addf %2, %4 : vector<512x16xf32>
    %cst_5 = arith.constant 5.000000e-01 : f32
    %6 = vector.broadcast %cst_5 : f32 to vector<512x16xf32>
    %7 = arith.mulf %6, %5 : vector<512x16xf32>
    %8 = math.tanh %7 : vector<512x16xf32>
    %cst_6 = arith.constant 1.000000e+00 : f32
    %9 = vector.broadcast %cst_6 : f32 to vector<512x16xf32>
    %10 = arith.addf %8, %9 : vector<512x16xf32>
    %cst_7 = arith.constant 5.000000e-01 : f32
    %11 = vector.broadcast %cst_7 : f32 to vector<512x16xf32>
    %12 = arith.mulf %11, %10 : vector<512x16xf32>
    %c0_8 = arith.constant 0 : index
    %c0_9 = arith.constant 0 : index
    %13 = vector.load %arg4[%c0_8, %c0_9] : memref<512x16xf32, #tpu.memory_space<vmem>>, vector<512x16xf32>
    tpu.vector_store %arg4[%c0_8, %c0_9], %12 {strides = array<i32>} : memref<512x16xf32, #tpu.memory_space<vmem>>, vector<512x16xf32>,
    return
  }
  func.func @transform_0(%arg0: i32) -> (i32, i32) {
    %c0_i32 = arith.constant 0 : i32
    %c0_i32_0 = arith.constant 0 : i32
    return %arg0, %c0_i32 : i32, i32
  }
  func.func @transform_1(%arg0: i32) -> (i32, i32) {
    %c0_i32 = arith.constant 0 : i32
    %c0_i32_0 = arith.constant 0 : i32
    %c0_i32_1 = arith.constant 0 : i32
    return %c0_i32, %c0_i32_0 : i32, i32
  }
  func.func @transform_2(%arg0: i32) -> (i32, i32) {
    %c0_i32 = arith.constant 0 : i32
    %c0_i32_0 = arith.constant 0 : i32
    %c0_i32_1 = arith.constant 0 : i32
    return %c0_i32, %c0_i32_0 : i32, i32
  }
  func.func @transform_3(%arg0: i32) -> (i32, i32) {
    %c0_i32 = arith.constant 0 : i32
    %c0_i32_0 = arith.constant 0 : i32
    return %arg0, %c0_i32 : i32, i32
  }
}

</mosaic_0001>

<bundles_post_ra>
// kernel: vae_forward.7
= control target key start
LH: loop header
LB: loop body
LE: loop exit
PB: predicated region body
PF: predicated region fallthrough
CT: control target
= control target key end

     0   :  { %8 = vsyncpa [#allocation3], 0  ;;  %s2945_s0 = inlined_call_operand.vmem [shape: bf16[1568,9], index: 0, kind: input, shape index: {}]   ;;  %s2946_s1 = inlined_call_operand.hbm [shape: bf16[9,10], index: 1, kind: input, shape index: {}]   ;;  %s2947_s2 = inlined_call_operand.hbm [shape: f32[1,10], index: 2, kind: input, shape index: {}]   ;;  %s2948_s3 = inlined_call_operand.vmem [shape: bf16[1568,10], index: 3, kind: output, shape index: {}]  }
   0x1   :  { %9 = vsyncpa [#allocation5], 0  ;;  %s2373_s12 = smov 0   ;;  %s2375_s13 = smov 0  }
   0x2   :  { %s2377_s14 = smov 0  }
   0x3 LB: > { %s2386_s15 = sadd.s32 4294967295, %s2314_s14   ;;  %s2388_s16 = sadd.s32 1, %s2314_s14   ;;  %s2314_s14 = sphi %s2377_s14, %s2965_s14   ;;  %s2310_s13 = sphi %s2375_s13, %s2964_s13   ;;  %s2306_s12 = sphi %s2373_s12, %s2963_s12  }
   0x4   : > { %s87_s17 = ssub.s32 %s2314_s14, %s2388_s16  ;;  %s90_s18 = sadd.s32 1, %s2310_s13 }
   0x5   : > { %p88_p0 = scmp.eq.s32.totalorder %s87_s17, 0  ;;  %p100_p1 = scmp.ne.s32.totalorder %s2310_s13, %s2306_s12 }
   0x6   : > { %p101_p2 = scmp.eq.s32.totalorder %s2386_s15, 3  ;;  %p1726_p3 = scmp.ge.s32.totalorder %s2314_s14, 1 }
   0x7   : > { %s2396_s19 = scalar_select %p88_p0, %s2310_s13, %s90_s18  }
   0x8   : > { %p2398_p4 = por %p101_p2, %p100_p1  ;;  %p114_p5 = scmp.lt.s32.totalorder %s2314_s14, 5 }
   0x9   : > { %p2949_p6 = scmp.eq.s32.totalorder %s2386_s15, 0  ;;  %s2348_s22 = smov [#allocation2]  }
   0xa   : > { %s2951_s20 = scalar_select %p2398_p4, 1, 0 }
   0xb   : > { %p2403_p7 = pnand %p1726_p3, %p114_p5  ;;  %s126_s23 = sshll.u32 %s2348_s22, 4  ;;  %s127_s23 = int_to_ptr.vmem [resolvable:$true] %s126_s23 }
   0xc   : > { %s2349_s25 = smov [#allocation4]   ;;  %s2196_s29 = scalar_lea.hbm %s2946_s1, 128 }
   0xd   : > { %s2952_s21 = scalar_select %p2403_p7, 1, 0 }
   0xe   : > { %p2059_p8 = pneg %p2403_p7  ;;  %s140_s26 = sshll.u32 %s2349_s25, 4  ;;  %s2415_s26 = int_to_ptr.vmem [resolvable:$true] %s140_s26 }
   0xf   : > { %p2197_p10 = scmp.ne.s32.totalorder %s2946_s1, %s2196_s29  ;;  %p2203_p0 = scmp.lt.u32.totalorder %s2196_s29, %s2946_s1 }
  0x10   : > { %p2411_p9 = pnand %p2949_p6, %p2059_p8 }
  0x12   : > { %p2198_p11 = pneg %p2411_p9 }
  0x14   : > { %p2199_p12 = pnand %p2198_p11, %p2197_p10 }
  0x16   : > { %p2200_p13 = pneg %p2199_p12 }
  0x18   : > { %p2205_p1 = pnand %p2203_p0, %p2200_p13 }
  0x1a   : > { %2208 = shalt.err (!%p2205_p1)
}
  0x1b   : > { %s2209_s7 = scalar_lea.vmem %s127_s23, 128  ;;  %p2217_p8 = scmp.lt.s32.totalorder %s127_s23, %s127_s23 }
  0x1c   : > { %p2210_p2 = scmp.ne.s32.totalorder %s127_s23, %s2209_s7  ;;  %p2218_p6 = scmp.lt.s32.totalorder %s2209_s7, %s2209_s7 }
  0x1e   : > { %p2212_p3 = pnand %p2210_p2, %p2198_p11  ;;  %p2219_p4 = por %p2218_p6, %p2217_p8 }
  0x20   : > { %p2213_p5 = pneg %p2212_p3 }
  0x22   : > { %p2220_p7 = pnand %p2219_p4, %p2213_p5 }
  0x24   : > { %2223 = shalt.err (!%p2220_p7)
}
  0x25   : > { %s2350_s8 = smov 64   ;;  %s2351_s9 = smov 4  }
  0x26   : > { %2062 = dma.hbm_to_vmem [thread:$0]  (!%p2411_p9), %s2946_s1, 128, %s127_s23, [#allocation3], %s2350_s8, %s2350_s8, %s2351_s9  }
  0x27   : > { %s2224_s18 = scalar_lea.hbm %s2947_s2, 16 }
  0x28   : > { %p2225_p10 = scmp.ne.s32.totalorder %s2947_s2, %s2224_s18  ;;  %p2231_p7 = scmp.lt.u32.totalorder %s2224_s18, %s2947_s2 }
  0x2a   : > { %p2227_p4 = pnand %p2225_p10, %p2198_p11 }
  0x2c   : > { %p2228_p6 = pneg %p2227_p4 }
  0x2e   : > { %p2233_p12 = pnand %p2231_p7, %p2228_p6 }
  0x30   : > { %2236 = shalt.err (!%p2233_p12)
}
  0x31   : > { %s2237_s23 = scalar_lea.vmem %s2415_s26, 16  ;;  %s2244_s29 = scalar_lea.vmem %s2415_s26, 32 }
  0x32   : > { %p2238_p13 = scmp.ne.s32.totalorder %s2415_s26, %s2237_s23  ;;  %p2245_p2 = scmp.lt.s32.totalorder %s2415_s26, %s2415_s26 }
  0x33   : > { %p2246_p3 = scmp.lt.s32.totalorder %s2244_s29, %s2237_s23 }
  0x34   : > { %p2240_p0 = pnand %p2238_p13, %p2198_p11 }
  0x35   : > { %p2247_p5 = por %p2246_p3, %p2245_p2 }
  0x36   : > { %p2241_p1 = pneg %p2240_p0 }
  0x38   : > { %p2248_p8 = pnand %p2247_p5, %p2241_p1 }
  0x3a   : > { %2251 = shalt.err (!%p2248_p8)
}
  0x3b   : > { %2065 = dma.hbm_to_vmem [thread:$0]  (!%p2411_p9), %s2947_s2, 16, %s2415_s26, [#allocation5]  }
  0x3c   : > { %p2954_p10 = scmp.ne.s32.totalorder %s2952_s21, 0 }
  0x3d   : > { %p2955_p11 = scmp.eq.s32.totalorder (!%p2954_p10), %s2386_s15, 0 }
  0x3e   : > { %170 = sbr.rel (%p2954_p10) target bundleno = 453 (0x1c5), region = 32 }
  0x45   : > { %2297 = dma.done.wait (%p2955_p11), [#allocation3], 128   ;;  %p2956_p4 = pmov %p2955_p11 }
  0x47   : > { %2299 = vsyncadd (%p2956_p4), [#allocation3], 4294967168  ;;  %p2957_p6 = pmov %p2956_p4 }
  0x48   : > { %p2958_p7 = pmov %p2956_p4 }
  0x49   : > { %2301 = dma.done.wait (%p2957_p6), [#allocation5], 16  }
  0x4a   : > { %2303 = vsyncadd (%p2958_p7), [#allocation5], 4294967280  ;;  %vm556_vm0 = vcmask 1043456   ;;  %s2476_s24 = sshll.u32 %s2386_s15, 6  ;;  %vm557_vm1 = vcmask 1044480   ;;  %v2352_v0 = vmov 65535  }
  0x4b   : > { %p206_p9 = scmp.lt.s32.totalorder %s2476_s24, 195  ;;  %v558_v1 = vsel %vm556_vm0, 4294967295, %v2352_v0  ;;  %vm459_vm2 = vcmask 72704   ;;  %v2163_v3 = vld [vmem:[#allocation2] sm:$0x1f]   ;;  %s198_s8 = sand.u32 1, %s2306_s12  }
  0x4c   : > { %v559_v2 = vsel %vm557_vm1, %v558_v1, 0  ;;  %v2550_v37 = vld [vmem:[#allocation4] ss:$0 sm:$0xff]  ;;  %s1733_s9 = sshll.u32 %s198_s8, 8  ;;  %vm1172_vm3 = vcmask 76800   ;;  %p2959_p12 = scmp.ne.s32.totalorder %s2951_s20, 0 }
  0x4d   : > { %s207_s21 = scalar_select %p206_p9, %s2476_s24, 195  ;;  %v561_v5 = vand.u32 %v2163_v3, %v559_v2 }
  0x4e   : > { %s2560_s12 = scalar_lea.vmem [#allocation6], %s1733_s9   ;;  %s1245_s10 = ssub.s32 (%p2959_p12), 196, %s2476_s24 }
  0x4f   : > { %s1735_s26 = sshll.u32 %s207_s21, 2  ;;  %1983 = vmatprep.subr.bf16.mxu0 %v561_v5  ;;  %2049 = vmatprep.subr.bf16.mxu1 %v561_v5  ;;  %s1947_s11 = sshll.u32 (%p2959_p12), %s2386_s15, 8 }
  0x50   : > { %s2483_s7 = scalar_lea.vmem %s2945_s0, %s1735_s26  ;;  %1984 = vmatpush3.bf16.msra.mxu0 %v561_v5  ;;  %2050 = vmatpush3.bf16.msra.mxu1 %v561_v5  ;;  %p1246_p13 = scmp.lt.s32.totalorder (%p2959_p12), %s1245_s10, 64 }
  0x51   : > { %v2164_v4 = vld [vmem:[%s2483_s7] sm:$0xff]   ;;  %v2166_v7 = vld [vmem:[%s2483_s7 + $0x8] sm:$0xff]   ;;  %v2168_v9 = vld [vmem:[%s2483_s7 + $0x10] sm:$0xff]   ;;  %s2753_s18 = scalar_lea.vmem (%p2959_p12), %s2948_s3, %s1947_s11  }
  0x52   : > { %v2165_v6 = vld [vmem:[%s2483_s7 + $0x80] sm:$0xff]   ;;  %1985 = vmatprep.mubr.msk.bf16.mxu0 %vm459_vm2, %v2164_v4  ;;  %v2167_v8 = vld [vmem:[%s2483_s7 + $0x88] sm:$0xff]   ;;  %v2169_v10 = vld [vmem:[%s2483_s7 + $0x90] sm:$0xff]  }
  0x53   : > { %2017 = vmatprep.mubr.msk.bf16.mxu1 %vm459_vm2, %v2165_v6  ;;  %1986 = vmatmul.mubr.msk.bf16.vlgmr.msra.gmra.mrb[0].mxu0 %vm459_vm2, %v2166_v7  ;;  %v2170_v11 = vld [vmem:[%s2483_s7 + $0x18] sm:$0xff]   ;;  %v2172_v13 = vld [vmem:[%s2483_s7 + $0x20] sm:$0xff]   ;;  %v2174_v15 = vld [vmem:[%s2483_s7 + $0x28] sm:$0xff]  }
  0x54   : > { %2018 = vmatmul.mubr.msk.bf16.vlgmr.msra.gmra.mrb[0].mxu1 %vm459_vm2, %v2167_v8  ;;  %1989 = vmatprep.mubr.msk.bf16.mxu0 %vm459_vm2, %v2168_v9  ;;  %v2171_v12 = vld [vmem:[%s2483_s7 + $0x98] sm:$0xff]   ;;  %v2173_v14 = vld [vmem:[%s2483_s7 + $0xa0] sm:$0xff]   ;;  %v2175_v16 = vld [vmem:[%s2483_s7 + $0xa8] sm:$0xff]  }
  0x55   : > { %2021 = vmatprep.mubr.msk.bf16.mxu1 %vm459_vm2, %v2169_v10  ;;  %v2176_v17 = vld [vmem:[%s2483_s7 + $0x30] sm:$0xff]   ;;  %v2178_v19 = vld [vmem:[%s2483_s7 + $0x38] sm:$0xff]   ;;  %v2180_v21 = vld [vmem:[%s2483_s7 + $0x40] sm:$0xff]  }
  0x56   : > { %v2177_v18 = vld [vmem:[%s2483_s7 + $0xb0] sm:$0xff]   ;;  %v2179_v20 = vld [vmem:[%s2483_s7 + $0xb8] sm:$0xff]   ;;  %v2181_v22 = vld [vmem:[%s2483_s7 + $0xc0] sm:$0xff]  }
  0x57   : > { %v2182_v23 = vld [vmem:[%s2483_s7 + $0x48] sm:$0xff]   ;;  %v2184_v25 = vld [vmem:[%s2483_s7 + $0x50] sm:$0xff]   ;;  %v2186_v27 = vld [vmem:[%s2483_s7 + $0x58] sm:$0xff]  }
  0x58   : > { %v2183_v24 = vld [vmem:[%s2483_s7 + $0xc8] sm:$0xff]   ;;  %v2185_v26 = vld [vmem:[%s2483_s7 + $0xd0] sm:$0xff]   ;;  %v2187_v28 = vld [vmem:[%s2483_s7 + $0xd8] sm:$0xff]  }
  0x59   : > { %v2188_v29 = vld [vmem:[%s2483_s7 + $0x60] sm:$0xff]   ;;  %v2190_v31 = vld [vmem:[%s2483_s7 + $0x68] sm:$0xff]   ;;  %v2192_v33 = vld [vmem:[%s2483_s7 + $0x70] sm:$0xff]  }
  0x5a   : > { %v2189_v30 = vld [vmem:[%s2483_s7 + $0xe0] sm:$0xff]   ;;  %v2191_v32 = vld [vmem:[%s2483_s7 + $0xe8] sm:$0xff]   ;;  %v2193_v34 = vld [vmem:[%s2483_s7 + $0xf0] sm:$0xff]  }
  0x5b   : > { %1990 = vmatmul.mubr.msk.bf16.gmra.mrb[4].mxu0 %vm459_vm2, %v2170_v11  ;;  %v2194_v35 = vld [vmem:[%s2483_s7 + $0x78] sm:$0xff]  }
  0x5c   : > { %2022 = vmatmul.mubr.msk.bf16.gmra.mrb[4].mxu1 %vm459_vm2, %v2171_v12  ;;  %1993 = vmatprep.mubr.msk.bf16.mxu0 %vm459_vm2, %v2172_v13  ;;  %v2195_v36 = vld [vmem:[%s2483_s7 + $0xf8] sm:$0xff]  }
  0x5d   : > { %2025 = vmatprep.mubr.msk.bf16.mxu1 %vm459_vm2, %v2173_v14 }
  0x63   : > { %1994 = vmatmul.mubr.msk.bf16.gmra.mrb[8].mxu0 %vm459_vm2, %v2174_v15 }
  0x64   : > { %2026 = vmatmul.mubr.msk.bf16.gmra.mrb[8].mxu1 %vm459_vm2, %v2175_v16  ;;  %1997 = vmatprep.mubr.msk.bf16.mxu0 %vm459_vm2, %v2176_v17 }
  0x65   : > { %2029 = vmatprep.mubr.msk.bf16.mxu1 %vm459_vm2, %v2177_v18 }
  0x6b   : > { %1998 = vmatmul.mubr.msk.bf16.gmra.mrb[12].mxu0 %vm459_vm2, %v2178_v19 }
  0x6c   : > { %2030 = vmatmul.mubr.msk.bf16.gmra.mrb[12].mxu1 %vm459_vm2, %v2179_v20  ;;  %2001 = vmatprep.mubr.msk.bf16.mxu0 %vm459_vm2, %v2180_v21 }
  0x6d   : > { %2033 = vmatprep.mubr.msk.bf16.mxu1 %vm459_vm2, %v2181_v22 }
  0x73   : > { %2002 = vmatmul.mubr.msk.bf16.gmra.mrb[16].mxu0 %vm459_vm2, %v2182_v23 }
  0x74   : > { %2034 = vmatmul.mubr.msk.bf16.gmra.mrb[16].mxu1 %vm459_vm2, %v2183_v24  ;;  %2005 = vmatprep.mubr.msk.bf16.mxu0 %vm459_vm2, %v2184_v25 }
  0x75   : > { %2037 = vmatprep.mubr.msk.bf16.mxu1 %vm459_vm2, %v2185_v26 }
  0x7b   : > { %2006 = vmatmul.mubr.msk.bf16.gmra.mrb[20].mxu0 %vm459_vm2, %v2186_v27 }
  0x7c   : > { %2038 = vmatmul.mubr.msk.bf16.gmra.mrb[20].mxu1 %vm459_vm2, %v2187_v28  ;;  %2009 = vmatprep.mubr.msk.bf16.mxu0 %vm459_vm2, %v2188_v29 }
  0x7d   : > { %2041 = vmatprep.mubr.msk.bf16.mxu1 %vm459_vm2, %v2189_v30 }
  0x83   : > { %2010 = vmatmul.mubr.msk.bf16.gmra.mrb[24].mxu0 %vm459_vm2, %v2190_v31 }
  0x84   : > { %2042 = vmatmul.mubr.msk.bf16.gmra.mrb[24].mxu1 %vm459_vm2, %v2191_v32  ;;  %2013 = vmatprep.mubr.msk.bf16.mxu0 %vm459_vm2, %v2192_v33 }
  0x85   : > { %2045 = vmatprep.mubr.msk.bf16.mxu1 %vm459_vm2, %v2193_v34 }
  0x8b   : > { %2014 = vmatmul.mubr.msk.bf16.gmra.mrb[28].mxu0 %vm459_vm2, %v2194_v35 }
  0x8c   : > { %2046 = vmatmul.mubr.msk.bf16.gmra.mrb[28].mxu1 %vm459_vm2, %v2195_v36 }
 0x126   : > { %v1987_v38 = vpop.f32.mrb[0].mxu0 }
 0x127   : > { %v2019_v39 = vpop.f32.mrb[0].mxu1  ;;  %v606_v40 = vadd.f32 %v1987_v38, %v2550_v37  ;;  %v597_v42 = vpop.f32.mrb[1].mxu0 }
 0x128   : > { %v734_v41 = vadd.f32 %v2019_v39, %v2550_v37  ;;  %v725_v43 = vpop.f32.mrb[1].mxu1  ;;  %v598_v44 = vadd.f32 %v2550_v37, %v597_v42  ;;  %v1988_v46 = vpop.f32.mrb[2].mxu0 }
 0x129   : > { %v726_v45 = vadd.f32 %v2550_v37, %v725_v43  ;;  %v2020_v47 = vpop.f32.mrb[2].mxu1  ;;  %v854_v48 = vmax.f32 %v606_v40, 0.0  ;;  %v609_v50 = vadd.f32 %v1988_v46, %v2550_v37  ;;  %v600_v52 = vpop.f32.mrb[3].mxu0 }
 0x12a   : > { %v886_v49 = vmax.f32 %v734_v41, 0.0  ;;  %v737_v51 = vadd.f32 %v2020_v47, %v2550_v37  ;;  %v728_v53 = vpop.f32.mrb[3].mxu1  ;;  %v852_v54 = vmax.f32 %v598_v44, 0.0  ;;  %v601_v56 = vadd.f32 %v2550_v37, %v600_v52 }
 0x12b   : > { %v884_v55 = vmax.f32 %v726_v45, 0.0  ;;  %v729_v57 = vadd.f32 %v2550_v37, %v728_v53  ;;  %v1885_v58 = vpack.c.bf16 %v854_v48, %v854_v48  ;;  %v855_v60 = vmax.f32 %v609_v50, 0.0 }
 0x12c   : > { %v1917_v59 = vpack.c.bf16 %v886_v49, %v886_v49  ;;  %v887_v61 = vmax.f32 %v737_v51, 0.0  ;;  %v1883_v62 = vpack.c.bf16 %v852_v54, %v852_v54  ;;  %v853_v0 = vmax.f32 %v601_v56, 0.0 }
 0x12d   : > { %v1915_v63 = vpack.c.bf16 %v884_v55, %v884_v55  ;;  %v885_v1 = vmax.f32 %v729_v57, 0.0  ;;  %1175 = vst.msk [vmem:[%s2560_s12 + $0x8] sm:$0xf] %vm1172_vm3, %v1885_v58  ;;  %v1886_v2 = vpack.c.bf16 %v855_v60, %v855_v60 }
 0x12e   : > { %1207 = vst.msk [vmem:[%s2560_s12 + $0x88] sm:$0xf] %vm1172_vm3, %v1917_v59  ;;  %v1918_v3 = vpack.c.bf16 %v887_v61, %v887_v61  ;;  %1173 = vst.msk [vmem:[%s2560_s12] sm:$0xf] %vm1172_vm3, %v1883_v62  ;;  %v1884_v4 = vpack.c.bf16 %v853_v0, %v853_v0  ;;  %v1991_v6 = vpop.f32.mrb[4].mxu0 }
 0x12f   : > { %1205 = vst.msk [vmem:[%s2560_s12 + $0x80] sm:$0xf] %vm1172_vm3, %v1915_v63  ;;  %v1916_v5 = vpack.c.bf16 %v885_v1, %v885_v1  ;;  %v2023_v7 = vpop.f32.mrb[4].mxu1  ;;  %1176 = vst.msk [vmem:[%s2560_s12 + $0xc] sm:$0xf] %vm1172_vm3, %v1886_v2  ;;  %v622_v8 = vadd.f32 %v1991_v6, %v2550_v37  ;;  %v613_v10 = vpop.f32.mrb[5].mxu0 }
 0x130   : > { %1208 = vst.msk [vmem:[%s2560_s12 + $0x8c] sm:$0xf] %vm1172_vm3, %v1918_v3  ;;  %v750_v9 = vadd.f32 %v2023_v7, %v2550_v37  ;;  %v741_v11 = vpop.f32.mrb[5].mxu1  ;;  %1174 = vst.msk [vmem:[%s2560_s12 + $0x4] sm:$0xf] %vm1172_vm3, %v1884_v4  ;;  %v614_v12 = vadd.f32 %v2550_v37, %v613_v10  ;;  %v1992_v14 = vpop.f32.mrb[6].mxu0 }
 0x131   : > { %1206 = vst.msk [vmem:[%s2560_s12 + $0x84] sm:$0xf] %vm1172_vm3, %v1916_v5  ;;  %v742_v13 = vadd.f32 %v2550_v37, %v741_v11  ;;  %v2024_v15 = vpop.f32.mrb[6].mxu1  ;;  %v858_v16 = vmax.f32 %v622_v8, 0.0  ;;  %v625_v18 = vadd.f32 %v1992_v14, %v2550_v37  ;;  %v616_v20 = vpop.f32.mrb[7].mxu0 }
 0x132   : > { %v890_v17 = vmax.f32 %v750_v9, 0.0  ;;  %v753_v19 = vadd.f32 %v2024_v15, %v2550_v37  ;;  %v744_v21 = vpop.f32.mrb[7].mxu1  ;;  %v856_v22 = vmax.f32 %v614_v12, 0.0  ;;  %v617_v24 = vadd.f32 %v2550_v37, %v616_v20 }
 0x133   : > { %v888_v23 = vmax.f32 %v742_v13, 0.0  ;;  %v745_v25 = vadd.f32 %v2550_v37, %v744_v21  ;;  %v1889_v26 = vpack.c.bf16 %v858_v16, %v858_v16  ;;  %v859_v28 = vmax.f32 %v625_v18, 0.0 }
 0x134   : > { %v1921_v27 = vpack.c.bf16 %v890_v17, %v890_v17  ;;  %v891_v29 = vmax.f32 %v753_v19, 0.0  ;;  %v1887_v30 = vpack.c.bf16 %v856_v22, %v856_v22  ;;  %v857_v32 = vmax.f32 %v617_v24, 0.0 }
 0x135   : > { %v1919_v31 = vpack.c.bf16 %v888_v23, %v888_v23  ;;  %v889_v33 = vmax.f32 %v745_v25, 0.0  ;;  %1179 = vst.msk [vmem:[%s2560_s12 + $0x18] sm:$0xf] %vm1172_vm3, %v1889_v26  ;;  %v1890_v34 = vpack.c.bf16 %v859_v28, %v859_v28 }
 0x136   : > { %1211 = vst.msk [vmem:[%s2560_s12 + $0x98] sm:$0xf] %vm1172_vm3, %v1921_v27  ;;  %v1922_v35 = vpack.c.bf16 %v891_v29, %v891_v29  ;;  %1177 = vst.msk [vmem:[%s2560_s12 + $0x10] sm:$0xf] %vm1172_vm3, %v1887_v30  ;;  %v1888_v36 = vpack.c.bf16 %v857_v32, %v857_v32  ;;  %v1995_v39 = vpop.f32.mrb[8].mxu0 }
 0x137   : > { %1209 = vst.msk [vmem:[%s2560_s12 + $0x90] sm:$0xf] %vm1172_vm3, %v1919_v31  ;;  %v1920_v38 = vpack.c.bf16 %v889_v33, %v889_v33  ;;  %v2027_v40 = vpop.f32.mrb[8].mxu1  ;;  %1180 = vst.msk [vmem:[%s2560_s12 + $0x1c] sm:$0xf] %vm1172_vm3, %v1890_v34  ;;  %v638_v41 = vadd.f32 %v1995_v39, %v2550_v37  ;;  %v629_v43 = vpop.f32.mrb[9].mxu0 }
 0x138   : > { %1212 = vst.msk [vmem:[%s2560_s12 + $0x9c] sm:$0xf] %vm1172_vm3, %v1922_v35  ;;  %v766_v42 = vadd.f32 %v2027_v40, %v2550_v37  ;;  %v757_v44 = vpop.f32.mrb[9].mxu1  ;;  %1178 = vst.msk [vmem:[%s2560_s12 + $0x14] sm:$0xf] %vm1172_vm3, %v1888_v36  ;;  %v630_v45 = vadd.f32 %v2550_v37, %v629_v43  ;;  %v1996_v47 = vpop.f32.mrb[10].mxu0 }
 0x139   : > { %1210 = vst.msk [vmem:[%s2560_s12 + $0x94] sm:$0xf] %vm1172_vm3, %v1920_v38  ;;  %v758_v46 = vadd.f32 %v2550_v37, %v757_v44  ;;  %v2028_v48 = vpop.f32.mrb[10].mxu1  ;;  %v862_v49 = vmax.f32 %v638_v41, 0.0  ;;  %v641_v51 = vadd.f32 %v1996_v47, %v2550_v37  ;;  %v632_v53 = vpop.f32.mrb[11].mxu0 }
 0x13a   : > { %v894_v50 = vmax.f32 %v766_v42, 0.0  ;;  %v769_v52 = vadd.f32 %v2028_v48, %v2550_v37  ;;  %v760_v54 = vpop.f32.mrb[11].mxu1  ;;  %v860_v55 = vmax.f32 %v630_v45, 0.0  ;;  %v633_v57 = vadd.f32 %v2550_v37, %v632_v53 }
 0x13b   : > { %v892_v56 = vmax.f32 %v758_v46, 0.0  ;;  %v761_v58 = vadd.f32 %v2550_v37, %v760_v54  ;;  %v1893_v59 = vpack.c.bf16 %v862_v49, %v862_v49  ;;  %v863_v61 = vmax.f32 %v641_v51, 0.0 }
 0x13c   : > { %v1925_v60 = vpack.c.bf16 %v894_v50, %v894_v50  ;;  %v895_v62 = vmax.f32 %v769_v52, 0.0  ;;  %v1891_v63 = vpack.c.bf16 %v860_v55, %v860_v55  ;;  %v861_v1 = vmax.f32 %v633_v57, 0.0 }
 0x13d   : > { %v1923_v0 = vpack.c.bf16 %v892_v56, %v892_v56  ;;  %v893_v2 = vmax.f32 %v761_v58, 0.0  ;;  %1183 = vst.msk [vmem:[%s2560_s12 + $0x28] sm:$0xf] %vm1172_vm3, %v1893_v59  ;;  %v1894_v3 = vpack.c.bf16 %v863_v61, %v863_v61 }
 0x13e   : > { %1215 = vst.msk [vmem:[%s2560_s12 + $0xa8] sm:$0xf] %vm1172_vm3, %v1925_v60  ;;  %v1926_v4 = vpack.c.bf16 %v895_v62, %v895_v62  ;;  %1181 = vst.msk [vmem:[%s2560_s12 + $0x20] sm:$0xf] %vm1172_vm3, %v1891_v63  ;;  %v1892_v5 = vpack.c.bf16 %v861_v1, %v861_v1  ;;  %v1999_v7 = vpop.f32.mrb[12].mxu0 }
 0x13f   : > { %1213 = vst.msk [vmem:[%s2560_s12 + $0xa0] sm:$0xf] %vm1172_vm3, %v1923_v0  ;;  %v1924_v6 = vpack.c.bf16 %v893_v2, %v893_v2  ;;  %v2031_v8 = vpop.f32.mrb[12].mxu1  ;;  %1184 = vst.msk [vmem:[%s2560_s12 + $0x2c] sm:$0xf] %vm1172_vm3, %v1894_v3  ;;  %v654_v9 = vadd.f32 %v1999_v7, %v2550_v37  ;;  %v645_v11 = vpop.f32.mrb[13].mxu0 }
 0x140   : > { %1216 = vst.msk [vmem:[%s2560_s12 + $0xac] sm:$0xf] %vm1172_vm3, %v1926_v4  ;;  %v782_v10 = vadd.f32 %v2031_v8, %v2550_v37  ;;  %v773_v12 = vpop.f32.mrb[13].mxu1  ;;  %1182 = vst.msk [vmem:[%s2560_s12 + $0x24] sm:$0xf] %vm1172_vm3, %v1892_v5  ;;  %v646_v13 = vadd.f32 %v2550_v37, %v645_v11  ;;  %v2000_v15 = vpop.f32.mrb[14].mxu0 }
 0x141   : > { %1214 = vst.msk [vmem:[%s2560_s12 + $0xa4] sm:$0xf] %vm1172_vm3, %v1924_v6  ;;  %v774_v14 = vadd.f32 %v2550_v37, %v773_v12  ;;  %v2032_v16 = vpop.f32.mrb[14].mxu1  ;;  %v866_v17 = vmax.f32 %v654_v9, 0.0  ;;  %v657_v19 = vadd.f32 %v2000_v15, %v2550_v37  ;;  %v648_v21 = vpop.f32.mrb[15].mxu0 }
 0x142   : > { %v898_v18 = vmax.f32 %v782_v10, 0.0  ;;  %v785_v20 = vadd.f32 %v2032_v16, %v2550_v37  ;;  %v776_v22 = vpop.f32.mrb[15].mxu1  ;;  %v864_v23 = vmax.f32 %v646_v13, 0.0  ;;  %v649_v25 = vadd.f32 %v2550_v37, %v648_v21 }
 0x143   : > { %v896_v24 = vmax.f32 %v774_v14, 0.0  ;;  %v777_v26 = vadd.f32 %v2550_v37, %v776_v22  ;;  %v1897_v27 = vpack.c.bf16 %v866_v17, %v866_v17  ;;  %v867_v29 = vmax.f32 %v657_v19, 0.0 }
 0x144   : > { %v1929_v28 = vpack.c.bf16 %v898_v18, %v898_v18  ;;  %v899_v30 = vmax.f32 %v785_v20, 0.0  ;;  %v1895_v31 = vpack.c.bf16 %v864_v23, %v864_v23  ;;  %v865_v33 = vmax.f32 %v649_v25, 0.0 }
 0x145   : > { %v1927_v32 = vpack.c.bf16 %v896_v24, %v896_v24  ;;  %v897_v34 = vmax.f32 %v777_v26, 0.0  ;;  %1187 = vst.msk [vmem:[%s2560_s12 + $0x38] sm:$0xf] %vm1172_vm3, %v1897_v27  ;;  %v1898_v35 = vpack.c.bf16 %v867_v29, %v867_v29 }
 0x146   : > { %1219 = vst.msk [vmem:[%s2560_s12 + $0xb8] sm:$0xf] %vm1172_vm3, %v1929_v28  ;;  %v1930_v36 = vpack.c.bf16 %v899_v30, %v899_v30  ;;  %1185 = vst.msk [vmem:[%s2560_s12 + $0x30] sm:$0xf] %vm1172_vm3, %v1895_v31  ;;  %v1896_v38 = vpack.c.bf16 %v865_v33, %v865_v33  ;;  %v2003_v40 = vpop.f32.mrb[16].mxu0 }
 0x147   : > { %1217 = vst.msk [vmem:[%s2560_s12 + $0xb0] sm:$0xf] %vm1172_vm3, %v1927_v32  ;;  %v1928_v39 = vpack.c.bf16 %v897_v34, %v897_v34  ;;  %v2035_v41 = vpop.f32.mrb[16].mxu1  ;;  %1188 = vst.msk [vmem:[%s2560_s12 + $0x3c] sm:$0xf] %vm1172_vm3, %v1898_v35  ;;  %v670_v42 = vadd.f32 %v2003_v40, %v2550_v37  ;;  %v661_v44 = vpop.f32.mrb[17].mxu0 }
 0x148   : > { %1220 = vst.msk [vmem:[%s2560_s12 + $0xbc] sm:$0xf] %vm1172_vm3, %v1930_v36  ;;  %v798_v43 = vadd.f32 %v2035_v41, %v2550_v37  ;;  %v789_v45 = vpop.f32.mrb[17].mxu1  ;;  %1186 = vst.msk [vmem:[%s2560_s12 + $0x34] sm:$0xf] %vm1172_vm3, %v1896_v38  ;;  %v662_v46 = vadd.f32 %v2550_v37, %v661_v44  ;;  %v2004_v48 = vpop.f32.mrb[18].mxu0 }
 0x149   : > { %1218 = vst.msk [vmem:[%s2560_s12 + $0xb4] sm:$0xf] %vm1172_vm3, %v1928_v39  ;;  %v790_v47 = vadd.f32 %v2550_v37, %v789_v45  ;;  %v2036_v49 = vpop.f32.mrb[18].mxu1  ;;  %v870_v50 = vmax.f32 %v670_v42, 0.0  ;;  %v673_v52 = vadd.f32 %v2004_v48, %v2550_v37  ;;  %v664_v54 = vpop.f32.mrb[19].mxu0 }
 0x14a   : > { %v902_v51 = vmax.f32 %v798_v43, 0.0  ;;  %v801_v53 = vadd.f32 %v2036_v49, %v2550_v37  ;;  %v792_v55 = vpop.f32.mrb[19].mxu1  ;;  %v868_v56 = vmax.f32 %v662_v46, 0.0  ;;  %v665_v58 = vadd.f32 %v2550_v37, %v664_v54 }
 0x14b   : > { %v900_v57 = vmax.f32 %v790_v47, 0.0  ;;  %v793_v59 = vadd.f32 %v2550_v37, %v792_v55  ;;  %v1901_v60 = vpack.c.bf16 %v870_v50, %v870_v50  ;;  %v871_v62 = vmax.f32 %v673_v52, 0.0 }
 0x14c   : > { %v1933_v61 = vpack.c.bf16 %v902_v51, %v902_v51  ;;  %v903_v63 = vmax.f32 %v801_v53, 0.0  ;;  %v1899_v0 = vpack.c.bf16 %v868_v56, %v868_v56  ;;  %v869_v2 = vmax.f32 %v665_v58, 0.0 }
 0x14d   : > { %v1931_v1 = vpack.c.bf16 %v900_v57, %v900_v57  ;;  %v901_v3 = vmax.f32 %v793_v59, 0.0  ;;  %1191 = vst.msk [vmem:[%s2560_s12 + $0x48] sm:$0xf] %vm1172_vm3, %v1901_v60  ;;  %v1902_v4 = vpack.c.bf16 %v871_v62, %v871_v62 }
 0x14e   : > { %1223 = vst.msk [vmem:[%s2560_s12 + $0xc8] sm:$0xf] %vm1172_vm3, %v1933_v61  ;;  %v1934_v5 = vpack.c.bf16 %v903_v63, %v903_v63  ;;  %1189 = vst.msk [vmem:[%s2560_s12 + $0x40] sm:$0xf] %vm1172_vm3, %v1899_v0  ;;  %v1900_v6 = vpack.c.bf16 %v869_v2, %v869_v2  ;;  %v2007_v8 = vpop.f32.mrb[20].mxu0 }
 0x14f   : > { %1221 = vst.msk [vmem:[%s2560_s12 + $0xc0] sm:$0xf] %vm1172_vm3, %v1931_v1  ;;  %v1932_v7 = vpack.c.bf16 %v901_v3, %v901_v3  ;;  %v2039_v9 = vpop.f32.mrb[20].mxu1  ;;  %1192 = vst.msk [vmem:[%s2560_s12 + $0x4c] sm:$0xf] %vm1172_vm3, %v1902_v4  ;;  %v686_v10 = vadd.f32 %v2007_v8, %v2550_v37  ;;  %v677_v12 = vpop.f32.mrb[21].mxu0 }
 0x150   : > { %1224 = vst.msk [vmem:[%s2560_s12 + $0xcc] sm:$0xf] %vm1172_vm3, %v1934_v5  ;;  %v814_v11 = vadd.f32 %v2039_v9, %v2550_v37  ;;  %v805_v13 = vpop.f32.mrb[21].mxu1  ;;  %1190 = vst.msk [vmem:[%s2560_s12 + $0x44] sm:$0xf] %vm1172_vm3, %v1900_v6  ;;  %v678_v14 = vadd.f32 %v2550_v37, %v677_v12  ;;  %v2008_v16 = vpop.f32.mrb[22].mxu0 }
 0x151   : > { %1222 = vst.msk [vmem:[%s2560_s12 + $0xc4] sm:$0xf] %vm1172_vm3, %v1932_v7  ;;  %v806_v15 = vadd.f32 %v2550_v37, %v805_v13  ;;  %v2040_v17 = vpop.f32.mrb[22].mxu1  ;;  %v874_v18 = vmax.f32 %v686_v10, 0.0  ;;  %v689_v20 = vadd.f32 %v2008_v16, %v2550_v37  ;;  %v680_v22 = vpop.f32.mrb[23].mxu0 }
 0x152   : > { %v906_v19 = vmax.f32 %v814_v11, 0.0  ;;  %v817_v21 = vadd.f32 %v2040_v17, %v2550_v37  ;;  %v808_v23 = vpop.f32.mrb[23].mxu1  ;;  %v872_v24 = vmax.f32 %v678_v14, 0.0  ;;  %v681_v26 = vadd.f32 %v2550_v37, %v680_v22 }
 0x153   : > { %v904_v25 = vmax.f32 %v806_v15, 0.0  ;;  %v809_v27 = vadd.f32 %v2550_v37, %v808_v23  ;;  %v1905_v28 = vpack.c.bf16 %v874_v18, %v874_v18  ;;  %v875_v30 = vmax.f32 %v689_v20, 0.0 }
 0x154   : > { %v1937_v29 = vpack.c.bf16 %v906_v19, %v906_v19  ;;  %v907_v31 = vmax.f32 %v817_v21, 0.0  ;;  %v1903_v32 = vpack.c.bf16 %v872_v24, %v872_v24  ;;  %v873_v34 = vmax.f32 %v681_v26, 0.0 }
 0x155   : > { %v1935_v33 = vpack.c.bf16 %v904_v25, %v904_v25  ;;  %v905_v35 = vmax.f32 %v809_v27, 0.0  ;;  %1195 = vst.msk [vmem:[%s2560_s12 + $0x58] sm:$0xf] %vm1172_vm3, %v1905_v28  ;;  %v1906_v36 = vpack.c.bf16 %v875_v30, %v875_v30 }
 0x156   : > { %1227 = vst.msk [vmem:[%s2560_s12 + $0xd8] sm:$0xf] %vm1172_vm3, %v1937_v29  ;;  %v1938_v38 = vpack.c.bf16 %v907_v31, %v907_v31  ;;  %1193 = vst.msk [vmem:[%s2560_s12 + $0x50] sm:$0xf] %vm1172_vm3, %v1903_v32  ;;  %v1904_v39 = vpack.c.bf16 %v873_v34, %v873_v34  ;;  %v2011_v41 = vpop.f32.mrb[24].mxu0 }
 0x157   : > { %1225 = vst.msk [vmem:[%s2560_s12 + $0xd0] sm:$0xf] %vm1172_vm3, %v1935_v33  ;;  %v1936_v40 = vpack.c.bf16 %v905_v35, %v905_v35  ;;  %v2043_v42 = vpop.f32.mrb[24].mxu1  ;;  %1196 = vst.msk [vmem:[%s2560_s12 + $0x5c] sm:$0xf] %vm1172_vm3, %v1906_v36  ;;  %v702_v43 = vadd.f32 %v2011_v41, %v2550_v37  ;;  %v693_v45 = vpop.f32.mrb[25].mxu0 }
 0x158   : > { %1228 = vst.msk [vmem:[%s2560_s12 + $0xdc] sm:$0xf] %vm1172_vm3, %v1938_v38  ;;  %v830_v44 = vadd.f32 %v2043_v42, %v2550_v37  ;;  %v821_v46 = vpop.f32.mrb[25].mxu1  ;;  %1194 = vst.msk [vmem:[%s2560_s12 + $0x54] sm:$0xf] %vm1172_vm3, %v1904_v39  ;;  %v694_v47 = vadd.f32 %v2550_v37, %v693_v45  ;;  %v2012_v49 = vpop.f32.mrb[26].mxu0 }
 0x159   : > { %1226 = vst.msk [vmem:[%s2560_s12 + $0xd4] sm:$0xf] %vm1172_vm3, %v1936_v40  ;;  %v822_v48 = vadd.f32 %v2550_v37, %v821_v46  ;;  %v2044_v50 = vpop.f32.mrb[26].mxu1  ;;  %v878_v51 = vmax.f32 %v702_v43, 0.0  ;;  %v705_v53 = vadd.f32 %v2012_v49, %v2550_v37  ;;  %v696_v55 = vpop.f32.mrb[27].mxu0 }
 0x15a   : > { %v910_v52 = vmax.f32 %v830_v44, 0.0  ;;  %v833_v54 = vadd.f32 %v2044_v50, %v2550_v37  ;;  %v824_v56 = vpop.f32.mrb[27].mxu1  ;;  %v876_v57 = vmax.f32 %v694_v47, 0.0  ;;  %v697_v59 = vadd.f32 %v2550_v37, %v696_v55 }
 0x15b   : > { %v908_v58 = vmax.f32 %v822_v48, 0.0  ;;  %v825_v60 = vadd.f32 %v2550_v37, %v824_v56  ;;  %v1909_v61 = vpack.c.bf16 %v878_v51, %v878_v51  ;;  %v879_v63 = vmax.f32 %v705_v53, 0.0 }
 0x15c   : > { %v1941_v62 = vpack.c.bf16 %v910_v52, %v910_v52  ;;  %v911_v0 = vmax.f32 %v833_v54, 0.0  ;;  %v1907_v1 = vpack.c.bf16 %v876_v57, %v876_v57  ;;  %v877_v3 = vmax.f32 %v697_v59, 0.0 }
 0x15d   : > { %v1939_v2 = vpack.c.bf16 %v908_v58, %v908_v58  ;;  %v909_v4 = vmax.f32 %v825_v60, 0.0  ;;  %1199 = vst.msk [vmem:[%s2560_s12 + $0x68] sm:$0xf] %vm1172_vm3, %v1909_v61  ;;  %v1910_v5 = vpack.c.bf16 %v879_v63, %v879_v63 }
 0x15e   : > { %1231 = vst.msk [vmem:[%s2560_s12 + $0xe8] sm:$0xf] %vm1172_vm3, %v1941_v62  ;;  %v1942_v6 = vpack.c.bf16 %v911_v0, %v911_v0  ;;  %1197 = vst.msk [vmem:[%s2560_s12 + $0x60] sm:$0xf] %vm1172_vm3, %v1907_v1  ;;  %v1908_v7 = vpack.c.bf16 %v877_v3, %v877_v3  ;;  %v2015_v9 = vpop.f32.mrb[28].mxu0 }
 0x15f   : > { %1229 = vst.msk [vmem:[%s2560_s12 + $0xe0] sm:$0xf] %vm1172_vm3, %v1939_v2  ;;  %v1940_v8 = vpack.c.bf16 %v909_v4, %v909_v4  ;;  %v2047_v10 = vpop.f32.mrb[28].mxu1  ;;  %1200 = vst.msk [vmem:[%s2560_s12 + $0x6c] sm:$0xf] %vm1172_vm3, %v1910_v5  ;;  %v718_v11 = vadd.f32 %v2015_v9, %v2550_v37  ;;  %v709_v13 = vpop.f32.mrb[29].mxu0 }
 0x160   : > { %1232 = vst.msk [vmem:[%s2560_s12 + $0xec] sm:$0xf] %vm1172_vm3, %v1942_v6  ;;  %v846_v12 = vadd.f32 %v2047_v10, %v2550_v37  ;;  %v837_v14 = vpop.f32.mrb[29].mxu1  ;;  %1198 = vst.msk [vmem:[%s2560_s12 + $0x64] sm:$0xf] %vm1172_vm3, %v1908_v7  ;;  %v710_v15 = vadd.f32 %v2550_v37, %v709_v13  ;;  %v2016_v17 = vpop.f32.mrb[30].mxu0 }
 0x161   : > { %1230 = vst.msk [vmem:[%s2560_s12 + $0xe4] sm:$0xf] %vm1172_vm3, %v1940_v8  ;;  %v838_v16 = vadd.f32 %v2550_v37, %v837_v14  ;;  %v2048_v18 = vpop.f32.mrb[30].mxu1  ;;  %v882_v19 = vmax.f32 %v718_v11, 0.0  ;;  %v721_v21 = vadd.f32 %v2016_v17, %v2550_v37  ;;  %v712_v23 = vpop.f32.mrb[31].mxu0 }
 0x162   : > { %v914_v20 = vmax.f32 %v846_v12, 0.0  ;;  %v849_v22 = vadd.f32 %v2048_v18, %v2550_v37  ;;  %v840_v24 = vpop.f32.mrb[31].mxu1  ;;  %v880_v25 = vmax.f32 %v710_v15, 0.0  ;;  %v713_v27 = vadd.f32 %v2550_v37, %v712_v23 }
 0x163   : > { %v912_v26 = vmax.f32 %v838_v16, 0.0  ;;  %v841_v28 = vadd.f32 %v2550_v37, %v840_v24  ;;  %v1913_v29 = vpack.c.bf16 %v882_v19, %v882_v19  ;;  %v883_v31 = vmax.f32 %v721_v21, 0.0  ;;  %1243 = sbr.rel (!%p2959_p12) target bundleno = 453 (0x1c5), region = 44 }
 0x164   : > { %v1945_v30 = vpack.c.bf16 %v914_v20, %v914_v20  ;;  %v915_v32 = vmax.f32 %v849_v22, 0.0  ;;  %v1911_v33 = vpack.c.bf16 %v880_v25, %v880_v25  ;;  %v881_v35 = vmax.f32 %v713_v27, 0.0 }
 0x165   : > { %v1943_v34 = vpack.c.bf16 %v912_v26, %v912_v26  ;;  %v913_v36 = vmax.f32 %v841_v28, 0.0  ;;  %1203 = vst.msk [vmem:[%s2560_s12 + $0x78] sm:$0xf] %vm1172_vm3, %v1913_v29  ;;  %v1914_v38 = vpack.c.bf16 %v883_v31, %v883_v31 }
 0x166   : > { %1235 = vst.msk [vmem:[%s2560_s12 + $0xf8] sm:$0xf] %vm1172_vm3, %v1945_v30  ;;  %v1946_v39 = vpack.c.bf16 %v915_v32, %v915_v32  ;;  %1201 = vst.msk [vmem:[%s2560_s12 + $0x70] sm:$0xf] %vm1172_vm3, %v1911_v33  ;;  %v1912_v37 = vpack.c.bf16 %v881_v35, %v881_v35 }
 0x167   : > { %1233 = vst.msk [vmem:[%s2560_s12 + $0xf0] sm:$0xf] %vm1172_vm3, %v1943_v34  ;;  %v1944_v40 = vpack.c.bf16 %v913_v36, %v913_v36  ;;  %1204 = vst.msk [vmem:[%s2560_s12 + $0x7c] sm:$0xf] %vm1172_vm3, %v1914_v38 }
 0x168   : > { %1236 = vst.msk [vmem:[%s2560_s12 + $0xfc] sm:$0xf] %vm1172_vm3, %v1946_v39  ;;  %1202 = vst.msk [vmem:[%s2560_s12 + $0x74] sm:$0xf] %vm1172_vm3, %v1912_v37 }
 0x169   : > { %1234 = vst.msk [vmem:[%s2560_s12 + $0xf4] sm:$0xf] %vm1172_vm3, %v1944_v40 }
 0x16a   : > { %s2967_s10 = smov (!%p1246_p13, %s1245_s10), 64 }
 0x16b   : > { %s1868_s22 = sshll.u32 %s2967_s10, 6 }
 0x16c   : > { %p1871_p0 = scmp.eq.s32.totalorder %s1868_s22, 0 }
 0x16d   : > { %s2759_s25 = sshrl.u32 (!%p1871_p0), %s2967_s10, 6 }
 0x16e   : > { %1254 = sbr.rel (%p1871_p0) target bundleno = 453 (0x1c5), region = 48  ;;  %p1872_p1 = scmp.le.s32.totalorder (!%p1871_p0), %s2759_s25, 0 }
 0x175   : > { %1663 = sbr.rel (%p1872_p1) target bundleno = 432 (0x1b0), region = 121  ;;  %s2960_s15 = smov (!%p1872_p1), %s2753_s18 }
 0x176   : > { %s2961_s20 = smov (!%p1872_p1), %s2560_s12  ;;  %s2768_s27 = smov (!%p1872_p1), 0  }
 0x177   : > { %s2770_s28 = smov (!%p1872_p1), 0  }
 0x17c LB: >> { %v1270_v41 = vld [vmem:[%s2322_s20] sm:$0xf]  ;;  %v1272_v42 = vld [vmem:[%s2322_s20 + $0x4] sm:$0xf]  ;;  %v1274_v43 = vld [vmem:[%s2322_s20 + $0x8] sm:$0xf]  ;;  %s2330_s28 = sphi %s2770_s28, %s1264_s28   ;;  %s2326_s27 = sphi %s2768_s27, %s2962_s27   ;;  %s2322_s20 = sphi %s2961_s20, %s1403_s20   ;;  %s2318_s15 = sphi %s2960_s15, %s1404_s15  }
 0x17d   : >> { %1271 = vst [vmem:[%s2318_s15] sm:$0xf] %v1270_v41  ;;  %1273 = vst [vmem:[%s2318_s15 + $0x4] sm:$0xf] %v1272_v42  ;;  %v1276_v44 = vld [vmem:[%s2322_s20 + $0xc] sm:$0xf]  ;;  %s1398_s23 = sadd.s32 1, %s2326_s27 }
 0x17e   : >> { %1275 = vst [vmem:[%s2318_s15 + $0x8] sm:$0xf] %v1274_v43  ;;  %v1278_v45 = vld [vmem:[%s2322_s20 + $0x10] sm:$0xf]  ;;  %v1280_v46 = vld [vmem:[%s2322_s20 + $0x14] sm:$0xf]  ;;  %p1399_p2 = scmp.ge.s32.totalorder %s1398_s23, %s2759_s25 }
 0x17f   : >> { %1277 = vst [vmem:[%s2318_s15 + $0xc] sm:$0xf] %v1276_v44  ;;  %1279 = vst [vmem:[%s2318_s15 + $0x10] sm:$0xf] %v1278_v45  ;;  %v1282_v47 = vld [vmem:[%s2322_s20 + $0x18] sm:$0xf] }
 0x180   : >> { %1281 = vst [vmem:[%s2318_s15 + $0x14] sm:$0xf] %v1280_v46  ;;  %v1284_v48 = vld [vmem:[%s2322_s20 + $0x1c] sm:$0xf]  ;;  %v1286_v49 = vld [vmem:[%s2322_s20 + $0x20] sm:$0xf] }
 0x181   : >> { %1283 = vst [vmem:[%s2318_s15 + $0x18] sm:$0xf] %v1282_v47  ;;  %1285 = vst [vmem:[%s2318_s15 + $0x1c] sm:$0xf] %v1284_v48  ;;  %v1288_v50 = vld [vmem:[%s2322_s20 + $0x24] sm:$0xf] }
 0x182   : >> { %1287 = vst [vmem:[%s2318_s15 + $0x20] sm:$0xf] %v1286_v49  ;;  %v1290_v51 = vld [vmem:[%s2322_s20 + $0x28] sm:$0xf]  ;;  %v1292_v52 = vld [vmem:[%s2322_s20 + $0x2c] sm:$0xf] }
 0x183   : >> { %1289 = vst [vmem:[%s2318_s15 + $0x24] sm:$0xf] %v1288_v50  ;;  %1291 = vst [vmem:[%s2318_s15 + $0x28] sm:$0xf] %v1290_v51  ;;  %v1294_v53 = vld [vmem:[%s2322_s20 + $0x30] sm:$0xf] }
 0x184   : >> { %1293 = vst [vmem:[%s2318_s15 + $0x2c] sm:$0xf] %v1292_v52  ;;  %v1296_v54 = vld [vmem:[%s2322_s20 + $0x34] sm:$0xf]  ;;  %v1298_v55 = vld [vmem:[%s2322_s20 + $0x38] sm:$0xf] }
 0x185   : >> { %1295 = vst [vmem:[%s2318_s15 + $0x30] sm:$0xf] %v1294_v53  ;;  %1297 = vst [vmem:[%s2318_s15 + $0x34] sm:$0xf] %v1296_v54  ;;  %v1300_v56 = vld [vmem:[%s2322_s20 + $0x3c] sm:$0xf] }
 0x186   : >> { %1299 = vst [vmem:[%s2318_s15 + $0x38] sm:$0xf] %v1298_v55  ;;  %v1302_v57 = vld [vmem:[%s2322_s20 + $0x40] sm:$0xf]  ;;  %v1304_v58 = vld [vmem:[%s2322_s20 + $0x44] sm:$0xf] }
 0x187   : >> { %1301 = vst [vmem:[%s2318_s15 + $0x3c] sm:$0xf] %v1300_v56  ;;  %1303 = vst [vmem:[%s2318_s15 + $0x40] sm:$0xf] %v1302_v57  ;;  %v1306_v59 = vld [vmem:[%s2322_s20 + $0x48] sm:$0xf] }
 0x188   : >> { %1305 = vst [vmem:[%s2318_s15 + $0x44] sm:$0xf] %v1304_v58  ;;  %v1308_v60 = vld [vmem:[%s2322_s20 + $0x4c] sm:$0xf]  ;;  %v1310_v61 = vld [vmem:[%s2322_s20 + $0x50] sm:$0xf] }
 0x189   : >> { %1307 = vst [vmem:[%s2318_s15 + $0x48] sm:$0xf] %v1306_v59  ;;  %1309 = vst [vmem:[%s2318_s15 + $0x4c] sm:$0xf] %v1308_v60  ;;  %v1312_v62 = vld [vmem:[%s2322_s20 + $0x54] sm:$0xf] }
 0x18a   : >> { %1311 = vst [vmem:[%s2318_s15 + $0x50] sm:$0xf] %v1310_v61  ;;  %v1314_v63 = vld [vmem:[%s2322_s20 + $0x58] sm:$0xf]  ;;  %v1316_v0 = vld [vmem:[%s2322_s20 + $0x5c] sm:$0xf] }
 0x18b   : >> { %1313 = vst [vmem:[%s2318_s15 + $0x54] sm:$0xf] %v1312_v62  ;;  %1315 = vst [vmem:[%s2318_s15 + $0x58] sm:$0xf] %v1314_v63  ;;  %v1318_v1 = vld [vmem:[%s2322_s20 + $0x60] sm:$0xf] }
 0x18c   : >> { %1317 = vst [vmem:[%s2318_s15 + $0x5c] sm:$0xf] %v1316_v0  ;;  %v1320_v2 = vld [vmem:[%s2322_s20 + $0x64] sm:$0xf]  ;;  %v1322_v3 = vld [vmem:[%s2322_s20 + $0x68] sm:$0xf] }
 0x18d   : >> { %1319 = vst [vmem:[%s2318_s15 + $0x60] sm:$0xf] %v1318_v1  ;;  %1321 = vst [vmem:[%s2318_s15 + $0x64] sm:$0xf] %v1320_v2  ;;  %v1324_v4 = vld [vmem:[%s2322_s20 + $0x6c] sm:$0xf] }
 0x18e   : >> { %1323 = vst [vmem:[%s2318_s15 + $0x68] sm:$0xf] %v1322_v3  ;;  %v1326_v5 = vld [vmem:[%s2322_s20 + $0x70] sm:$0xf]  ;;  %v1328_v6 = vld [vmem:[%s2322_s20 + $0x74] sm:$0xf] }
 0x18f   : >> { %1325 = vst [vmem:[%s2318_s15 + $0x6c] sm:$0xf] %v1324_v4  ;;  %1327 = vst [vmem:[%s2318_s15 + $0x70] sm:$0xf] %v1326_v5  ;;  %v1330_v7 = vld [vmem:[%s2322_s20 + $0x78] sm:$0xf] }
 0x190   : >> { %1329 = vst [vmem:[%s2318_s15 + $0x74] sm:$0xf] %v1328_v6  ;;  %v1332_v8 = vld [vmem:[%s2322_s20 + $0x7c] sm:$0xf]  ;;  %v1334_v9 = vld [vmem:[%s2322_s20 + $0x80] sm:$0xf] }
 0x191   : >> { %1331 = vst [vmem:[%s2318_s15 + $0x78] sm:$0xf] %v1330_v7  ;;  %1333 = vst [vmem:[%s2318_s15 + $0x7c] sm:$0xf] %v1332_v8  ;;  %v1336_v10 = vld [vmem:[%s2322_s20 + $0x84] sm:$0xf] }
 0x192   : >> { %1335 = vst [vmem:[%s2318_s15 + $0x80] sm:$0xf] %v1334_v9  ;;  %v1338_v11 = vld [vmem:[%s2322_s20 + $0x88] sm:$0xf]  ;;  %v1340_v12 = vld [vmem:[%s2322_s20 + $0x8c] sm:$0xf] }
 0x193   : >> { %1337 = vst [vmem:[%s2318_s15 + $0x84] sm:$0xf] %v1336_v10  ;;  %1339 = vst [vmem:[%s2318_s15 + $0x88] sm:$0xf] %v1338_v11  ;;  %v1342_v13 = vld [vmem:[%s2322_s20 + $0x90] sm:$0xf] }
 0x194   : >> { %1341 = vst [vmem:[%s2318_s15 + $0x8c] sm:$0xf] %v1340_v12  ;;  %v1344_v14 = vld [vmem:[%s2322_s20 + $0x94] sm:$0xf]  ;;  %v1346_v15 = vld [vmem:[%s2322_s20 + $0x98] sm:$0xf] }
 0x195   : >> { %1343 = vst [vmem:[%s2318_s15 + $0x90] sm:$0xf] %v1342_v13  ;;  %1345 = vst [vmem:[%s2318_s15 + $0x94] sm:$0xf] %v1344_v14  ;;  %v1348_v16 = vld [vmem:[%s2322_s20 + $0x9c] sm:$0xf] }
 0x196   : >> { %1347 = vst [vmem:[%s2318_s15 + $0x98] sm:$0xf] %v1346_v15  ;;  %v1350_v17 = vld [vmem:[%s2322_s20 + $0xa0] sm:$0xf]  ;;  %v1352_v18 = vld [vmem:[%s2322_s20 + $0xa4] sm:$0xf] }
 0x197   : >> { %1349 = vst [vmem:[%s2318_s15 + $0x9c] sm:$0xf] %v1348_v16  ;;  %1351 = vst [vmem:[%s2318_s15 + $0xa0] sm:$0xf] %v1350_v17  ;;  %v1354_v19 = vld [vmem:[%s2322_s20 + $0xa8] sm:$0xf] }
 0x198   : >> { %1353 = vst [vmem:[%s2318_s15 + $0xa4] sm:$0xf] %v1352_v18  ;;  %v1356_v20 = vld [vmem:[%s2322_s20 + $0xac] sm:$0xf]  ;;  %v1358_v21 = vld [vmem:[%s2322_s20 + $0xb0] sm:$0xf] }
 0x199   : >> { %1355 = vst [vmem:[%s2318_s15 + $0xa8] sm:$0xf] %v1354_v19  ;;  %1357 = vst [vmem:[%s2318_s15 + $0xac] sm:$0xf] %v1356_v20  ;;  %v1360_v22 = vld [vmem:[%s2322_s20 + $0xb4] sm:$0xf] }
 0x19a   : >> { %1359 = vst [vmem:[%s2318_s15 + $0xb0] sm:$0xf] %v1358_v21  ;;  %v1362_v23 = vld [vmem:[%s2322_s20 + $0xb8] sm:$0xf]  ;;  %v1364_v24 = vld [vmem:[%s2322_s20 + $0xbc] sm:$0xf] }
 0x19b   : >> { %1361 = vst [vmem:[%s2318_s15 + $0xb4] sm:$0xf] %v1360_v22  ;;  %1363 = vst [vmem:[%s2318_s15 + $0xb8] sm:$0xf] %v1362_v23  ;;  %v1366_v25 = vld [vmem:[%s2322_s20 + $0xc0] sm:$0xf] }
 0x19c   : >> { %1365 = vst [vmem:[%s2318_s15 + $0xbc] sm:$0xf] %v1364_v24  ;;  %v1368_v26 = vld [vmem:[%s2322_s20 + $0xc4] sm:$0xf]  ;;  %v1370_v27 = vld [vmem:[%s2322_s20 + $0xc8] sm:$0xf] }
 0x19d   : >> { %1367 = vst [vmem:[%s2318_s15 + $0xc0] sm:$0xf] %v1366_v25  ;;  %1369 = vst [vmem:[%s2318_s15 + $0xc4] sm:$0xf] %v1368_v26  ;;  %v1372_v28 = vld [vmem:[%s2322_s20 + $0xcc] sm:$0xf] }
 0x19e   : >> { %1371 = vst [vmem:[%s2318_s15 + $0xc8] sm:$0xf] %v1370_v27  ;;  %v1374_v29 = vld [vmem:[%s2322_s20 + $0xd0] sm:$0xf]  ;;  %v1376_v30 = vld [vmem:[%s2322_s20 + $0xd4] sm:$0xf] }
 0x19f   : >> { %1373 = vst [vmem:[%s2318_s15 + $0xcc] sm:$0xf] %v1372_v28  ;;  %1375 = vst [vmem:[%s2318_s15 + $0xd0] sm:$0xf] %v1374_v29  ;;  %v1378_v31 = vld [vmem:[%s2322_s20 + $0xd8] sm:$0xf] }
 0x1a0   : >> { %1377 = vst [vmem:[%s2318_s15 + $0xd4] sm:$0xf] %v1376_v30  ;;  %v1380_v32 = vld [vmem:[%s2322_s20 + $0xdc] sm:$0xf]  ;;  %v1382_v33 = vld [vmem:[%s2322_s20 + $0xe0] sm:$0xf] }
 0x1a1   : >> { %1379 = vst [vmem:[%s2318_s15 + $0xd8] sm:$0xf] %v1378_v31  ;;  %1381 = vst [vmem:[%s2318_s15 + $0xdc] sm:$0xf] %v1380_v32  ;;  %v1384_v34 = vld [vmem:[%s2322_s20 + $0xe4] sm:$0xf] }
 0x1a2   : >> { %1383 = vst [vmem:[%s2318_s15 + $0xe0] sm:$0xf] %v1382_v33  ;;  %v1386_v35 = vld [vmem:[%s2322_s20 + $0xe8] sm:$0xf]  ;;  %v1388_v36 = vld [vmem:[%s2322_s20 + $0xec] sm:$0xf] }
 0x1a3   : >> { %1385 = vst [vmem:[%s2318_s15 + $0xe4] sm:$0xf] %v1384_v34  ;;  %1387 = vst [vmem:[%s2318_s15 + $0xe8] sm:$0xf] %v1386_v35  ;;  %v1390_v38 = vld [vmem:[%s2322_s20 + $0xf0] sm:$0xf] }
 0x1a4   : >> { %1389 = vst [vmem:[%s2318_s15 + $0xec] sm:$0xf] %v1388_v36  ;;  %v1392_v39 = vld [vmem:[%s2322_s20 + $0xf4] sm:$0xf]  ;;  %v1394_v37 = vld [vmem:[%s2322_s20 + $0xf8] sm:$0xf] }
 0x1a5   : >> { %1391 = vst [vmem:[%s2318_s15 + $0xf0] sm:$0xf] %v1390_v38  ;;  %1393 = vst [vmem:[%s2318_s15 + $0xf4] sm:$0xf] %v1392_v39  ;;  %v1396_v40 = vld [vmem:[%s2322_s20 + $0xfc] sm:$0xf] }
 0x1a6   : >> { %1395 = vst [vmem:[%s2318_s15 + $0xf8] sm:$0xf] %v1394_v37  ;;  %1397 = vst [vmem:[%s2318_s15 + $0xfc] sm:$0xf] %v1396_v40  ;;  %s2969_s23 = smov (%p1399_p2, %s1398_s23), 0  ;;  %s1264_s28 = sadd.s32 1, %s2330_s28  }
 0x1a7   : >> { %s1873_s29 = sshll.u32 %s2969_s23, 8  ;;  %p1263_p3 = scmp.ge.s32.totalorder %s1264_s28, %s2759_s25 }
 0x1a8   : >> { %s1403_s20 = scalar_lea.vmem %s2560_s12, %s1873_s29 [#allocation6]   ;;  %s1404_s15 = scalar_lea.vmem %s2753_s18, %s1873_s29  }
 0x1a9   : >> { %s2962_s27 = smov %s2969_s23  ;;  %1266 = sbr.rel (!%p1263_p3) target bundleno = 380 (0x17c), region = 127 }
 0x1b0 PF: > { %s2927_s30 = sand.u32 63, %s2967_s10   ;;  %s1948_s4 = sshll.u32 %s2759_s25, 8 }
 0x1b1   : > { %s1409_s24 = scalar_lea.vmem %s2560_s12, %s1948_s4 [#allocation6]   ;;  %s1411_s21 = scalar_lea.vmem %s2753_s18, %s1948_s4  }
 0x1b2   : > { %p1878_p5 = scmp.le.s32.totalorder %s2927_s30, 0 }
 0x1b3   : > { %s2332_s26 = smov (!%p1878_p5), %s1411_s21   ;;  %s2336_s5 = smov (!%p1878_p5), %s1409_s24  }
 0x1b4   : > { %1677 = sbr.rel (%p1878_p5) target bundleno = 453 (0x1c5), region = 132  ;;  %s2340_s6 = smov (!%p1878_p5), 0  }
 0x1b5   : > { %s2344_s7 = smov (!%p1878_p5), 0  }
 0x1bb LB: >> { %v1421_v41 = vld [vmem:[%s2338_s5] sm:$0xf]  ;;  %s1423_s8 = sadd.s32 1, %s2342_s6  ;;  %s1415_s7 = sadd.s32 1, %s2346_s7   ;;  %s2346_s7 = sphi %s2344_s7, %s1415_s7   ;;  %s2342_s6 = sphi %s2340_s6, %s2341_s6   ;;  %s2338_s5 = sphi %s2336_s5, %s1428_s5   ;;  %s2334_s26 = sphi %s2332_s26, %s1429_s26  }
 0x1bc   : >> { %1422 = vst [vmem:[%s2334_s26] sm:$0xf] %v1421_v41  ;;  %p1424_p8 = scmp.ge.s32.totalorder %s1423_s8, %s2927_s30  ;;  %p1414_p10 = scmp.ge.s32.totalorder %s1415_s7, %s2927_s30 }
 0x1be   : >> { %s2971_s8 = smov (%p1424_p8, %s1423_s8), 0  ;;  %1417 = sbr.rel (!%p1414_p10) target bundleno = 443 (0x1bb), region = 138 }
 0x1bf   : >> { %s1879_s9 = sshll.u32 %s2971_s8, 2  ;;  %s2341_s6 = smov %s2971_s8  }
 0x1c0   : >> { %s1428_s5 = scalar_lea.vmem %s1409_s24, %s1879_s9 [#allocation6]   ;;  %s1429_s26 = scalar_lea.vmem %s1411_s21, %s1879_s9  }
 0x1c5 PF: > { %p12_p11 = scmp.ge.s32.totalorder %s2388_s16, 6   ;;  %s2963_s12 = smov %s2310_s13 }
 0x1c6   : > { %s2964_s13 = smov %s2396_s19  ;;  %s2965_s14 = smov %s2388_s16 }
 0x1c7   :  { %14 = sbr.rel (!%p12_p11) target bundleno = 3 (0x3), region = 149 }
 0x1ce   :  { %1616 = vsyncpa [#allocation3], 1 }
 0x1cf   :  { %1618 = vsyncpa [#allocation3 + $0x1], 1 }
 0x1d0   :  { %1619 = vsyncpa [#allocation5], 1 }

// kernel: vae_forward.8
= control target key start
LH: loop header
LB: loop body
LE: loop exit
PB: predicated region body
PF: predicated region fallthrough
CT: control target
= control target key end

     0   :  { %v1270_v0 = vmov 0   ;;  %vm373_vm0 = vcmask 261120   ;;  %vm927_vm1 = vcmask 76800   ;;  %s1743_s1 = inlined_call_operand.vmem [shape: bf16[160,10], index: 1, kind: input, shape index: {}]   ;;  %s1744_s0 = inlined_call_operand.vmem [shape: bf16[392,160], index: 0, kind: input, shape index: {}]   ;;  %s1745_s2 = inlined_call_operand.vmem [shape: f32[1,10], index: 2, kind: input, shape index: {}]   ;;  %s1746_s3 = inlined_call_operand.vmem [shape: bf16[392,10], index: 3, kind: output, shape index: {}]  }
   0x1   :  { %449 = vmatprep.subr.bf16.mxu0 %v1270_v0  ;;  %v1186_v1 = vld [vmem:[%s1743_s1] sm:$0xff]   ;;  %1165 = vmatprep.subr.bf16.mxu1 %v1270_v0  ;;  %v1187_v2 = vld [vmem:[%s1743_s1 + $0x8] sm:$0xff]   ;;  %v1188_v3 = vld [vmem:[%s1743_s1 + $0x10] sm:$0xff]  }
   0x2   :  { %450 = vmatpush1.bf16.msra.mxu0 %v1186_v1  ;;  %1175 = vmatpush1.bf16.msra.mxu1 %v1186_v1  ;;  %v1189_v4 = vld [vmem:[%s1743_s1 + $0x18] sm:$0xff]   ;;  %v1198_v5 = vld [vmem:[%s1744_s0 + $0x4] ss:$8 sps:$4 sm:$0xff]   ;;  %v1192_v9 = vld [vmem:[%s1743_s1 + $0x30] sm:$0xff]  }
   0x3   :  { %451 = vmatprep.subr.bf16.mxu0 %v1270_v0  ;;  %1166 = vmatprep.subr.bf16.mxu1 %v1270_v0  ;;  %v1201_v6 = vld [vmem:[%s1744_s0 + $0xd4] ss:$8 sps:$4 sm:$0xff]   ;;  %v1190_v7 = vld [vmem:[%s1743_s1 + $0x20] sm:$0xff]   ;;  %v1191_v8 = vld [vmem:[%s1743_s1 + $0x28] sm:$0xff]  }
   0x4   :  { %1042 = vmatprep.mubr.msk.bf16.mxu0 %vm373_vm0, %v1198_v5  ;;  %1055 = vmatprep.mubr.msk.bf16.mxu1 %vm373_vm0, %v1201_v6  ;;  %v1193_v10 = vld [vmem:[%s1743_s1 + $0x38] sm:$0xff]   ;;  %v1194_v11 = vld [vmem:[%s1743_s1 + $0x40] sm:$0xff]   ;;  %v1195_v12 = vld [vmem:[%s1743_s1 + $0x48] sm:$0xff]  }
   0x5   :  { %v1196_v13 = vld [vmem:[%s1744_s0] ss:$8 sps:$4 sm:$0xff]   ;;  %v1199_v14 = vld [vmem:[%s1744_s0 + $0xd0] ss:$8 sps:$4 sm:$0xff]   ;;  %v1202_v15 = vld [vmem:[%s1744_s0 + $0x14] ss:$8 sps:$4 sm:$0xff]  }
   0x6   :  { %452 = vmatpush1.bf16.msra.mxu0 %v1187_v2  ;;  %1176 = vmatpush1.bf16.msra.mxu1 %v1187_v2  ;;  %v1205_v16 = vld [vmem:[%s1744_s0 + $0xe4] ss:$8 sps:$4 sm:$0xff]   ;;  %v1204_v17 = vld [vmem:[%s1744_s0 + $0x10] ss:$8 sps:$4 sm:$0xff]   ;;  %v1209_v18 = vld [vmem:[%s1744_s0 + $0xe0] ss:$8 sps:$4 sm:$0xff]  }
   0x7   :  { %453 = vmatprep.subr.bf16.mxu0 %v1270_v0  ;;  %1167 = vmatprep.subr.bf16.mxu1 %v1270_v0  ;;  %v1207_v19 = vld [vmem:[%s1744_s0 + $0x24] ss:$8 sps:$4 sm:$0xff]   ;;  %v1211_v20 = vld [vmem:[%s1744_s0 + $0xf4] ss:$8 sps:$4 sm:$0xff]   ;;  %v1210_v21 = vld [vmem:[%s1744_s0 + $0x20] ss:$8 sps:$4 sm:$0xff]  }
   0x8   :  { %v1215_v22 = vld [vmem:[%s1744_s0 + $0xf0] ss:$8 sps:$4 sm:$0xff]   ;;  %v1213_v23 = vld [vmem:[%s1744_s0 + $0x34] ss:$8 sps:$4 sm:$0xff]   ;;  %v1217_v24 = vld [vmem:[%s1744_s0 + $0x104] ss:$8 sps:$4 sm:$0xff]  }
   0x9   :  { %v1216_v25 = vld [vmem:[%s1744_s0 + $0x30] ss:$8 sps:$4 sm:$0xff]   ;;  %v1221_v26 = vld [vmem:[%s1744_s0 + $0x100] ss:$8 sps:$4 sm:$0xff]   ;;  %v1219_v27 = vld [vmem:[%s1744_s0 + $0x44] ss:$8 sps:$4 sm:$0xff]  }
   0xa   :  { %454 = vmatpush1.bf16.msra.mxu0 %v1188_v3  ;;  %1177 = vmatpush1.bf16.msra.mxu1 %v1188_v3  ;;  %v1223_v28 = vld [vmem:[%s1744_s0 + $0x114] ss:$8 sps:$4 sm:$0xff]   ;;  %v1222_v29 = vld [vmem:[%s1744_s0 + $0x40] ss:$8 sps:$4 sm:$0xff]   ;;  %v1227_v30 = vld [vmem:[%s1744_s0 + $0x110] ss:$8 sps:$4 sm:$0xff]  }
   0xb   :  { %455 = vmatprep.subr.bf16.mxu0 %v1270_v0  ;;  %1168 = vmatprep.subr.bf16.mxu1 %v1270_v0  ;;  %v1225_v31 = vld [vmem:[%s1744_s0 + $0x54] ss:$8 sps:$4 sm:$0xff]   ;;  %v1229_v32 = vld [vmem:[%s1744_s0 + $0x124] ss:$8 sps:$4 sm:$0xff]   ;;  %v1228_v33 = vld [vmem:[%s1744_s0 + $0x50] ss:$8 sps:$4 sm:$0xff]  }
   0xc   :  { %v1233_v34 = vld [vmem:[%s1744_s0 + $0x120] ss:$8 sps:$4 sm:$0xff]   ;;  %v1231_v35 = vld [vmem:[%s1744_s0 + $0x64] ss:$8 sps:$4 sm:$0xff]   ;;  %v1235_v36 = vld [vmem:[%s1744_s0 + $0x134] ss:$8 sps:$4 sm:$0xff]  }
   0xd   :  { %v1234_v37 = vld [vmem:[%s1744_s0 + $0x60] ss:$8 sps:$4 sm:$0xff]   ;;  %v1239_v38 = vld [vmem:[%s1744_s0 + $0x130] ss:$8 sps:$4 sm:$0xff]   ;;  %v1237_v39 = vld [vmem:[%s1744_s0 + $0x74] ss:$8 sps:$4 sm:$0xff]  }
   0xe   :  { %456 = vmatpush1.bf16.msra.mxu0 %v1189_v4  ;;  %1178 = vmatpush1.bf16.msra.mxu1 %v1189_v4  ;;  %v1241_v40 = vld [vmem:[%s1744_s0 + $0x144] ss:$8 sps:$4 sm:$0xff]   ;;  %v1240_v41 = vld [vmem:[%s1744_s0 + $0x70] ss:$8 sps:$4 sm:$0xff]   ;;  %v1245_v42 = vld [vmem:[%s1744_s0 + $0x140] ss:$8 sps:$4 sm:$0xff]  }
   0xf   :  { %457 = vmatprep.subr.bf16.mxu0 %v1270_v0  ;;  %1169 = vmatprep.subr.bf16.mxu1 %v1270_v0  ;;  %v1243_v43 = vld [vmem:[%s1744_s0 + $0x84] ss:$8 sps:$4 sm:$0xff]   ;;  %v1247_v44 = vld [vmem:[%s1744_s0 + $0x154] ss:$8 sps:$4 sm:$0xff]   ;;  %v1246_v45 = vld [vmem:[%s1744_s0 + $0x80] ss:$8 sps:$4 sm:$0xff]  }
  0x10   :  { %v1251_v46 = vld [vmem:[%s1744_s0 + $0x150] ss:$8 sps:$4 sm:$0xff]   ;;  %v1249_v47 = vld [vmem:[%s1744_s0 + $0x94] ss:$8 sps:$4 sm:$0xff]   ;;  %v1253_v48 = vld [vmem:[%s1744_s0 + $0x164] ss:$8 sps:$4 sm:$0xff]  }
  0x11   :  { %v1252_v49 = vld [vmem:[%s1744_s0 + $0x90] ss:$8 sps:$4 sm:$0xff]   ;;  %v1257_v50 = vld [vmem:[%s1744_s0 + $0x160] ss:$8 sps:$4 sm:$0xff]   ;;  %v1255_v51 = vld [vmem:[%s1744_s0 + $0xa4] ss:$8 sps:$4 sm:$0xff]  }
  0x12   :  { %458 = vmatpush1.bf16.msra.mxu0 %v1190_v7  ;;  %1179 = vmatpush1.bf16.msra.mxu1 %v1190_v7  ;;  %v1259_v52 = vld [vmem:[%s1744_s0 + $0x174] ss:$8 sps:$4 sm:$0xff]   ;;  %v63_v53 = vld [vmem:[%s1744_s0 + $0x180] sm:$0xff]  ;;  %v1263_v55 = vld [vmem:[%s1744_s0 + $0x170] ss:$8 sps:$4 sm:$0xff]  }
  0x13   :  { %459 = vmatprep.subr.bf16.mxu0 %v1270_v0  ;;  %1170 = vmatprep.subr.bf16.mxu1 %v1270_v0  ;;  %v1258_v54 = vld [vmem:[%s1744_s0 + $0xa0] ss:$8 sps:$4 sm:$0xff]   ;;  %v1261_v56 = vld [vmem:[%s1744_s0 + $0xb4] ss:$8 sps:$4 sm:$0xff]   ;;  %v1031_v57 = vcombine.high %v63_v53, %v63_v53  ;;  %v1264_v58 = vld [vmem:[%s1744_s0 + $0xb0] ss:$8 sps:$4 sm:$0xff]   ;;  %v1030_v59 = vcombine.low %v63_v53, %v63_v53 }
  0x14   :  { %v1266_v60 = vld [vmem:[%s1744_s0 + $0xc4] ss:$8 sps:$4 sm:$0xff]   ;;  %v1269_v61 = vld [vmem:[%s1744_s0 + $0xc0] ss:$8 sps:$4 sm:$0xff]  }
  0x15   :  { %v1496_v62 = vld [vmem:[%s1745_s2] ss:$0 sm:$0xff] }
  0x16   :  { %460 = vmatpush1.bf16.msra.mxu0 %v1191_v8  ;;  %1180 = vmatpush1.bf16.msra.mxu1 %v1191_v8 }
  0x17   :  { %461 = vmatprep.subr.bf16.mxu0 %v1270_v0  ;;  %1171 = vmatprep.subr.bf16.mxu1 %v1270_v0 }
  0x1a   :  { %462 = vmatpush1.bf16.msra.mxu0 %v1192_v9  ;;  %1181 = vmatpush1.bf16.msra.mxu1 %v1192_v9 }
  0x1b   :  { %463 = vmatprep.subr.bf16.mxu0 %v1270_v0  ;;  %1172 = vmatprep.subr.bf16.mxu1 %v1270_v0 }
  0x1e   :  { %464 = vmatpush1.bf16.msra.mxu0 %v1193_v10  ;;  %1182 = vmatpush1.bf16.msra.mxu1 %v1193_v10 }
  0x1f   :  { %465 = vmatprep.subr.bf16.mxu0 %v1270_v0  ;;  %1173 = vmatprep.subr.bf16.mxu1 %v1270_v0 }
  0x22   :  { %466 = vmatpush1.bf16.msra.mxu0 %v1194_v11  ;;  %1183 = vmatpush1.bf16.msra.mxu1 %v1194_v11 }
  0x23   :  { %467 = vmatprep.subr.bf16.mxu0 %v1270_v0  ;;  %1174 = vmatprep.subr.bf16.mxu1 %v1270_v0 }
  0x26   :  { %468 = vmatpush1.bf16.msra.mxu0 %v1195_v12  ;;  %1184 = vmatpush1.bf16.msra.mxu1 %v1195_v12 }
  0x29   :  { %482 = vmatmul.mubr.bf16.vlgmr.msra.gmra.mrb[0].mxu0 %v1196_v13  ;;  %586 = vmatmul.mubr.bf16.vlgmr.msra.gmra.mrb[0].mxu1 %v1199_v14 }
  0x2a   :  { %1043 = vmatprep.mubr.msk.bf16.mxu0 %vm373_vm0, %v1202_v15  ;;  %1056 = vmatprep.mubr.msk.bf16.mxu1 %vm373_vm0, %v1205_v16 }
  0x31   :  { %490 = vmatmul.mubr.bf16.gmra.mrb[4].mxu0 %v1204_v17  ;;  %594 = vmatmul.mubr.bf16.gmra.mrb[4].mxu1 %v1209_v18 }
  0x32   :  { %1044 = vmatprep.mubr.msk.bf16.mxu0 %vm373_vm0, %v1207_v19  ;;  %1057 = vmatprep.mubr.msk.bf16.mxu1 %vm373_vm0, %v1211_v20 }
  0x39   :  { %498 = vmatmul.mubr.bf16.gmra.mrb[8].mxu0 %v1210_v21  ;;  %602 = vmatmul.mubr.bf16.gmra.mrb[8].mxu1 %v1215_v22 }
  0x3a   :  { %1045 = vmatprep.mubr.msk.bf16.mxu0 %vm373_vm0, %v1213_v23  ;;  %1058 = vmatprep.mubr.msk.bf16.mxu1 %vm373_vm0, %v1217_v24 }
  0x41   :  { %506 = vmatmul.mubr.bf16.gmra.mrb[12].mxu0 %v1216_v25  ;;  %610 = vmatmul.mubr.bf16.gmra.mrb[12].mxu1 %v1221_v26 }
  0x42   :  { %1046 = vmatprep.mubr.msk.bf16.mxu0 %vm373_vm0, %v1219_v27  ;;  %1059 = vmatprep.mubr.msk.bf16.mxu1 %vm373_vm0, %v1223_v28 }
  0x49   :  { %514 = vmatmul.mubr.bf16.gmra.mrb[16].mxu0 %v1222_v29  ;;  %618 = vmatmul.mubr.bf16.gmra.mrb[16].mxu1 %v1227_v30 }
  0x4a   :  { %1047 = vmatprep.mubr.msk.bf16.mxu0 %vm373_vm0, %v1225_v31  ;;  %1060 = vmatprep.mubr.msk.bf16.mxu1 %vm373_vm0, %v1229_v32 }
  0x51   :  { %522 = vmatmul.mubr.bf16.gmra.mrb[20].mxu0 %v1228_v33  ;;  %626 = vmatmul.mubr.bf16.gmra.mrb[20].mxu1 %v1233_v34 }
  0x52   :  { %1048 = vmatprep.mubr.msk.bf16.mxu0 %vm373_vm0, %v1231_v35  ;;  %1061 = vmatprep.mubr.msk.bf16.mxu1 %vm373_vm0, %v1235_v36 }
  0x59   :  { %530 = vmatmul.mubr.bf16.gmra.mrb[24].mxu0 %v1234_v37  ;;  %634 = vmatmul.mubr.bf16.gmra.mrb[24].mxu1 %v1239_v38 }
  0x5a   :  { %1049 = vmatprep.mubr.msk.bf16.mxu0 %vm373_vm0, %v1237_v39  ;;  %1062 = vmatprep.mubr.msk.bf16.mxu1 %vm373_vm0, %v1241_v40 }
  0x61   :  { %538 = vmatmul.mubr.bf16.gmra.mrb[28].mxu0 %v1240_v41  ;;  %642 = vmatmul.mubr.bf16.gmra.mrb[28].mxu1 %v1245_v42 }
  0x62   :  { %1050 = vmatprep.mubr.msk.bf16.mxu0 %vm373_vm0, %v1243_v43  ;;  %1063 = vmatprep.mubr.msk.bf16.mxu1 %vm373_vm0, %v1247_v44 }
  0x69   :  { %546 = vmatmul.mubr.bf16.gmra.mrb[32].mxu0 %v1246_v45  ;;  %650 = vmatmul.mubr.bf16.gmra.mrb[32].mxu1 %v1251_v46 }
  0x6a   :  { %1051 = vmatprep.mubr.msk.bf16.mxu0 %vm373_vm0, %v1249_v47  ;;  %1064 = vmatprep.mubr.msk.bf16.mxu1 %vm373_vm0, %v1253_v48 }
  0x71   :  { %554 = vmatmul.mubr.bf16.gmra.mrb[36].mxu0 %v1252_v49  ;;  %658 = vmatmul.mubr.bf16.gmra.mrb[36].mxu1 %v1257_v50 }
  0x72   :  { %1052 = vmatprep.mubr.msk.bf16.mxu0 %vm373_vm0, %v1255_v51  ;;  %1065 = vmatprep.mubr.msk.bf16.mxu1 %vm373_vm0, %v1259_v52 }
  0x79   :  { %562 = vmatmul.mubr.bf16.gmra.mrb[40].mxu0 %v1258_v54  ;;  %666 = vmatmul.mubr.bf16.gmra.mrb[40].mxu1 %v1263_v55 }
  0x7a   :  { %1053 = vmatprep.mubr.msk.bf16.mxu0 %vm373_vm0, %v1261_v56  ;;  %1066 = vmatprep.mubr.msk.bf16.mxu1 %vm373_vm0, %v1031_v57 }
  0x81   :  { %570 = vmatmul.mubr.bf16.gmra.mrb[44].mxu0 %v1264_v58  ;;  %674 = vmatmul.mubr.bf16.gmra.mrb[44].mxu1 %v1030_v59 }
  0x82   :  { %1054 = vmatprep.mubr.msk.bf16.mxu0 %vm373_vm0, %v1266_v60 }
  0x89   :  { %578 = vmatmul.mubr.bf16.gmra.mrb[48].mxu0 %v1269_v61 }
  0xfc   :  { %v483_v63 = vpop.f32.mrb[0].mxu0  ;;  %v587_v0 = vpop.f32.mrb[0].mxu1 }
  0xfd   :  { %v484_v1 = vadd.f32 %v1496_v62, %v483_v63  ;;  %v485_v2 = vpop.f32.mrb[1].mxu0  ;;  %v588_v3 = vadd.f32 %v1496_v62, %v587_v0  ;;  %v589_v4 = vpop.f32.mrb[1].mxu1 }
  0xfe   :  { %v486_v5 = vpop.f32.mrb[2].mxu0  ;;  %v590_v6 = vpop.f32.mrb[2].mxu1 }
  0xff   :  { %v681_v7 = vmax.f32 %v484_v1, 0.0  ;;  %v487_v8 = vadd.f32 %v1496_v62, %v486_v5  ;;  %v488_v9 = vpop.f32.mrb[3].mxu0  ;;  %v707_v10 = vmax.f32 %v588_v3, 0.0  ;;  %v591_v11 = vadd.f32 %v1496_v62, %v590_v6  ;;  %v592_v12 = vpop.f32.mrb[3].mxu1 }
 0x101   :  { %v1116_v13 = vpack.c.bf16 %v681_v7, %v681_v7  ;;  %v682_v14 = vmax.f32 %v487_v8, 0.0  ;;  %v1142_v15 = vpack.c.bf16 %v707_v10, %v707_v10  ;;  %v708_v16 = vmax.f32 %v591_v11, 0.0 }
 0x103   :  { %928 = vst.msk [vmem:[%s1746_s3] sm:$0xf] %vm927_vm1, %v1116_v13  ;;  %v1117_v17 = vpack.c.bf16 %v682_v14, %v682_v14  ;;  %954 = vst.msk [vmem:[%s1746_s3 + $0x68] sm:$0xf] %vm927_vm1, %v1142_v15  ;;  %v1143_v18 = vpack.c.bf16 %v708_v16, %v708_v16 }
 0x104   :  { %v491_v19 = vpop.f32.mrb[4].mxu0  ;;  %v595_v20 = vpop.f32.mrb[4].mxu1 }
 0x105   :  { %929 = vst.msk [vmem:[%s1746_s3 + $0x4] sm:$0xf] %vm927_vm1, %v1117_v17  ;;  %v492_v21 = vadd.f32 %v1496_v62, %v491_v19  ;;  %v493_v22 = vpop.f32.mrb[5].mxu0  ;;  %955 = vst.msk [vmem:[%s1746_s3 + $0x6c] sm:$0xf] %vm927_vm1, %v1143_v18  ;;  %v596_v23 = vadd.f32 %v1496_v62, %v595_v20  ;;  %v597_v24 = vpop.f32.mrb[5].mxu1 }
 0x106   :  { %v494_v25 = vpop.f32.mrb[6].mxu0  ;;  %v598_v26 = vpop.f32.mrb[6].mxu1 }
 0x107   :  { %v683_v27 = vmax.f32 %v492_v21, 0.0  ;;  %v495_v28 = vadd.f32 %v1496_v62, %v494_v25  ;;  %v496_v29 = vpop.f32.mrb[7].mxu0  ;;  %v709_v30 = vmax.f32 %v596_v23, 0.0  ;;  %v599_v31 = vadd.f32 %v1496_v62, %v598_v26  ;;  %v600_v32 = vpop.f32.mrb[7].mxu1 }
 0x109   :  { %v1118_v33 = vpack.c.bf16 %v683_v27, %v683_v27  ;;  %v684_v34 = vmax.f32 %v495_v28, 0.0  ;;  %v1144_v35 = vpack.c.bf16 %v709_v30, %v709_v30  ;;  %v710_v36 = vmax.f32 %v599_v31, 0.0 }
 0x10b   :  { %930 = vst.msk [vmem:[%s1746_s3 + $0x8] sm:$0xf] %vm927_vm1, %v1118_v33  ;;  %v1119_v37 = vpack.c.bf16 %v684_v34, %v684_v34  ;;  %956 = vst.msk [vmem:[%s1746_s3 + $0x70] sm:$0xf] %vm927_vm1, %v1144_v35  ;;  %v1145_v38 = vpack.c.bf16 %v710_v36, %v710_v36 }
 0x10c   :  { %v499_v39 = vpop.f32.mrb[8].mxu0  ;;  %v603_v40 = vpop.f32.mrb[8].mxu1 }
 0x10d   :  { %931 = vst.msk [vmem:[%s1746_s3 + $0xc] sm:$0xf] %vm927_vm1, %v1119_v37  ;;  %v500_v41 = vadd.f32 %v1496_v62, %v499_v39  ;;  %v501_v42 = vpop.f32.mrb[9].mxu0  ;;  %957 = vst.msk [vmem:[%s1746_s3 + $0x74] sm:$0xf] %vm927_vm1, %v1145_v38  ;;  %v604_v43 = vadd.f32 %v1496_v62, %v603_v40  ;;  %v605_v44 = vpop.f32.mrb[9].mxu1 }
 0x10e   :  { %v502_v45 = vpop.f32.mrb[10].mxu0  ;;  %v606_v46 = vpop.f32.mrb[10].mxu1 }
 0x10f   :  { %v685_v47 = vmax.f32 %v500_v41, 0.0  ;;  %v503_v48 = vadd.f32 %v1496_v62, %v502_v45  ;;  %v504_v49 = vpop.f32.mrb[11].mxu0  ;;  %v711_v50 = vmax.f32 %v604_v43, 0.0  ;;  %v607_v51 = vadd.f32 %v1496_v62, %v606_v46  ;;  %v608_v52 = vpop.f32.mrb[11].mxu1 }
 0x111   :  { %v1120_v53 = vpack.c.bf16 %v685_v47, %v685_v47  ;;  %v686_v54 = vmax.f32 %v503_v48, 0.0  ;;  %v1146_v55 = vpack.c.bf16 %v711_v50, %v711_v50  ;;  %v712_v56 = vmax.f32 %v607_v51, 0.0 }
 0x113   :  { %932 = vst.msk [vmem:[%s1746_s3 + $0x10] sm:$0xf] %vm927_vm1, %v1120_v53  ;;  %v1121_v57 = vpack.c.bf16 %v686_v54, %v686_v54  ;;  %958 = vst.msk [vmem:[%s1746_s3 + $0x78] sm:$0xf] %vm927_vm1, %v1146_v55  ;;  %v1147_v58 = vpack.c.bf16 %v712_v56, %v712_v56 }
 0x114   :  { %v507_v59 = vpop.f32.mrb[12].mxu0  ;;  %v611_v60 = vpop.f32.mrb[12].mxu1 }
 0x115   :  { %933 = vst.msk [vmem:[%s1746_s3 + $0x14] sm:$0xf] %vm927_vm1, %v1121_v57  ;;  %v508_v61 = vadd.f32 %v1496_v62, %v507_v59  ;;  %v509_v63 = vpop.f32.mrb[13].mxu0  ;;  %959 = vst.msk [vmem:[%s1746_s3 + $0x7c] sm:$0xf] %vm927_vm1, %v1147_v58  ;;  %v612_v0 = vadd.f32 %v1496_v62, %v611_v60  ;;  %v613_v1 = vpop.f32.mrb[13].mxu1 }
 0x116   :  { %v510_v2 = vpop.f32.mrb[14].mxu0  ;;  %v614_v3 = vpop.f32.mrb[14].mxu1 }
 0x117   :  { %v687_v4 = vmax.f32 %v508_v61, 0.0  ;;  %v511_v5 = vadd.f32 %v1496_v62, %v510_v2  ;;  %v512_v6 = vpop.f32.mrb[15].mxu0  ;;  %v713_v7 = vmax.f32 %v612_v0, 0.0  ;;  %v615_v8 = vadd.f32 %v1496_v62, %v614_v3  ;;  %v616_v9 = vpop.f32.mrb[15].mxu1 }
 0x119   :  { %v1122_v10 = vpack.c.bf16 %v687_v4, %v687_v4  ;;  %v688_v11 = vmax.f32 %v511_v5, 0.0  ;;  %v1148_v12 = vpack.c.bf16 %v713_v7, %v713_v7  ;;  %v714_v13 = vmax.f32 %v615_v8, 0.0 }
 0x11b   :  { %934 = vst.msk [vmem:[%s1746_s3 + $0x18] sm:$0xf] %vm927_vm1, %v1122_v10  ;;  %v1123_v14 = vpack.c.bf16 %v688_v11, %v688_v11  ;;  %960 = vst.msk [vmem:[%s1746_s3 + $0x80] sm:$0xf] %vm927_vm1, %v1148_v12  ;;  %v1149_v15 = vpack.c.bf16 %v714_v13, %v714_v13 }
 0x11c   :  { %v515_v16 = vpop.f32.mrb[16].mxu0  ;;  %v619_v17 = vpop.f32.mrb[16].mxu1 }
 0x11d   :  { %935 = vst.msk [vmem:[%s1746_s3 + $0x1c] sm:$0xf] %vm927_vm1, %v1123_v14  ;;  %v516_v18 = vadd.f32 %v1496_v62, %v515_v16  ;;  %v517_v19 = vpop.f32.mrb[17].mxu0  ;;  %961 = vst.msk [vmem:[%s1746_s3 + $0x84] sm:$0xf] %vm927_vm1, %v1149_v15  ;;  %v620_v20 = vadd.f32 %v1496_v62, %v619_v17  ;;  %v621_v21 = vpop.f32.mrb[17].mxu1 }
 0x11e   :  { %v518_v22 = vpop.f32.mrb[18].mxu0  ;;  %v622_v23 = vpop.f32.mrb[18].mxu1 }
 0x11f   :  { %v689_v24 = vmax.f32 %v516_v18, 0.0  ;;  %v519_v25 = vadd.f32 %v1496_v62, %v518_v22  ;;  %v520_v26 = vpop.f32.mrb[19].mxu0  ;;  %v715_v27 = vmax.f32 %v620_v20, 0.0  ;;  %v623_v28 = vadd.f32 %v1496_v62, %v622_v23  ;;  %v624_v29 = vpop.f32.mrb[19].mxu1 }
 0x121   :  { %v1124_v30 = vpack.c.bf16 %v689_v24, %v689_v24  ;;  %v690_v31 = vmax.f32 %v519_v25, 0.0  ;;  %v1150_v32 = vpack.c.bf16 %v715_v27, %v715_v27  ;;  %v716_v33 = vmax.f32 %v623_v28, 0.0 }
 0x123   :  { %936 = vst.msk [vmem:[%s1746_s3 + $0x20] sm:$0xf] %vm927_vm1, %v1124_v30  ;;  %v1125_v34 = vpack.c.bf16 %v690_v31, %v690_v31  ;;  %962 = vst.msk [vmem:[%s1746_s3 + $0x88] sm:$0xf] %vm927_vm1, %v1150_v32  ;;  %v1151_v35 = vpack.c.bf16 %v716_v33, %v716_v33 }
 0x124   :  { %v523_v36 = vpop.f32.mrb[20].mxu0  ;;  %v627_v37 = vpop.f32.mrb[20].mxu1 }
 0x125   :  { %937 = vst.msk [vmem:[%s1746_s3 + $0x24] sm:$0xf] %vm927_vm1, %v1125_v34  ;;  %v524_v38 = vadd.f32 %v1496_v62, %v523_v36  ;;  %v525_v39 = vpop.f32.mrb[21].mxu0  ;;  %963 = vst.msk [vmem:[%s1746_s3 + $0x8c] sm:$0xf] %vm927_vm1, %v1151_v35  ;;  %v628_v40 = vadd.f32 %v1496_v62, %v627_v37  ;;  %v629_v41 = vpop.f32.mrb[21].mxu1 }
 0x126   :  { %v526_v42 = vpop.f32.mrb[22].mxu0  ;;  %v630_v43 = vpop.f32.mrb[22].mxu1 }
 0x127   :  { %v691_v44 = vmax.f32 %v524_v38, 0.0  ;;  %v527_v45 = vadd.f32 %v1496_v62, %v526_v42  ;;  %v528_v46 = vpop.f32.mrb[23].mxu0  ;;  %v717_v47 = vmax.f32 %v628_v40, 0.0  ;;  %v631_v48 = vadd.f32 %v1496_v62, %v630_v43  ;;  %v632_v49 = vpop.f32.mrb[23].mxu1 }
 0x129   :  { %v1126_v50 = vpack.c.bf16 %v691_v44, %v691_v44  ;;  %v692_v51 = vmax.f32 %v527_v45, 0.0  ;;  %v1152_v52 = vpack.c.bf16 %v717_v47, %v717_v47  ;;  %v718_v53 = vmax.f32 %v631_v48, 0.0 }
 0x12b   :  { %938 = vst.msk [vmem:[%s1746_s3 + $0x28] sm:$0xf] %vm927_vm1, %v1126_v50  ;;  %v1127_v54 = vpack.c.bf16 %v692_v51, %v692_v51  ;;  %964 = vst.msk [vmem:[%s1746_s3 + $0x90] sm:$0xf] %vm927_vm1, %v1152_v52  ;;  %v1153_v55 = vpack.c.bf16 %v718_v53, %v718_v53 }
 0x12c   :  { %v531_v56 = vpop.f32.mrb[24].mxu0  ;;  %v635_v57 = vpop.f32.mrb[24].mxu1 }
 0x12d   :  { %939 = vst.msk [vmem:[%s1746_s3 + $0x2c] sm:$0xf] %vm927_vm1, %v1127_v54  ;;  %v532_v58 = vadd.f32 %v1496_v62, %v531_v56  ;;  %v533_v59 = vpop.f32.mrb[25].mxu0  ;;  %965 = vst.msk [vmem:[%s1746_s3 + $0x94] sm:$0xf] %vm927_vm1, %v1153_v55  ;;  %v636_v60 = vadd.f32 %v1496_v62, %v635_v57  ;;  %v637_v61 = vpop.f32.mrb[25].mxu1 }
 0x12e   :  { %v534_v63 = vpop.f32.mrb[26].mxu0  ;;  %v638_v0 = vpop.f32.mrb[26].mxu1 }
 0x12f   :  { %v693_v1 = vmax.f32 %v532_v58, 0.0  ;;  %v535_v2 = vadd.f32 %v1496_v62, %v534_v63  ;;  %v536_v3 = vpop.f32.mrb[27].mxu0  ;;  %v719_v4 = vmax.f32 %v636_v60, 0.0  ;;  %v639_v5 = vadd.f32 %v1496_v62, %v638_v0  ;;  %v640_v6 = vpop.f32.mrb[27].mxu1 }
 0x131   :  { %v1128_v7 = vpack.c.bf16 %v693_v1, %v693_v1  ;;  %v694_v8 = vmax.f32 %v535_v2, 0.0  ;;  %v1154_v9 = vpack.c.bf16 %v719_v4, %v719_v4  ;;  %v720_v10 = vmax.f32 %v639_v5, 0.0 }
 0x133   :  { %940 = vst.msk [vmem:[%s1746_s3 + $0x30] sm:$0xf] %vm927_vm1, %v1128_v7  ;;  %v1129_v11 = vpack.c.bf16 %v694_v8, %v694_v8  ;;  %966 = vst.msk [vmem:[%s1746_s3 + $0x98] sm:$0xf] %vm927_vm1, %v1154_v9  ;;  %v1155_v12 = vpack.c.bf16 %v720_v10, %v720_v10 }
 0x134   :  { %v539_v13 = vpop.f32.mrb[28].mxu0  ;;  %v643_v14 = vpop.f32.mrb[28].mxu1 }
 0x135   :  { %941 = vst.msk [vmem:[%s1746_s3 + $0x34] sm:$0xf] %vm927_vm1, %v1129_v11  ;;  %v540_v15 = vadd.f32 %v1496_v62, %v539_v13  ;;  %v541_v16 = vpop.f32.mrb[29].mxu0  ;;  %967 = vst.msk [vmem:[%s1746_s3 + $0x9c] sm:$0xf] %vm927_vm1, %v1155_v12  ;;  %v644_v17 = vadd.f32 %v1496_v62, %v643_v14  ;;  %v645_v18 = vpop.f32.mrb[29].mxu1 }
 0x136   :  { %v542_v19 = vpop.f32.mrb[30].mxu0  ;;  %v646_v20 = vpop.f32.mrb[30].mxu1 }
 0x137   :  { %v695_v21 = vmax.f32 %v540_v15, 0.0  ;;  %v543_v22 = vadd.f32 %v1496_v62, %v542_v19  ;;  %v544_v23 = vpop.f32.mrb[31].mxu0  ;;  %v721_v24 = vmax.f32 %v644_v17, 0.0  ;;  %v647_v25 = vadd.f32 %v1496_v62, %v646_v20  ;;  %v648_v26 = vpop.f32.mrb[31].mxu1 }
 0x139   :  { %v1130_v27 = vpack.c.bf16 %v695_v21, %v695_v21  ;;  %v696_v28 = vmax.f32 %v543_v22, 0.0  ;;  %v1156_v29 = vpack.c.bf16 %v721_v24, %v721_v24  ;;  %v722_v30 = vmax.f32 %v647_v25, 0.0 }
 0x13b   :  { %942 = vst.msk [vmem:[%s1746_s3 + $0x38] sm:$0xf] %vm927_vm1, %v1130_v27  ;;  %v1131_v31 = vpack.c.bf16 %v696_v28, %v696_v28  ;;  %968 = vst.msk [vmem:[%s1746_s3 + $0xa0] sm:$0xf] %vm927_vm1, %v1156_v29  ;;  %v1157_v32 = vpack.c.bf16 %v722_v30, %v722_v30 }
 0x13c   :  { %v547_v33 = vpop.f32.mrb[32].mxu0  ;;  %v651_v34 = vpop.f32.mrb[32].mxu1 }
 0x13d   :  { %943 = vst.msk [vmem:[%s1746_s3 + $0x3c] sm:$0xf] %vm927_vm1, %v1131_v31  ;;  %v548_v35 = vadd.f32 %v1496_v62, %v547_v33  ;;  %v549_v36 = vpop.f32.mrb[33].mxu0  ;;  %969 = vst.msk [vmem:[%s1746_s3 + $0xa4] sm:$0xf] %vm927_vm1, %v1157_v32  ;;  %v652_v37 = vadd.f32 %v1496_v62, %v651_v34  ;;  %v653_v38 = vpop.f32.mrb[33].mxu1 }
 0x13e   :  { %v550_v39 = vpop.f32.mrb[34].mxu0  ;;  %v654_v40 = vpop.f32.mrb[34].mxu1 }
 0x13f   :  { %v697_v41 = vmax.f32 %v548_v35, 0.0  ;;  %v551_v42 = vadd.f32 %v1496_v62, %v550_v39  ;;  %v552_v43 = vpop.f32.mrb[35].mxu0  ;;  %v723_v44 = vmax.f32 %v652_v37, 0.0  ;;  %v655_v45 = vadd.f32 %v1496_v62, %v654_v40  ;;  %v656_v46 = vpop.f32.mrb[35].mxu1 }
 0x141   :  { %v1132_v47 = vpack.c.bf16 %v697_v41, %v697_v41  ;;  %v698_v48 = vmax.f32 %v551_v42, 0.0  ;;  %v1158_v49 = vpack.c.bf16 %v723_v44, %v723_v44  ;;  %v724_v50 = vmax.f32 %v655_v45, 0.0 }
 0x143   :  { %944 = vst.msk [vmem:[%s1746_s3 + $0x40] sm:$0xf] %vm927_vm1, %v1132_v47  ;;  %v1133_v51 = vpack.c.bf16 %v698_v48, %v698_v48  ;;  %970 = vst.msk [vmem:[%s1746_s3 + $0xa8] sm:$0xf] %vm927_vm1, %v1158_v49  ;;  %v1159_v52 = vpack.c.bf16 %v724_v50, %v724_v50 }
 0x144   :  { %v555_v53 = vpop.f32.mrb[36].mxu0  ;;  %v659_v54 = vpop.f32.mrb[36].mxu1 }
 0x145   :  { %945 = vst.msk [vmem:[%s1746_s3 + $0x44] sm:$0xf] %vm927_vm1, %v1133_v51  ;;  %v556_v55 = vadd.f32 %v1496_v62, %v555_v53  ;;  %v557_v56 = vpop.f32.mrb[37].mxu0  ;;  %971 = vst.msk [vmem:[%s1746_s3 + $0xac] sm:$0xf] %vm927_vm1, %v1159_v52  ;;  %v660_v57 = vadd.f32 %v1496_v62, %v659_v54  ;;  %v661_v58 = vpop.f32.mrb[37].mxu1 }
 0x146   :  { %v558_v59 = vpop.f32.mrb[38].mxu0  ;;  %v662_v60 = vpop.f32.mrb[38].mxu1 }
 0x147   :  { %v699_v61 = vmax.f32 %v556_v55, 0.0  ;;  %v559_v63 = vadd.f32 %v1496_v62, %v558_v59  ;;  %v560_v0 = vpop.f32.mrb[39].mxu0  ;;  %v725_v1 = vmax.f32 %v660_v57, 0.0  ;;  %v663_v2 = vadd.f32 %v1496_v62, %v662_v60  ;;  %v664_v3 = vpop.f32.mrb[39].mxu1 }
 0x149   :  { %v1134_v4 = vpack.c.bf16 %v699_v61, %v699_v61  ;;  %v700_v5 = vmax.f32 %v559_v63, 0.0  ;;  %v1160_v6 = vpack.c.bf16 %v725_v1, %v725_v1  ;;  %v726_v7 = vmax.f32 %v663_v2, 0.0 }
 0x14b   :  { %946 = vst.msk [vmem:[%s1746_s3 + $0x48] sm:$0xf] %vm927_vm1, %v1134_v4  ;;  %v1135_v8 = vpack.c.bf16 %v700_v5, %v700_v5  ;;  %972 = vst.msk [vmem:[%s1746_s3 + $0xb0] sm:$0xf] %vm927_vm1, %v1160_v6  ;;  %v1161_v9 = vpack.c.bf16 %v726_v7, %v726_v7 }
 0x14c   :  { %v563_v10 = vpop.f32.mrb[40].mxu0  ;;  %v667_v11 = vpop.f32.mrb[40].mxu1 }
 0x14d   :  { %947 = vst.msk [vmem:[%s1746_s3 + $0x4c] sm:$0xf] %vm927_vm1, %v1135_v8  ;;  %v564_v12 = vadd.f32 %v1496_v62, %v563_v10  ;;  %v565_v13 = vpop.f32.mrb[41].mxu0  ;;  %973 = vst.msk [vmem:[%s1746_s3 + $0xb4] sm:$0xf] %vm927_vm1, %v1161_v9  ;;  %v668_v14 = vadd.f32 %v1496_v62, %v667_v11  ;;  %v669_v15 = vpop.f32.mrb[41].mxu1 }
 0x14e   :  { %v566_v16 = vpop.f32.mrb[42].mxu0  ;;  %v670_v17 = vpop.f32.mrb[42].mxu1 }
 0x14f   :  { %v701_v18 = vmax.f32 %v564_v12, 0.0  ;;  %v567_v19 = vadd.f32 %v1496_v62, %v566_v16  ;;  %v568_v20 = vpop.f32.mrb[43].mxu0  ;;  %v727_v21 = vmax.f32 %v668_v14, 0.0  ;;  %v671_v22 = vadd.f32 %v1496_v62, %v670_v17  ;;  %v672_v23 = vpop.f32.mrb[43].mxu1 }
 0x151   :  { %v1136_v24 = vpack.c.bf16 %v701_v18, %v701_v18  ;;  %v702_v25 = vmax.f32 %v567_v19, 0.0  ;;  %v1162_v26 = vpack.c.bf16 %v727_v21, %v727_v21  ;;  %v728_v27 = vmax.f32 %v671_v22, 0.0 }
 0x153   :  { %948 = vst.msk [vmem:[%s1746_s3 + $0x50] sm:$0xf] %vm927_vm1, %v1136_v24  ;;  %v1137_v28 = vpack.c.bf16 %v702_v25, %v702_v25  ;;  %974 = vst.msk [vmem:[%s1746_s3 + $0xb8] sm:$0xf] %vm927_vm1, %v1162_v26  ;;  %v1163_v29 = vpack.c.bf16 %v728_v27, %v728_v27 }
 0x154   :  { %v571_v30 = vpop.f32.mrb[44].mxu0  ;;  %v675_v31 = vpop.f32.mrb[44].mxu1 }
 0x155   :  { %949 = vst.msk [vmem:[%s1746_s3 + $0x54] sm:$0xf] %vm927_vm1, %v1137_v28  ;;  %v572_v32 = vadd.f32 %v1496_v62, %v571_v30  ;;  %v573_v33 = vpop.f32.mrb[45].mxu0  ;;  %975 = vst.msk [vmem:[%s1746_s3 + $0xbc] sm:$0xf] %vm927_vm1, %v1163_v29  ;;  %v676_v34 = vadd.f32 %v1496_v62, %v675_v31  ;;  %v677_v35 = vpop.f32.mrb[45].mxu1 }
 0x156   :  { %v574_v36 = vpop.f32.mrb[46].mxu0  ;;  %v678_v37 = vpop.f32.mrb[46].mxu1 }
 0x157   :  { %v703_v38 = vmax.f32 %v572_v32, 0.0  ;;  %v575_v39 = vadd.f32 %v1496_v62, %v574_v36  ;;  %v576_v40 = vpop.f32.mrb[47].mxu0  ;;  %v729_v41 = vmax.f32 %v676_v34, 0.0  ;;  %v679_v42 = vpop.f32.mrb[47].mxu1 }
 0x159   :  { %v1138_v43 = vpack.c.bf16 %v703_v38, %v703_v38  ;;  %v704_v44 = vmax.f32 %v575_v39, 0.0  ;;  %v1164_v45 = vpack.c.bf16 %v729_v41, %v729_v41 }
 0x15b   :  { %950 = vst.msk [vmem:[%s1746_s3 + $0x58] sm:$0xf] %vm927_vm1, %v1138_v43  ;;  %v1139_v46 = vpack.c.bf16 %v704_v44, %v704_v44  ;;  %976 = vst.msk [vmem:[%s1746_s3 + $0xc0] sm:$0xf] %vm927_vm1, %v1164_v45 }
 0x15c   :  { %v579_v47 = vpop.f32.mrb[48].mxu0 }
 0x15d   :  { %951 = vst.msk [vmem:[%s1746_s3 + $0x5c] sm:$0xf] %vm927_vm1, %v1139_v46  ;;  %v580_v48 = vadd.f32 %v1496_v62, %v579_v47  ;;  %v581_v49 = vpop.f32.mrb[49].mxu0 }
 0x15e   :  { %v582_v50 = vpop.f32.mrb[50].mxu0 }
 0x15f   :  { %v705_v51 = vmax.f32 %v580_v48, 0.0  ;;  %v583_v52 = vadd.f32 %v1496_v62, %v582_v50  ;;  %v584_v53 = vpop.f32.mrb[51].mxu0 }
 0x161   :  { %v1140_v54 = vpack.c.bf16 %v705_v51, %v705_v51  ;;  %v706_v55 = vmax.f32 %v583_v52, 0.0 }
 0x163   :  { %952 = vst.msk [vmem:[%s1746_s3 + $0x60] sm:$0xf] %vm927_vm1, %v1140_v54  ;;  %v1141_v56 = vpack.c.bf16 %v706_v55, %v706_v55 }
 0x165   :  { %953 = vst.msk [vmem:[%s1746_s3 + $0x64] sm:$0xf] %vm927_vm1, %v1141_v56 }

// kernel: vae_forward.9
= control target key start
LH: loop header
LB: loop body
LE: loop exit
PB: predicated region body
PF: predicated region fallthrough
CT: control target
= control target key end

     0   :  { %vm222_vm0 = vcmask 998400   ;;  %vm244_vm1 = vcmask 1044480   ;;  %vm402_vm2 = vcmask 158720   ;;  %vm415_vm3 = vcmask 155648   ;;  %s780_s1 = inlined_call_operand.vmem [shape: bf16[250,20], index: 1, kind: input, shape index: {}]   ;;  %s781_s0 = inlined_call_operand.vmem [shape: bf16[98,250], index: 0, kind: input, shape index: {}]   ;;  %s782_s2 = inlined_call_operand.vmem [shape: f32[1,20], index: 2, kind: input, shape index: {}]   ;;  %s783_s3 = inlined_call_operand.vmem [shape: bf16[98,20], index: 3, kind: output, shape index: {}]  }
   0x1   :  { %v561_v0 = vld [vmem:[%s780_s1 + $0x40] sm:$0xff]   ;;  %v563_v2 = vld [vmem:[%s780_s1 + $0x48] sm:$0xff]   ;;  %v565_v4 = vld [vmem:[%s780_s1 + $0x50] sm:$0xff]  }
   0x2   :  { %v562_v1 = vld [vmem:[%s780_s1] sm:$0xff]   ;;  %485 = vmatprep.subr.bf16.mxu0 %v561_v0  ;;  %543 = vmatprep.subr.bf16.mxu1 %v561_v0  ;;  %v564_v3 = vld [vmem:[%s780_s1 + $0x8] sm:$0xff]   ;;  %v566_v5 = vld [vmem:[%s780_s1 + $0x10] sm:$0xff]  }
   0x3   :  { %486 = vmatpush3.bf16.msra.mxu0 %v562_v1  ;;  %551 = vmatpush3.bf16.msra.mxu1 %v562_v1  ;;  %v567_v6 = vld [vmem:[%s780_s1 + $0x58] sm:$0xff]   ;;  %v569_v8 = vld [vmem:[%s780_s1 + $0x60] sm:$0xff]   ;;  %v571_v10 = vld [vmem:[%s780_s1 + $0x68] sm:$0xff]  }
   0x4   :  { %487 = vmatprep.subr.bf16.mxu0 %v563_v2  ;;  %544 = vmatprep.subr.bf16.mxu1 %v563_v2  ;;  %v568_v7 = vld [vmem:[%s780_s1 + $0x18] sm:$0xff]   ;;  %v570_v9 = vld [vmem:[%s780_s1 + $0x20] sm:$0xff]   ;;  %v572_v13 = vld [vmem:[%s780_s1 + $0x28] sm:$0xff]  }
   0x5   :  { %v579_v11 = vld [vmem:[%s781_s0 + $0x4] ss:$8 sps:$4 sm:$0xff]   ;;  %v573_v14 = vld [vmem:[%s780_s1 + $0x70] sm:$0xff]   ;;  %v575_v16 = vld [vmem:[%s780_s1 + $0x78] sm:$0x1f]  }
   0x6   :  { %v582_v12 = vld [vmem:[%s781_s0 + $0x44] ss:$8 sps:$4 sm:$0xff]   ;;  %452 = vmatprep.mubr.msk.bf16.mxu0 %vm222_vm0, %v579_v11  ;;  %v574_v15 = vld [vmem:[%s780_s1 + $0x30] sm:$0xff]   ;;  %v576_v17 = vld [vmem:[%s780_s1 + $0x38] sm:$0xff]  }
   0x7   :  { %488 = vmatpush3.bf16.msra.mxu0 %v564_v3  ;;  %552 = vmatpush3.bf16.msra.mxu1 %v564_v3  ;;  %v577_v18 = vld [vmem:[%s781_s0] ss:$8 sps:$4 sm:$0xff]   ;;  %v583_v20 = vld [vmem:[%s781_s0 + $0x14] ss:$8 sps:$4 sm:$0xff]   ;;  %v585_v23 = vld [vmem:[%s781_s0 + $0x10] ss:$8 sps:$4 sm:$0xff]  }
   0x8   :  { %489 = vmatprep.subr.bf16.mxu0 %v565_v4  ;;  %545 = vmatprep.subr.bf16.mxu1 %v565_v4  ;;  %v580_v19 = vld [vmem:[%s781_s0 + $0x40] ss:$8 sps:$4 sm:$0xff]   ;;  %v586_v21 = vld [vmem:[%s781_s0 + $0x54] ss:$8 sps:$4 sm:$0xff]   ;;  %v590_v24 = vld [vmem:[%s781_s0 + $0x50] ss:$8 sps:$4 sm:$0xff]  }
   0x9   :  { %456 = vmatprep.mubr.msk.bf16.mxu1 %vm222_vm0, %v582_v12  ;;  %v27_v22 = vld [vmem:[%s781_s0 + $0x60] sm:$0x11]  ;;  %v593_v29 = vld [vmem:[%s781_s0 + $0x34] ss:$8 sps:$4 sm:$0xff]   ;;  %v596_v30 = vld [vmem:[%s781_s0 + $0x30] ss:$8 sps:$4 sm:$0xff]  }
   0xa   :  { %v588_v25 = vld [vmem:[%s781_s0 + $0x24] ss:$8 sps:$4 sm:$0xff]   ;;  %v435_v26 = vcombine.high %v27_v22, %v27_v22  ;;  %v591_v27 = vld [vmem:[%s781_s0 + $0x20] ss:$8 sps:$4 sm:$0xff]   ;;  %v434_v28 = vcombine.low %v27_v22, %v27_v22 }
   0xb   :  { %490 = vmatpush3.bf16.msra.mxu0 %v566_v5  ;;  %553 = vmatpush3.bf16.msra.mxu1 %v566_v5  ;;  %v714_v33 = vld [vmem:[%s782_s2] ss:$0 sm:$0xff] }
   0xc   :  { %491 = vmatprep.subr.bf16.mxu0 %v567_v6  ;;  %546 = vmatprep.subr.bf16.mxu1 %v567_v6 }
   0xf   :  { %492 = vmatpush3.bf16.msra.mxu0 %v568_v7  ;;  %554 = vmatpush3.bf16.msra.mxu1 %v568_v7 }
  0x10   :  { %493 = vmatprep.subr.bf16.mxu0 %v569_v8  ;;  %547 = vmatprep.subr.bf16.mxu1 %v569_v8 }
  0x13   :  { %494 = vmatpush3.bf16.msra.mxu0 %v570_v9  ;;  %555 = vmatpush3.bf16.msra.mxu1 %v570_v9 }
  0x14   :  { %495 = vmatprep.subr.bf16.mxu0 %v571_v10  ;;  %548 = vmatprep.subr.bf16.mxu1 %v571_v10 }
  0x17   :  { %496 = vmatpush3.bf16.msra.mxu0 %v572_v13  ;;  %556 = vmatpush3.bf16.msra.mxu1 %v572_v13 }
  0x18   :  { %497 = vmatprep.subr.bf16.mxu0 %v573_v14  ;;  %549 = vmatprep.subr.bf16.mxu1 %v573_v14 }
  0x1b   :  { %498 = vmatpush3.bf16.msra.mxu0 %v574_v15  ;;  %557 = vmatpush3.bf16.msra.mxu1 %v574_v15 }
  0x1c   :  { %559 = vmatprep.subr.msk.bf16.mxu0 %vm244_vm1, %v575_v16  ;;  %560 = vmatprep.subr.msk.bf16.mxu1 %vm244_vm1, %v575_v16 }
  0x1f   :  { %500 = vmatpush3.bf16.msra.mxu0 %v576_v17  ;;  %558 = vmatpush3.bf16.msra.mxu1 %v576_v17 }
  0x22   :  { %281 = vmatmul.mubr.bf16.vlgmr.msra.gmra.mrb[0].mxu0 %v577_v18  ;;  %313 = vmatmul.mubr.bf16.vlgmr.msra.gmra.mrb[0].mxu1 %v580_v19 }
  0x23   :  { %453 = vmatprep.mubr.msk.bf16.mxu0 %vm222_vm0, %v583_v20  ;;  %457 = vmatprep.mubr.msk.bf16.mxu1 %vm222_vm0, %v586_v21 }
  0x2a   :  { %289 = vmatmul.mubr.bf16.gmra.mrb[4].mxu0 %v585_v23  ;;  %321 = vmatmul.mubr.bf16.gmra.mrb[4].mxu1 %v590_v24 }
  0x2b   :  { %454 = vmatprep.mubr.msk.bf16.mxu0 %vm222_vm0, %v588_v25  ;;  %458 = vmatprep.mubr.msk.bf16.mxu1 %vm222_vm0, %v435_v26 }
  0x32   :  { %297 = vmatmul.mubr.bf16.gmra.mrb[8].mxu0 %v591_v27  ;;  %329 = vmatmul.mubr.bf16.gmra.mrb[8].mxu1 %v434_v28 }
  0x33   :  { %455 = vmatprep.mubr.msk.bf16.mxu0 %vm222_vm0, %v593_v29 }
  0x3a   :  { %305 = vmatmul.mubr.bf16.gmra.mrb[12].mxu0 %v596_v30 }
  0xf5   :  { %v501_v31 = vpop.f32.mrb[0].mxu0  ;;  %v525_v32 = vpop.f32.mrb[0].mxu1 }
  0xf6   :  { %v502_v34 = vpop.f32.mrb[1].mxu0  ;;  %v526_v35 = vpop.f32.mrb[1].mxu1 }
  0xf7   :  { %v503_v36 = vadd.f32 %v502_v34, %v501_v31  ;;  %v504_v37 = vpop.f32.mrb[2].mxu0  ;;  %v527_v38 = vadd.f32 %v526_v35, %v525_v32  ;;  %v528_v39 = vpop.f32.mrb[2].mxu1 }
  0xf8   :  { %v505_v40 = vpop.f32.mrb[3].mxu0  ;;  %v529_v41 = vpop.f32.mrb[3].mxu1 }
  0xf9   :  { %v283_v42 = vadd.f32 %v503_v36, %v714_v33  ;;  %v506_v43 = vadd.f32 %v505_v40, %v504_v37  ;;  %v315_v44 = vadd.f32 %v527_v38, %v714_v33  ;;  %v530_v45 = vadd.f32 %v529_v41, %v528_v39 }
  0xfb   :  { %v336_v46 = vmax.f32 %v283_v42, 0.0  ;;  %v286_v47 = vadd.f32 %v506_v43, %v714_v33  ;;  %v344_v48 = vmax.f32 %v315_v44, 0.0  ;;  %v318_v49 = vadd.f32 %v530_v45, %v714_v33 }
  0xfd   :  { %v472_v50 = vpack.c.bf16 %v336_v46, %v336_v46  ;;  %v337_v51 = vmax.f32 %v286_v47, 0.0  ;;  %v507_v52 = vpop.f32.mrb[4].mxu0  ;;  %v480_v53 = vpack.c.bf16 %v344_v48, %v344_v48  ;;  %v345_v54 = vmax.f32 %v318_v49, 0.0  ;;  %v531_v55 = vpop.f32.mrb[4].mxu1 }
  0xfe   :  { %v508_v56 = vpop.f32.mrb[5].mxu0  ;;  %v532_v57 = vpop.f32.mrb[5].mxu1 }
  0xff   :  { %403 = vst.msk [vmem:[%s783_s3] sm:$0xf] %vm402_vm2, %v472_v50  ;;  %v473_v58 = vpack.c.bf16 %v337_v51, %v337_v51  ;;  %411 = vst.msk [vmem:[%s783_s3 + $0x20] sm:$0xf] %vm402_vm2, %v480_v53  ;;  %v509_v59 = vadd.f32 %v508_v56, %v507_v52  ;;  %v510_v60 = vpop.f32.mrb[6].mxu0  ;;  %v481_v61 = vpack.c.bf16 %v345_v54, %v345_v54  ;;  %v534_v63 = vpop.f32.mrb[6].mxu1 }
 0x100   :  { %v533_v62 = vadd.f32 %v532_v57, %v531_v55  ;;  %v511_v0 = vpop.f32.mrb[7].mxu0  ;;  %v535_v1 = vpop.f32.mrb[7].mxu1 }
 0x101   :  { %404 = vst.msk [vmem:[%s783_s3 + $0x4] sm:$0xf] %vm402_vm2, %v473_v58  ;;  %v291_v2 = vadd.f32 %v509_v59, %v714_v33  ;;  %412 = vst.msk [vmem:[%s783_s3 + $0x24] sm:$0xf] %vm402_vm2, %v481_v61  ;;  %v512_v3 = vadd.f32 %v511_v0, %v510_v60  ;;  %v536_v5 = vadd.f32 %v535_v1, %v534_v63 }
 0x102   :  { %v323_v4 = vadd.f32 %v533_v62, %v714_v33 }
 0x103   :  { %v338_v6 = vmax.f32 %v291_v2, 0.0  ;;  %v294_v7 = vadd.f32 %v512_v3, %v714_v33  ;;  %v326_v9 = vadd.f32 %v536_v5, %v714_v33 }
 0x104   :  { %v346_v8 = vmax.f32 %v323_v4, 0.0 }
 0x105   :  { %v474_v10 = vpack.c.bf16 %v338_v6, %v338_v6  ;;  %v339_v11 = vmax.f32 %v294_v7, 0.0  ;;  %v513_v12 = vpop.f32.mrb[8].mxu0  ;;  %v347_v14 = vmax.f32 %v326_v9, 0.0  ;;  %v537_v15 = vpop.f32.mrb[8].mxu1 }
 0x106   :  { %v482_v13 = vpack.c.bf16 %v346_v8, %v346_v8  ;;  %v514_v16 = vpop.f32.mrb[9].mxu0  ;;  %v538_v17 = vpop.f32.mrb[9].mxu1 }
 0x107   :  { %405 = vst.msk [vmem:[%s783_s3 + $0x8] sm:$0xf] %vm402_vm2, %v474_v10  ;;  %v475_v18 = vpack.c.bf16 %v339_v11, %v339_v11  ;;  %v515_v19 = vadd.f32 %v514_v16, %v513_v12  ;;  %v516_v20 = vpop.f32.mrb[10].mxu0  ;;  %v483_v21 = vpack.c.bf16 %v347_v14, %v347_v14  ;;  %v539_v22 = vadd.f32 %v538_v17, %v537_v15  ;;  %v540_v23 = vpop.f32.mrb[10].mxu1 }
 0x108   :  { %413 = vst.msk [vmem:[%s783_s3 + $0x28] sm:$0xf] %vm402_vm2, %v482_v13  ;;  %v517_v24 = vpop.f32.mrb[11].mxu0  ;;  %v541_v25 = vpop.f32.mrb[11].mxu1 }
 0x109   :  { %406 = vst.msk [vmem:[%s783_s3 + $0xc] sm:$0xf] %vm402_vm2, %v475_v18  ;;  %v299_v26 = vadd.f32 %v515_v19, %v714_v33  ;;  %414 = vst.msk [vmem:[%s783_s3 + $0x2c] sm:$0xf] %vm402_vm2, %v483_v21  ;;  %v518_v27 = vadd.f32 %v517_v24, %v516_v20  ;;  %v331_v28 = vadd.f32 %v539_v22, %v714_v33 }
 0x10b   :  { %v340_v29 = vmax.f32 %v299_v26, 0.0  ;;  %v302_v30 = vadd.f32 %v518_v27, %v714_v33  ;;  %v348_v31 = vmax.f32 %v331_v28, 0.0 }
 0x10d   :  { %v476_v32 = vpack.c.bf16 %v340_v29, %v340_v29  ;;  %v341_v34 = vmax.f32 %v302_v30, 0.0  ;;  %v519_v35 = vpop.f32.mrb[12].mxu0  ;;  %v484_v36 = vpack.c.bf16 %v348_v31, %v348_v31 }
 0x10e   :  { %v520_v37 = vpop.f32.mrb[13].mxu0 }
 0x10f   :  { %407 = vst.msk [vmem:[%s783_s3 + $0x10] sm:$0xf] %vm402_vm2, %v476_v32  ;;  %v477_v38 = vpack.c.bf16 %v341_v34, %v341_v34  ;;  %v521_v39 = vadd.f32 %v520_v37, %v519_v35  ;;  %v522_v40 = vpop.f32.mrb[14].mxu0 }
 0x110   :  { %416 = vst.msk [vmem:[%s783_s3 + $0x30] sm:$0x1] %vm415_vm3, %v484_v36  ;;  %v523_v41 = vpop.f32.mrb[15].mxu0 }
 0x111   :  { %408 = vst.msk [vmem:[%s783_s3 + $0x14] sm:$0xf] %vm402_vm2, %v477_v38  ;;  %v307_v42 = vadd.f32 %v521_v39, %v714_v33  ;;  %v524_v43 = vadd.f32 %v523_v41, %v522_v40 }
 0x113   :  { %v342_v44 = vmax.f32 %v307_v42, 0.0  ;;  %v310_v45 = vadd.f32 %v524_v43, %v714_v33 }
 0x115   :  { %v478_v46 = vpack.c.bf16 %v342_v44, %v342_v44  ;;  %v343_v47 = vmax.f32 %v310_v45, 0.0 }
 0x117   :  { %409 = vst.msk [vmem:[%s783_s3 + $0x18] sm:$0xf] %vm402_vm2, %v478_v46  ;;  %v479_v48 = vpack.c.bf16 %v343_v47, %v343_v47 }
 0x119   :  { %410 = vst.msk [vmem:[%s783_s3 + $0x1c] sm:$0xf] %vm402_vm2, %v479_v48 }

// kernel: vae_forward.10
= control target key start
LH: loop header
LB: loop body
LE: loop exit
PB: predicated region body
PF: predicated region fallthrough
CT: control target
= control target key end

     0   :  { %v152_v7 = vlaneseq  ;;  %v2105_v8 = vmov 1966171168   ;;  %vm834_vm0 = vcmask 687104   ;;  %vm838_vm1 = vcmask 1041408   ;;  %s2794_s1 = inlined_call_operand.vmem [shape: bf16[980,256], index: 1, kind: input, shape index: {}]   ;;  %s2795_s0 = inlined_call_operand.vmem [shape: bf16[2,980], index: 0, kind: input, shape index: {}]   ;;  %s2796_s4 = inlined_call_operand.vmem [shape: bf16[128,980], index: 4, kind: input, shape index: {}]   ;;  %s2797_s2 = inlined_call_operand.vmem [shape: f32[1,256], index: 2, kind: input, shape index: {}]   ;;  %s2798_s6 = inlined_call_operand.vmem [shape: f32[2,256], index: 6, kind: output, shape index: {0}]   ;;  %s2799_s3 = inlined_call_operand.vmem [shape: f32[2,128], index: 3, kind: input, shape index: {}]   ;;  %s2800_s5 = inlined_call_operand.vmem [shape: f32[1,980], index: 5, kind: input, shape index: {}]   ;;  %s2801_s7 = inlined_call_operand.vmem [shape: bf16[2,980], index: 7, kind: output, shape index: {1}]  }
   0x1   :  { %v1917_v0 = vld [vmem:[%s2794_s1 + $0x104] ss:$8 sps:$4 sm:$0xff]   ;;  %v1919_v1 = vld [vmem:[%s2794_s1 + $0x100] ss:$8 sps:$4 sm:$0xff]   ;;  %v1920_v2 = vld [vmem:[%s2794_s1 + $0x114] ss:$8 sps:$4 sm:$0xff]   ;;  %v165_v9 = vunpack.c.l.s4 %v2105_v8 }
   0x2   :  { %886 = vmatprep.subr.bf16.mxu0 %v1917_v0  ;;  %v1922_v3 = vld [vmem:[%s2794_s1 + $0x110] ss:$8 sps:$4 sm:$0xff]   ;;  %v1923_v4 = vld [vmem:[%s2794_s1 + $0x124] ss:$8 sps:$4 sm:$0xff]   ;;  %v1925_v5 = vld [vmem:[%s2794_s1 + $0x120] ss:$8 sps:$4 sm:$0xff]  }
   0x3   :  { %887 = vmatpush1.bf16.msra.mxu0 %v1919_v1  ;;  %v1926_v6 = vld [vmem:[%s2794_s1 + $0x134] ss:$8 sps:$4 sm:$0xff]   ;;  %v1928_v10 = vld [vmem:[%s2794_s1 + $0x130] ss:$8 sps:$4 sm:$0xff]   ;;  %v1929_v11 = vld [vmem:[%s2794_s1 + $0x144] ss:$8 sps:$4 sm:$0xff]   ;;  %v166_v13 = vunpack.c.0.s8 %v165_v9 }
   0x4   :  { %888 = vmatprep.subr.bf16.mxu0 %v1920_v2  ;;  %v2174_v12 = vshrl.u32 %v152_v7, 7  ;;  %v1931_v14 = vld [vmem:[%s2794_s1 + $0x140] ss:$8 sps:$4 sm:$0xff]   ;;  %v1932_v15 = vld [vmem:[%s2794_s1 + $0x154] ss:$8 sps:$4 sm:$0xff]   ;;  %vm1684_vm2 = vcmask 1040384  }
   0x5   :  { %v1934_v17 = vld [vmem:[%s2794_s1 + $0x150] ss:$8 sps:$4 sm:$0xff]   ;;  %v1935_v18 = vld [vmem:[%s2794_s1 + $0x164] ss:$8 sps:$4 sm:$0xff]   ;;  %v1937_v21 = vld [vmem:[%s2794_s1 + $0x160] ss:$8 sps:$4 sm:$0xff]  }
   0x6   :  { %v2183_v16 = vsub.s32 %v166_v13, %v2174_v12  ;;  %v26_v19 = vld [vmem:[%s2795_s0] sm:$0xff]  ;;  %v1938_v22 = vld [vmem:[%s2794_s1 + $0x174] ss:$8 sps:$4 sm:$0xff]   ;;  %v1940_v25 = vld [vmem:[%s2794_s1 + $0x170] ss:$8 sps:$4 sm:$0xff]   ;;  %vm1685_vm3 = vcmask 1041409  }
   0x7   :  { %889 = vmatpush1.bf16.msra.mxu0 %v1922_v3  ;;  %v1941_v26 = vld [vmem:[%s2794_s1 + $0x184] ss:$8 sps:$4 sm:$0xff]   ;;  %v1943_v28 = vld [vmem:[%s2794_s1 + $0x180] ss:$8 sps:$4 sm:$0xff]   ;;  %v1944_v29 = vld [vmem:[%s2794_s1 + $0x194] ss:$8 sps:$4 sm:$0xff]   ;;  %v163_v47 = vcombine.high %v26_v19, %v26_v19 }
   0x8   :  { %890 = vmatprep.subr.bf16.mxu0 %v1923_v4  ;;  %v2195_v20 = vrot.slane %v26_v19, %v2183_v16  ;;  %v1946_v30 = vld [vmem:[%s2794_s1 + $0x190] ss:$8 sps:$4 sm:$0xff]   ;;  %v1947_v31 = vld [vmem:[%s2794_s1 + $0x1a4] ss:$8 sps:$4 sm:$0xff]   ;;  %v1949_v32 = vld [vmem:[%s2794_s1 + $0x1a0] ss:$8 sps:$4 sm:$0xff]  }
   0x9   :  { %v1950_v33 = vld [vmem:[%s2794_s1 + $0x1b4] ss:$8 sps:$4 sm:$0xff]   ;;  %v2005_v34 = vld [vmem:[%s2794_s1 + $0x4] ss:$8 sps:$4 sm:$0xff]   ;;  %v2007_v35 = vld [vmem:[%s2794_s1] ss:$8 sps:$4 sm:$0xff]   ;;  %v2282_v52 = vrot.slane %v163_v47, %v2183_v16 }
   0xa   :  { %v178_v23 = vcombine.high %v2195_v20, %v2195_v20  ;;  %845 = vmatprep.subr.bf16.mxu1 %v2005_v34  ;;  %v2011_v36 = vld [vmem:[%s2794_s1 + $0x14] ss:$8 sps:$4 sm:$0xff]   ;;  %v2013_v37 = vld [vmem:[%s2794_s1 + $0x10] ss:$8 sps:$4 sm:$0xff]   ;;  %v1953_v39 = vld [vmem:[%s2794_s1 + $0x1c4] ss:$8 sps:$4 sm:$0xff]   ;;  %v2295_v56 = vrot.slane %v2195_v20, %v2183_v16 }
   0xb   :  { %891 = vmatpush1.bf16.msra.mxu0 %v1925_v5  ;;  %846 = vmatpush1.bf16.msra.mxu1 %v2007_v35  ;;  %v1952_v38 = vld [vmem:[%s2794_s1 + $0x1b0] ss:$8 sps:$4 sm:$0xff]   ;;  %v2017_v40 = vld [vmem:[%s2794_s1 + $0x24] ss:$8 sps:$4 sm:$0xff]   ;;  %v1955_v41 = vld [vmem:[%s2794_s1 + $0x1c0] ss:$8 sps:$4 sm:$0xff]   ;;  %v179_v58 = vcombine.high %v2282_v52, %v2282_v52 }
   0xc   :  { %892 = vmatprep.subr.bf16.mxu0 %v1926_v6  ;;  %v200_v24 = vrot.slane %v178_v23, %v2183_v16  ;;  %847 = vmatprep.subr.bf16.mxu1 %v2011_v36  ;;  %v2019_v42 = vld [vmem:[%s2794_s1 + $0x20] ss:$8 sps:$4 sm:$0xff]   ;;  %v2023_v43 = vld [vmem:[%s2794_s1 + $0x34] ss:$8 sps:$4 sm:$0xff]   ;;  %v1958_v45 = vld [vmem:[%s2794_s1 + $0x1d0] ss:$8 sps:$4 sm:$0xff]   ;;  %v208_v62 = vcombine.high %v2295_v56, %v2295_v56 }
   0xd   :  { %v1956_v44 = vld [vmem:[%s2794_s1 + $0x1d4] ss:$8 sps:$4 sm:$0xff]   ;;  %v2025_v46 = vld [vmem:[%s2794_s1 + $0x30] ss:$8 sps:$4 sm:$0xff]   ;;  %v2029_v48 = vld [vmem:[%s2794_s1 + $0x44] ss:$8 sps:$4 sm:$0xff]   ;;  %v2320_v1 = vrot.slane %v179_v58, %v2183_v16 }
   0xe   :  { %v210_v27 = vcombine.high %v200_v24, %v200_v24  ;;  %877 = vmatprep.mubr.bf16.mxu1 %v200_v24  ;;  %v1959_v49 = vld [vmem:[%s2794_s1 + $0x1e4] ss:$8 sps:$4 sm:$0xff]   ;;  %v1961_v50 = vld [vmem:[%s2794_s1 + $0x1e0] ss:$8 sps:$4 sm:$0xff]   ;;  %v2035_v53 = vld [vmem:[%s2794_s1 + $0x54] ss:$8 sps:$4 sm:$0xff]  }
   0xf   :  { %893 = vmatpush1.bf16.msra.mxu0 %v1928_v10  ;;  %848 = vmatpush1.bf16.msra.mxu1 %v2013_v37  ;;  %v2031_v51 = vld [vmem:[%s2794_s1 + $0x40] ss:$8 sps:$4 sm:$0xff]   ;;  %v1962_v54 = vld [vmem:[%s2794_s1 + $0x1f4] ss:$8 sps:$4 sm:$0xff]   ;;  %v1964_v55 = vld [vmem:[%s2794_s1 + $0x1f0] ss:$8 sps:$4 sm:$0xff]   ;;  %v211_v58 = vcombine.high %v2320_v1, %v2320_v1 }
  0x10   :  { %894 = vmatprep.subr.bf16.mxu0 %v1929_v11  ;;  %918 = vmatprep.mubr.bf16.mxu0 %v210_v27  ;;  %v2037_v57 = vld [vmem:[%s2794_s1 + $0x50] ss:$8 sps:$4 sm:$0xff]   ;;  %v2041_v59 = vld [vmem:[%s2794_s1 + $0x64] ss:$8 sps:$4 sm:$0xff]   ;;  %v1966_v61 = vld [vmem:[%s2794_s1 + $0x200] ss:$8 sps:$4 sm:$0xff]  }
  0x11   :  { %849 = vmatprep.subr.bf16.mxu1 %v2017_v40  ;;  %v1968_v60 = vld [vmem:[%s2794_s1 + $0x204] ss:$8 sps:$4 sm:$0xff]   ;;  %v2043_v63 = vld [vmem:[%s2794_s1 + $0x60] ss:$8 sps:$4 sm:$0xff]   ;;  %v1971_v0 = vld [vmem:[%s2794_s1 + $0x214] ss:$8 sps:$4 sm:$0xff]  }
  0x12   :  { %v2047_v2 = vld [vmem:[%s2794_s1 + $0x74] ss:$8 sps:$4 sm:$0xff]   ;;  %v1969_v3 = vld [vmem:[%s2794_s1 + $0x210] ss:$8 sps:$4 sm:$0xff]   ;;  %v2053_v5 = vld [vmem:[%s2794_s1 + $0x84] ss:$8 sps:$4 sm:$0xff]  }
  0x13   :  { %895 = vmatpush1.bf16.msra.mxu0 %v1931_v14  ;;  %850 = vmatpush1.bf16.msra.mxu1 %v2019_v42  ;;  %v2049_v4 = vld [vmem:[%s2794_s1 + $0x70] ss:$8 sps:$4 sm:$0xff]   ;;  %v1974_v6 = vld [vmem:[%s2794_s1 + $0x224] ss:$8 sps:$4 sm:$0xff]   ;;  %v1972_v7 = vld [vmem:[%s2794_s1 + $0x220] ss:$8 sps:$4 sm:$0xff]  }
  0x14   :  { %896 = vmatprep.subr.bf16.mxu0 %v1932_v15  ;;  %851 = vmatprep.subr.bf16.mxu1 %v2023_v43  ;;  %v2055_v8 = vld [vmem:[%s2794_s1 + $0x80] ss:$8 sps:$4 sm:$0xff]   ;;  %v2059_v9 = vld [vmem:[%s2794_s1 + $0x94] ss:$8 sps:$4 sm:$0xff]   ;;  %v1975_v11 = vld [vmem:[%s2794_s1 + $0x230] ss:$8 sps:$4 sm:$0xff]  }
  0x15   :  { %v1977_v10 = vld [vmem:[%s2794_s1 + $0x234] ss:$8 sps:$4 sm:$0xff]   ;;  %v2061_v13 = vld [vmem:[%s2794_s1 + $0x90] ss:$8 sps:$4 sm:$0xff]   ;;  %v2065_v14 = vld [vmem:[%s2794_s1 + $0xa4] ss:$8 sps:$4 sm:$0xff]  }
  0x16   :  { %v1980_v15 = vld [vmem:[%s2794_s1 + $0x244] ss:$8 sps:$4 sm:$0xff]   ;;  %v2071_v19 = vld [vmem:[%s2794_s1 + $0xb4] ss:$8 sps:$4 sm:$0xff]   ;;  %v1990_v34 = vld [vmem:[%s2794_s1 + $0x280] ss:$8 sps:$4 sm:$0xff]  }
  0x17   :  { %897 = vmatpush1.bf16.msra.mxu0 %v1934_v17  ;;  %852 = vmatpush1.bf16.msra.mxu1 %v2025_v46  ;;  %v1978_v17 = vld [vmem:[%s2794_s1 + $0x240] ss:$8 sps:$4 sm:$0xff]   ;;  %v1983_v20 = vld [vmem:[%s2794_s1 + $0x254] ss:$8 sps:$4 sm:$0xff]   ;;  %v2077_v23 = vld [vmem:[%s2794_s1 + $0xc4] ss:$8 sps:$4 sm:$0xff]  }
  0x18   :  { %898 = vmatprep.subr.bf16.mxu0 %v1935_v18  ;;  %853 = vmatprep.subr.bf16.mxu1 %v2029_v48  ;;  %v2067_v18 = vld [vmem:[%s2794_s1 + $0xa0] ss:$8 sps:$4 sm:$0xff]   ;;  %v1986_v24 = vld [vmem:[%s2794_s1 + $0x264] ss:$8 sps:$4 sm:$0xff]   ;;  %v2083_v27 = vld [vmem:[%s2794_s1 + $0xd4] ss:$8 sps:$4 sm:$0xff]  }
  0x19   :  { %v2095_v35 = vld [vmem:[%s2794_s1 + $0xf4] ss:$8 sps:$4 sm:$0xff]   ;;  %v1016_v37 = vld [vmem:[%s2796_s4] sm:$0xff]  ;;  %v1993_v40 = vld [vmem:[%s2794_s1 + $0x290] ss:$8 sps:$4 sm:$0xff]   ;;  %vm1687_vm5 = vcmask 1042434  }
  0x1a   :  { %v1995_v36 = vld [vmem:[%s2794_s1 + $0x294] ss:$8 sps:$4 sm:$0xff]   ;;  %v1998_v42 = vld [vmem:[%s2794_s1 + $0x2a4] ss:$8 sps:$4 sm:$0xff]   ;;  %v1999_v46 = vld [vmem:[%s2794_s1 + $0x2b0] ss:$8 sps:$4 sm:$0xff]  }
  0x1b   :  { %899 = vmatpush1.bf16.msra.mxu0 %v1937_v21  ;;  %854 = vmatpush1.bf16.msra.mxu1 %v2031_v51  ;;  %v2073_v21 = vld [vmem:[%s2794_s1 + $0xb0] ss:$8 sps:$4 sm:$0xff]   ;;  %v2004_v47 = vld [vmem:[%s2794_s1 + $0x2c4] ss:$8 sps:$4 sm:$0xff]   ;;  %v2002_v48 = vld [vmem:[%s2794_s1 + $0x2c0] ss:$8 sps:$4 sm:$0xff]  }
  0x1c   :  { %900 = vmatprep.subr.bf16.mxu0 %v1938_v22  ;;  %855 = vmatprep.subr.bf16.mxu1 %v2035_v53  ;;  %v1981_v22 = vld [vmem:[%s2794_s1 + $0x250] ss:$8 sps:$4 sm:$0xff]   ;;  %v2016_v51 = vld [vmem:[%s2794_s1 + $0x2e4] ss:$8 sps:$4 sm:$0xff]   ;;  %v2014_v53 = vld [vmem:[%s2794_s1 + $0x2e0] ss:$8 sps:$4 sm:$0xff]  }
  0x1d   :  { %vm1686_vm4 = vmor %vm1685_vm3, %vm1684_vm2  ;;  %vm1689_vm7 = vcmask 1043459   ;;  %vm1691_vm9 = vcmask 1044484   ;;  %vm1693_vm11 = vcmask 1045509   ;;  %vm1695_vm13 = vcmask 1046534  }
  0x1e   :  { %vm1688_vm6 = vmor %vm1687_vm5, %vm1686_vm4  ;;  %vm1697_vm15 = vcmask 687111  }
  0x1f   :  { %901 = vmatpush1.bf16.msra.mxu0 %v1940_v25  ;;  %856 = vmatpush1.bf16.msra.mxu1 %v2037_v57  ;;  %v2079_v25 = vld [vmem:[%s2794_s1 + $0xc0] ss:$8 sps:$4 sm:$0xff]   ;;  %v2476_v57 = vrot.slane %v2282_v52, %v2183_v16  ;;  %v2032_v52 = vld [vmem:[%s2794_s1 + $0x310] ss:$8 sps:$4 sm:$0xff]   ;;  %vm1690_vm8 = vmor %vm1689_vm7, %vm1688_vm6 }
  0x20   :  { %902 = vmatprep.subr.bf16.mxu0 %v1941_v26  ;;  %857 = vmatprep.subr.bf16.mxu1 %v2041_v59  ;;  %v1984_v26 = vld [vmem:[%s2794_s1 + $0x260] ss:$8 sps:$4 sm:$0xff]   ;;  %vm1692_vm10 = vmor %vm1691_vm9, %vm1690_vm8 }
  0x21   :  { %v2026_v59 = vld [vmem:[%s2794_s1 + $0x300] ss:$8 sps:$4 sm:$0xff]   ;;  %vm1694_vm12 = vmor %vm1693_vm11, %vm1692_vm10 }
  0x22   :  { %vm1696_vm14 = vmor %vm1695_vm13, %vm1694_vm12 }
  0x23   :  { %903 = vmatpush1.bf16.msra.mxu0 %v1943_v28  ;;  %858 = vmatpush1.bf16.msra.mxu1 %v2043_v63  ;;  %v1989_v28 = vld [vmem:[%s2794_s1 + $0x274] ss:$8 sps:$4 sm:$0xff]  }
  0x24   :  { %904 = vmatprep.subr.bf16.mxu0 %v1944_v29  ;;  %859 = vmatprep.subr.bf16.mxu1 %v2047_v2  ;;  %v2085_v29 = vld [vmem:[%s2794_s1 + $0xd0] ss:$8 sps:$4 sm:$0xff]   ;;  %v2046_v63 = vld [vmem:[%s2794_s1 + $0x334] ss:$8 sps:$4 sm:$0xff]   ;;  %v2050_v2 = vld [vmem:[%s2794_s1 + $0x340] ss:$8 sps:$4 sm:$0xff]  }
  0x27   :  { %905 = vmatpush1.bf16.msra.mxu0 %v1946_v30  ;;  %860 = vmatpush1.bf16.msra.mxu1 %v2049_v4  ;;  %v1987_v30 = vld [vmem:[%s2794_s1 + $0x270] ss:$8 sps:$4 sm:$0xff]  }
  0x28   :  { %906 = vmatprep.subr.bf16.mxu0 %v1947_v31  ;;  %861 = vmatprep.subr.bf16.mxu1 %v2053_v5  ;;  %v2089_v31 = vld [vmem:[%s2794_s1 + $0xe4] ss:$8 sps:$4 sm:$0xff]   ;;  %v2056_v4 = vld [vmem:[%s2794_s1 + $0x350] ss:$8 sps:$4 sm:$0xff]  }
  0x29   :  { %v2064_v5 = vld [vmem:[%s2794_s1 + $0x364] ss:$8 sps:$4 sm:$0xff]  }
  0x2b   :  { %907 = vmatpush1.bf16.msra.mxu0 %v1949_v32  ;;  %862 = vmatpush1.bf16.msra.mxu1 %v2055_v8  ;;  %v1992_v32 = vld [vmem:[%s2794_s1 + $0x284] ss:$8 sps:$4 sm:$0xff]   ;;  %v2068_v8 = vld [vmem:[%s2794_s1 + $0x370] ss:$8 sps:$4 sm:$0xff]  }
  0x2c   :  { %908 = vmatprep.subr.bf16.mxu0 %v1950_v33  ;;  %863 = vmatprep.subr.bf16.mxu1 %v2059_v9  ;;  %v2091_v33 = vld [vmem:[%s2794_s1 + $0xe0] ss:$8 sps:$4 sm:$0xff]   ;;  %v2076_v9 = vld [vmem:[%s2794_s1 + $0x384] ss:$8 sps:$4 sm:$0xff]  }
  0x2f   :  { %909 = vmatpush1.bf16.msra.mxu0 %v1952_v38  ;;  %864 = vmatpush1.bf16.msra.mxu1 %v2061_v13  ;;  %v1020_v38 = vld [vmem:[%s2796_s4 + $0x20] sm:$0xff]  ;;  %v2080_v13 = vld [vmem:[%s2794_s1 + $0x390] ss:$8 sps:$4 sm:$0xff]  }
  0x30   :  { %910 = vmatprep.subr.bf16.mxu0 %v1953_v39  ;;  %865 = vmatprep.subr.bf16.mxu1 %v2065_v14  ;;  %v2097_v39 = vld [vmem:[%s2794_s1 + $0xf0] ss:$8 sps:$4 sm:$0xff]   ;;  %v1834_v43 = vcombine.low %v1016_v37, %v1020_v38  ;;  %v2088_v14 = vld [vmem:[%s2794_s1 + $0x3a4] ss:$8 sps:$4 sm:$0xff]  }
  0x33   :  { %911 = vmatpush1.bf16.msra.mxu0 %v1955_v41  ;;  %866 = vmatpush1.bf16.msra.mxu1 %v2067_v18  ;;  %v1835_v41 = vcombine.high %v1016_v37, %v1020_v38  ;;  %v2092_v18 = vld [vmem:[%s2794_s1 + $0x3b0] ss:$8 sps:$4 sm:$0xff]   ;;  %v1048_v38 = vld [vmem:[%s2796_s4 + $0x100] sm:$0xff] }
  0x34   :  { %912 = vmatprep.subr.bf16.mxu0 %v1956_v44  ;;  %867 = vmatprep.subr.bf16.mxu1 %v2071_v19  ;;  %v1996_v44 = vld [vmem:[%s2794_s1 + $0x2a0] ss:$8 sps:$4 sm:$0xff]   ;;  %v2100_v19 = vld [vmem:[%s2794_s1 + $0x3c4] ss:$8 sps:$4 sm:$0xff]  }
  0x37   :  { %913 = vmatpush1.bf16.msra.mxu0 %v1958_v45  ;;  %868 = vmatpush1.bf16.msra.mxu1 %v2073_v21  ;;  %v2001_v45 = vld [vmem:[%s2794_s1 + $0x2b4] ss:$8 sps:$4 sm:$0xff]   ;;  %v2098_v21 = vld [vmem:[%s2794_s1 + $0x3c0] ss:$8 sps:$4 sm:$0xff]  }
  0x38   :  { %914 = vmatprep.subr.bf16.mxu0 %v1959_v49  ;;  %869 = vmatprep.subr.bf16.mxu1 %v2077_v23  ;;  %v2010_v49 = vld [vmem:[%s2794_s1 + $0x2d4] ss:$8 sps:$4 sm:$0xff]  }
  0x3b   :  { %915 = vmatpush1.bf16.msra.mxu0 %v1961_v50  ;;  %870 = vmatpush1.bf16.msra.mxu1 %v2079_v25  ;;  %v2008_v50 = vld [vmem:[%s2794_s1 + $0x2d0] ss:$8 sps:$4 sm:$0xff]   ;;  %v209_v25 = vcombine.high %v2476_v57, %v2476_v57 }
  0x3c   :  { %916 = vmatprep.subr.bf16.mxu0 %v1962_v54  ;;  %871 = vmatprep.subr.bf16.mxu1 %v2083_v27  ;;  %v2022_v54 = vld [vmem:[%s2794_s1 + $0x2f4] ss:$8 sps:$4 sm:$0xff]   ;;  %v1028_v27 = vld [vmem:[%s2796_s4 + $0x60] sm:$0xff] }
  0x3f   :  { %917 = vmatpush1.bf16.msra.mxu0 %v1964_v55  ;;  %872 = vmatpush1.bf16.msra.mxu1 %v2085_v29  ;;  %v2020_v55 = vld [vmem:[%s2794_s1 + $0x2f0] ss:$8 sps:$4 sm:$0xff]  }
  0x40   :  { %927 = vmatprep.subr.bf16.mxu0 %v1968_v60  ;;  %873 = vmatprep.subr.bf16.mxu1 %v2089_v31  ;;  %v2034_v60 = vld [vmem:[%s2794_s1 + $0x314] ss:$8 sps:$4 sm:$0xff]   ;;  %v1036_v31 = vld [vmem:[%s2796_s4 + $0xa0] sm:$0xff] }
  0x42   :  { %919 = vmatmul.mubr.bf16.vlgmr.msra.gmra.mrb[0].mxu0 %v208_v62  ;;  %v2038_v62 = vld [vmem:[%s2794_s1 + $0x320] ss:$8 sps:$4 sm:$0xff]  }
  0x43   :  { %928 = vmatpush1.bf16.msra.mxu0 %v1966_v61  ;;  %959 = vmatprep.mubr.bf16.mxu0 %v2320_v1  ;;  %v2040_v61 = vld [vmem:[%s2794_s1 + $0x324] ss:$8 sps:$4 sm:$0xff]  }
  0x44   :  { %929 = vmatprep.subr.bf16.mxu0 %v1971_v0  ;;  %874 = vmatpush1.bf16.msra.mxu1 %v2091_v33  ;;  %v2044_v0 = vld [vmem:[%s2794_s1 + $0x330] ss:$8 sps:$4 sm:$0xff]   ;;  %v2052_v1 = vld [vmem:[%s2794_s1 + $0x344] ss:$8 sps:$4 sm:$0xff]  }
  0x45   :  { %875 = vmatprep.subr.bf16.mxu1 %v2095_v35  ;;  %v1044_v35 = vld [vmem:[%s2796_s4 + $0xe0] sm:$0xff] }
  0x47   :  { %930 = vmatpush1.bf16.msra.mxu0 %v1969_v3  ;;  %v2058_v3 = vld [vmem:[%s2794_s1 + $0x354] ss:$8 sps:$4 sm:$0xff]  }
  0x48   :  { %931 = vmatprep.subr.bf16.mxu0 %v1974_v6  ;;  %876 = vmatpush1.bf16.msra.mxu1 %v2097_v39  ;;  %v2062_v6 = vld [vmem:[%s2794_s1 + $0x360] ss:$8 sps:$4 sm:$0xff]  }
  0x49   :  { %1442 = vmatprep.subr.bf16.mxu1 %v1835_v41  ;;  %v1052_v39 = vld [vmem:[%s2796_s4 + $0x120] sm:$0xff] }
  0x4a   :  { %v1866_v41 = vcombine.low %v1048_v38, %v1052_v39 }
  0x4b   :  { %932 = vmatpush1.bf16.msra.mxu0 %v1972_v7  ;;  %878 = vmatmul.mubr.bf16.vlgmr.msra.gmra.mrb[0].mxu1 %v2295_v56  ;;  %v2028_v56 = vld [vmem:[%s2794_s1 + $0x304] ss:$8 sps:$4 sm:$0xff]   ;;  %v2070_v7 = vld [vmem:[%s2794_s1 + $0x374] ss:$8 sps:$4 sm:$0xff]  }
  0x4c   :  { %933 = vmatprep.subr.bf16.mxu0 %v1977_v10  ;;  %1443 = vmatpush1.bf16.msra.mxu1 %v1834_v43  ;;  %v2074_v10 = vld [vmem:[%s2794_s1 + $0x380] ss:$8 sps:$4 sm:$0xff]  }
  0x4d   :  { %v1060_v43 = vld [vmem:[%s2796_s4 + $0x160] sm:$0xff] }
  0x4f   :  { %934 = vmatpush1.bf16.msra.mxu0 %v1975_v11  ;;  %v2082_v11 = vld [vmem:[%s2794_s1 + $0x394] ss:$8 sps:$4 sm:$0xff]  }
  0x50   :  { %935 = vmatprep.subr.bf16.mxu0 %v1980_v15  ;;  %v2086_v15 = vld [vmem:[%s2794_s1 + $0x3a0] ss:$8 sps:$4 sm:$0xff]  }
  0x53   :  { %936 = vmatpush1.bf16.msra.mxu0 %v1978_v17  ;;  %v2094_v17 = vld [vmem:[%s2794_s1 + $0x3b4] ss:$8 sps:$4 sm:$0xff]  }
  0x54   :  { %937 = vmatprep.subr.bf16.mxu0 %v1983_v20  ;;  %v149_v20 = vld [vmem:[%s2794_s1 + $0x3d0] sm:$0x33] }
  0x55   :  { %v1830_v23 = vcombine.low %v149_v20, %v149_v20 }
  0x57   :  { %938 = vmatpush1.bf16.msra.mxu0 %v1981_v22  ;;  %v1831_v22 = vcombine.high %v149_v20, %v149_v20  ;;  %v1025_v20 = vld [vmem:[%s2796_s4 + $0x48] sm:$0xff] }
  0x58   :  { %939 = vmatprep.subr.bf16.mxu0 %v1986_v24  ;;  %v840_v24 = vsel %vm838_vm1, %v1830_v23, 0 }
  0x5b   :  { %940 = vmatpush1.bf16.msra.mxu0 %v1984_v26  ;;  %v1024_v26 = vld [vmem:[%s2796_s4 + $0x40] sm:$0xff] }
  0x5c   :  { %941 = vmatprep.subr.bf16.mxu0 %v1989_v28  ;;  %v1842_v28 = vcombine.low %v1024_v26, %v1028_v27  ;;  %v1843_v29 = vcombine.high %v1024_v26, %v1028_v27  ;;  %v1037_v26 = vld [vmem:[%s2796_s4 + $0xa8] sm:$0xff] }
  0x5e   :  { %1444 = vmatprep.subr.bf16.mxu1 %v1843_v29  ;;  %v1041_v29 = vld [vmem:[%s2796_s4 + $0xc8] sm:$0xff] }
  0x5f   :  { %942 = vmatpush1.bf16.msra.mxu0 %v1987_v30  ;;  %1445 = vmatpush1.bf16.msra.mxu1 %v1842_v28  ;;  %v1032_v30 = vld [vmem:[%s2796_s4 + $0x80] sm:$0xff] }
  0x60   :  { %943 = vmatprep.subr.bf16.mxu0 %v1992_v32  ;;  %v1851_v32 = vcombine.high %v1032_v30, %v1036_v31  ;;  %v1850_v33 = vcombine.low %v1032_v30, %v1036_v31  ;;  %v1045_v30 = vld [vmem:[%s2796_s4 + $0xe8] sm:$0xff] }
  0x62   :  { %1446 = vmatprep.subr.bf16.mxu1 %v1851_v32  ;;  %v1861_v32 = vcombine.high %v1041_v29, %v1045_v30 }
  0x63   :  { %944 = vmatpush1.bf16.msra.mxu0 %v1990_v34  ;;  %1447 = vmatpush1.bf16.msra.mxu1 %v1850_v33  ;;  %v1040_v34 = vld [vmem:[%s2796_s4 + $0xc0] sm:$0xff]  ;;  %v1049_v33 = vld [vmem:[%s2796_s4 + $0x108] sm:$0xff] }
  0x64   :  { %945 = vmatprep.subr.bf16.mxu0 %v1995_v36  ;;  %v1859_v36 = vcombine.high %v1040_v34, %v1044_v35  ;;  %v1858_v37 = vcombine.low %v1040_v34, %v1044_v35  ;;  %v1053_v34 = vld [vmem:[%s2796_s4 + $0x128] sm:$0xff]  ;;  %v1860_v35 = vcombine.low %v1041_v29, %v1045_v30 }
  0x66   :  { %1448 = vmatprep.subr.bf16.mxu1 %v1859_v36  ;;  %v1869_v36 = vcombine.high %v1049_v33, %v1053_v34 }
  0x67   :  { %946 = vmatpush1.bf16.msra.mxu0 %v1993_v40  ;;  %1449 = vmatpush1.bf16.msra.mxu1 %v1858_v37  ;;  %v1867_v40 = vcombine.high %v1048_v38, %v1052_v39  ;;  %v1057_v37 = vld [vmem:[%s2796_s4 + $0x148] sm:$0xff]  ;;  %v1868_v39 = vcombine.low %v1049_v33, %v1053_v34 }
  0x68   :  { %947 = vmatprep.subr.bf16.mxu0 %v1998_v42  ;;  %v1056_v42 = vld [vmem:[%s2796_s4 + $0x140] sm:$0xff]  ;;  %v1061_v38 = vld [vmem:[%s2796_s4 + $0x168] sm:$0xff] }
  0x69   :  { %1450 = vmatprep.subr.bf16.mxu1 %v1867_v40  ;;  %v1877_v40 = vcombine.high %v1057_v37, %v1061_v38 }
  0x6b   :  { %948 = vmatpush1.bf16.msra.mxu0 %v1996_v44  ;;  %v1064_v44 = vld [vmem:[%s2796_s4 + $0x180] sm:$0xff]  ;;  %1451 = vmatpush1.bf16.msra.mxu1 %v1866_v41  ;;  %v1065_v41 = vld [vmem:[%s2796_s4 + $0x188] sm:$0xff] }
  0x6c   :  { %949 = vmatprep.subr.bf16.mxu0 %v2001_v45  ;;  %v1874_v45 = vcombine.low %v1056_v42, %v1060_v43 }
  0x6f   :  { %950 = vmatpush1.bf16.msra.mxu0 %v1999_v46  ;;  %v1875_v46 = vcombine.high %v1056_v42, %v1060_v43  ;;  %v1069_v42 = vld [vmem:[%s2796_s4 + $0x1a8] sm:$0xff]  ;;  %v1876_v43 = vcombine.low %v1057_v37, %v1061_v38 }
  0x70   :  { %951 = vmatprep.subr.bf16.mxu0 %v2004_v47  ;;  %v1068_v47 = vld [vmem:[%s2796_s4 + $0x1a0] sm:$0xff] }
  0x71   :  { %1452 = vmatprep.subr.bf16.mxu1 %v1875_v46  ;;  %v1077_v46 = vld [vmem:[%s2796_s4 + $0x1e8] sm:$0xff] }
  0x72   :  { %1453 = vmatpush1.bf16.msra.mxu1 %v1874_v45  ;;  %v1073_v45 = vld [vmem:[%s2796_s4 + $0x1c8] sm:$0xff] }
  0x73   :  { %952 = vmatpush1.bf16.msra.mxu0 %v2002_v48  ;;  %v2106_v48 = vmov 0  }
  0x74   :  { %953 = vmatprep.subr.bf16.mxu0 %v2010_v49  ;;  %1474 = vmatprep.mubr.bf16.mxu1 %v2106_v48  ;;  %v1883_v49 = vcombine.high %v1064_v44, %v1068_v47 }
  0x76   :  { %1454 = vmatprep.subr.bf16.mxu1 %v1883_v49  ;;  %v1893_v49 = vcombine.high %v1073_v45, %v1077_v46 }
  0x77   :  { %954 = vmatpush1.bf16.msra.mxu0 %v2008_v50  ;;  %v1017_v50 = vld [vmem:[%s2796_s4 + $0x8] sm:$0xff] }
  0x78   :  { %955 = vmatprep.subr.bf16.mxu0 %v2016_v51  ;;  %v1021_v51 = vld [vmem:[%s2796_s4 + $0x28] sm:$0xff] }
  0x7b   :  { %956 = vmatpush1.bf16.msra.mxu0 %v2014_v53  ;;  %v1072_v53 = vld [vmem:[%s2796_s4 + $0x1c0] sm:$0xff] }
  0x7c   :  { %957 = vmatprep.subr.bf16.mxu0 %v2022_v54  ;;  %v1076_v54 = vld [vmem:[%s2796_s4 + $0x1e0] sm:$0xff] }
  0x7f   :  { %958 = vmatpush1.bf16.msra.mxu0 %v2020_v55  ;;  %v1836_v55 = vcombine.low %v1017_v50, %v1021_v51 }
  0x80   :  { %968 = vmatprep.subr.bf16.mxu0 %v2028_v56  ;;  %v1882_v56 = vcombine.low %v1064_v44, %v1068_v47  ;;  %v1885_v44 = vcombine.high %v1065_v41, %v1069_v42  ;;  %v1884_v47 = vcombine.low %v1065_v41, %v1069_v42  ;;  %v1059_v42 = vld [vmem:[%s2796_s4 + $0x158] sm:$0xff] }
  0x82   :  { %960 = vmatmul.mubr.bf16.vlgmr.msra.gmra.mrb[0].mxu0 %v2476_v57  ;;  %v1891_v57 = vcombine.high %v1072_v53, %v1076_v54  ;;  %1455 = vmatpush1.bf16.msra.mxu1 %v1882_v56  ;;  %v1030_v56 = vld [vmem:[%s2796_s4 + $0x70] sm:$0xff] }
  0x83   :  { %969 = vmatpush1.bf16.msra.mxu0 %v2026_v59  ;;  %1833 = vmatprep.mubr.msk.bf16.mxu0 %vm834_vm0, %v211_v58  ;;  %v1890_v58 = vcombine.low %v1072_v53, %v1076_v54  ;;  %v1837_v59 = vcombine.high %v1017_v50, %v1021_v51  ;;  %v1018_v50 = vld [vmem:[%s2796_s4 + $0x10] sm:$0xff]  ;;  %v1892_v53 = vcombine.low %v1073_v45, %v1077_v46  ;;  %v1067_v46 = vld [vmem:[%s2796_s4 + $0x198] sm:$0xff]  ;;  %vm1698_vm0 = vmor %vm1697_vm15, %vm1696_vm14 }
  0x84   :  { %970 = vmatprep.subr.bf16.mxu0 %v2034_v60  ;;  %1456 = vmatprep.subr.bf16.mxu1 %v1891_v57  ;;  %v1022_v51 = vld [vmem:[%s2796_s4 + $0x30] sm:$0xff] }
  0x85   :  { %v1839_v54 = vcombine.high %v1018_v50, %v1022_v51  ;;  %v1838_v57 = vcombine.low %v1018_v50, %v1022_v51  ;;  %v1075_v51 = vld [vmem:[%s2796_s4 + $0x1d8] sm:$0xff] }
  0x86   :  { %1457 = vmatpush1.bf16.msra.mxu1 %v1890_v58 }
  0x87   :  { %971 = vmatpush1.bf16.msra.mxu0 %v2032_v52  ;;  %1483 = vmatprep.subr.bf16.mxu1 %v1837_v59  ;;  %v1034_v59 = vld [vmem:[%s2796_s4 + $0x90] sm:$0xff] }
  0x88   :  { %972 = vmatprep.subr.bf16.mxu0 %v2040_v61 }
  0x8b   :  { %973 = vmatpush1.bf16.msra.mxu0 %v2038_v62 }
  0x8c   :  { %974 = vmatprep.subr.bf16.mxu0 %v2046_v63  ;;  %v154_v63 = vsub.s32 0, %v2174_v12 }
  0x8f   :  { %975 = vmatpush1.bf16.msra.mxu0 %v2044_v0  ;;  %v150_v0 = vld [vmem:[%s2797_s2] sm:$0x3] }
  0x90   :  { %976 = vmatprep.subr.bf16.mxu0 %v2052_v1  ;;  %v158_v1 = vsub.s32 1, %v2174_v12 }
  0x93   :  { %977 = vmatpush1.bf16.msra.mxu0 %v2050_v2  ;;  %v155_v2 = vrot.slane %v150_v0, %v154_v63 }
  0x94   :  { %978 = vmatprep.subr.bf16.mxu0 %v2058_v3  ;;  %v159_v3 = vrot.slane %v150_v0, %v158_v1  ;;  %v1046_v0 = vld [vmem:[%s2796_s4 + $0xf0] sm:$0xff] }
  0x97   :  { %979 = vmatpush1.bf16.msra.mxu0 %v2056_v4 }
  0x98   :  { %980 = vmatprep.subr.bf16.mxu0 %v2064_v5 }
  0x9b   :  { %981 = vmatpush1.bf16.msra.mxu0 %v2062_v6 }
  0x9c   :  { %982 = vmatprep.subr.bf16.mxu0 %v2070_v7 }
  0x9f   :  { %983 = vmatpush1.bf16.msra.mxu0 %v2068_v8 }
  0xa0   :  { %984 = vmatprep.subr.bf16.mxu0 %v2076_v9 }
  0xa3   :  { %985 = vmatpush1.bf16.msra.mxu0 %v2074_v10 }
  0xa4   :  { %986 = vmatprep.subr.bf16.mxu0 %v2082_v11 }
  0xa7   :  { %987 = vmatpush1.bf16.msra.mxu0 %v2080_v13 }
  0xa8   :  { %988 = vmatprep.subr.bf16.mxu0 %v2088_v14 }
  0xab   :  { %989 = vmatpush1.bf16.msra.mxu0 %v2086_v15 }
  0xac   :  { %990 = vmatprep.subr.bf16.mxu0 %v2094_v17  ;;  %v1009_v17 = vld [vmem:[%s2799_s3] sm:$0x3] }
  0xaf   :  { %991 = vmatpush1.bf16.msra.mxu0 %v2092_v18 }
  0xb0   :  { %992 = vmatprep.subr.bf16.mxu0 %v2100_v19 }
  0xb3   :  { %993 = vmatpush1.bf16.msra.mxu0 %v2098_v21  ;;  %v1029_v21 = vld [vmem:[%s2796_s4 + $0x68] sm:$0xff] }
  0xb4   :  { %1832 = vmatprep.subr.msk.bf16.mxu0 %vm838_vm1, %v1831_v22  ;;  %v1844_v27 = vcombine.low %v1025_v20, %v1029_v21 }
  0xb7   :  { %995 = vmatpush1.bf16.msra.mxu0 %v840_v24  ;;  %v1845_v24 = vcombine.high %v1025_v20, %v1029_v21 }
  0xba   :  { %1001 = vmatmul.mubr.bf16.vlgmr.msra.gmra.mrb[0].mxu0 %v209_v25  ;;  %v1033_v25 = vld [vmem:[%s2796_s4 + $0x88] sm:$0xff] }
  0xbb   :  { %v1853_v28 = vcombine.high %v1033_v25, %v1037_v26  ;;  %v1852_v31 = vcombine.low %v1033_v25, %v1037_v26 }
 0x11e   :  { %v879_v60 = vpop.f32.mrb[0].mxu1 }
 0x11f   :  { %v881_v52 = vpop.f32.mrb[1].mxu1  ;;  %v880_v4 = vadd.f32 %v879_v60, %v155_v2  ;;  %v1038_v60 = vld [vmem:[%s2796_s4 + $0xb0] sm:$0xff] }
 0x120   :  { %v883_v61 = vpop.f32.mrb[2].mxu1  ;;  %v882_v5 = vadd.f32 %v881_v52, %v159_v3  ;;  %v1854_v2 = vcombine.low %v1034_v59, %v1038_v60 }
 0x121   :  { %v884_v62 = vpop.f32.mrb[3].mxu1  ;;  %v1855_v61 = vcombine.high %v1034_v59, %v1038_v60 }
 0x122   :  { %v1042_v62 = vld [vmem:[%s2796_s4 + $0xd0] sm:$0xff] }
 0x123   :  { %v1863_v3 = vcombine.high %v1042_v62, %v1046_v0 }
 0x18d   :  { %v1002_v6 = vpop.f32.mrb[0].mxu0 }
 0x18e   :  { %v1904_v7 = vadd.f32 %v1002_v6, %v880_v4  ;;  %v1004_v8 = vpop.f32.mrb[1].mxu0  ;;  %v1050_v4 = vld [vmem:[%s2796_s4 + $0x110] sm:$0xff]  ;;  %v1862_v6 = vcombine.low %v1042_v62, %v1046_v0 }
 0x18f   :  { %v1906_v9 = vadd.f32 %v1004_v8, %v882_v5  ;;  %v1006_v10 = vpop.f32.mrb[2].mxu0  ;;  %v1054_v5 = vld [vmem:[%s2796_s4 + $0x130] sm:$0xff] }
 0x190   :  { %v1007_v11 = vpop.f32.mrb[3].mxu0  ;;  %v1058_v8 = vld [vmem:[%s2796_s4 + $0x150] sm:$0xff]  ;;  %v1870_v10 = vcombine.low %v1050_v4, %v1054_v5 }
 0x191   :  { %v1010_v13 = vmul.f32 0.5, %v1906_v9  ;;  %v1608_v14 = vcombine.low %v1904_v7, %v1906_v9  ;;  %v1062_v9 = vld [vmem:[%s2796_s4 + $0x170] sm:$0xff] }
 0x192   :  { %v1879_v11 = vcombine.high %v1058_v8, %v1062_v9 }
 0x193   :  { %v1011_v15 = vmul.f32 1.442695, %v1010_v13  ;;  %1898 = vst.sshfl [vmem:[%s2798_s6] sm:$0x33 pattern:$0x76325410] %v1608_v14  ;;  %v1066_v13 = vld [vmem:[%s2796_s4 + $0x190] sm:$0xff] }
 0x194   :  { %v1070_v14 = vld [vmem:[%s2796_s4 + $0x1b0] sm:$0xff] }
 0x195   :  { %2103 = vpow2.f32 %v1011_v15  ;;  %v1878_v15 = vcombine.low %v1058_v8, %v1062_v9  ;;  %v1886_v20 = vcombine.low %v1066_v13, %v1070_v14 }
 0x19f   :  { %v2104_v18 = vpop.eup %2103 }
 0x1a0   :  { %v1013_v19 = vmul.f32 %v2104_v18, %v1009_v17  ;;  %v1887_v17 = vcombine.high %v1066_v13, %v1070_v14  ;;  %v1074_v18 = vld [vmem:[%s2796_s4 + $0x1d0] sm:$0xff] }
 0x1a2   :  { %v1014_v22 = vadd.f32 %v1904_v7, %v1013_v19  ;;  %v1871_v7 = vcombine.high %v1050_v4, %v1054_v5  ;;  %v1078_v19 = vld [vmem:[%s2796_s4 + $0x1f0] sm:$0xff]  ;;  %v1092_v4 = vsub.s32 2, %v2174_v12 }
 0x1a3   :  { %v1895_v21 = vcombine.high %v1074_v18, %v1078_v19  ;;  %v1894_v25 = vcombine.low %v1074_v18, %v1078_v19  ;;  %v1104_v18 = vsub.s32 5, %v2174_v12 }
 0x1a4   :  { %v2631_v23 = vpack.c.bf16 %v1014_v22, %v1014_v22  ;;  %v1019_v22 = vld [vmem:[%s2796_s4 + $0x18] sm:$0xff] }
 0x1a6   :  { %1475 = vmatmul.mubr.bf16.vlgmr.msra.gmra.mrb[4].mxu1 %v2631_v23 }
 0x1a7   :  { %1484 = vmatpush1.bf16.msra.mxu1 %v1836_v55  ;;  %1515 = vmatprep.mubr.bf16.mxu1 %v2106_v48  ;;  %v1026_v55 = vld [vmem:[%s2796_s4 + $0x50] sm:$0xff] }
 0x1a8   :  { %1485 = vmatprep.subr.bf16.mxu1 %v1845_v24  ;;  %v1847_v58 = vcombine.high %v1026_v55, %v1030_v56  ;;  %v1846_v52 = vcombine.low %v1026_v55, %v1030_v56  ;;  %v1023_v24 = vld [vmem:[%s2796_s4 + $0x38] sm:$0xff] }
 0x1a9   :  { %v1841_v26 = vcombine.high %v1019_v22, %v1023_v24  ;;  %v1840_v29 = vcombine.low %v1019_v22, %v1023_v24 }
 0x1ab   :  { %1486 = vmatpush1.bf16.msra.mxu1 %v1844_v27  ;;  %v1027_v27 = vld [vmem:[%s2796_s4 + $0x58] sm:$0xff] }
 0x1ac   :  { %1487 = vmatprep.subr.bf16.mxu1 %v1853_v28  ;;  %v1031_v28 = vld [vmem:[%s2796_s4 + $0x78] sm:$0xff] }
 0x1ad   :  { %v1849_v30 = vcombine.high %v1027_v27, %v1031_v28  ;;  %v1848_v33 = vcombine.low %v1027_v27, %v1031_v28 }
 0x1af   :  { %1488 = vmatpush1.bf16.msra.mxu1 %v1852_v31  ;;  %v1035_v31 = vld [vmem:[%s2796_s4 + $0x98] sm:$0xff] }
 0x1b0   :  { %1489 = vmatprep.subr.bf16.mxu1 %v1861_v32  ;;  %v1039_v32 = vld [vmem:[%s2796_s4 + $0xb8] sm:$0xff] }
 0x1b1   :  { %v1857_v34 = vcombine.high %v1035_v31, %v1039_v32  ;;  %v1856_v37 = vcombine.low %v1035_v31, %v1039_v32 }
 0x1b3   :  { %1490 = vmatpush1.bf16.msra.mxu1 %v1860_v35  ;;  %v1043_v35 = vld [vmem:[%s2796_s4 + $0xd8] sm:$0xff] }
 0x1b4   :  { %1491 = vmatprep.subr.bf16.mxu1 %v1869_v36  ;;  %v1047_v36 = vld [vmem:[%s2796_s4 + $0xf8] sm:$0xff] }
 0x1b5   :  { %v1865_v38 = vcombine.high %v1043_v35, %v1047_v36 }
 0x1b7   :  { %1492 = vmatpush1.bf16.msra.mxu1 %v1868_v39  ;;  %v1051_v39 = vld [vmem:[%s2796_s4 + $0x118] sm:$0xff] }
 0x1b8   :  { %1493 = vmatprep.subr.bf16.mxu1 %v1877_v40  ;;  %v1864_v40 = vcombine.low %v1043_v35, %v1047_v36 }
 0x1bb   :  { %1494 = vmatpush1.bf16.msra.mxu1 %v1876_v43  ;;  %v1063_v43 = vld [vmem:[%s2796_s4 + $0x178] sm:$0xff] }
 0x1bc   :  { %1495 = vmatprep.subr.bf16.mxu1 %v1885_v44  ;;  %v1881_v45 = vcombine.high %v1059_v42, %v1063_v43 }
 0x1bf   :  { %1496 = vmatpush1.bf16.msra.mxu1 %v1884_v47  ;;  %v1071_v47 = vld [vmem:[%s2796_s4 + $0x1b8] sm:$0xff] }
 0x1c0   :  { %1497 = vmatprep.subr.bf16.mxu1 %v1893_v49  ;;  %v1880_v49 = vcombine.low %v1059_v42, %v1063_v43  ;;  %v1889_v50 = vcombine.high %v1067_v46, %v1071_v47 }
 0x1c3   :  { %1498 = vmatpush1.bf16.msra.mxu1 %v1892_v53  ;;  %v1079_v53 = vld [vmem:[%s2796_s4 + $0x1f8] sm:$0xff] }
 0x1c4   :  { %1524 = vmatprep.subr.bf16.mxu1 %v1839_v54  ;;  %v1888_v54 = vcombine.low %v1067_v46, %v1071_v47  ;;  %v1897_v55 = vcombine.high %v1075_v51, %v1079_v53  ;;  %v1896_v56 = vcombine.low %v1075_v51, %v1079_v53 }
 0x1c6   :  { %1516 = vmatmul.mubr.bf16.vlgmr.msra.gmra.mrb[8].mxu1 %v2631_v23 }
 0x1c7   :  { %1525 = vmatpush1.bf16.msra.mxu1 %v1838_v57  ;;  %1556 = vmatprep.mubr.bf16.mxu1 %v2106_v48  ;;  %v1080_v57 = vld [vmem:[%s2800_s5] sm:$0xff] }
 0x1c8   :  { %1526 = vmatprep.subr.bf16.mxu1 %v1847_v58  ;;  %v1085_v58 = vrot.slane %v1080_v57, %v154_v63  ;;  %v1089_v59 = vrot.slane %v1080_v57, %v158_v1  ;;  %v1093_v5 = vrot.slane %v1080_v57, %v1092_v4 }
 0x1cb   :  { %1527 = vmatpush1.bf16.msra.mxu1 %v1846_v52 }
 0x1cc   :  { %1528 = vmatprep.subr.bf16.mxu1 %v1855_v61 }
 0x1cf   :  { %1529 = vmatpush1.bf16.msra.mxu1 %v1854_v2 }
 0x1d0   :  { %1530 = vmatprep.subr.bf16.mxu1 %v1863_v3 }
 0x1d3   :  { %1531 = vmatpush1.bf16.msra.mxu1 %v1862_v6 }
 0x1d4   :  { %1532 = vmatprep.subr.bf16.mxu1 %v1871_v7 }
 0x1d7   :  { %1533 = vmatpush1.bf16.msra.mxu1 %v1870_v10 }
 0x1d8   :  { %1534 = vmatprep.subr.bf16.mxu1 %v1879_v11 }
 0x1db   :  { %1535 = vmatpush1.bf16.msra.mxu1 %v1878_v15 }
 0x1dc   :  { %1536 = vmatprep.subr.bf16.mxu1 %v1887_v17  ;;  %v1100_v17 = vsub.s32 4, %v2174_v12 }
 0x1de   :  { %v1101_v19 = vrot.slane %v1080_v57, %v1100_v17 }
 0x1df   :  { %1537 = vmatpush1.bf16.msra.mxu1 %v1886_v20  ;;  %v1105_v20 = vrot.slane %v1080_v57, %v1104_v18 }
 0x1e0   :  { %1538 = vmatprep.subr.bf16.mxu1 %v1895_v21 }
 0x1e3   :  { %1539 = vmatpush1.bf16.msra.mxu1 %v1894_v25 }
 0x1e4   :  { %1565 = vmatprep.subr.bf16.mxu1 %v1841_v26 }
 0x1e6   :  { %1557 = vmatmul.mubr.bf16.vlgmr.msra.gmra.mrb[12].mxu1 %v2631_v23 }
 0x1e7   :  { %1566 = vmatpush1.bf16.msra.mxu1 %v1840_v29  ;;  %1597 = vmatprep.mubr.bf16.mxu1 %v2106_v48  ;;  %v1055_v48 = vld [vmem:[%s2796_s4 + $0x138] sm:$0xff]  ;;  %v1108_v29 = vsub.s32 6, %v2174_v12 }
 0x1e8   :  { %1567 = vmatprep.subr.bf16.mxu1 %v1849_v30  ;;  %v1873_v41 = vcombine.high %v1051_v39, %v1055_v48  ;;  %v1872_v44 = vcombine.low %v1051_v39, %v1055_v48  ;;  %v1112_v30 = vsub.s32 7, %v2174_v12 }
 0x1e9   :  { %v1109_v31 = vrot.slane %v1080_v57, %v1108_v29 }
 0x1ea   :  { %v1113_v32 = vrot.slane %v1080_v57, %v1112_v30 }
 0x1eb   :  { %1568 = vmatpush1.bf16.msra.mxu1 %v1848_v33 }
 0x1ec   :  { %1569 = vmatprep.subr.bf16.mxu1 %v1857_v34 }
 0x1ef   :  { %1570 = vmatpush1.bf16.msra.mxu1 %v1856_v37 }
 0x1f0   :  { %1571 = vmatprep.subr.bf16.mxu1 %v1865_v38 }
 0x1f3   :  { %1572 = vmatpush1.bf16.msra.mxu1 %v1864_v40 }
 0x1f4   :  { %1573 = vmatprep.subr.bf16.mxu1 %v1873_v41 }
 0x1f7   :  { %1574 = vmatpush1.bf16.msra.mxu1 %v1872_v44 }
 0x1f8   :  { %1575 = vmatprep.subr.bf16.mxu1 %v1881_v45 }
 0x1fb   :  { %1576 = vmatpush1.bf16.msra.mxu1 %v1880_v49 }
 0x1fc   :  { %1577 = vmatprep.subr.bf16.mxu1 %v1889_v50 }
 0x1ff   :  { %1578 = vmatpush1.bf16.msra.mxu1 %v1888_v54 }
 0x200   :  { %1579 = vmatprep.subr.bf16.mxu1 %v1897_v55 }
 0x203   :  { %1580 = vmatpush1.bf16.msra.mxu1 %v1896_v56 }
 0x206   :  { %1598 = vmatmul.mubr.bf16.vlgmr.msra.gmra.mrb[16].mxu1 %v2631_v23  ;;  %v1096_v23 = vsub.s32 3, %v2174_v12 }
 0x208   :  { %v1097_v6 = vrot.slane %v1080_v57, %v1096_v23 }
 0x279   :  { %v1476_v60 = vpop.f32.mrb[4].mxu1 }
 0x27a   :  { %v1477_v52 = vadd.f32 %v1476_v60, %v1085_v58  ;;  %v1478_v61 = vpop.f32.mrb[5].mxu1 }
 0x27b   :  { %v1479_v62 = vadd.f32 %v1478_v61, %v1089_v59  ;;  %v1480_v0 = vpop.f32.mrb[6].mxu1 }
 0x27c   :  { %v1481_v2 = vpop.f32.mrb[7].mxu1 }
 0x27d   :  { %v1899_v3 = vpack.c.bf16 %v1479_v62, %v1477_v52 }
 0x27f   :  { %v1644_v13 = vrot.slane %v1899_v3, %v2183_v16 }
 0x299   :  { %v1517_v7 = vpop.f32.mrb[8].mxu1 }
 0x29a   :  { %v1518_v8 = vadd.f32 %v1517_v7, %v1093_v5  ;;  %v1519_v9 = vpop.f32.mrb[9].mxu1 }
 0x29b   :  { %v1520_v63 = vadd.f32 %v1519_v9, %v1097_v6  ;;  %v1521_v10 = vpop.f32.mrb[10].mxu1 }
 0x29c   :  { %v1522_v11 = vpop.f32.mrb[11].mxu1 }
 0x29d   :  { %v1900_v1 = vpack.c.bf16 %v1520_v63, %v1518_v8 }
 0x29f   :  { %v1651_v14 = vrot.slane %v1900_v1, %v2183_v16 }
 0x2a1   :  { %v1666_v15 = vcombine.low %v1644_v13, %v1651_v14 }
 0x2a3   :  { %v1674_v41 = vrot.slane %v1666_v15, %v2183_v16 }
 0x2b9   :  { %v1558_v21 = vpop.f32.mrb[12].mxu1 }
 0x2ba   :  { %v1559_v22 = vadd.f32 %v1558_v21, %v1101_v19  ;;  %v1560_v24 = vpop.f32.mrb[13].mxu1 }
 0x2bb   :  { %v1561_v25 = vadd.f32 %v1560_v24, %v1105_v20  ;;  %v1562_v26 = vpop.f32.mrb[14].mxu1 }
 0x2bc   :  { %v1563_v27 = vpop.f32.mrb[15].mxu1 }
 0x2bd   :  { %v1901_v28 = vpack.c.bf16 %v1561_v25, %v1559_v22 }
 0x2bf   :  { %v1658_v48 = vrot.slane %v1901_v28, %v2183_v16 }
 0x2d9   :  { %v1599_v33 = vpop.f32.mrb[16].mxu1 }
 0x2da   :  { %v1600_v34 = vadd.f32 %v1599_v33, %v1109_v31  ;;  %v1601_v35 = vpop.f32.mrb[17].mxu1 }
 0x2db   :  { %v1602_v36 = vadd.f32 %v1601_v35, %v1113_v32  ;;  %v1603_v37 = vpop.f32.mrb[18].mxu1 }
 0x2dc   :  { %v1604_v38 = vpop.f32.mrb[19].mxu1 }
 0x2dd   :  { %v1902_v39 = vpack.c.bf16 %v1602_v36, %v1600_v34 }
 0x2df   :  { %v1665_v12 = vrot.slane %v1902_v39, %v2183_v16 }
 0x2e1   :  { %v1667_v40 = vcombine.low %v1658_v48, %v1665_v12 }
 0x2e3   :  { %v1681_v42 = vrot.slane %v1667_v40, %v2183_v16 }
 0x2e5   :  { %v1682_v43 = vcombine.low %v1674_v41, %v1681_v42 }
 0x2e7   :  { %1699 = vst.msk [vmem:[%s2801_s7] sm:$0xff] %vm1698_vm0, %v1682_v43 }

// kernel: vae_forward.11
= control target key start
LH: loop header
LB: loop body
LE: loop exit
PB: predicated region body
PF: predicated region fallthrough
CT: control target
= control target key end

     0   :  { %v2002_v0 = vmov 0   ;;  %vm772_vm0 = vcmask 949248   ;;  %vm839_vm1 = vcmask 1041408   ;;  %vm1475_vm2 = vcmask 76800   ;;  %s2650_s1 = inlined_call_operand.vmem [shape: bf16[500,10], index: 1, kind: input, shape index: {}]   ;;  %s2651_s0 = inlined_call_operand.vmem [shape: bf16[338,500], index: 0, kind: input, shape index: {}]   ;;  %s2652_s2 = inlined_call_operand.vmem [shape: f32[1,10], index: 2, kind: input, shape index: {}]   ;;  %s2653_s3 = inlined_call_operand.vmem [shape: bf16[338,10], index: 3, kind: output, shape index: {}]  }
   0x1   :  { %843 = vmatprep.subr.bf16.mxu1 %v2002_v0  ;;  %1051 = vmatprep.subr.bf16.mxu0 %v2002_v0  ;;  %v1840_v1 = vld [vmem:[%s2650_s1] sm:$0xff]   ;;  %v1842_v3 = vld [vmem:[%s2650_s1 + $0x8] sm:$0xff]   ;;  %v1844_v5 = vld [vmem:[%s2650_s1 + $0x10] sm:$0xff]   ;;  %vm1518_vm3 = vcmask 73728  }
   0x2   :  { %v1841_v2 = vld [vmem:[%s2650_s1 + $0x80] sm:$0xff]   ;;  %844 = vmatpush1.bf16.msra.mxu1 %v1840_v1  ;;  %v1843_v4 = vld [vmem:[%s2650_s1 + $0x88] sm:$0xff]   ;;  %v1845_v6 = vld [vmem:[%s2650_s1 + $0x90] sm:$0xff]  }
   0x3   :  { %1052 = vmatpush1.bf16.msra.mxu0 %v1841_v2  ;;  %845 = vmatprep.subr.bf16.mxu1 %v2002_v0  ;;  %v1846_v7 = vld [vmem:[%s2650_s1 + $0x18] sm:$0xff]   ;;  %v1848_v9 = vld [vmem:[%s2650_s1 + $0x20] sm:$0xff]   ;;  %v1850_v11 = vld [vmem:[%s2650_s1 + $0x28] sm:$0xff]  }
   0x4   :  { %1053 = vmatprep.subr.bf16.mxu0 %v2002_v0  ;;  %v1847_v8 = vld [vmem:[%s2650_s1 + $0x98] sm:$0xff]   ;;  %v1849_v10 = vld [vmem:[%s2650_s1 + $0xa0] sm:$0xff]   ;;  %v1851_v12 = vld [vmem:[%s2650_s1 + $0xa8] sm:$0xff]  }
   0x5   :  { %v1852_v13 = vld [vmem:[%s2650_s1 + $0x30] sm:$0xff]   ;;  %v1854_v15 = vld [vmem:[%s2650_s1 + $0x38] sm:$0xff]   ;;  %v1856_v17 = vld [vmem:[%s2650_s1 + $0x40] sm:$0xff]  }
   0x6   :  { %846 = vmatpush1.bf16.msra.mxu1 %v1842_v3  ;;  %v1853_v14 = vld [vmem:[%s2650_s1 + $0xb0] sm:$0xff]   ;;  %v1855_v16 = vld [vmem:[%s2650_s1 + $0xb8] sm:$0xff]   ;;  %v1857_v18 = vld [vmem:[%s2650_s1 + $0xc0] sm:$0xff]  }
   0x7   :  { %1054 = vmatpush1.bf16.msra.mxu0 %v1843_v4  ;;  %847 = vmatprep.subr.bf16.mxu1 %v2002_v0  ;;  %v1874_v19 = vld [vmem:[%s2651_s0 + $0x4] ss:$16 sps:$4 sm:$0xff]   ;;  %v1858_v20 = vld [vmem:[%s2650_s1 + $0x48] sm:$0xff]   ;;  %v1862_v25 = vld [vmem:[%s2650_s1 + $0x58] sm:$0xff]  }
   0x8   :  { %1055 = vmatprep.subr.bf16.mxu0 %v2002_v0  ;;  %875 = vmatprep.mubr.bf16.mxu1 %v1874_v19  ;;  %v1877_v21 = vld [vmem:[%s2651_s0 + $0xc] ss:$16 sps:$4 sm:$0xff]   ;;  %v1860_v23 = vld [vmem:[%s2650_s1 + $0x50] sm:$0xff]   ;;  %v1864_v27 = vld [vmem:[%s2650_s1 + $0x60] sm:$0xff]  }
   0x9   :  { %v1859_v22 = vld [vmem:[%s2650_s1 + $0xc8] sm:$0xff]   ;;  %1645 = vmatprep.mubr.msk.bf16.mxu0 %vm772_vm0, %v1877_v21  ;;  %v1861_v24 = vld [vmem:[%s2650_s1 + $0xd0] sm:$0xff]   ;;  %v1863_v26 = vld [vmem:[%s2650_s1 + $0xd8] sm:$0xff]  }
   0xa   :  { %848 = vmatpush1.bf16.msra.mxu1 %v1844_v5  ;;  %v1865_v28 = vld [vmem:[%s2650_s1 + $0xe0] sm:$0xff]   ;;  %v1866_v29 = vld [vmem:[%s2650_s1 + $0x68] sm:$0xff]   ;;  %v1868_v31 = vld [vmem:[%s2650_s1 + $0x70] sm:$0xff]  }
   0xb   :  { %1056 = vmatpush1.bf16.msra.mxu0 %v1845_v6  ;;  %849 = vmatprep.subr.bf16.mxu1 %v2002_v0  ;;  %v1867_v30 = vld [vmem:[%s2650_s1 + $0xe8] sm:$0xff]   ;;  %v1869_v32 = vld [vmem:[%s2650_s1 + $0xf0] sm:$0xff]   ;;  %v1871_v33 = vld [vmem:[%s2650_s1 + $0xf8] ss:$0 sps:$4 sm:$0x33]  }
   0xc   :  { %1057 = vmatprep.subr.bf16.mxu0 %v2002_v0  ;;  %v1870_v34 = vld [vmem:[%s2650_s1 + $0x78] sm:$0xff]   ;;  %v841_v35 = vsel %vm839_vm1, %v1871_v33, 0  ;;  %v1872_v36 = vld [vmem:[%s2651_s0] ss:$16 sps:$4 sm:$0xff]   ;;  %v1878_v38 = vld [vmem:[%s2651_s0 + $0x24] ss:$16 sps:$4 sm:$0xff]  }
   0xd   :  { %v1875_v37 = vld [vmem:[%s2651_s0 + $0x8] ss:$16 sps:$4 sm:$0xff]   ;;  %v1880_v39 = vld [vmem:[%s2651_s0 + $0x2c] ss:$16 sps:$4 sm:$0xff]   ;;  %v1882_v40 = vld [vmem:[%s2651_s0 + $0x20] ss:$16 sps:$4 sm:$0xff]  }
   0xe   :  { %850 = vmatpush1.bf16.msra.mxu1 %v1846_v7  ;;  %v1883_v41 = vld [vmem:[%s2651_s0 + $0x28] ss:$16 sps:$4 sm:$0xff]   ;;  %v1884_v42 = vld [vmem:[%s2651_s0 + $0x44] ss:$16 sps:$4 sm:$0xff]   ;;  %v1886_v43 = vld [vmem:[%s2651_s0 + $0x4c] ss:$16 sps:$4 sm:$0xff]  }
   0xf   :  { %1058 = vmatpush1.bf16.msra.mxu0 %v1847_v8  ;;  %851 = vmatprep.subr.bf16.mxu1 %v2002_v0  ;;  %v1888_v44 = vld [vmem:[%s2651_s0 + $0x40] ss:$16 sps:$4 sm:$0xff]   ;;  %v1889_v45 = vld [vmem:[%s2651_s0 + $0x48] ss:$16 sps:$4 sm:$0xff]   ;;  %v1890_v46 = vld [vmem:[%s2651_s0 + $0x64] ss:$16 sps:$4 sm:$0xff]  }
  0x10   :  { %1059 = vmatprep.subr.bf16.mxu0 %v2002_v0  ;;  %v1892_v47 = vld [vmem:[%s2651_s0 + $0x6c] ss:$16 sps:$4 sm:$0xff]   ;;  %v1894_v48 = vld [vmem:[%s2651_s0 + $0x60] ss:$16 sps:$4 sm:$0xff]   ;;  %v1895_v49 = vld [vmem:[%s2651_s0 + $0x68] ss:$16 sps:$4 sm:$0xff]  }
  0x11   :  { %v1896_v50 = vld [vmem:[%s2651_s0 + $0x84] ss:$16 sps:$4 sm:$0xff]   ;;  %v1898_v51 = vld [vmem:[%s2651_s0 + $0x8c] ss:$16 sps:$4 sm:$0xff]   ;;  %v1900_v52 = vld [vmem:[%s2651_s0 + $0x80] ss:$16 sps:$4 sm:$0xff]  }
  0x12   :  { %852 = vmatpush1.bf16.msra.mxu1 %v1848_v9  ;;  %v1901_v53 = vld [vmem:[%s2651_s0 + $0x88] ss:$16 sps:$4 sm:$0xff]   ;;  %v1902_v54 = vld [vmem:[%s2651_s0 + $0xa4] ss:$16 sps:$4 sm:$0xff]   ;;  %v1904_v55 = vld [vmem:[%s2651_s0 + $0xac] ss:$16 sps:$4 sm:$0xff]  }
  0x13   :  { %1060 = vmatpush1.bf16.msra.mxu0 %v1849_v10  ;;  %853 = vmatprep.subr.bf16.mxu1 %v2002_v0  ;;  %v1906_v56 = vld [vmem:[%s2651_s0 + $0xa0] ss:$16 sps:$4 sm:$0xff]   ;;  %v1907_v57 = vld [vmem:[%s2651_s0 + $0xa8] ss:$16 sps:$4 sm:$0xff]   ;;  %v1908_v58 = vld [vmem:[%s2651_s0 + $0xc4] ss:$16 sps:$4 sm:$0xff]  }
  0x14   :  { %1061 = vmatprep.subr.bf16.mxu0 %v2002_v0  ;;  %v1910_v59 = vld [vmem:[%s2651_s0 + $0xcc] ss:$16 sps:$4 sm:$0xff]   ;;  %v1912_v60 = vld [vmem:[%s2651_s0 + $0xc0] ss:$16 sps:$4 sm:$0xff]   ;;  %v1913_v61 = vld [vmem:[%s2651_s0 + $0xc8] ss:$16 sps:$4 sm:$0xff]  }
  0x15   :  { %v1914_v62 = vld [vmem:[%s2651_s0 + $0xe4] ss:$16 sps:$4 sm:$0xff]   ;;  %v1916_v63 = vld [vmem:[%s2651_s0 + $0xec] ss:$16 sps:$4 sm:$0xff]   ;;  %v1919_v1 = vld [vmem:[%s2651_s0 + $0xe8] ss:$16 sps:$4 sm:$0xff]  }
  0x16   :  { %854 = vmatpush1.bf16.msra.mxu1 %v1850_v11  ;;  %v1920_v2 = vld [vmem:[%s2651_s0 + $0x104] ss:$16 sps:$4 sm:$0xff]   ;;  %v1922_v3 = vld [vmem:[%s2651_s0 + $0x10c] ss:$16 sps:$4 sm:$0xff]   ;;  %v1924_v4 = vld [vmem:[%s2651_s0 + $0x100] ss:$16 sps:$4 sm:$0xff]  }
  0x17   :  { %1062 = vmatpush1.bf16.msra.mxu0 %v1851_v12  ;;  %855 = vmatprep.subr.bf16.mxu1 %v2002_v0  ;;  %v1925_v5 = vld [vmem:[%s2651_s0 + $0x108] ss:$16 sps:$4 sm:$0xff]   ;;  %v1926_v6 = vld [vmem:[%s2651_s0 + $0x124] ss:$16 sps:$4 sm:$0xff]   ;;  %v1928_v7 = vld [vmem:[%s2651_s0 + $0x12c] ss:$16 sps:$4 sm:$0xff]  }
  0x18   :  { %1063 = vmatprep.subr.bf16.mxu0 %v2002_v0  ;;  %v1930_v8 = vld [vmem:[%s2651_s0 + $0x120] ss:$16 sps:$4 sm:$0xff]   ;;  %v1931_v9 = vld [vmem:[%s2651_s0 + $0x128] ss:$16 sps:$4 sm:$0xff]   ;;  %v1932_v10 = vld [vmem:[%s2651_s0 + $0x144] ss:$16 sps:$4 sm:$0xff]  }
  0x19   :  { %v1934_v11 = vld [vmem:[%s2651_s0 + $0x14c] ss:$16 sps:$4 sm:$0xff]   ;;  %v1936_v12 = vld [vmem:[%s2651_s0 + $0x140] ss:$16 sps:$4 sm:$0xff]   ;;  %v1949_v21 = vld [vmem:[%s2651_s0 + $0x188] ss:$16 sps:$4 sm:$0xff]  }
  0x1a   :  { %856 = vmatpush1.bf16.msra.mxu1 %v1852_v13  ;;  %v1937_v13 = vld [vmem:[%s2651_s0 + $0x148] ss:$16 sps:$4 sm:$0xff]   ;;  %v1946_v19 = vld [vmem:[%s2651_s0 + $0x18c] ss:$16 sps:$4 sm:$0xff]  }
  0x1b   :  { %1064 = vmatpush1.bf16.msra.mxu0 %v1853_v14  ;;  %857 = vmatprep.subr.bf16.mxu1 %v2002_v0  ;;  %v1938_v14 = vld [vmem:[%s2651_s0 + $0x164] ss:$16 sps:$4 sm:$0xff]   ;;  %v1967_v33 = vld [vmem:[%s2651_s0 + $0x1e8] ss:$16 sps:$4 sm:$0xff]  }
  0x1c   :  { %1065 = vmatprep.subr.bf16.mxu0 %v2002_v0 }
  0x1e   :  { %858 = vmatpush1.bf16.msra.mxu1 %v1854_v15  ;;  %v1940_v15 = vld [vmem:[%s2651_s0 + $0x16c] ss:$16 sps:$4 sm:$0xff]  }
  0x1f   :  { %1066 = vmatpush1.bf16.msra.mxu0 %v1855_v16  ;;  %859 = vmatprep.subr.bf16.mxu1 %v2002_v0  ;;  %v1942_v16 = vld [vmem:[%s2651_s0 + $0x160] ss:$16 sps:$4 sm:$0xff]  }
  0x20   :  { %1067 = vmatprep.subr.bf16.mxu0 %v2002_v0 }
  0x22   :  { %860 = vmatpush1.bf16.msra.mxu1 %v1856_v17  ;;  %v1943_v17 = vld [vmem:[%s2651_s0 + $0x168] ss:$16 sps:$4 sm:$0xff]  }
  0x23   :  { %1068 = vmatpush1.bf16.msra.mxu0 %v1857_v18  ;;  %861 = vmatprep.subr.bf16.mxu1 %v2002_v0  ;;  %v1944_v18 = vld [vmem:[%s2651_s0 + $0x184] ss:$16 sps:$4 sm:$0xff]  }
  0x24   :  { %1069 = vmatprep.subr.bf16.mxu0 %v2002_v0 }
  0x26   :  { %862 = vmatpush1.bf16.msra.mxu1 %v1858_v20  ;;  %v1948_v20 = vld [vmem:[%s2651_s0 + $0x180] ss:$16 sps:$4 sm:$0xff]  }
  0x27   :  { %1070 = vmatpush1.bf16.msra.mxu0 %v1859_v22  ;;  %863 = vmatprep.subr.bf16.mxu1 %v2002_v0  ;;  %v1950_v22 = vld [vmem:[%s2651_s0 + $0x1a4] ss:$16 sps:$4 sm:$0xff]  }
  0x28   :  { %1071 = vmatprep.subr.bf16.mxu0 %v2002_v0 }
  0x2a   :  { %864 = vmatpush1.bf16.msra.mxu1 %v1860_v23  ;;  %v1952_v23 = vld [vmem:[%s2651_s0 + $0x1ac] ss:$16 sps:$4 sm:$0xff]  }
  0x2b   :  { %1072 = vmatpush1.bf16.msra.mxu0 %v1861_v24  ;;  %865 = vmatprep.subr.bf16.mxu1 %v2002_v0  ;;  %v1954_v24 = vld [vmem:[%s2651_s0 + $0x1a0] ss:$16 sps:$4 sm:$0xff]  }
  0x2c   :  { %1073 = vmatprep.subr.bf16.mxu0 %v2002_v0 }
  0x2e   :  { %866 = vmatpush1.bf16.msra.mxu1 %v1862_v25  ;;  %v1955_v25 = vld [vmem:[%s2651_s0 + $0x1a8] ss:$16 sps:$4 sm:$0xff]  }
  0x2f   :  { %1074 = vmatpush1.bf16.msra.mxu0 %v1863_v26  ;;  %867 = vmatprep.subr.bf16.mxu1 %v2002_v0  ;;  %v1956_v26 = vld [vmem:[%s2651_s0 + $0x1c4] ss:$16 sps:$4 sm:$0xff]  }
  0x30   :  { %1075 = vmatprep.subr.bf16.mxu0 %v2002_v0 }
  0x32   :  { %868 = vmatpush1.bf16.msra.mxu1 %v1864_v27  ;;  %v1958_v27 = vld [vmem:[%s2651_s0 + $0x1cc] ss:$16 sps:$4 sm:$0xff]  }
  0x33   :  { %1076 = vmatpush1.bf16.msra.mxu0 %v1865_v28  ;;  %869 = vmatprep.subr.bf16.mxu1 %v2002_v0  ;;  %v1960_v28 = vld [vmem:[%s2651_s0 + $0x1c0] ss:$16 sps:$4 sm:$0xff]  }
  0x34   :  { %1077 = vmatprep.subr.bf16.mxu0 %v2002_v0 }
  0x36   :  { %870 = vmatpush1.bf16.msra.mxu1 %v1866_v29  ;;  %v1961_v29 = vld [vmem:[%s2651_s0 + $0x1c8] ss:$16 sps:$4 sm:$0xff]  }
  0x37   :  { %1078 = vmatpush1.bf16.msra.mxu0 %v1867_v30  ;;  %871 = vmatprep.subr.bf16.mxu1 %v2002_v0  ;;  %v1962_v30 = vld [vmem:[%s2651_s0 + $0x1e4] ss:$16 sps:$4 sm:$0xff]  }
  0x38   :  { %1079 = vmatprep.subr.bf16.mxu0 %v2002_v0 }
  0x3a   :  { %872 = vmatpush1.bf16.msra.mxu1 %v1868_v31  ;;  %v1964_v31 = vld [vmem:[%s2651_s0 + $0x1ec] ss:$16 sps:$4 sm:$0xff]  }
  0x3b   :  { %1080 = vmatpush1.bf16.msra.mxu0 %v1869_v32  ;;  %873 = vmatprep.subr.bf16.mxu1 %v2002_v0  ;;  %v1966_v32 = vld [vmem:[%s2651_s0 + $0x1e0] ss:$16 sps:$4 sm:$0xff]  }
  0x3c   :  { %1081 = vmatprep.subr.bf16.mxu0 %v2002_v0  ;;  %v1918_v0 = vld [vmem:[%s2651_s0 + $0xe0] ss:$16 sps:$4 sm:$0xff]  }
  0x3e   :  { %874 = vmatpush1.bf16.msra.mxu1 %v1870_v34  ;;  %v1968_v34 = vld [vmem:[%s2651_s0 + $0x204] ss:$16 sps:$4 sm:$0xff]  }
  0x3f   :  { %1082 = vmatpush1.bf16.msra.mxu0 %v841_v35  ;;  %v1970_v35 = vld [vmem:[%s2651_s0 + $0x20c] ss:$16 sps:$4 sm:$0xff]  }
  0x41   :  { %876 = vmatmul.mubr.bf16.vlgmr.msra.gmra.mrb[0].mxu1 %v1872_v36  ;;  %v1972_v36 = vld [vmem:[%s2651_s0 + $0x200] ss:$16 sps:$4 sm:$0xff]  }
  0x42   :  { %1084 = vmatmul.mubr.bf16.vlgmr.msra.gmra.mrb[0].mxu0 %v1875_v37  ;;  %883 = vmatprep.mubr.bf16.mxu1 %v1878_v38  ;;  %v1973_v37 = vld [vmem:[%s2651_s0 + $0x208] ss:$16 sps:$4 sm:$0xff]   ;;  %v1974_v38 = vld [vmem:[%s2651_s0 + $0x224] ss:$16 sps:$4 sm:$0xff]  }
  0x43   :  { %1646 = vmatprep.mubr.msk.bf16.mxu0 %vm772_vm0, %v1880_v39  ;;  %v1976_v39 = vld [vmem:[%s2651_s0 + $0x22c] ss:$16 sps:$4 sm:$0xff]  }
  0x49   :  { %884 = vmatmul.mubr.bf16.gmra.mrb[4].mxu1 %v1882_v40  ;;  %v1978_v40 = vld [vmem:[%s2651_s0 + $0x220] ss:$16 sps:$4 sm:$0xff]  }
  0x4a   :  { %1092 = vmatmul.mubr.bf16.gmra.mrb[4].mxu0 %v1883_v41  ;;  %891 = vmatprep.mubr.bf16.mxu1 %v1884_v42  ;;  %v1979_v41 = vld [vmem:[%s2651_s0 + $0x228] ss:$16 sps:$4 sm:$0xff]   ;;  %v1980_v42 = vld [vmem:[%s2651_s0 + $0x244] ss:$16 sps:$4 sm:$0xff]  }
  0x4b   :  { %1647 = vmatprep.mubr.msk.bf16.mxu0 %vm772_vm0, %v1886_v43  ;;  %v1982_v43 = vld [vmem:[%s2651_s0 + $0x24c] ss:$16 sps:$4 sm:$0xff]  }
  0x51   :  { %892 = vmatmul.mubr.bf16.gmra.mrb[8].mxu1 %v1888_v44  ;;  %v1984_v44 = vld [vmem:[%s2651_s0 + $0x240] ss:$16 sps:$4 sm:$0xff]  }
  0x52   :  { %1100 = vmatmul.mubr.bf16.gmra.mrb[8].mxu0 %v1889_v45  ;;  %899 = vmatprep.mubr.bf16.mxu1 %v1890_v46  ;;  %v1985_v45 = vld [vmem:[%s2651_s0 + $0x248] ss:$16 sps:$4 sm:$0xff]   ;;  %v1986_v46 = vld [vmem:[%s2651_s0 + $0x264] ss:$16 sps:$4 sm:$0xff]  }
  0x53   :  { %1648 = vmatprep.mubr.msk.bf16.mxu0 %vm772_vm0, %v1892_v47  ;;  %v1988_v47 = vld [vmem:[%s2651_s0 + $0x26c] ss:$16 sps:$4 sm:$0xff]  }
  0x59   :  { %900 = vmatmul.mubr.bf16.gmra.mrb[12].mxu1 %v1894_v48  ;;  %v1990_v48 = vld [vmem:[%s2651_s0 + $0x260] ss:$16 sps:$4 sm:$0xff]  }
  0x5a   :  { %1108 = vmatmul.mubr.bf16.gmra.mrb[12].mxu0 %v1895_v49  ;;  %907 = vmatprep.mubr.bf16.mxu1 %v1896_v50  ;;  %v1991_v49 = vld [vmem:[%s2651_s0 + $0x268] ss:$16 sps:$4 sm:$0xff]   ;;  %v1992_v50 = vld [vmem:[%s2651_s0 + $0x284] ss:$16 sps:$4 sm:$0xff]  }
  0x5b   :  { %1649 = vmatprep.mubr.msk.bf16.mxu0 %vm772_vm0, %v1898_v51  ;;  %v1994_v51 = vld [vmem:[%s2651_s0 + $0x28c] ss:$16 sps:$4 sm:$0xff]  }
  0x61   :  { %908 = vmatmul.mubr.bf16.gmra.mrb[16].mxu1 %v1900_v52  ;;  %v99_v52 = vld [vmem:[%s2651_s0 + $0x2a0] sm:$0x11] }
  0x62   :  { %1116 = vmatmul.mubr.bf16.gmra.mrb[16].mxu0 %v1901_v53  ;;  %915 = vmatprep.mubr.bf16.mxu1 %v1902_v54  ;;  %v100_v53 = vld [vmem:[%s2651_s0 + $0x2a8] sm:$0x11]  ;;  %v1996_v54 = vld [vmem:[%s2651_s0 + $0x280] ss:$16 sps:$4 sm:$0xff]  }
  0x63   :  { %1650 = vmatprep.mubr.msk.bf16.mxu0 %vm772_vm0, %v1904_v55  ;;  %v1997_v55 = vld [vmem:[%s2651_s0 + $0x288] ss:$16 sps:$4 sm:$0xff]  }
  0x69   :  { %916 = vmatmul.mubr.bf16.gmra.mrb[20].mxu1 %v1906_v56  ;;  %v1610_v56 = vcombine.high %v99_v52, %v99_v52 }
  0x6a   :  { %1124 = vmatmul.mubr.bf16.gmra.mrb[20].mxu0 %v1907_v57  ;;  %923 = vmatprep.mubr.bf16.mxu1 %v1908_v58  ;;  %v1612_v57 = vcombine.high %v100_v53, %v100_v53  ;;  %v1609_v58 = vcombine.low %v99_v52, %v99_v52 }
  0x6b   :  { %1651 = vmatprep.mubr.msk.bf16.mxu0 %vm772_vm0, %v1910_v59  ;;  %v1611_v59 = vcombine.low %v100_v53, %v100_v53 }
  0x71   :  { %924 = vmatmul.mubr.bf16.gmra.mrb[24].mxu1 %v1912_v60  ;;  %v2434_v60 = vld [vmem:[%s2652_s2] ss:$0 sm:$0xff] }
  0x72   :  { %1132 = vmatmul.mubr.bf16.gmra.mrb[24].mxu0 %v1913_v61  ;;  %931 = vmatprep.mubr.bf16.mxu1 %v1914_v62 }
  0x73   :  { %1652 = vmatprep.mubr.msk.bf16.mxu0 %vm772_vm0, %v1916_v63 }
  0x79   :  { %932 = vmatmul.mubr.bf16.gmra.mrb[28].mxu1 %v1918_v0 }
  0x7a   :  { %1140 = vmatmul.mubr.bf16.gmra.mrb[28].mxu0 %v1919_v1  ;;  %939 = vmatprep.mubr.bf16.mxu1 %v1920_v2 }
  0x7b   :  { %1653 = vmatprep.mubr.msk.bf16.mxu0 %vm772_vm0, %v1922_v3 }
  0x81   :  { %940 = vmatmul.mubr.bf16.gmra.mrb[32].mxu1 %v1924_v4 }
  0x82   :  { %1148 = vmatmul.mubr.bf16.gmra.mrb[32].mxu0 %v1925_v5  ;;  %947 = vmatprep.mubr.bf16.mxu1 %v1926_v6 }
  0x83   :  { %1654 = vmatprep.mubr.msk.bf16.mxu0 %vm772_vm0, %v1928_v7 }
  0x89   :  { %948 = vmatmul.mubr.bf16.gmra.mrb[36].mxu1 %v1930_v8 }
  0x8a   :  { %1156 = vmatmul.mubr.bf16.gmra.mrb[36].mxu0 %v1931_v9  ;;  %955 = vmatprep.mubr.bf16.mxu1 %v1932_v10 }
  0x8b   :  { %1655 = vmatprep.mubr.msk.bf16.mxu0 %vm772_vm0, %v1934_v11 }
  0x91   :  { %956 = vmatmul.mubr.bf16.gmra.mrb[40].mxu1 %v1936_v12 }
  0x92   :  { %1164 = vmatmul.mubr.bf16.gmra.mrb[40].mxu0 %v1937_v13  ;;  %963 = vmatprep.mubr.bf16.mxu1 %v1938_v14 }
  0x93   :  { %1656 = vmatprep.mubr.msk.bf16.mxu0 %vm772_vm0, %v1940_v15 }
  0x99   :  { %964 = vmatmul.mubr.bf16.gmra.mrb[44].mxu1 %v1942_v16 }
  0x9a   :  { %1172 = vmatmul.mubr.bf16.gmra.mrb[44].mxu0 %v1943_v17  ;;  %971 = vmatprep.mubr.bf16.mxu1 %v1944_v18 }
  0x9b   :  { %1657 = vmatprep.mubr.msk.bf16.mxu0 %vm772_vm0, %v1946_v19 }
  0xa1   :  { %972 = vmatmul.mubr.bf16.gmra.mrb[48].mxu1 %v1948_v20 }
  0xa2   :  { %1180 = vmatmul.mubr.bf16.gmra.mrb[48].mxu0 %v1949_v21  ;;  %979 = vmatprep.mubr.bf16.mxu1 %v1950_v22 }
  0xa3   :  { %1658 = vmatprep.mubr.msk.bf16.mxu0 %vm772_vm0, %v1952_v23 }
  0xa9   :  { %980 = vmatmul.mubr.bf16.gmra.mrb[52].mxu1 %v1954_v24 }
  0xaa   :  { %1188 = vmatmul.mubr.bf16.gmra.mrb[52].mxu0 %v1955_v25  ;;  %987 = vmatprep.mubr.bf16.mxu1 %v1956_v26 }
  0xab   :  { %1659 = vmatprep.mubr.msk.bf16.mxu0 %vm772_vm0, %v1958_v27 }
  0xb1   :  { %988 = vmatmul.mubr.bf16.gmra.mrb[56].mxu1 %v1960_v28 }
  0xb2   :  { %1196 = vmatmul.mubr.bf16.gmra.mrb[56].mxu0 %v1961_v29  ;;  %995 = vmatprep.mubr.bf16.mxu1 %v1962_v30 }
  0xb3   :  { %1660 = vmatprep.mubr.msk.bf16.mxu0 %vm772_vm0, %v1964_v31 }
  0xb9   :  { %996 = vmatmul.mubr.bf16.gmra.mrb[60].mxu1 %v1966_v32 }
  0xba   :  { %1204 = vmatmul.mubr.bf16.gmra.mrb[60].mxu0 %v1967_v33  ;;  %1003 = vmatprep.mubr.bf16.mxu1 %v1968_v34 }
  0xbb   :  { %1661 = vmatprep.mubr.msk.bf16.mxu0 %vm772_vm0, %v1970_v35 }
  0xc1   :  { %1004 = vmatmul.mubr.bf16.gmra.mrb[64].mxu1 %v1972_v36 }
  0xc2   :  { %1212 = vmatmul.mubr.bf16.gmra.mrb[64].mxu0 %v1973_v37  ;;  %1011 = vmatprep.mubr.bf16.mxu1 %v1974_v38 }
  0xc3   :  { %1662 = vmatprep.mubr.msk.bf16.mxu0 %vm772_vm0, %v1976_v39 }
  0xc9   :  { %1012 = vmatmul.mubr.bf16.gmra.mrb[68].mxu1 %v1978_v40 }
  0xca   :  { %1220 = vmatmul.mubr.bf16.gmra.mrb[68].mxu0 %v1979_v41  ;;  %1019 = vmatprep.mubr.bf16.mxu1 %v1980_v42 }
  0xcb   :  { %1663 = vmatprep.mubr.msk.bf16.mxu0 %vm772_vm0, %v1982_v43 }
  0xd1   :  { %1020 = vmatmul.mubr.bf16.gmra.mrb[72].mxu1 %v1984_v44 }
  0xd2   :  { %1228 = vmatmul.mubr.bf16.gmra.mrb[72].mxu0 %v1985_v45  ;;  %1027 = vmatprep.mubr.bf16.mxu1 %v1986_v46 }
  0xd3   :  { %1664 = vmatprep.mubr.msk.bf16.mxu0 %vm772_vm0, %v1988_v47 }
  0xd9   :  { %1028 = vmatmul.mubr.bf16.gmra.mrb[76].mxu1 %v1990_v48 }
  0xda   :  { %1236 = vmatmul.mubr.bf16.gmra.mrb[76].mxu0 %v1991_v49  ;;  %1035 = vmatprep.mubr.bf16.mxu1 %v1992_v50 }
  0xdb   :  { %1665 = vmatprep.mubr.msk.bf16.mxu0 %vm772_vm0, %v1994_v51 }
  0xe1   :  { %1036 = vmatmul.mubr.bf16.gmra.mrb[80].mxu1 %v1996_v54 }
  0xe2   :  { %1244 = vmatmul.mubr.bf16.gmra.mrb[80].mxu0 %v1997_v55  ;;  %1043 = vmatprep.mubr.bf16.mxu1 %v1610_v56 }
  0xe3   :  { %1666 = vmatprep.mubr.msk.bf16.mxu0 %vm772_vm0, %v1612_v57 }
  0xe9   :  { %1044 = vmatmul.mubr.bf16.gmra.mrb[84].mxu1 %v1609_v58 }
  0xea   :  { %1252 = vmatmul.mubr.bf16.gmra.mrb[84].mxu0 %v1611_v59 }
 0x114   :  { %v877_v61 = vpop.f32.mrb[0].mxu1 }
 0x115   :  { %v878_v62 = vadd.f32 %v2434_v60, %v877_v61  ;;  %v1085_v63 = vpop.f32.mrb[0].mxu0  ;;  %v879_v0 = vpop.f32.mrb[1].mxu1 }
 0x116   :  { %v1087_v1 = vpop.f32.mrb[1].mxu0  ;;  %v880_v2 = vpop.f32.mrb[2].mxu1 }
 0x117   :  { %v1086_v3 = vadd.f32 %v1085_v63, %v878_v62  ;;  %v881_v4 = vadd.f32 %v2434_v60, %v880_v2  ;;  %v1088_v5 = vpop.f32.mrb[2].mxu0  ;;  %v882_v6 = vpop.f32.mrb[3].mxu1 }
 0x118   :  { %v1090_v7 = vpop.f32.mrb[3].mxu0 }
 0x119   :  { %v1259_v8 = vmax.f32 %v1086_v3, 0.0  ;;  %v1089_v9 = vadd.f32 %v1088_v5, %v881_v4 }
 0x11b   :  { %v1710_v10 = vpack.c.bf16 %v1259_v8, %v1259_v8  ;;  %v1260_v11 = vmax.f32 %v1089_v9, 0.0 }
 0x11c   :  { %v885_v12 = vpop.f32.mrb[4].mxu1 }
 0x11d   :  { %1476 = vst.msk [vmem:[%s2653_s3] sm:$0xf] %vm1475_vm2, %v1710_v10  ;;  %v1711_v13 = vpack.c.bf16 %v1260_v11, %v1260_v11  ;;  %v886_v14 = vadd.f32 %v2434_v60, %v885_v12  ;;  %v1093_v15 = vpop.f32.mrb[4].mxu0  ;;  %v887_v16 = vpop.f32.mrb[5].mxu1 }
 0x11e   :  { %v1095_v17 = vpop.f32.mrb[5].mxu0  ;;  %v888_v18 = vpop.f32.mrb[6].mxu1 }
 0x11f   :  { %1477 = vst.msk [vmem:[%s2653_s3 + $0x4] sm:$0xf] %vm1475_vm2, %v1711_v13  ;;  %v1094_v19 = vadd.f32 %v1093_v15, %v886_v14  ;;  %v889_v20 = vadd.f32 %v2434_v60, %v888_v18  ;;  %v1096_v21 = vpop.f32.mrb[6].mxu0  ;;  %v890_v22 = vpop.f32.mrb[7].mxu1 }
 0x120   :  { %v1098_v23 = vpop.f32.mrb[7].mxu0 }
 0x121   :  { %v1261_v24 = vmax.f32 %v1094_v19, 0.0  ;;  %v1097_v25 = vadd.f32 %v1096_v21, %v889_v20 }
 0x123   :  { %v1712_v26 = vpack.c.bf16 %v1261_v24, %v1261_v24  ;;  %v1262_v27 = vmax.f32 %v1097_v25, 0.0 }
 0x124   :  { %v893_v28 = vpop.f32.mrb[8].mxu1 }
 0x125   :  { %1478 = vst.msk [vmem:[%s2653_s3 + $0x8] sm:$0xf] %vm1475_vm2, %v1712_v26  ;;  %v1713_v29 = vpack.c.bf16 %v1262_v27, %v1262_v27  ;;  %v894_v30 = vadd.f32 %v2434_v60, %v893_v28  ;;  %v1101_v31 = vpop.f32.mrb[8].mxu0  ;;  %v895_v32 = vpop.f32.mrb[9].mxu1 }
 0x126   :  { %v1103_v33 = vpop.f32.mrb[9].mxu0  ;;  %v896_v34 = vpop.f32.mrb[10].mxu1 }
 0x127   :  { %1479 = vst.msk [vmem:[%s2653_s3 + $0xc] sm:$0xf] %vm1475_vm2, %v1713_v29  ;;  %v1102_v35 = vadd.f32 %v1101_v31, %v894_v30  ;;  %v897_v36 = vadd.f32 %v2434_v60, %v896_v34  ;;  %v1104_v37 = vpop.f32.mrb[10].mxu0  ;;  %v898_v38 = vpop.f32.mrb[11].mxu1 }
 0x128   :  { %v1106_v39 = vpop.f32.mrb[11].mxu0 }
 0x129   :  { %v1263_v40 = vmax.f32 %v1102_v35, 0.0  ;;  %v1105_v41 = vadd.f32 %v1104_v37, %v897_v36 }
 0x12b   :  { %v1714_v42 = vpack.c.bf16 %v1263_v40, %v1263_v40  ;;  %v1264_v43 = vmax.f32 %v1105_v41, 0.0 }
 0x12c   :  { %v901_v44 = vpop.f32.mrb[12].mxu1 }
 0x12d   :  { %1480 = vst.msk [vmem:[%s2653_s3 + $0x10] sm:$0xf] %vm1475_vm2, %v1714_v42  ;;  %v1715_v45 = vpack.c.bf16 %v1264_v43, %v1264_v43  ;;  %v902_v46 = vadd.f32 %v2434_v60, %v901_v44  ;;  %v1109_v47 = vpop.f32.mrb[12].mxu0  ;;  %v903_v48 = vpop.f32.mrb[13].mxu1 }
 0x12e   :  { %v1111_v49 = vpop.f32.mrb[13].mxu0  ;;  %v904_v50 = vpop.f32.mrb[14].mxu1 }
 0x12f   :  { %1481 = vst.msk [vmem:[%s2653_s3 + $0x14] sm:$0xf] %vm1475_vm2, %v1715_v45  ;;  %v1110_v51 = vadd.f32 %v1109_v47, %v902_v46  ;;  %v905_v52 = vadd.f32 %v2434_v60, %v904_v50  ;;  %v1112_v53 = vpop.f32.mrb[14].mxu0  ;;  %v906_v54 = vpop.f32.mrb[15].mxu1 }
 0x130   :  { %v1114_v55 = vpop.f32.mrb[15].mxu0 }
 0x131   :  { %v1265_v56 = vmax.f32 %v1110_v51, 0.0  ;;  %v1113_v57 = vadd.f32 %v1112_v53, %v905_v52 }
 0x133   :  { %v1716_v58 = vpack.c.bf16 %v1265_v56, %v1265_v56  ;;  %v1266_v59 = vmax.f32 %v1113_v57, 0.0 }
 0x134   :  { %v909_v61 = vpop.f32.mrb[16].mxu1 }
 0x135   :  { %1482 = vst.msk [vmem:[%s2653_s3 + $0x18] sm:$0xf] %vm1475_vm2, %v1716_v58  ;;  %v1717_v62 = vpack.c.bf16 %v1266_v59, %v1266_v59  ;;  %v910_v63 = vadd.f32 %v2434_v60, %v909_v61  ;;  %v1117_v0 = vpop.f32.mrb[16].mxu0  ;;  %v911_v1 = vpop.f32.mrb[17].mxu1 }
 0x136   :  { %v1119_v2 = vpop.f32.mrb[17].mxu0  ;;  %v912_v3 = vpop.f32.mrb[18].mxu1 }
 0x137   :  { %1483 = vst.msk [vmem:[%s2653_s3 + $0x1c] sm:$0xf] %vm1475_vm2, %v1717_v62  ;;  %v1118_v4 = vadd.f32 %v1117_v0, %v910_v63  ;;  %v913_v5 = vadd.f32 %v2434_v60, %v912_v3  ;;  %v1120_v6 = vpop.f32.mrb[18].mxu0  ;;  %v914_v7 = vpop.f32.mrb[19].mxu1 }
 0x138   :  { %v1122_v8 = vpop.f32.mrb[19].mxu0 }
 0x139   :  { %v1267_v9 = vmax.f32 %v1118_v4, 0.0  ;;  %v1121_v10 = vadd.f32 %v1120_v6, %v913_v5 }
 0x13b   :  { %v1718_v11 = vpack.c.bf16 %v1267_v9, %v1267_v9  ;;  %v1268_v12 = vmax.f32 %v1121_v10, 0.0 }
 0x13c   :  { %v917_v13 = vpop.f32.mrb[20].mxu1 }
 0x13d   :  { %1484 = vst.msk [vmem:[%s2653_s3 + $0x20] sm:$0xf] %vm1475_vm2, %v1718_v11  ;;  %v1719_v14 = vpack.c.bf16 %v1268_v12, %v1268_v12  ;;  %v918_v15 = vadd.f32 %v2434_v60, %v917_v13  ;;  %v1125_v16 = vpop.f32.mrb[20].mxu0  ;;  %v919_v17 = vpop.f32.mrb[21].mxu1 }
 0x13e   :  { %v1127_v18 = vpop.f32.mrb[21].mxu0  ;;  %v920_v19 = vpop.f32.mrb[22].mxu1 }
 0x13f   :  { %1485 = vst.msk [vmem:[%s2653_s3 + $0x24] sm:$0xf] %vm1475_vm2, %v1719_v14  ;;  %v1126_v20 = vadd.f32 %v1125_v16, %v918_v15  ;;  %v921_v21 = vadd.f32 %v2434_v60, %v920_v19  ;;  %v1128_v22 = vpop.f32.mrb[22].mxu0  ;;  %v922_v23 = vpop.f32.mrb[23].mxu1 }
 0x140   :  { %v1130_v24 = vpop.f32.mrb[23].mxu0 }
 0x141   :  { %v1269_v25 = vmax.f32 %v1126_v20, 0.0  ;;  %v1129_v26 = vadd.f32 %v1128_v22, %v921_v21 }
 0x143   :  { %v1720_v27 = vpack.c.bf16 %v1269_v25, %v1269_v25  ;;  %v1270_v28 = vmax.f32 %v1129_v26, 0.0 }
 0x144   :  { %v925_v29 = vpop.f32.mrb[24].mxu1 }
 0x145   :  { %1486 = vst.msk [vmem:[%s2653_s3 + $0x28] sm:$0xf] %vm1475_vm2, %v1720_v27  ;;  %v1721_v30 = vpack.c.bf16 %v1270_v28, %v1270_v28  ;;  %v926_v31 = vadd.f32 %v2434_v60, %v925_v29  ;;  %v1133_v32 = vpop.f32.mrb[24].mxu0  ;;  %v927_v33 = vpop.f32.mrb[25].mxu1 }
 0x146   :  { %v1135_v34 = vpop.f32.mrb[25].mxu0  ;;  %v928_v35 = vpop.f32.mrb[26].mxu1 }
 0x147   :  { %1487 = vst.msk [vmem:[%s2653_s3 + $0x2c] sm:$0xf] %vm1475_vm2, %v1721_v30  ;;  %v1134_v36 = vadd.f32 %v1133_v32, %v926_v31  ;;  %v929_v37 = vadd.f32 %v2434_v60, %v928_v35  ;;  %v1136_v38 = vpop.f32.mrb[26].mxu0  ;;  %v930_v39 = vpop.f32.mrb[27].mxu1 }
 0x148   :  { %v1138_v40 = vpop.f32.mrb[27].mxu0 }
 0x149   :  { %v1271_v41 = vmax.f32 %v1134_v36, 0.0  ;;  %v1137_v42 = vadd.f32 %v1136_v38, %v929_v37 }
 0x14b   :  { %v1722_v43 = vpack.c.bf16 %v1271_v41, %v1271_v41  ;;  %v1272_v44 = vmax.f32 %v1137_v42, 0.0 }
 0x14c   :  { %v933_v45 = vpop.f32.mrb[28].mxu1 }
 0x14d   :  { %1488 = vst.msk [vmem:[%s2653_s3 + $0x30] sm:$0xf] %vm1475_vm2, %v1722_v43  ;;  %v1723_v46 = vpack.c.bf16 %v1272_v44, %v1272_v44  ;;  %v934_v47 = vadd.f32 %v2434_v60, %v933_v45  ;;  %v1141_v48 = vpop.f32.mrb[28].mxu0  ;;  %v935_v49 = vpop.f32.mrb[29].mxu1 }
 0x14e   :  { %v1143_v50 = vpop.f32.mrb[29].mxu0  ;;  %v936_v51 = vpop.f32.mrb[30].mxu1 }
 0x14f   :  { %1489 = vst.msk [vmem:[%s2653_s3 + $0x34] sm:$0xf] %vm1475_vm2, %v1723_v46  ;;  %v1142_v52 = vadd.f32 %v1141_v48, %v934_v47  ;;  %v937_v53 = vadd.f32 %v2434_v60, %v936_v51  ;;  %v1144_v54 = vpop.f32.mrb[30].mxu0  ;;  %v938_v55 = vpop.f32.mrb[31].mxu1 }
 0x150   :  { %v1146_v56 = vpop.f32.mrb[31].mxu0 }
 0x151   :  { %v1273_v57 = vmax.f32 %v1142_v52, 0.0  ;;  %v1145_v58 = vadd.f32 %v1144_v54, %v937_v53 }
 0x153   :  { %v1724_v59 = vpack.c.bf16 %v1273_v57, %v1273_v57  ;;  %v1274_v61 = vmax.f32 %v1145_v58, 0.0 }
 0x154   :  { %v941_v62 = vpop.f32.mrb[32].mxu1 }
 0x155   :  { %1490 = vst.msk [vmem:[%s2653_s3 + $0x38] sm:$0xf] %vm1475_vm2, %v1724_v59  ;;  %v1725_v63 = vpack.c.bf16 %v1274_v61, %v1274_v61  ;;  %v942_v0 = vadd.f32 %v2434_v60, %v941_v62  ;;  %v1149_v1 = vpop.f32.mrb[32].mxu0  ;;  %v943_v2 = vpop.f32.mrb[33].mxu1 }
 0x156   :  { %v1151_v3 = vpop.f32.mrb[33].mxu0  ;;  %v944_v4 = vpop.f32.mrb[34].mxu1 }
 0x157   :  { %1491 = vst.msk [vmem:[%s2653_s3 + $0x3c] sm:$0xf] %vm1475_vm2, %v1725_v63  ;;  %v1150_v5 = vadd.f32 %v1149_v1, %v942_v0  ;;  %v945_v6 = vadd.f32 %v2434_v60, %v944_v4  ;;  %v1152_v7 = vpop.f32.mrb[34].mxu0  ;;  %v946_v8 = vpop.f32.mrb[35].mxu1 }
 0x158   :  { %v1154_v9 = vpop.f32.mrb[35].mxu0 }
 0x159   :  { %v1275_v10 = vmax.f32 %v1150_v5, 0.0  ;;  %v1153_v11 = vadd.f32 %v1152_v7, %v945_v6 }
 0x15b   :  { %v1726_v12 = vpack.c.bf16 %v1275_v10, %v1275_v10  ;;  %v1276_v13 = vmax.f32 %v1153_v11, 0.0 }
 0x15c   :  { %v949_v14 = vpop.f32.mrb[36].mxu1 }
 0x15d   :  { %1492 = vst.msk [vmem:[%s2653_s3 + $0x40] sm:$0xf] %vm1475_vm2, %v1726_v12  ;;  %v1727_v15 = vpack.c.bf16 %v1276_v13, %v1276_v13  ;;  %v950_v16 = vadd.f32 %v2434_v60, %v949_v14  ;;  %v1157_v17 = vpop.f32.mrb[36].mxu0  ;;  %v951_v18 = vpop.f32.mrb[37].mxu1 }
 0x15e   :  { %v1159_v19 = vpop.f32.mrb[37].mxu0  ;;  %v952_v20 = vpop.f32.mrb[38].mxu1 }
 0x15f   :  { %1493 = vst.msk [vmem:[%s2653_s3 + $0x44] sm:$0xf] %vm1475_vm2, %v1727_v15  ;;  %v1158_v21 = vadd.f32 %v1157_v17, %v950_v16  ;;  %v953_v22 = vadd.f32 %v2434_v60, %v952_v20  ;;  %v1160_v23 = vpop.f32.mrb[38].mxu0  ;;  %v954_v24 = vpop.f32.mrb[39].mxu1 }
 0x160   :  { %v1162_v25 = vpop.f32.mrb[39].mxu0 }
 0x161   :  { %v1277_v26 = vmax.f32 %v1158_v21, 0.0  ;;  %v1161_v27 = vadd.f32 %v1160_v23, %v953_v22 }
 0x163   :  { %v1728_v28 = vpack.c.bf16 %v1277_v26, %v1277_v26  ;;  %v1278_v29 = vmax.f32 %v1161_v27, 0.0 }
 0x164   :  { %v957_v30 = vpop.f32.mrb[40].mxu1 }
 0x165   :  { %1494 = vst.msk [vmem:[%s2653_s3 + $0x48] sm:$0xf] %vm1475_vm2, %v1728_v28  ;;  %v1729_v31 = vpack.c.bf16 %v1278_v29, %v1278_v29  ;;  %v958_v32 = vadd.f32 %v2434_v60, %v957_v30  ;;  %v1165_v33 = vpop.f32.mrb[40].mxu0  ;;  %v959_v34 = vpop.f32.mrb[41].mxu1 }
 0x166   :  { %v1167_v35 = vpop.f32.mrb[41].mxu0  ;;  %v960_v36 = vpop.f32.mrb[42].mxu1 }
 0x167   :  { %1495 = vst.msk [vmem:[%s2653_s3 + $0x4c] sm:$0xf] %vm1475_vm2, %v1729_v31  ;;  %v1166_v37 = vadd.f32 %v1165_v33, %v958_v32  ;;  %v961_v38 = vadd.f32 %v2434_v60, %v960_v36  ;;  %v1168_v39 = vpop.f32.mrb[42].mxu0  ;;  %v962_v40 = vpop.f32.mrb[43].mxu1 }
 0x168   :  { %v1170_v41 = vpop.f32.mrb[43].mxu0 }
 0x169   :  { %v1279_v42 = vmax.f32 %v1166_v37, 0.0  ;;  %v1169_v43 = vadd.f32 %v1168_v39, %v961_v38 }
 0x16b   :  { %v1730_v44 = vpack.c.bf16 %v1279_v42, %v1279_v42  ;;  %v1280_v45 = vmax.f32 %v1169_v43, 0.0 }
 0x16c   :  { %v965_v46 = vpop.f32.mrb[44].mxu1 }
 0x16d   :  { %1496 = vst.msk [vmem:[%s2653_s3 + $0x50] sm:$0xf] %vm1475_vm2, %v1730_v44  ;;  %v1731_v47 = vpack.c.bf16 %v1280_v45, %v1280_v45  ;;  %v966_v48 = vadd.f32 %v2434_v60, %v965_v46  ;;  %v1173_v49 = vpop.f32.mrb[44].mxu0  ;;  %v967_v50 = vpop.f32.mrb[45].mxu1 }
 0x16e   :  { %v1175_v51 = vpop.f32.mrb[45].mxu0  ;;  %v968_v52 = vpop.f32.mrb[46].mxu1 }
 0x16f   :  { %1497 = vst.msk [vmem:[%s2653_s3 + $0x54] sm:$0xf] %vm1475_vm2, %v1731_v47  ;;  %v1174_v53 = vadd.f32 %v1173_v49, %v966_v48  ;;  %v969_v54 = vadd.f32 %v2434_v60, %v968_v52  ;;  %v1176_v55 = vpop.f32.mrb[46].mxu0  ;;  %v970_v56 = vpop.f32.mrb[47].mxu1 }
 0x170   :  { %v1178_v57 = vpop.f32.mrb[47].mxu0 }
 0x171   :  { %v1281_v58 = vmax.f32 %v1174_v53, 0.0  ;;  %v1177_v59 = vadd.f32 %v1176_v55, %v969_v54 }
 0x173   :  { %v1732_v61 = vpack.c.bf16 %v1281_v58, %v1281_v58  ;;  %v1282_v62 = vmax.f32 %v1177_v59, 0.0 }
 0x174   :  { %v973_v63 = vpop.f32.mrb[48].mxu1 }
 0x175   :  { %1498 = vst.msk [vmem:[%s2653_s3 + $0x58] sm:$0xf] %vm1475_vm2, %v1732_v61  ;;  %v1733_v0 = vpack.c.bf16 %v1282_v62, %v1282_v62  ;;  %v974_v1 = vadd.f32 %v2434_v60, %v973_v63  ;;  %v1181_v2 = vpop.f32.mrb[48].mxu0  ;;  %v975_v3 = vpop.f32.mrb[49].mxu1 }
 0x176   :  { %v1183_v4 = vpop.f32.mrb[49].mxu0  ;;  %v976_v5 = vpop.f32.mrb[50].mxu1 }
 0x177   :  { %1499 = vst.msk [vmem:[%s2653_s3 + $0x5c] sm:$0xf] %vm1475_vm2, %v1733_v0  ;;  %v1182_v6 = vadd.f32 %v1181_v2, %v974_v1  ;;  %v977_v7 = vadd.f32 %v2434_v60, %v976_v5  ;;  %v1184_v8 = vpop.f32.mrb[50].mxu0  ;;  %v978_v9 = vpop.f32.mrb[51].mxu1 }
 0x178   :  { %v1186_v10 = vpop.f32.mrb[51].mxu0 }
 0x179   :  { %v1283_v11 = vmax.f32 %v1182_v6, 0.0  ;;  %v1185_v12 = vadd.f32 %v1184_v8, %v977_v7 }
 0x17b   :  { %v1734_v13 = vpack.c.bf16 %v1283_v11, %v1283_v11  ;;  %v1284_v14 = vmax.f32 %v1185_v12, 0.0 }
 0x17c   :  { %v981_v15 = vpop.f32.mrb[52].mxu1 }
 0x17d   :  { %1500 = vst.msk [vmem:[%s2653_s3 + $0x60] sm:$0xf] %vm1475_vm2, %v1734_v13  ;;  %v1735_v16 = vpack.c.bf16 %v1284_v14, %v1284_v14  ;;  %v982_v17 = vadd.f32 %v2434_v60, %v981_v15  ;;  %v1189_v18 = vpop.f32.mrb[52].mxu0  ;;  %v983_v19 = vpop.f32.mrb[53].mxu1 }
 0x17e   :  { %v1191_v20 = vpop.f32.mrb[53].mxu0  ;;  %v984_v21 = vpop.f32.mrb[54].mxu1 }
 0x17f   :  { %1501 = vst.msk [vmem:[%s2653_s3 + $0x64] sm:$0xf] %vm1475_vm2, %v1735_v16  ;;  %v1190_v22 = vadd.f32 %v1189_v18, %v982_v17  ;;  %v985_v23 = vadd.f32 %v2434_v60, %v984_v21  ;;  %v1192_v24 = vpop.f32.mrb[54].mxu0  ;;  %v986_v25 = vpop.f32.mrb[55].mxu1 }
 0x180   :  { %v1194_v26 = vpop.f32.mrb[55].mxu0 }
 0x181   :  { %v1285_v27 = vmax.f32 %v1190_v22, 0.0  ;;  %v1193_v28 = vadd.f32 %v1192_v24, %v985_v23 }
 0x183   :  { %v1736_v29 = vpack.c.bf16 %v1285_v27, %v1285_v27  ;;  %v1286_v30 = vmax.f32 %v1193_v28, 0.0 }
 0x184   :  { %v989_v31 = vpop.f32.mrb[56].mxu1 }
 0x185   :  { %1502 = vst.msk [vmem:[%s2653_s3 + $0x68] sm:$0xf] %vm1475_vm2, %v1736_v29  ;;  %v1737_v32 = vpack.c.bf16 %v1286_v30, %v1286_v30  ;;  %v990_v33 = vadd.f32 %v2434_v60, %v989_v31  ;;  %v1197_v34 = vpop.f32.mrb[56].mxu0  ;;  %v991_v35 = vpop.f32.mrb[57].mxu1 }
 0x186   :  { %v1199_v36 = vpop.f32.mrb[57].mxu0  ;;  %v992_v37 = vpop.f32.mrb[58].mxu1 }
 0x187   :  { %1503 = vst.msk [vmem:[%s2653_s3 + $0x6c] sm:$0xf] %vm1475_vm2, %v1737_v32  ;;  %v1198_v38 = vadd.f32 %v1197_v34, %v990_v33  ;;  %v993_v39 = vadd.f32 %v2434_v60, %v992_v37  ;;  %v1200_v40 = vpop.f32.mrb[58].mxu0  ;;  %v994_v41 = vpop.f32.mrb[59].mxu1 }
 0x188   :  { %v1202_v42 = vpop.f32.mrb[59].mxu0 }
 0x189   :  { %v1287_v43 = vmax.f32 %v1198_v38, 0.0  ;;  %v1201_v44 = vadd.f32 %v1200_v40, %v993_v39 }
 0x18b   :  { %v1738_v45 = vpack.c.bf16 %v1287_v43, %v1287_v43  ;;  %v1288_v46 = vmax.f32 %v1201_v44, 0.0 }
 0x18c   :  { %v997_v47 = vpop.f32.mrb[60].mxu1 }
 0x18d   :  { %1504 = vst.msk [vmem:[%s2653_s3 + $0x70] sm:$0xf] %vm1475_vm2, %v1738_v45  ;;  %v1739_v48 = vpack.c.bf16 %v1288_v46, %v1288_v46  ;;  %v998_v49 = vadd.f32 %v2434_v60, %v997_v47  ;;  %v1205_v50 = vpop.f32.mrb[60].mxu0  ;;  %v999_v51 = vpop.f32.mrb[61].mxu1 }
 0x18e   :  { %v1207_v52 = vpop.f32.mrb[61].mxu0  ;;  %v1000_v53 = vpop.f32.mrb[62].mxu1 }
 0x18f   :  { %1505 = vst.msk [vmem:[%s2653_s3 + $0x74] sm:$0xf] %vm1475_vm2, %v1739_v48  ;;  %v1206_v54 = vadd.f32 %v1205_v50, %v998_v49  ;;  %v1001_v55 = vadd.f32 %v2434_v60, %v1000_v53  ;;  %v1208_v56 = vpop.f32.mrb[62].mxu0  ;;  %v1002_v57 = vpop.f32.mrb[63].mxu1 }
 0x190   :  { %v1210_v58 = vpop.f32.mrb[63].mxu0 }
 0x191   :  { %v1289_v59 = vmax.f32 %v1206_v54, 0.0  ;;  %v1209_v61 = vadd.f32 %v1208_v56, %v1001_v55 }
 0x193   :  { %v1740_v62 = vpack.c.bf16 %v1289_v59, %v1289_v59  ;;  %v1290_v63 = vmax.f32 %v1209_v61, 0.0 }
 0x194   :  { %v1005_v0 = vpop.f32.mrb[64].mxu1 }
 0x195   :  { %1506 = vst.msk [vmem:[%s2653_s3 + $0x78] sm:$0xf] %vm1475_vm2, %v1740_v62  ;;  %v1741_v1 = vpack.c.bf16 %v1290_v63, %v1290_v63  ;;  %v1006_v2 = vadd.f32 %v2434_v60, %v1005_v0  ;;  %v1213_v3 = vpop.f32.mrb[64].mxu0  ;;  %v1007_v4 = vpop.f32.mrb[65].mxu1 }
 0x196   :  { %v1215_v5 = vpop.f32.mrb[65].mxu0  ;;  %v1008_v6 = vpop.f32.mrb[66].mxu1 }
 0x197   :  { %1507 = vst.msk [vmem:[%s2653_s3 + $0x7c] sm:$0xf] %vm1475_vm2, %v1741_v1  ;;  %v1214_v7 = vadd.f32 %v1213_v3, %v1006_v2  ;;  %v1009_v8 = vadd.f32 %v2434_v60, %v1008_v6  ;;  %v1216_v9 = vpop.f32.mrb[66].mxu0  ;;  %v1010_v10 = vpop.f32.mrb[67].mxu1 }
 0x198   :  { %v1218_v11 = vpop.f32.mrb[67].mxu0 }
 0x199   :  { %v1291_v12 = vmax.f32 %v1214_v7, 0.0  ;;  %v1217_v13 = vadd.f32 %v1216_v9, %v1009_v8 }
 0x19b   :  { %v1742_v14 = vpack.c.bf16 %v1291_v12, %v1291_v12  ;;  %v1292_v15 = vmax.f32 %v1217_v13, 0.0 }
 0x19c   :  { %v1013_v16 = vpop.f32.mrb[68].mxu1 }
 0x19d   :  { %1508 = vst.msk [vmem:[%s2653_s3 + $0x80] sm:$0xf] %vm1475_vm2, %v1742_v14  ;;  %v1743_v17 = vpack.c.bf16 %v1292_v15, %v1292_v15  ;;  %v1014_v18 = vadd.f32 %v2434_v60, %v1013_v16  ;;  %v1221_v19 = vpop.f32.mrb[68].mxu0  ;;  %v1015_v20 = vpop.f32.mrb[69].mxu1 }
 0x19e   :  { %v1223_v21 = vpop.f32.mrb[69].mxu0  ;;  %v1016_v22 = vpop.f32.mrb[70].mxu1 }
 0x19f   :  { %1509 = vst.msk [vmem:[%s2653_s3 + $0x84] sm:$0xf] %vm1475_vm2, %v1743_v17  ;;  %v1222_v23 = vadd.f32 %v1221_v19, %v1014_v18  ;;  %v1017_v24 = vadd.f32 %v2434_v60, %v1016_v22  ;;  %v1224_v25 = vpop.f32.mrb[70].mxu0  ;;  %v1018_v26 = vpop.f32.mrb[71].mxu1 }
 0x1a0   :  { %v1226_v27 = vpop.f32.mrb[71].mxu0 }
 0x1a1   :  { %v1293_v28 = vmax.f32 %v1222_v23, 0.0  ;;  %v1225_v29 = vadd.f32 %v1224_v25, %v1017_v24 }
 0x1a3   :  { %v1744_v30 = vpack.c.bf16 %v1293_v28, %v1293_v28  ;;  %v1294_v31 = vmax.f32 %v1225_v29, 0.0 }
 0x1a4   :  { %v1021_v32 = vpop.f32.mrb[72].mxu1 }
 0x1a5   :  { %1510 = vst.msk [vmem:[%s2653_s3 + $0x88] sm:$0xf] %vm1475_vm2, %v1744_v30  ;;  %v1745_v33 = vpack.c.bf16 %v1294_v31, %v1294_v31  ;;  %v1022_v34 = vadd.f32 %v2434_v60, %v1021_v32  ;;  %v1229_v35 = vpop.f32.mrb[72].mxu0  ;;  %v1023_v36 = vpop.f32.mrb[73].mxu1 }
 0x1a6   :  { %v1231_v37 = vpop.f32.mrb[73].mxu0  ;;  %v1024_v38 = vpop.f32.mrb[74].mxu1 }
 0x1a7   :  { %1511 = vst.msk [vmem:[%s2653_s3 + $0x8c] sm:$0xf] %vm1475_vm2, %v1745_v33  ;;  %v1230_v39 = vadd.f32 %v1229_v35, %v1022_v34  ;;  %v1025_v40 = vadd.f32 %v2434_v60, %v1024_v38  ;;  %v1232_v41 = vpop.f32.mrb[74].mxu0  ;;  %v1026_v42 = vpop.f32.mrb[75].mxu1 }
 0x1a8   :  { %v1234_v43 = vpop.f32.mrb[75].mxu0 }
 0x1a9   :  { %v1295_v44 = vmax.f32 %v1230_v39, 0.0  ;;  %v1233_v45 = vadd.f32 %v1232_v41, %v1025_v40 }
 0x1ab   :  { %v1746_v46 = vpack.c.bf16 %v1295_v44, %v1295_v44  ;;  %v1296_v47 = vmax.f32 %v1233_v45, 0.0 }
 0x1ac   :  { %v1029_v48 = vpop.f32.mrb[76].mxu1 }
 0x1ad   :  { %1512 = vst.msk [vmem:[%s2653_s3 + $0x90] sm:$0xf] %vm1475_vm2, %v1746_v46  ;;  %v1747_v49 = vpack.c.bf16 %v1296_v47, %v1296_v47  ;;  %v1030_v50 = vadd.f32 %v2434_v60, %v1029_v48  ;;  %v1237_v51 = vpop.f32.mrb[76].mxu0  ;;  %v1031_v52 = vpop.f32.mrb[77].mxu1 }
 0x1ae   :  { %v1239_v53 = vpop.f32.mrb[77].mxu0  ;;  %v1032_v54 = vpop.f32.mrb[78].mxu1 }
 0x1af   :  { %1513 = vst.msk [vmem:[%s2653_s3 + $0x94] sm:$0xf] %vm1475_vm2, %v1747_v49  ;;  %v1238_v55 = vadd.f32 %v1237_v51, %v1030_v50  ;;  %v1033_v56 = vadd.f32 %v2434_v60, %v1032_v54  ;;  %v1240_v57 = vpop.f32.mrb[78].mxu0  ;;  %v1034_v58 = vpop.f32.mrb[79].mxu1 }
 0x1b0   :  { %v1242_v59 = vpop.f32.mrb[79].mxu0 }
 0x1b1   :  { %v1297_v61 = vmax.f32 %v1238_v55, 0.0  ;;  %v1241_v62 = vadd.f32 %v1240_v57, %v1033_v56 }
 0x1b3   :  { %v1748_v63 = vpack.c.bf16 %v1297_v61, %v1297_v61  ;;  %v1298_v0 = vmax.f32 %v1241_v62, 0.0 }
 0x1b4   :  { %v1037_v1 = vpop.f32.mrb[80].mxu1 }
 0x1b5   :  { %1514 = vst.msk [vmem:[%s2653_s3 + $0x98] sm:$0xf] %vm1475_vm2, %v1748_v63  ;;  %v1749_v2 = vpack.c.bf16 %v1298_v0, %v1298_v0  ;;  %v1038_v3 = vadd.f32 %v2434_v60, %v1037_v1  ;;  %v1245_v4 = vpop.f32.mrb[80].mxu0  ;;  %v1039_v5 = vpop.f32.mrb[81].mxu1 }
 0x1b6   :  { %v1247_v6 = vpop.f32.mrb[81].mxu0  ;;  %v1040_v7 = vpop.f32.mrb[82].mxu1 }
 0x1b7   :  { %1515 = vst.msk [vmem:[%s2653_s3 + $0x9c] sm:$0xf] %vm1475_vm2, %v1749_v2  ;;  %v1246_v8 = vadd.f32 %v1245_v4, %v1038_v3  ;;  %v1041_v9 = vadd.f32 %v2434_v60, %v1040_v7  ;;  %v1248_v10 = vpop.f32.mrb[82].mxu0  ;;  %v1042_v11 = vpop.f32.mrb[83].mxu1 }
 0x1b8   :  { %v1250_v12 = vpop.f32.mrb[83].mxu0 }
 0x1b9   :  { %v1299_v13 = vmax.f32 %v1246_v8, 0.0  ;;  %v1249_v14 = vadd.f32 %v1248_v10, %v1041_v9 }
 0x1bb   :  { %v1750_v15 = vpack.c.bf16 %v1299_v13, %v1299_v13  ;;  %v1300_v16 = vmax.f32 %v1249_v14, 0.0 }
 0x1bc   :  { %v1045_v17 = vpop.f32.mrb[84].mxu1 }
 0x1bd   :  { %1516 = vst.msk [vmem:[%s2653_s3 + $0xa0] sm:$0xf] %vm1475_vm2, %v1750_v15  ;;  %v1751_v18 = vpack.c.bf16 %v1300_v16, %v1300_v16  ;;  %v1046_v19 = vadd.f32 %v2434_v60, %v1045_v17  ;;  %v1253_v20 = vpop.f32.mrb[84].mxu0  ;;  %v1047_v21 = vpop.f32.mrb[85].mxu1 }
 0x1be   :  { %v1255_v22 = vpop.f32.mrb[85].mxu0  ;;  %v1048_v23 = vpop.f32.mrb[86].mxu1 }
 0x1bf   :  { %1517 = vst.msk [vmem:[%s2653_s3 + $0xa4] sm:$0xf] %vm1475_vm2, %v1751_v18  ;;  %v1254_v24 = vadd.f32 %v1253_v20, %v1046_v19  ;;  %v1256_v25 = vpop.f32.mrb[86].mxu0  ;;  %v1049_v26 = vpop.f32.mrb[87].mxu1 }
 0x1c0   :  { %v1257_v27 = vpop.f32.mrb[87].mxu0 }
 0x1c1   :  { %v1301_v28 = vmax.f32 %v1254_v24, 0.0 }
 0x1c3   :  { %v1752_v29 = vpack.c.bf16 %v1301_v28, %v1301_v28 }
 0x1c5   :  { %1519 = vst.msk [vmem:[%s2653_s3 + $0xa8] sm:$0x1] %vm1518_vm3, %v1752_v29 }

// kernel: vae_forward.12
= control target key start
LH: loop header
LB: loop body
LE: loop exit
PB: predicated region body
PF: predicated region fallthrough
CT: control target
= control target key end

     0   :  { %s2540_s12 = smov 0   ;;  %s2542_s13 = smov 0   ;;  %s3154_s0 = inlined_call_operand.vmem [shape: bf16[1458,250], index: 0, kind: input, shape index: {}]   ;;  %s3155_s1 = inlined_call_operand.vmem [shape: bf16[250,10], index: 1, kind: input, shape index: {}]   ;;  %s3156_s2 = inlined_call_operand.vmem [shape: f32[1,10], index: 2, kind: input, shape index: {}]   ;;  %s3157_s3 = inlined_call_operand.vmem [shape: bf16[1458,10], index: 3, kind: output, shape index: {}]  }
   0x1   :  { %s2544_s14 = smov 0  }
   0x2 LB: > { %s2553_s15 = sadd.s32 4294967295, %s2485_s14   ;;  %s2555_s16 = sadd.s32 1, %s2485_s14   ;;  %s2485_s14 = sphi %s2544_s14, %s3164_s14   ;;  %s2481_s13 = sphi %s2542_s13, %s3163_s13   ;;  %s2477_s12 = sphi %s2540_s12, %s3162_s12  }
   0x3   : > { %s85_s17 = ssub.s32 %s2485_s14, %s2555_s16  ;;  %s88_s18 = sadd.s32 1, %s2481_s13 }
   0x4   : > { %p86_p0 = scmp.eq.s32.totalorder %s85_s17, 0  ;;  %p98_p1 = scmp.ne.s32.totalorder %s2481_s13, %s2477_s12 }
   0x5   : > { %p99_p2 = scmp.eq.s32.totalorder %s2553_s15, 2  ;;  %p1931_p3 = scmp.ge.s32.totalorder %s2485_s14, 1 }
   0x6   : > { %s2563_s19 = scalar_select %p86_p0, %s2481_s13, %s88_s18  }
   0x7   : > { %p2565_p4 = por %p99_p2, %p98_p1  ;;  %p149_p5 = scmp.lt.s32.totalorder %s2485_s14, 4 }
   0x9   : > { %p150_p6 = pnand %p1931_p3, %p149_p5 }
   0xa   : > { %v2319_v0 = vld [vmem:[%s3155_s1] sm:$0xff] (!%p150_p6)   ;;  %v2519_v1 = vmov (!%p150_p6), 0   ;;  %v2320_v2 = vld [vmem:[%s3155_s1 + $0x8] sm:$0xff] (!%p150_p6)   ;;  %s2578_s25 = sshll.u32 (!%p150_p6), %s2553_s15, 6  ;;  %v2321_v3 = vld [vmem:[%s3155_s1 + $0x10] sm:$0xff] (!%p150_p6)   ;;  %vm687_vm0 = vcmask (!%p150_p6), 998400  }
   0xb   : > { %153 = sbr.rel (%p150_p6) target bundleno = 507 (0x1fb), region = 32  ;;  %788 = vmatprep.subr.bf16.mxu0 (!%p150_p6), %v2519_v1  ;;  %2198 = vmatprep.subr.bf16.mxu1 (!%p150_p6), %v2519_v1  ;;  %p184_p7 = scmp.lt.s32.totalorder (!%p150_p6), %s2578_s25, 182  ;;  %v2322_v4 = vld [vmem:[%s3155_s1 + $0x18] sm:$0xff] (!%p150_p6)   ;;  %v2323_v5 = vld [vmem:[%s3155_s1 + $0x20] sm:$0xff] (!%p150_p6)   ;;  %v2324_v7 = vld [vmem:[%s3155_s1 + $0x28] sm:$0xff] (!%p150_p6)   ;;  %vm784_vm1 = vcmask (!%p150_p6), 1044480  }
   0xc   : > { %789 = vmatpush1.bf16.msra.mxu0 (!%p150_p6), %v2319_v0  ;;  %2214 = vmatpush1.bf16.msra.mxu1 (!%p150_p6), %v2319_v0  ;;  %v2325_v9 = vld [vmem:[%s3155_s1 + $0x30] sm:$0xff] (!%p150_p6)   ;;  %v2326_v10 = vld [vmem:[%s3155_s1 + $0x38] sm:$0xff] (!%p150_p6)   ;;  %v2327_v11 = vld [vmem:[%s3155_s1 + $0x40] sm:$0xff] (!%p150_p6)   ;;  %s175_s17 = sand.u32 (!%p150_p6), 1, %s2477_s12   ;;  %vm1397_vm2 = vcmask (!%p150_p6), 76800  }
   0xd   : > { %790 = vmatprep.subr.bf16.mxu0 (!%p150_p6), %v2519_v1  ;;  %2199 = vmatprep.subr.bf16.mxu1 (!%p150_p6), %v2519_v1  ;;  %v2328_v12 = vld [vmem:[%s3155_s1 + $0x48] sm:$0xff] (!%p150_p6)   ;;  %v2329_v13 = vld [vmem:[%s3155_s1 + $0x50] sm:$0xff] (!%p150_p6)   ;;  %v2330_v14 = vld [vmem:[%s3155_s1 + $0x58] sm:$0xff] (!%p150_p6)   ;;  %s1932_s22 = sshll.u32 (!%p150_p6), %s175_s17, 8 }
   0xe   : > { %v2331_v15 = vld [vmem:[%s3155_s1 + $0x60] sm:$0xff] (!%p150_p6)   ;;  %v2332_v16 = vld [vmem:[%s3155_s1 + $0x68] sm:$0xff] (!%p150_p6)   ;;  %v2333_v17 = vld [vmem:[%s3155_s1 + $0x70] sm:$0xff] (!%p150_p6)   ;;  %s2765_s12 = scalar_lea.vmem (!%p150_p6), [#allocation2], %s1932_s22  }
   0xf   : > { %v2334_v18 = vld [vmem:[%s3155_s1 + $0x78] sm:$0x1f] (!%p150_p6)  }
  0x10   : > { %791 = vmatpush1.bf16.msra.mxu0 (!%p150_p6), %v2320_v2  ;;  %2215 = vmatpush1.bf16.msra.mxu1 (!%p150_p6), %v2320_v2  ;;  %v786_v19 = vsel (!%p150_p6), %vm784_vm1, %v2334_v18, 0  ;;  %v2759_v18 = vld [vmem:[%s3156_s2] ss:$0 sm:$0xff] (!%p150_p6) }
  0x11   : > { %792 = vmatprep.subr.bf16.mxu0 (!%p150_p6), %v2519_v1  ;;  %2200 = vmatprep.subr.bf16.mxu1 (!%p150_p6), %v2519_v1 }
  0x12   : > { %s185_s28 = scalar_select %p184_p7, %s2578_s25, 182 }
  0x13   : > { %s2195_s23 = sshll.u32 (%p2565_p4), %s2553_s15, 8 }
  0x14   : > { %793 = vmatpush1.bf16.msra.mxu0 %v2321_v3  ;;  %2216 = vmatpush1.bf16.msra.mxu1 %v2321_v3  ;;  %s2130_s4 = sshll.u32 %s185_s28, 3  ;;  %s2962_s27 = scalar_lea.vmem (%p2565_p4), %s3157_s3, %s2195_s23  }
  0x15   : > { %794 = vmatprep.subr.bf16.mxu0 %v2519_v1  ;;  %2201 = vmatprep.subr.bf16.mxu1 %v2519_v1  ;;  %s2600_s9 = scalar_lea.vmem %s3154_s0, %s2130_s4 }
  0x16   : > { %v2337_v6 = vld [vmem:[%s2600_s9 + $0x4] ss:$8 sps:$4 sm:$0xff]   ;;  %v2335_v20 = vld [vmem:[%s2600_s9] ss:$8 sps:$4 sm:$0xff]   ;;  %v2341_v22 = vld [vmem:[%s2600_s9 + $0x14] ss:$8 sps:$4 sm:$0xff]  }
  0x17   : > { %v2340_v8 = vld [vmem:[%s2600_s9 + $0x104] ss:$8 sps:$4 sm:$0xff]   ;;  %2017 = vmatprep.mubr.msk.bf16.mxu0 %vm687_vm0, %v2337_v6  ;;  %v2338_v21 = vld [vmem:[%s2600_s9 + $0x100] ss:$8 sps:$4 sm:$0xff]   ;;  %v2343_v23 = vld [vmem:[%s2600_s9 + $0x114] ss:$8 sps:$4 sm:$0xff]  }
  0x18   : > { %795 = vmatpush1.bf16.msra.mxu0 %v2322_v4  ;;  %2217 = vmatpush1.bf16.msra.mxu1 %v2322_v4  ;;  %v2345_v24 = vld [vmem:[%s2600_s9 + $0x10] ss:$8 sps:$4 sm:$0xff]   ;;  %v2347_v26 = vld [vmem:[%s2600_s9 + $0x24] ss:$8 sps:$4 sm:$0xff]   ;;  %v2351_v28 = vld [vmem:[%s2600_s9 + $0x20] ss:$8 sps:$4 sm:$0xff]  }
  0x19   : > { %796 = vmatprep.subr.bf16.mxu0 %v2519_v1  ;;  %2202 = vmatprep.subr.bf16.mxu1 %v2519_v1  ;;  %v2346_v25 = vld [vmem:[%s2600_s9 + $0x110] ss:$8 sps:$4 sm:$0xff]   ;;  %v2349_v27 = vld [vmem:[%s2600_s9 + $0x124] ss:$8 sps:$4 sm:$0xff]   ;;  %v2352_v29 = vld [vmem:[%s2600_s9 + $0x120] ss:$8 sps:$4 sm:$0xff]  }
  0x1a   : > { %2033 = vmatprep.mubr.msk.bf16.mxu1 %vm687_vm0, %v2340_v8  ;;  %v2353_v30 = vld [vmem:[%s2600_s9 + $0x34] ss:$8 sps:$4 sm:$0xff]   ;;  %v2357_v32 = vld [vmem:[%s2600_s9 + $0x30] ss:$8 sps:$4 sm:$0xff]   ;;  %v2359_v34 = vld [vmem:[%s2600_s9 + $0x44] ss:$8 sps:$4 sm:$0xff]  }
  0x1b   : > { %v2355_v31 = vld [vmem:[%s2600_s9 + $0x134] ss:$8 sps:$4 sm:$0xff]   ;;  %v2358_v33 = vld [vmem:[%s2600_s9 + $0x130] ss:$8 sps:$4 sm:$0xff]   ;;  %v2361_v35 = vld [vmem:[%s2600_s9 + $0x144] ss:$8 sps:$4 sm:$0xff]  }
  0x1c   : > { %797 = vmatpush1.bf16.msra.mxu0 %v2323_v5  ;;  %2218 = vmatpush1.bf16.msra.mxu1 %v2323_v5  ;;  %v2363_v36 = vld [vmem:[%s2600_s9 + $0x40] ss:$8 sps:$4 sm:$0xff]   ;;  %v2365_v38 = vld [vmem:[%s2600_s9 + $0x54] ss:$8 sps:$4 sm:$0xff]   ;;  %v2369_v40 = vld [vmem:[%s2600_s9 + $0x50] ss:$8 sps:$4 sm:$0xff]  }
  0x1d   : > { %798 = vmatprep.subr.bf16.mxu0 %v2519_v1  ;;  %2203 = vmatprep.subr.bf16.mxu1 %v2519_v1  ;;  %v2364_v37 = vld [vmem:[%s2600_s9 + $0x140] ss:$8 sps:$4 sm:$0xff]   ;;  %v2367_v39 = vld [vmem:[%s2600_s9 + $0x154] ss:$8 sps:$4 sm:$0xff]   ;;  %v2370_v41 = vld [vmem:[%s2600_s9 + $0x150] ss:$8 sps:$4 sm:$0xff]  }
  0x1e   : > { %v2371_v42 = vld [vmem:[%s2600_s9 + $0x64] ss:$8 sps:$4 sm:$0xff]   ;;  %v2375_v44 = vld [vmem:[%s2600_s9 + $0x60] ss:$8 sps:$4 sm:$0xff]   ;;  %v2377_v46 = vld [vmem:[%s2600_s9 + $0x74] ss:$8 sps:$4 sm:$0xff]  }
  0x1f   : > { %v2373_v43 = vld [vmem:[%s2600_s9 + $0x164] ss:$8 sps:$4 sm:$0xff]   ;;  %v2376_v45 = vld [vmem:[%s2600_s9 + $0x160] ss:$8 sps:$4 sm:$0xff]   ;;  %v2379_v47 = vld [vmem:[%s2600_s9 + $0x174] ss:$8 sps:$4 sm:$0xff]  }
  0x20   : > { %799 = vmatpush1.bf16.msra.mxu0 %v2324_v7  ;;  %2219 = vmatpush1.bf16.msra.mxu1 %v2324_v7  ;;  %v2381_v48 = vld [vmem:[%s2600_s9 + $0x70] ss:$8 sps:$4 sm:$0xff]   ;;  %v2383_v50 = vld [vmem:[%s2600_s9 + $0x84] ss:$8 sps:$4 sm:$0xff]   ;;  %v2387_v52 = vld [vmem:[%s2600_s9 + $0x80] ss:$8 sps:$4 sm:$0xff]  }
  0x21   : > { %800 = vmatprep.subr.bf16.mxu0 %v2519_v1  ;;  %2204 = vmatprep.subr.bf16.mxu1 %v2519_v1  ;;  %v2382_v49 = vld [vmem:[%s2600_s9 + $0x170] ss:$8 sps:$4 sm:$0xff]   ;;  %v2385_v51 = vld [vmem:[%s2600_s9 + $0x184] ss:$8 sps:$4 sm:$0xff]   ;;  %v2388_v53 = vld [vmem:[%s2600_s9 + $0x180] ss:$8 sps:$4 sm:$0xff]  }
  0x22   : > { %v2389_v54 = vld [vmem:[%s2600_s9 + $0x94] ss:$8 sps:$4 sm:$0xff]   ;;  %v2393_v56 = vld [vmem:[%s2600_s9 + $0x90] ss:$8 sps:$4 sm:$0xff]   ;;  %v2395_v58 = vld [vmem:[%s2600_s9 + $0xa4] ss:$8 sps:$4 sm:$0xff]  }
  0x23   : > { %v2391_v55 = vld [vmem:[%s2600_s9 + $0x194] ss:$8 sps:$4 sm:$0xff]   ;;  %v2394_v57 = vld [vmem:[%s2600_s9 + $0x190] ss:$8 sps:$4 sm:$0xff]   ;;  %v2397_v59 = vld [vmem:[%s2600_s9 + $0x1a4] ss:$8 sps:$4 sm:$0xff]  }
  0x24   : > { %801 = vmatpush1.bf16.msra.mxu0 %v2325_v9  ;;  %2220 = vmatpush1.bf16.msra.mxu1 %v2325_v9  ;;  %v2399_v60 = vld [vmem:[%s2600_s9 + $0xa0] ss:$8 sps:$4 sm:$0xff]   ;;  %v2401_v62 = vld [vmem:[%s2600_s9 + $0xb4] ss:$8 sps:$4 sm:$0xff]   ;;  %v2405_v0 = vld [vmem:[%s2600_s9 + $0xb0] ss:$8 sps:$4 sm:$0xff]  }
  0x25   : > { %802 = vmatprep.subr.bf16.mxu0 %v2519_v1  ;;  %2205 = vmatprep.subr.bf16.mxu1 %v2519_v1  ;;  %v2400_v61 = vld [vmem:[%s2600_s9 + $0x1a0] ss:$8 sps:$4 sm:$0xff]   ;;  %v2403_v63 = vld [vmem:[%s2600_s9 + $0x1b4] ss:$8 sps:$4 sm:$0xff]   ;;  %v2407_v2 = vld [vmem:[%s2600_s9 + $0xc4] ss:$8 sps:$4 sm:$0xff]  }
  0x26   : > { %v2409_v3 = vld [vmem:[%s2600_s9 + $0x1c4] ss:$8 sps:$4 sm:$0xff]   ;;  %v2411_v4 = vld [vmem:[%s2600_s9 + $0xc0] ss:$8 sps:$4 sm:$0xff]   ;;  %v2413_v6 = vld [vmem:[%s2600_s9 + $0xd4] ss:$8 sps:$4 sm:$0xff]  }
  0x27   : > { %v2412_v5 = vld [vmem:[%s2600_s9 + $0x1c0] ss:$8 sps:$4 sm:$0xff]   ;;  %v2415_v7 = vld [vmem:[%s2600_s9 + $0x1d4] ss:$8 sps:$4 sm:$0xff]   ;;  %v2417_v8 = vld [vmem:[%s2600_s9 + $0xd0] ss:$8 sps:$4 sm:$0xff]  }
  0x28   : > { %803 = vmatpush1.bf16.msra.mxu0 %v2326_v10  ;;  %2221 = vmatpush1.bf16.msra.mxu1 %v2326_v10  ;;  %v2418_v9 = vld [vmem:[%s2600_s9 + $0x1d0] ss:$8 sps:$4 sm:$0xff]   ;;  %v2419_v10 = vld [vmem:[%s2600_s9 + $0xe4] ss:$8 sps:$4 sm:$0xff]  }
  0x29   : > { %804 = vmatprep.subr.bf16.mxu0 %v2519_v1  ;;  %2206 = vmatprep.subr.bf16.mxu1 %v2519_v1 }
  0x2c   : > { %805 = vmatpush1.bf16.msra.mxu0 %v2327_v11  ;;  %2222 = vmatpush1.bf16.msra.mxu1 %v2327_v11  ;;  %v2421_v11 = vld [vmem:[%s2600_s9 + $0x1e4] ss:$8 sps:$4 sm:$0xff]  }
  0x2d   : > { %806 = vmatprep.subr.bf16.mxu0 %v2519_v1  ;;  %2207 = vmatprep.subr.bf16.mxu1 %v2519_v1 }
  0x30   : > { %807 = vmatpush1.bf16.msra.mxu0 %v2328_v12  ;;  %2223 = vmatpush1.bf16.msra.mxu1 %v2328_v12  ;;  %v2423_v12 = vld [vmem:[%s2600_s9 + $0xe0] ss:$8 sps:$4 sm:$0xff]  }
  0x31   : > { %808 = vmatprep.subr.bf16.mxu0 %v2519_v1  ;;  %2208 = vmatprep.subr.bf16.mxu1 %v2519_v1 }
  0x34   : > { %809 = vmatpush1.bf16.msra.mxu0 %v2329_v13  ;;  %2224 = vmatpush1.bf16.msra.mxu1 %v2329_v13  ;;  %v2424_v13 = vld [vmem:[%s2600_s9 + $0x1e0] ss:$8 sps:$4 sm:$0xff]  }
  0x35   : > { %810 = vmatprep.subr.bf16.mxu0 %v2519_v1  ;;  %2209 = vmatprep.subr.bf16.mxu1 %v2519_v1 }
  0x38   : > { %811 = vmatpush1.bf16.msra.mxu0 %v2330_v14  ;;  %2225 = vmatpush1.bf16.msra.mxu1 %v2330_v14  ;;  %v2425_v14 = vld [vmem:[%s2600_s9 + $0xf4] ss:$8 sps:$4 sm:$0xff]  }
  0x39   : > { %812 = vmatprep.subr.bf16.mxu0 %v2519_v1  ;;  %2210 = vmatprep.subr.bf16.mxu1 %v2519_v1 }
  0x3c   : > { %813 = vmatpush1.bf16.msra.mxu0 %v2331_v15  ;;  %2226 = vmatpush1.bf16.msra.mxu1 %v2331_v15  ;;  %v2427_v15 = vld [vmem:[%s2600_s9 + $0x1f4] ss:$8 sps:$4 sm:$0xff]  }
  0x3d   : > { %814 = vmatprep.subr.bf16.mxu0 %v2519_v1  ;;  %2211 = vmatprep.subr.bf16.mxu1 %v2519_v1 }
  0x40   : > { %815 = vmatpush1.bf16.msra.mxu0 %v2332_v16  ;;  %2227 = vmatpush1.bf16.msra.mxu1 %v2332_v16  ;;  %v2429_v16 = vld [vmem:[%s2600_s9 + $0xf0] ss:$8 sps:$4 sm:$0xff]  }
  0x41   : > { %816 = vmatprep.subr.bf16.mxu0 %v2519_v1  ;;  %2212 = vmatprep.subr.bf16.mxu1 %v2519_v1 }
  0x44   : > { %817 = vmatpush1.bf16.msra.mxu0 %v2333_v17  ;;  %2228 = vmatpush1.bf16.msra.mxu1 %v2333_v17  ;;  %v2430_v17 = vld [vmem:[%s2600_s9 + $0x1f0] ss:$8 sps:$4 sm:$0xff]  }
  0x45   : > { %818 = vmatprep.subr.bf16.mxu0 %v2519_v1  ;;  %2213 = vmatprep.subr.bf16.mxu1 %v2519_v1  ;;  %v2406_v1 = vld [vmem:[%s2600_s9 + $0x1b0] ss:$8 sps:$4 sm:$0xff]   ;;  %s1470_s9 = ssub.s32 (%p2565_p4), 183, %s2578_s25 }
  0x46   : > { %p1471_p8 = scmp.lt.s32.totalorder (%p2565_p4), %s1470_s9, 64 }
  0x48   : > { %819 = vmatpush1.bf16.msra.mxu0 %v786_v19  ;;  %2229 = vmatpush1.bf16.msra.mxu1 %v786_v19 }
  0x4b   : > { %821 = vmatmul.mubr.bf16.vlgmr.msra.gmra.mrb[0].mxu0 %v2335_v20  ;;  %949 = vmatmul.mubr.bf16.vlgmr.msra.gmra.mrb[0].mxu1 %v2338_v21 }
  0x4c   : > { %2018 = vmatprep.mubr.msk.bf16.mxu0 %vm687_vm0, %v2341_v22  ;;  %2034 = vmatprep.mubr.msk.bf16.mxu1 %vm687_vm0, %v2343_v23 }
  0x53   : > { %829 = vmatmul.mubr.bf16.gmra.mrb[4].mxu0 %v2345_v24  ;;  %957 = vmatmul.mubr.bf16.gmra.mrb[4].mxu1 %v2346_v25 }
  0x54   : > { %2019 = vmatprep.mubr.msk.bf16.mxu0 %vm687_vm0, %v2347_v26  ;;  %2035 = vmatprep.mubr.msk.bf16.mxu1 %vm687_vm0, %v2349_v27 }
  0x5b   : > { %837 = vmatmul.mubr.bf16.gmra.mrb[8].mxu0 %v2351_v28  ;;  %965 = vmatmul.mubr.bf16.gmra.mrb[8].mxu1 %v2352_v29 }
  0x5c   : > { %2020 = vmatprep.mubr.msk.bf16.mxu0 %vm687_vm0, %v2353_v30  ;;  %2036 = vmatprep.mubr.msk.bf16.mxu1 %vm687_vm0, %v2355_v31 }
  0x63   : > { %845 = vmatmul.mubr.bf16.gmra.mrb[12].mxu0 %v2357_v32  ;;  %973 = vmatmul.mubr.bf16.gmra.mrb[12].mxu1 %v2358_v33 }
  0x64   : > { %2021 = vmatprep.mubr.msk.bf16.mxu0 %vm687_vm0, %v2359_v34  ;;  %2037 = vmatprep.mubr.msk.bf16.mxu1 %vm687_vm0, %v2361_v35 }
  0x6b   : > { %853 = vmatmul.mubr.bf16.gmra.mrb[16].mxu0 %v2363_v36  ;;  %981 = vmatmul.mubr.bf16.gmra.mrb[16].mxu1 %v2364_v37 }
  0x6c   : > { %2022 = vmatprep.mubr.msk.bf16.mxu0 %vm687_vm0, %v2365_v38  ;;  %2038 = vmatprep.mubr.msk.bf16.mxu1 %vm687_vm0, %v2367_v39 }
  0x73   : > { %861 = vmatmul.mubr.bf16.gmra.mrb[20].mxu0 %v2369_v40  ;;  %989 = vmatmul.mubr.bf16.gmra.mrb[20].mxu1 %v2370_v41 }
  0x74   : > { %2023 = vmatprep.mubr.msk.bf16.mxu0 %vm687_vm0, %v2371_v42  ;;  %2039 = vmatprep.mubr.msk.bf16.mxu1 %vm687_vm0, %v2373_v43 }
  0x7b   : > { %869 = vmatmul.mubr.bf16.gmra.mrb[24].mxu0 %v2375_v44  ;;  %997 = vmatmul.mubr.bf16.gmra.mrb[24].mxu1 %v2376_v45 }
  0x7c   : > { %2024 = vmatprep.mubr.msk.bf16.mxu0 %vm687_vm0, %v2377_v46  ;;  %2040 = vmatprep.mubr.msk.bf16.mxu1 %vm687_vm0, %v2379_v47 }
  0x83   : > { %877 = vmatmul.mubr.bf16.gmra.mrb[28].mxu0 %v2381_v48  ;;  %1005 = vmatmul.mubr.bf16.gmra.mrb[28].mxu1 %v2382_v49 }
  0x84   : > { %2025 = vmatprep.mubr.msk.bf16.mxu0 %vm687_vm0, %v2383_v50  ;;  %2041 = vmatprep.mubr.msk.bf16.mxu1 %vm687_vm0, %v2385_v51 }
  0x8b   : > { %885 = vmatmul.mubr.bf16.gmra.mrb[32].mxu0 %v2387_v52  ;;  %1013 = vmatmul.mubr.bf16.gmra.mrb[32].mxu1 %v2388_v53 }
  0x8c   : > { %2026 = vmatprep.mubr.msk.bf16.mxu0 %vm687_vm0, %v2389_v54  ;;  %2042 = vmatprep.mubr.msk.bf16.mxu1 %vm687_vm0, %v2391_v55 }
  0x93   : > { %893 = vmatmul.mubr.bf16.gmra.mrb[36].mxu0 %v2393_v56  ;;  %1021 = vmatmul.mubr.bf16.gmra.mrb[36].mxu1 %v2394_v57 }
  0x94   : > { %2027 = vmatprep.mubr.msk.bf16.mxu0 %vm687_vm0, %v2395_v58  ;;  %2043 = vmatprep.mubr.msk.bf16.mxu1 %vm687_vm0, %v2397_v59 }
  0x9b   : > { %901 = vmatmul.mubr.bf16.gmra.mrb[40].mxu0 %v2399_v60  ;;  %1029 = vmatmul.mubr.bf16.gmra.mrb[40].mxu1 %v2400_v61 }
  0x9c   : > { %2028 = vmatprep.mubr.msk.bf16.mxu0 %vm687_vm0, %v2401_v62  ;;  %2044 = vmatprep.mubr.msk.bf16.mxu1 %vm687_vm0, %v2403_v63 }
  0xa3   : > { %909 = vmatmul.mubr.bf16.gmra.mrb[44].mxu0 %v2405_v0  ;;  %1037 = vmatmul.mubr.bf16.gmra.mrb[44].mxu1 %v2406_v1 }
  0xa4   : > { %2029 = vmatprep.mubr.msk.bf16.mxu0 %vm687_vm0, %v2407_v2  ;;  %2045 = vmatprep.mubr.msk.bf16.mxu1 %vm687_vm0, %v2409_v3 }
  0xab   : > { %917 = vmatmul.mubr.bf16.gmra.mrb[48].mxu0 %v2411_v4  ;;  %1045 = vmatmul.mubr.bf16.gmra.mrb[48].mxu1 %v2412_v5 }
  0xac   : > { %2030 = vmatprep.mubr.msk.bf16.mxu0 %vm687_vm0, %v2413_v6  ;;  %2046 = vmatprep.mubr.msk.bf16.mxu1 %vm687_vm0, %v2415_v7 }
  0xb3   : > { %925 = vmatmul.mubr.bf16.gmra.mrb[52].mxu0 %v2417_v8  ;;  %1053 = vmatmul.mubr.bf16.gmra.mrb[52].mxu1 %v2418_v9 }
  0xb4   : > { %2031 = vmatprep.mubr.msk.bf16.mxu0 %vm687_vm0, %v2419_v10  ;;  %2047 = vmatprep.mubr.msk.bf16.mxu1 %vm687_vm0, %v2421_v11 }
  0xbb   : > { %933 = vmatmul.mubr.bf16.gmra.mrb[56].mxu0 %v2423_v12  ;;  %1061 = vmatmul.mubr.bf16.gmra.mrb[56].mxu1 %v2424_v13 }
  0xbc   : > { %2032 = vmatprep.mubr.msk.bf16.mxu0 %vm687_vm0, %v2425_v14  ;;  %2048 = vmatprep.mubr.msk.bf16.mxu1 %vm687_vm0, %v2427_v15 }
  0xc3   : > { %941 = vmatmul.mubr.bf16.gmra.mrb[60].mxu0 %v2429_v16  ;;  %1069 = vmatmul.mubr.bf16.gmra.mrb[60].mxu1 %v2430_v17 }
 0x11e   : > { %v822_v19 = vpop.f32.mrb[0].mxu0  ;;  %v950_v20 = vpop.f32.mrb[0].mxu1 }
 0x11f   : > { %v823_v21 = vadd.f32 %v2759_v18, %v822_v19  ;;  %v951_v22 = vadd.f32 %v2759_v18, %v950_v20  ;;  %v824_v23 = vpop.f32.mrb[1].mxu0  ;;  %v952_v24 = vpop.f32.mrb[1].mxu1 }
 0x120   : > { %v825_v25 = vpop.f32.mrb[2].mxu0  ;;  %v953_v26 = vpop.f32.mrb[2].mxu1 }
 0x121   : > { %v1077_v27 = vmax.f32 %v823_v21, 0.0  ;;  %v1109_v28 = vmax.f32 %v951_v22, 0.0  ;;  %v826_v29 = vadd.f32 %v2759_v18, %v825_v25  ;;  %v954_v30 = vadd.f32 %v2759_v18, %v953_v26  ;;  %v827_v31 = vpop.f32.mrb[3].mxu0  ;;  %v955_v32 = vpop.f32.mrb[3].mxu1 }
 0x123   : > { %v2131_v33 = vpack.c.bf16 %v1077_v27, %v1077_v27  ;;  %v2163_v34 = vpack.c.bf16 %v1109_v28, %v1109_v28  ;;  %v1078_v35 = vmax.f32 %v826_v29, 0.0  ;;  %v1110_v36 = vmax.f32 %v954_v30, 0.0 }
 0x125   : > { %1398 = vst.msk [vmem:[%s2765_s12] sm:$0xf] %vm1397_vm2, %v2131_v33  ;;  %1430 = vst.msk [vmem:[%s2765_s12 + $0x80] sm:$0xf] %vm1397_vm2, %v2163_v34  ;;  %v2132_v37 = vpack.c.bf16 %v1078_v35, %v1078_v35  ;;  %v2164_v38 = vpack.c.bf16 %v1110_v36, %v1110_v36 }
 0x126   : > { %v830_v39 = vpop.f32.mrb[4].mxu0  ;;  %v958_v40 = vpop.f32.mrb[4].mxu1 }
 0x127   : > { %1399 = vst.msk [vmem:[%s2765_s12 + $0x4] sm:$0xf] %vm1397_vm2, %v2132_v37  ;;  %1431 = vst.msk [vmem:[%s2765_s12 + $0x84] sm:$0xf] %vm1397_vm2, %v2164_v38  ;;  %v831_v41 = vadd.f32 %v2759_v18, %v830_v39  ;;  %v959_v42 = vadd.f32 %v2759_v18, %v958_v40  ;;  %v832_v43 = vpop.f32.mrb[5].mxu0  ;;  %v960_v44 = vpop.f32.mrb[5].mxu1 }
 0x128   : > { %v833_v45 = vpop.f32.mrb[6].mxu0  ;;  %v961_v46 = vpop.f32.mrb[6].mxu1 }
 0x129   : > { %v1079_v47 = vmax.f32 %v831_v41, 0.0  ;;  %v1111_v48 = vmax.f32 %v959_v42, 0.0  ;;  %v834_v49 = vadd.f32 %v2759_v18, %v833_v45  ;;  %v962_v50 = vadd.f32 %v2759_v18, %v961_v46  ;;  %v835_v51 = vpop.f32.mrb[7].mxu0  ;;  %v963_v52 = vpop.f32.mrb[7].mxu1 }
 0x12b   : > { %v2133_v53 = vpack.c.bf16 %v1079_v47, %v1079_v47  ;;  %v2165_v54 = vpack.c.bf16 %v1111_v48, %v1111_v48  ;;  %v1080_v55 = vmax.f32 %v834_v49, 0.0  ;;  %v1112_v56 = vmax.f32 %v962_v50, 0.0 }
 0x12d   : > { %1400 = vst.msk [vmem:[%s2765_s12 + $0x8] sm:$0xf] %vm1397_vm2, %v2133_v53  ;;  %1432 = vst.msk [vmem:[%s2765_s12 + $0x88] sm:$0xf] %vm1397_vm2, %v2165_v54  ;;  %v2134_v57 = vpack.c.bf16 %v1080_v55, %v1080_v55  ;;  %v2166_v58 = vpack.c.bf16 %v1112_v56, %v1112_v56 }
 0x12e   : > { %v838_v59 = vpop.f32.mrb[8].mxu0  ;;  %v966_v60 = vpop.f32.mrb[8].mxu1 }
 0x12f   : > { %1401 = vst.msk [vmem:[%s2765_s12 + $0xc] sm:$0xf] %vm1397_vm2, %v2134_v57  ;;  %1433 = vst.msk [vmem:[%s2765_s12 + $0x8c] sm:$0xf] %vm1397_vm2, %v2166_v58  ;;  %v839_v61 = vadd.f32 %v2759_v18, %v838_v59  ;;  %v967_v62 = vadd.f32 %v2759_v18, %v966_v60  ;;  %v840_v63 = vpop.f32.mrb[9].mxu0  ;;  %v968_v0 = vpop.f32.mrb[9].mxu1 }
 0x130   : > { %v841_v1 = vpop.f32.mrb[10].mxu0  ;;  %v969_v2 = vpop.f32.mrb[10].mxu1 }
 0x131   : > { %v1081_v3 = vmax.f32 %v839_v61, 0.0  ;;  %v1113_v4 = vmax.f32 %v967_v62, 0.0  ;;  %v842_v5 = vadd.f32 %v2759_v18, %v841_v1  ;;  %v970_v6 = vadd.f32 %v2759_v18, %v969_v2  ;;  %v843_v7 = vpop.f32.mrb[11].mxu0  ;;  %v971_v8 = vpop.f32.mrb[11].mxu1 }
 0x133   : > { %v2135_v9 = vpack.c.bf16 %v1081_v3, %v1081_v3  ;;  %v2167_v10 = vpack.c.bf16 %v1113_v4, %v1113_v4  ;;  %v1082_v11 = vmax.f32 %v842_v5, 0.0  ;;  %v1114_v12 = vmax.f32 %v970_v6, 0.0 }
 0x135   : > { %1402 = vst.msk [vmem:[%s2765_s12 + $0x10] sm:$0xf] %vm1397_vm2, %v2135_v9  ;;  %1434 = vst.msk [vmem:[%s2765_s12 + $0x90] sm:$0xf] %vm1397_vm2, %v2167_v10  ;;  %v2136_v13 = vpack.c.bf16 %v1082_v11, %v1082_v11  ;;  %v2168_v14 = vpack.c.bf16 %v1114_v12, %v1114_v12 }
 0x136   : > { %v846_v15 = vpop.f32.mrb[12].mxu0  ;;  %v974_v16 = vpop.f32.mrb[12].mxu1 }
 0x137   : > { %1403 = vst.msk [vmem:[%s2765_s12 + $0x14] sm:$0xf] %vm1397_vm2, %v2136_v13  ;;  %1435 = vst.msk [vmem:[%s2765_s12 + $0x94] sm:$0xf] %vm1397_vm2, %v2168_v14  ;;  %v847_v17 = vadd.f32 %v2759_v18, %v846_v15  ;;  %v975_v19 = vadd.f32 %v2759_v18, %v974_v16  ;;  %v848_v20 = vpop.f32.mrb[13].mxu0  ;;  %v976_v21 = vpop.f32.mrb[13].mxu1 }
 0x138   : > { %v849_v22 = vpop.f32.mrb[14].mxu0  ;;  %v977_v23 = vpop.f32.mrb[14].mxu1 }
 0x139   : > { %v1083_v24 = vmax.f32 %v847_v17, 0.0  ;;  %v1115_v25 = vmax.f32 %v975_v19, 0.0  ;;  %v850_v26 = vadd.f32 %v2759_v18, %v849_v22  ;;  %v978_v27 = vadd.f32 %v2759_v18, %v977_v23  ;;  %v851_v28 = vpop.f32.mrb[15].mxu0  ;;  %v979_v29 = vpop.f32.mrb[15].mxu1 }
 0x13b   : > { %v2137_v30 = vpack.c.bf16 %v1083_v24, %v1083_v24  ;;  %v2169_v31 = vpack.c.bf16 %v1115_v25, %v1115_v25  ;;  %v1084_v32 = vmax.f32 %v850_v26, 0.0  ;;  %v1116_v33 = vmax.f32 %v978_v27, 0.0 }
 0x13d   : > { %1404 = vst.msk [vmem:[%s2765_s12 + $0x18] sm:$0xf] %vm1397_vm2, %v2137_v30  ;;  %1436 = vst.msk [vmem:[%s2765_s12 + $0x98] sm:$0xf] %vm1397_vm2, %v2169_v31  ;;  %v2138_v34 = vpack.c.bf16 %v1084_v32, %v1084_v32  ;;  %v2170_v35 = vpack.c.bf16 %v1116_v33, %v1116_v33 }
 0x13e   : > { %v854_v36 = vpop.f32.mrb[16].mxu0  ;;  %v982_v37 = vpop.f32.mrb[16].mxu1 }
 0x13f   : > { %1405 = vst.msk [vmem:[%s2765_s12 + $0x1c] sm:$0xf] %vm1397_vm2, %v2138_v34  ;;  %1437 = vst.msk [vmem:[%s2765_s12 + $0x9c] sm:$0xf] %vm1397_vm2, %v2170_v35  ;;  %v855_v38 = vadd.f32 %v2759_v18, %v854_v36  ;;  %v983_v39 = vadd.f32 %v2759_v18, %v982_v37  ;;  %v856_v40 = vpop.f32.mrb[17].mxu0  ;;  %v984_v41 = vpop.f32.mrb[17].mxu1 }
 0x140   : > { %v857_v42 = vpop.f32.mrb[18].mxu0  ;;  %v985_v43 = vpop.f32.mrb[18].mxu1 }
 0x141   : > { %v1085_v44 = vmax.f32 %v855_v38, 0.0  ;;  %v1117_v45 = vmax.f32 %v983_v39, 0.0  ;;  %v858_v46 = vadd.f32 %v2759_v18, %v857_v42  ;;  %v986_v47 = vadd.f32 %v2759_v18, %v985_v43  ;;  %v859_v48 = vpop.f32.mrb[19].mxu0  ;;  %v987_v49 = vpop.f32.mrb[19].mxu1 }
 0x143   : > { %v2139_v50 = vpack.c.bf16 %v1085_v44, %v1085_v44  ;;  %v2171_v51 = vpack.c.bf16 %v1117_v45, %v1117_v45  ;;  %v1086_v52 = vmax.f32 %v858_v46, 0.0  ;;  %v1118_v53 = vmax.f32 %v986_v47, 0.0 }
 0x145   : > { %1406 = vst.msk [vmem:[%s2765_s12 + $0x20] sm:$0xf] %vm1397_vm2, %v2139_v50  ;;  %1438 = vst.msk [vmem:[%s2765_s12 + $0xa0] sm:$0xf] %vm1397_vm2, %v2171_v51  ;;  %v2140_v54 = vpack.c.bf16 %v1086_v52, %v1086_v52  ;;  %v2172_v55 = vpack.c.bf16 %v1118_v53, %v1118_v53 }
 0x146   : > { %v862_v56 = vpop.f32.mrb[20].mxu0  ;;  %v990_v57 = vpop.f32.mrb[20].mxu1 }
 0x147   : > { %1407 = vst.msk [vmem:[%s2765_s12 + $0x24] sm:$0xf] %vm1397_vm2, %v2140_v54  ;;  %1439 = vst.msk [vmem:[%s2765_s12 + $0xa4] sm:$0xf] %vm1397_vm2, %v2172_v55  ;;  %v863_v58 = vadd.f32 %v2759_v18, %v862_v56  ;;  %v991_v59 = vadd.f32 %v2759_v18, %v990_v57  ;;  %v864_v60 = vpop.f32.mrb[21].mxu0  ;;  %v992_v61 = vpop.f32.mrb[21].mxu1 }
 0x148   : > { %v865_v62 = vpop.f32.mrb[22].mxu0  ;;  %v993_v63 = vpop.f32.mrb[22].mxu1 }
 0x149   : > { %v1087_v0 = vmax.f32 %v863_v58, 0.0  ;;  %v1119_v1 = vmax.f32 %v991_v59, 0.0  ;;  %v866_v2 = vadd.f32 %v2759_v18, %v865_v62  ;;  %v994_v3 = vadd.f32 %v2759_v18, %v993_v63  ;;  %v867_v4 = vpop.f32.mrb[23].mxu0  ;;  %v995_v5 = vpop.f32.mrb[23].mxu1 }
 0x14b   : > { %v2141_v6 = vpack.c.bf16 %v1087_v0, %v1087_v0  ;;  %v2173_v7 = vpack.c.bf16 %v1119_v1, %v1119_v1  ;;  %v1088_v8 = vmax.f32 %v866_v2, 0.0  ;;  %v1120_v9 = vmax.f32 %v994_v3, 0.0 }
 0x14d   : > { %1408 = vst.msk [vmem:[%s2765_s12 + $0x28] sm:$0xf] %vm1397_vm2, %v2141_v6  ;;  %1440 = vst.msk [vmem:[%s2765_s12 + $0xa8] sm:$0xf] %vm1397_vm2, %v2173_v7  ;;  %v2142_v10 = vpack.c.bf16 %v1088_v8, %v1088_v8  ;;  %v2174_v11 = vpack.c.bf16 %v1120_v9, %v1120_v9 }
 0x14e   : > { %v870_v12 = vpop.f32.mrb[24].mxu0  ;;  %v998_v13 = vpop.f32.mrb[24].mxu1 }
 0x14f   : > { %1409 = vst.msk [vmem:[%s2765_s12 + $0x2c] sm:$0xf] %vm1397_vm2, %v2142_v10  ;;  %1441 = vst.msk [vmem:[%s2765_s12 + $0xac] sm:$0xf] %vm1397_vm2, %v2174_v11  ;;  %v871_v14 = vadd.f32 %v2759_v18, %v870_v12  ;;  %v999_v15 = vadd.f32 %v2759_v18, %v998_v13  ;;  %v872_v16 = vpop.f32.mrb[25].mxu0  ;;  %v1000_v17 = vpop.f32.mrb[25].mxu1 }
 0x150   : > { %v873_v19 = vpop.f32.mrb[26].mxu0  ;;  %v1001_v20 = vpop.f32.mrb[26].mxu1 }
 0x151   : > { %v1089_v21 = vmax.f32 %v871_v14, 0.0  ;;  %v1121_v22 = vmax.f32 %v999_v15, 0.0  ;;  %v874_v23 = vadd.f32 %v2759_v18, %v873_v19  ;;  %v1002_v24 = vadd.f32 %v2759_v18, %v1001_v20  ;;  %v875_v25 = vpop.f32.mrb[27].mxu0  ;;  %v1003_v26 = vpop.f32.mrb[27].mxu1 }
 0x153   : > { %v2143_v27 = vpack.c.bf16 %v1089_v21, %v1089_v21  ;;  %v2175_v28 = vpack.c.bf16 %v1121_v22, %v1121_v22  ;;  %v1090_v29 = vmax.f32 %v874_v23, 0.0  ;;  %v1122_v30 = vmax.f32 %v1002_v24, 0.0 }
 0x155   : > { %1410 = vst.msk [vmem:[%s2765_s12 + $0x30] sm:$0xf] %vm1397_vm2, %v2143_v27  ;;  %1442 = vst.msk [vmem:[%s2765_s12 + $0xb0] sm:$0xf] %vm1397_vm2, %v2175_v28  ;;  %v2144_v31 = vpack.c.bf16 %v1090_v29, %v1090_v29  ;;  %v2176_v32 = vpack.c.bf16 %v1122_v30, %v1122_v30 }
 0x156   : > { %v878_v33 = vpop.f32.mrb[28].mxu0  ;;  %v1006_v34 = vpop.f32.mrb[28].mxu1 }
 0x157   : > { %1411 = vst.msk [vmem:[%s2765_s12 + $0x34] sm:$0xf] %vm1397_vm2, %v2144_v31  ;;  %1443 = vst.msk [vmem:[%s2765_s12 + $0xb4] sm:$0xf] %vm1397_vm2, %v2176_v32  ;;  %v879_v35 = vadd.f32 %v2759_v18, %v878_v33  ;;  %v1007_v36 = vadd.f32 %v2759_v18, %v1006_v34  ;;  %v880_v37 = vpop.f32.mrb[29].mxu0  ;;  %v1008_v38 = vpop.f32.mrb[29].mxu1 }
 0x158   : > { %v881_v39 = vpop.f32.mrb[30].mxu0  ;;  %v1009_v40 = vpop.f32.mrb[30].mxu1 }
 0x159   : > { %v1091_v41 = vmax.f32 %v879_v35, 0.0  ;;  %v1123_v42 = vmax.f32 %v1007_v36, 0.0  ;;  %v882_v43 = vadd.f32 %v2759_v18, %v881_v39  ;;  %v1010_v44 = vadd.f32 %v2759_v18, %v1009_v40  ;;  %v883_v45 = vpop.f32.mrb[31].mxu0  ;;  %v1011_v46 = vpop.f32.mrb[31].mxu1 }
 0x15b   : > { %v2145_v47 = vpack.c.bf16 %v1091_v41, %v1091_v41  ;;  %v2177_v48 = vpack.c.bf16 %v1123_v42, %v1123_v42  ;;  %v1092_v49 = vmax.f32 %v882_v43, 0.0  ;;  %v1124_v50 = vmax.f32 %v1010_v44, 0.0 }
 0x15d   : > { %1412 = vst.msk [vmem:[%s2765_s12 + $0x38] sm:$0xf] %vm1397_vm2, %v2145_v47  ;;  %1444 = vst.msk [vmem:[%s2765_s12 + $0xb8] sm:$0xf] %vm1397_vm2, %v2177_v48  ;;  %v2146_v51 = vpack.c.bf16 %v1092_v49, %v1092_v49  ;;  %v2178_v52 = vpack.c.bf16 %v1124_v50, %v1124_v50 }
 0x15e   : > { %v886_v53 = vpop.f32.mrb[32].mxu0  ;;  %v1014_v54 = vpop.f32.mrb[32].mxu1 }
 0x15f   : > { %1413 = vst.msk [vmem:[%s2765_s12 + $0x3c] sm:$0xf] %vm1397_vm2, %v2146_v51  ;;  %1445 = vst.msk [vmem:[%s2765_s12 + $0xbc] sm:$0xf] %vm1397_vm2, %v2178_v52  ;;  %v887_v55 = vadd.f32 %v2759_v18, %v886_v53  ;;  %v1015_v56 = vadd.f32 %v2759_v18, %v1014_v54  ;;  %v888_v57 = vpop.f32.mrb[33].mxu0  ;;  %v1016_v58 = vpop.f32.mrb[33].mxu1 }
 0x160   : > { %v889_v59 = vpop.f32.mrb[34].mxu0  ;;  %v1017_v60 = vpop.f32.mrb[34].mxu1 }
 0x161   : > { %v1093_v61 = vmax.f32 %v887_v55, 0.0  ;;  %v1125_v62 = vmax.f32 %v1015_v56, 0.0  ;;  %v890_v63 = vadd.f32 %v2759_v18, %v889_v59  ;;  %v1018_v0 = vadd.f32 %v2759_v18, %v1017_v60  ;;  %v891_v1 = vpop.f32.mrb[35].mxu0  ;;  %v1019_v2 = vpop.f32.mrb[35].mxu1 }
 0x163   : > { %v2147_v3 = vpack.c.bf16 %v1093_v61, %v1093_v61  ;;  %v2179_v4 = vpack.c.bf16 %v1125_v62, %v1125_v62  ;;  %v1094_v5 = vmax.f32 %v890_v63, 0.0  ;;  %v1126_v6 = vmax.f32 %v1018_v0, 0.0 }
 0x165   : > { %1414 = vst.msk [vmem:[%s2765_s12 + $0x40] sm:$0xf] %vm1397_vm2, %v2147_v3  ;;  %1446 = vst.msk [vmem:[%s2765_s12 + $0xc0] sm:$0xf] %vm1397_vm2, %v2179_v4  ;;  %v2148_v7 = vpack.c.bf16 %v1094_v5, %v1094_v5  ;;  %v2180_v8 = vpack.c.bf16 %v1126_v6, %v1126_v6 }
 0x166   : > { %v894_v9 = vpop.f32.mrb[36].mxu0  ;;  %v1022_v10 = vpop.f32.mrb[36].mxu1 }
 0x167   : > { %1415 = vst.msk [vmem:[%s2765_s12 + $0x44] sm:$0xf] %vm1397_vm2, %v2148_v7  ;;  %1447 = vst.msk [vmem:[%s2765_s12 + $0xc4] sm:$0xf] %vm1397_vm2, %v2180_v8  ;;  %v895_v11 = vadd.f32 %v2759_v18, %v894_v9  ;;  %v1023_v12 = vadd.f32 %v2759_v18, %v1022_v10  ;;  %v896_v13 = vpop.f32.mrb[37].mxu0  ;;  %v1024_v14 = vpop.f32.mrb[37].mxu1 }
 0x168   : > { %v897_v15 = vpop.f32.mrb[38].mxu0  ;;  %v1025_v16 = vpop.f32.mrb[38].mxu1 }
 0x169   : > { %v1095_v17 = vmax.f32 %v895_v11, 0.0  ;;  %v1127_v19 = vmax.f32 %v1023_v12, 0.0  ;;  %v898_v20 = vadd.f32 %v2759_v18, %v897_v15  ;;  %v1026_v21 = vadd.f32 %v2759_v18, %v1025_v16  ;;  %v899_v22 = vpop.f32.mrb[39].mxu0  ;;  %v1027_v23 = vpop.f32.mrb[39].mxu1 }
 0x16b   : > { %v2149_v24 = vpack.c.bf16 %v1095_v17, %v1095_v17  ;;  %v2181_v25 = vpack.c.bf16 %v1127_v19, %v1127_v19  ;;  %v1096_v26 = vmax.f32 %v898_v20, 0.0  ;;  %v1128_v27 = vmax.f32 %v1026_v21, 0.0 }
 0x16d   : > { %1416 = vst.msk [vmem:[%s2765_s12 + $0x48] sm:$0xf] %vm1397_vm2, %v2149_v24  ;;  %1448 = vst.msk [vmem:[%s2765_s12 + $0xc8] sm:$0xf] %vm1397_vm2, %v2181_v25  ;;  %v2150_v28 = vpack.c.bf16 %v1096_v26, %v1096_v26  ;;  %v2182_v29 = vpack.c.bf16 %v1128_v27, %v1128_v27 }
 0x16e   : > { %v902_v30 = vpop.f32.mrb[40].mxu0  ;;  %v1030_v31 = vpop.f32.mrb[40].mxu1 }
 0x16f   : > { %1417 = vst.msk [vmem:[%s2765_s12 + $0x4c] sm:$0xf] %vm1397_vm2, %v2150_v28  ;;  %1449 = vst.msk [vmem:[%s2765_s12 + $0xcc] sm:$0xf] %vm1397_vm2, %v2182_v29  ;;  %v903_v32 = vadd.f32 %v2759_v18, %v902_v30  ;;  %v1031_v33 = vadd.f32 %v2759_v18, %v1030_v31  ;;  %v904_v34 = vpop.f32.mrb[41].mxu0  ;;  %v1032_v35 = vpop.f32.mrb[41].mxu1 }
 0x170   : > { %v905_v36 = vpop.f32.mrb[42].mxu0  ;;  %v1033_v37 = vpop.f32.mrb[42].mxu1 }
 0x171   : > { %v1097_v38 = vmax.f32 %v903_v32, 0.0  ;;  %v1129_v39 = vmax.f32 %v1031_v33, 0.0  ;;  %v906_v40 = vadd.f32 %v2759_v18, %v905_v36  ;;  %v1034_v41 = vadd.f32 %v2759_v18, %v1033_v37  ;;  %v907_v42 = vpop.f32.mrb[43].mxu0  ;;  %v1035_v43 = vpop.f32.mrb[43].mxu1 }
 0x173   : > { %v2151_v44 = vpack.c.bf16 %v1097_v38, %v1097_v38  ;;  %v2183_v45 = vpack.c.bf16 %v1129_v39, %v1129_v39  ;;  %v1098_v46 = vmax.f32 %v906_v40, 0.0  ;;  %v1130_v47 = vmax.f32 %v1034_v41, 0.0 }
 0x175   : > { %1418 = vst.msk [vmem:[%s2765_s12 + $0x50] sm:$0xf] %vm1397_vm2, %v2151_v44  ;;  %1450 = vst.msk [vmem:[%s2765_s12 + $0xd0] sm:$0xf] %vm1397_vm2, %v2183_v45  ;;  %v2152_v48 = vpack.c.bf16 %v1098_v46, %v1098_v46  ;;  %v2184_v49 = vpack.c.bf16 %v1130_v47, %v1130_v47 }
 0x176   : > { %v910_v50 = vpop.f32.mrb[44].mxu0  ;;  %v1038_v51 = vpop.f32.mrb[44].mxu1 }
 0x177   : > { %1419 = vst.msk [vmem:[%s2765_s12 + $0x54] sm:$0xf] %vm1397_vm2, %v2152_v48  ;;  %1451 = vst.msk [vmem:[%s2765_s12 + $0xd4] sm:$0xf] %vm1397_vm2, %v2184_v49  ;;  %v911_v52 = vadd.f32 %v2759_v18, %v910_v50  ;;  %v1039_v53 = vadd.f32 %v2759_v18, %v1038_v51  ;;  %v912_v54 = vpop.f32.mrb[45].mxu0  ;;  %v1040_v55 = vpop.f32.mrb[45].mxu1 }
 0x178   : > { %v913_v56 = vpop.f32.mrb[46].mxu0  ;;  %v1041_v57 = vpop.f32.mrb[46].mxu1 }
 0x179   : > { %v1099_v58 = vmax.f32 %v911_v52, 0.0  ;;  %v1131_v59 = vmax.f32 %v1039_v53, 0.0  ;;  %v914_v60 = vadd.f32 %v2759_v18, %v913_v56  ;;  %v1042_v61 = vadd.f32 %v2759_v18, %v1041_v57  ;;  %v915_v62 = vpop.f32.mrb[47].mxu0  ;;  %v1043_v63 = vpop.f32.mrb[47].mxu1 }
 0x17b   : > { %v2153_v0 = vpack.c.bf16 %v1099_v58, %v1099_v58  ;;  %v2185_v1 = vpack.c.bf16 %v1131_v59, %v1131_v59  ;;  %v1100_v2 = vmax.f32 %v914_v60, 0.0  ;;  %v1132_v3 = vmax.f32 %v1042_v61, 0.0 }
 0x17d   : > { %1420 = vst.msk [vmem:[%s2765_s12 + $0x58] sm:$0xf] %vm1397_vm2, %v2153_v0  ;;  %1452 = vst.msk [vmem:[%s2765_s12 + $0xd8] sm:$0xf] %vm1397_vm2, %v2185_v1  ;;  %v2154_v4 = vpack.c.bf16 %v1100_v2, %v1100_v2  ;;  %v2186_v5 = vpack.c.bf16 %v1132_v3, %v1132_v3 }
 0x17e   : > { %v918_v6 = vpop.f32.mrb[48].mxu0  ;;  %v1046_v7 = vpop.f32.mrb[48].mxu1 }
 0x17f   : > { %1421 = vst.msk [vmem:[%s2765_s12 + $0x5c] sm:$0xf] %vm1397_vm2, %v2154_v4  ;;  %1453 = vst.msk [vmem:[%s2765_s12 + $0xdc] sm:$0xf] %vm1397_vm2, %v2186_v5  ;;  %v919_v8 = vadd.f32 %v2759_v18, %v918_v6  ;;  %v1047_v9 = vadd.f32 %v2759_v18, %v1046_v7  ;;  %v920_v10 = vpop.f32.mrb[49].mxu0  ;;  %v1048_v11 = vpop.f32.mrb[49].mxu1 }
 0x180   : > { %v921_v12 = vpop.f32.mrb[50].mxu0  ;;  %v1049_v13 = vpop.f32.mrb[50].mxu1 }
 0x181   : > { %v1101_v14 = vmax.f32 %v919_v8, 0.0  ;;  %v1133_v15 = vmax.f32 %v1047_v9, 0.0  ;;  %v922_v16 = vadd.f32 %v2759_v18, %v921_v12  ;;  %v1050_v17 = vadd.f32 %v2759_v18, %v1049_v13  ;;  %v923_v19 = vpop.f32.mrb[51].mxu0  ;;  %v1051_v20 = vpop.f32.mrb[51].mxu1 }
 0x183   : > { %v2155_v21 = vpack.c.bf16 %v1101_v14, %v1101_v14  ;;  %v2187_v22 = vpack.c.bf16 %v1133_v15, %v1133_v15  ;;  %v1102_v23 = vmax.f32 %v922_v16, 0.0  ;;  %v1134_v24 = vmax.f32 %v1050_v17, 0.0 }
 0x185   : > { %1422 = vst.msk [vmem:[%s2765_s12 + $0x60] sm:$0xf] %vm1397_vm2, %v2155_v21  ;;  %1454 = vst.msk [vmem:[%s2765_s12 + $0xe0] sm:$0xf] %vm1397_vm2, %v2187_v22  ;;  %v2156_v25 = vpack.c.bf16 %v1102_v23, %v1102_v23  ;;  %v2188_v26 = vpack.c.bf16 %v1134_v24, %v1134_v24 }
 0x186   : > { %v926_v27 = vpop.f32.mrb[52].mxu0  ;;  %v1054_v28 = vpop.f32.mrb[52].mxu1 }
 0x187   : > { %1423 = vst.msk [vmem:[%s2765_s12 + $0x64] sm:$0xf] %vm1397_vm2, %v2156_v25  ;;  %1455 = vst.msk [vmem:[%s2765_s12 + $0xe4] sm:$0xf] %vm1397_vm2, %v2188_v26  ;;  %v927_v29 = vadd.f32 %v2759_v18, %v926_v27  ;;  %v1055_v30 = vadd.f32 %v2759_v18, %v1054_v28  ;;  %v928_v31 = vpop.f32.mrb[53].mxu0  ;;  %v1056_v32 = vpop.f32.mrb[53].mxu1 }
 0x188   : > { %v929_v33 = vpop.f32.mrb[54].mxu0  ;;  %v1057_v34 = vpop.f32.mrb[54].mxu1 }
 0x189   : > { %v1103_v35 = vmax.f32 %v927_v29, 0.0  ;;  %v1135_v36 = vmax.f32 %v1055_v30, 0.0  ;;  %v930_v37 = vadd.f32 %v2759_v18, %v929_v33  ;;  %v1058_v38 = vadd.f32 %v2759_v18, %v1057_v34  ;;  %v931_v39 = vpop.f32.mrb[55].mxu0  ;;  %v1059_v40 = vpop.f32.mrb[55].mxu1 }
 0x18b   : > { %v2157_v41 = vpack.c.bf16 %v1103_v35, %v1103_v35  ;;  %v2189_v42 = vpack.c.bf16 %v1135_v36, %v1135_v36  ;;  %v1104_v43 = vmax.f32 %v930_v37, 0.0  ;;  %v1136_v44 = vmax.f32 %v1058_v38, 0.0 }
 0x18d   : > { %1424 = vst.msk [vmem:[%s2765_s12 + $0x68] sm:$0xf] %vm1397_vm2, %v2157_v41  ;;  %1456 = vst.msk [vmem:[%s2765_s12 + $0xe8] sm:$0xf] %vm1397_vm2, %v2189_v42  ;;  %v2158_v45 = vpack.c.bf16 %v1104_v43, %v1104_v43  ;;  %v2190_v46 = vpack.c.bf16 %v1136_v44, %v1136_v44 }
 0x18e   : > { %v934_v47 = vpop.f32.mrb[56].mxu0  ;;  %v1062_v48 = vpop.f32.mrb[56].mxu1 }
 0x18f   : > { %1425 = vst.msk [vmem:[%s2765_s12 + $0x6c] sm:$0xf] %vm1397_vm2, %v2158_v45  ;;  %1457 = vst.msk [vmem:[%s2765_s12 + $0xec] sm:$0xf] %vm1397_vm2, %v2190_v46  ;;  %v935_v49 = vadd.f32 %v2759_v18, %v934_v47  ;;  %v1063_v50 = vadd.f32 %v2759_v18, %v1062_v48  ;;  %v936_v51 = vpop.f32.mrb[57].mxu0  ;;  %v1064_v52 = vpop.f32.mrb[57].mxu1 }
 0x190   : > { %v937_v53 = vpop.f32.mrb[58].mxu0  ;;  %v1065_v54 = vpop.f32.mrb[58].mxu1 }
 0x191   : > { %v1105_v55 = vmax.f32 %v935_v49, 0.0  ;;  %v1137_v56 = vmax.f32 %v1063_v50, 0.0  ;;  %v938_v57 = vadd.f32 %v2759_v18, %v937_v53  ;;  %v1066_v58 = vadd.f32 %v2759_v18, %v1065_v54  ;;  %v939_v59 = vpop.f32.mrb[59].mxu0  ;;  %v1067_v60 = vpop.f32.mrb[59].mxu1 }
 0x193   : > { %v2159_v61 = vpack.c.bf16 %v1105_v55, %v1105_v55  ;;  %v2191_v62 = vpack.c.bf16 %v1137_v56, %v1137_v56  ;;  %v1106_v63 = vmax.f32 %v938_v57, 0.0  ;;  %v1138_v0 = vmax.f32 %v1066_v58, 0.0 }
 0x195   : > { %1426 = vst.msk [vmem:[%s2765_s12 + $0x70] sm:$0xf] %vm1397_vm2, %v2159_v61  ;;  %1458 = vst.msk [vmem:[%s2765_s12 + $0xf0] sm:$0xf] %vm1397_vm2, %v2191_v62  ;;  %v2160_v1 = vpack.c.bf16 %v1106_v63, %v1106_v63  ;;  %v2192_v2 = vpack.c.bf16 %v1138_v0, %v1138_v0 }
 0x196   : > { %v942_v3 = vpop.f32.mrb[60].mxu0  ;;  %v1070_v4 = vpop.f32.mrb[60].mxu1 }
 0x197   : > { %1427 = vst.msk [vmem:[%s2765_s12 + $0x74] sm:$0xf] %vm1397_vm2, %v2160_v1  ;;  %1459 = vst.msk [vmem:[%s2765_s12 + $0xf4] sm:$0xf] %vm1397_vm2, %v2192_v2  ;;  %v943_v5 = vadd.f32 %v2759_v18, %v942_v3  ;;  %v1071_v6 = vadd.f32 %v2759_v18, %v1070_v4  ;;  %v944_v7 = vpop.f32.mrb[61].mxu0  ;;  %v1072_v8 = vpop.f32.mrb[61].mxu1 }
 0x198   : > { %v945_v9 = vpop.f32.mrb[62].mxu0  ;;  %v1073_v10 = vpop.f32.mrb[62].mxu1 }
 0x199   : > { %v1107_v11 = vmax.f32 %v943_v5, 0.0  ;;  %v1139_v12 = vmax.f32 %v1071_v6, 0.0  ;;  %v946_v13 = vadd.f32 %v2759_v18, %v945_v9  ;;  %v1074_v14 = vadd.f32 %v2759_v18, %v1073_v10  ;;  %v947_v15 = vpop.f32.mrb[63].mxu0  ;;  %v1075_v16 = vpop.f32.mrb[63].mxu1  ;;  %1468 = sbr.rel (!%p2565_p4) target bundleno = 507 (0x1fb), region = 36 }
 0x19b   : > { %v2161_v17 = vpack.c.bf16 %v1107_v11, %v1107_v11  ;;  %v2193_v19 = vpack.c.bf16 %v1139_v12, %v1139_v12  ;;  %v1108_v20 = vmax.f32 %v946_v13, 0.0  ;;  %v1140_v21 = vmax.f32 %v1074_v14, 0.0 }
 0x19d   : > { %1428 = vst.msk [vmem:[%s2765_s12 + $0x78] sm:$0xf] %vm1397_vm2, %v2161_v17  ;;  %1460 = vst.msk [vmem:[%s2765_s12 + $0xf8] sm:$0xf] %vm1397_vm2, %v2193_v19  ;;  %v2162_v22 = vpack.c.bf16 %v1108_v20, %v1108_v20  ;;  %v2194_v23 = vpack.c.bf16 %v1140_v21, %v1140_v21 }
 0x19f   : > { %1429 = vst.msk [vmem:[%s2765_s12 + $0x7c] sm:$0xf] %vm1397_vm2, %v2162_v22  ;;  %1461 = vst.msk [vmem:[%s2765_s12 + $0xfc] sm:$0xf] %vm1397_vm2, %v2194_v23 }
 0x1a0   : > { %s3166_s9 = smov (!%p1471_p8, %s1470_s9), 64 }
 0x1a1   : > { %s2115_s28 = sshll.u32 %s3166_s9, 6 }
 0x1a2   : > { %p2118_p9 = scmp.eq.s32.totalorder %s2115_s28, 0 }
 0x1a3   : > { %s2968_s29 = sshrl.u32 (!%p2118_p9), %s3166_s9, 6 }
 0x1a4   : > { %1479 = sbr.rel (%p2118_p9) target bundleno = 507 (0x1fb), region = 40  ;;  %p2119_p10 = scmp.le.s32.totalorder (!%p2118_p9), %s2968_s29, 0 }
 0x1ab   : > { %1884 = sbr.rel (%p2119_p10) target bundleno = 486 (0x1e6), region = 112  ;;  %s3159_s15 = smov (!%p2119_p10), %s2962_s27 }
 0x1ac   : > { %s3160_s20 = smov (!%p2119_p10), %s2765_s12  ;;  %s2977_s25 = smov (!%p2119_p10), 0  }
 0x1ad   : > { %s2979_s30 = smov (!%p2119_p10), 0  }
 0x1b2 LB: >> { %v1495_v18 = vld [vmem:[%s2493_s20] sm:$0xf]  ;;  %v1497_v24 = vld [vmem:[%s2493_s20 + $0x4] sm:$0xf]  ;;  %v1499_v25 = vld [vmem:[%s2493_s20 + $0x8] sm:$0xf]  ;;  %s2501_s30 = sphi %s2979_s30, %s1489_s30   ;;  %s2497_s25 = sphi %s2977_s25, %s3161_s25   ;;  %s2493_s20 = sphi %s3160_s20, %s1628_s20   ;;  %s2489_s15 = sphi %s3159_s15, %s1629_s15  }
 0x1b3   : >> { %1496 = vst [vmem:[%s2489_s15] sm:$0xf] %v1495_v18  ;;  %1498 = vst [vmem:[%s2489_s15 + $0x4] sm:$0xf] %v1497_v24  ;;  %v1501_v26 = vld [vmem:[%s2493_s20 + $0xc] sm:$0xf]  ;;  %s1623_s4 = sadd.s32 1, %s2497_s25 }
 0x1b4   : >> { %1500 = vst [vmem:[%s2489_s15 + $0x8] sm:$0xf] %v1499_v25  ;;  %v1503_v27 = vld [vmem:[%s2493_s20 + $0x10] sm:$0xf]  ;;  %v1505_v28 = vld [vmem:[%s2493_s20 + $0x14] sm:$0xf]  ;;  %p1624_p11 = scmp.ge.s32.totalorder %s1623_s4, %s2968_s29 }
 0x1b5   : >> { %1502 = vst [vmem:[%s2489_s15 + $0xc] sm:$0xf] %v1501_v26  ;;  %1504 = vst [vmem:[%s2489_s15 + $0x10] sm:$0xf] %v1503_v27  ;;  %v1507_v29 = vld [vmem:[%s2493_s20 + $0x18] sm:$0xf] }
 0x1b6   : >> { %1506 = vst [vmem:[%s2489_s15 + $0x14] sm:$0xf] %v1505_v28  ;;  %v1509_v30 = vld [vmem:[%s2493_s20 + $0x1c] sm:$0xf]  ;;  %v1511_v31 = vld [vmem:[%s2493_s20 + $0x20] sm:$0xf] }
 0x1b7   : >> { %1508 = vst [vmem:[%s2489_s15 + $0x18] sm:$0xf] %v1507_v29  ;;  %1510 = vst [vmem:[%s2489_s15 + $0x1c] sm:$0xf] %v1509_v30  ;;  %v1513_v32 = vld [vmem:[%s2493_s20 + $0x24] sm:$0xf] }
 0x1b8   : >> { %1512 = vst [vmem:[%s2489_s15 + $0x20] sm:$0xf] %v1511_v31  ;;  %v1515_v33 = vld [vmem:[%s2493_s20 + $0x28] sm:$0xf]  ;;  %v1517_v34 = vld [vmem:[%s2493_s20 + $0x2c] sm:$0xf] }
 0x1b9   : >> { %1514 = vst [vmem:[%s2489_s15 + $0x24] sm:$0xf] %v1513_v32  ;;  %1516 = vst [vmem:[%s2489_s15 + $0x28] sm:$0xf] %v1515_v33  ;;  %v1519_v35 = vld [vmem:[%s2493_s20 + $0x30] sm:$0xf] }
 0x1ba   : >> { %1518 = vst [vmem:[%s2489_s15 + $0x2c] sm:$0xf] %v1517_v34  ;;  %v1521_v36 = vld [vmem:[%s2493_s20 + $0x34] sm:$0xf]  ;;  %v1523_v37 = vld [vmem:[%s2493_s20 + $0x38] sm:$0xf] }
 0x1bb   : >> { %1520 = vst [vmem:[%s2489_s15 + $0x30] sm:$0xf] %v1519_v35  ;;  %1522 = vst [vmem:[%s2489_s15 + $0x34] sm:$0xf] %v1521_v36  ;;  %v1525_v38 = vld [vmem:[%s2493_s20 + $0x3c] sm:$0xf] }
 0x1bc   : >> { %1524 = vst [vmem:[%s2489_s15 + $0x38] sm:$0xf] %v1523_v37  ;;  %v1527_v39 = vld [vmem:[%s2493_s20 + $0x40] sm:$0xf]  ;;  %v1529_v40 = vld [vmem:[%s2493_s20 + $0x44] sm:$0xf] }
 0x1bd   : >> { %1526 = vst [vmem:[%s2489_s15 + $0x3c] sm:$0xf] %v1525_v38  ;;  %1528 = vst [vmem:[%s2489_s15 + $0x40] sm:$0xf] %v1527_v39  ;;  %v1531_v41 = vld [vmem:[%s2493_s20 + $0x48] sm:$0xf] }
 0x1be   : >> { %1530 = vst [vmem:[%s2489_s15 + $0x44] sm:$0xf] %v1529_v40  ;;  %v1533_v42 = vld [vmem:[%s2493_s20 + $0x4c] sm:$0xf]  ;;  %v1535_v43 = vld [vmem:[%s2493_s20 + $0x50] sm:$0xf] }
 0x1bf   : >> { %1532 = vst [vmem:[%s2489_s15 + $0x48] sm:$0xf] %v1531_v41  ;;  %1534 = vst [vmem:[%s2489_s15 + $0x4c] sm:$0xf] %v1533_v42  ;;  %v1537_v44 = vld [vmem:[%s2493_s20 + $0x54] sm:$0xf] }
 0x1c0   : >> { %1536 = vst [vmem:[%s2489_s15 + $0x50] sm:$0xf] %v1535_v43  ;;  %v1539_v45 = vld [vmem:[%s2493_s20 + $0x58] sm:$0xf]  ;;  %v1541_v46 = vld [vmem:[%s2493_s20 + $0x5c] sm:$0xf] }
 0x1c1   : >> { %1538 = vst [vmem:[%s2489_s15 + $0x54] sm:$0xf] %v1537_v44  ;;  %1540 = vst [vmem:[%s2489_s15 + $0x58] sm:$0xf] %v1539_v45  ;;  %v1543_v47 = vld [vmem:[%s2493_s20 + $0x60] sm:$0xf] }
 0x1c2   : >> { %1542 = vst [vmem:[%s2489_s15 + $0x5c] sm:$0xf] %v1541_v46  ;;  %v1545_v48 = vld [vmem:[%s2493_s20 + $0x64] sm:$0xf]  ;;  %v1547_v49 = vld [vmem:[%s2493_s20 + $0x68] sm:$0xf] }
 0x1c3   : >> { %1544 = vst [vmem:[%s2489_s15 + $0x60] sm:$0xf] %v1543_v47  ;;  %1546 = vst [vmem:[%s2489_s15 + $0x64] sm:$0xf] %v1545_v48  ;;  %v1549_v50 = vld [vmem:[%s2493_s20 + $0x6c] sm:$0xf] }
 0x1c4   : >> { %1548 = vst [vmem:[%s2489_s15 + $0x68] sm:$0xf] %v1547_v49  ;;  %v1551_v51 = vld [vmem:[%s2493_s20 + $0x70] sm:$0xf]  ;;  %v1553_v52 = vld [vmem:[%s2493_s20 + $0x74] sm:$0xf] }
 0x1c5   : >> { %1550 = vst [vmem:[%s2489_s15 + $0x6c] sm:$0xf] %v1549_v50  ;;  %1552 = vst [vmem:[%s2489_s15 + $0x70] sm:$0xf] %v1551_v51  ;;  %v1555_v53 = vld [vmem:[%s2493_s20 + $0x78] sm:$0xf] }
 0x1c6   : >> { %1554 = vst [vmem:[%s2489_s15 + $0x74] sm:$0xf] %v1553_v52  ;;  %v1557_v54 = vld [vmem:[%s2493_s20 + $0x7c] sm:$0xf]  ;;  %v1559_v55 = vld [vmem:[%s2493_s20 + $0x80] sm:$0xf] }
 0x1c7   : >> { %1556 = vst [vmem:[%s2489_s15 + $0x78] sm:$0xf] %v1555_v53  ;;  %1558 = vst [vmem:[%s2489_s15 + $0x7c] sm:$0xf] %v1557_v54  ;;  %v1561_v56 = vld [vmem:[%s2493_s20 + $0x84] sm:$0xf] }
 0x1c8   : >> { %1560 = vst [vmem:[%s2489_s15 + $0x80] sm:$0xf] %v1559_v55  ;;  %v1563_v57 = vld [vmem:[%s2493_s20 + $0x88] sm:$0xf]  ;;  %v1565_v58 = vld [vmem:[%s2493_s20 + $0x8c] sm:$0xf] }
 0x1c9   : >> { %1562 = vst [vmem:[%s2489_s15 + $0x84] sm:$0xf] %v1561_v56  ;;  %1564 = vst [vmem:[%s2489_s15 + $0x88] sm:$0xf] %v1563_v57  ;;  %v1567_v59 = vld [vmem:[%s2493_s20 + $0x90] sm:$0xf] }
 0x1ca   : >> { %1566 = vst [vmem:[%s2489_s15 + $0x8c] sm:$0xf] %v1565_v58  ;;  %v1569_v60 = vld [vmem:[%s2493_s20 + $0x94] sm:$0xf]  ;;  %v1571_v61 = vld [vmem:[%s2493_s20 + $0x98] sm:$0xf] }
 0x1cb   : >> { %1568 = vst [vmem:[%s2489_s15 + $0x90] sm:$0xf] %v1567_v59  ;;  %1570 = vst [vmem:[%s2489_s15 + $0x94] sm:$0xf] %v1569_v60  ;;  %v1573_v62 = vld [vmem:[%s2493_s20 + $0x9c] sm:$0xf] }
 0x1cc   : >> { %1572 = vst [vmem:[%s2489_s15 + $0x98] sm:$0xf] %v1571_v61  ;;  %v1575_v63 = vld [vmem:[%s2493_s20 + $0xa0] sm:$0xf]  ;;  %v1577_v0 = vld [vmem:[%s2493_s20 + $0xa4] sm:$0xf] }
 0x1cd   : >> { %1574 = vst [vmem:[%s2489_s15 + $0x9c] sm:$0xf] %v1573_v62  ;;  %1576 = vst [vmem:[%s2489_s15 + $0xa0] sm:$0xf] %v1575_v63  ;;  %v1579_v1 = vld [vmem:[%s2493_s20 + $0xa8] sm:$0xf] }
 0x1ce   : >> { %1578 = vst [vmem:[%s2489_s15 + $0xa4] sm:$0xf] %v1577_v0  ;;  %v1581_v2 = vld [vmem:[%s2493_s20 + $0xac] sm:$0xf]  ;;  %v1583_v3 = vld [vmem:[%s2493_s20 + $0xb0] sm:$0xf] }
 0x1cf   : >> { %1580 = vst [vmem:[%s2489_s15 + $0xa8] sm:$0xf] %v1579_v1  ;;  %1582 = vst [vmem:[%s2489_s15 + $0xac] sm:$0xf] %v1581_v2  ;;  %v1585_v4 = vld [vmem:[%s2493_s20 + $0xb4] sm:$0xf] }
 0x1d0   : >> { %1584 = vst [vmem:[%s2489_s15 + $0xb0] sm:$0xf] %v1583_v3  ;;  %v1587_v5 = vld [vmem:[%s2493_s20 + $0xb8] sm:$0xf]  ;;  %v1589_v6 = vld [vmem:[%s2493_s20 + $0xbc] sm:$0xf] }
 0x1d1   : >> { %1586 = vst [vmem:[%s2489_s15 + $0xb4] sm:$0xf] %v1585_v4  ;;  %1588 = vst [vmem:[%s2489_s15 + $0xb8] sm:$0xf] %v1587_v5  ;;  %v1591_v7 = vld [vmem:[%s2493_s20 + $0xc0] sm:$0xf] }
 0x1d2   : >> { %1590 = vst [vmem:[%s2489_s15 + $0xbc] sm:$0xf] %v1589_v6  ;;  %v1593_v8 = vld [vmem:[%s2493_s20 + $0xc4] sm:$0xf]  ;;  %v1595_v9 = vld [vmem:[%s2493_s20 + $0xc8] sm:$0xf] }
 0x1d3   : >> { %1592 = vst [vmem:[%s2489_s15 + $0xc0] sm:$0xf] %v1591_v7  ;;  %1594 = vst [vmem:[%s2489_s15 + $0xc4] sm:$0xf] %v1593_v8  ;;  %v1597_v10 = vld [vmem:[%s2493_s20 + $0xcc] sm:$0xf] }
 0x1d4   : >> { %1596 = vst [vmem:[%s2489_s15 + $0xc8] sm:$0xf] %v1595_v9  ;;  %v1599_v11 = vld [vmem:[%s2493_s20 + $0xd0] sm:$0xf]  ;;  %v1601_v12 = vld [vmem:[%s2493_s20 + $0xd4] sm:$0xf] }
 0x1d5   : >> { %1598 = vst [vmem:[%s2489_s15 + $0xcc] sm:$0xf] %v1597_v10  ;;  %1600 = vst [vmem:[%s2489_s15 + $0xd0] sm:$0xf] %v1599_v11  ;;  %v1603_v13 = vld [vmem:[%s2493_s20 + $0xd8] sm:$0xf] }
 0x1d6   : >> { %1602 = vst [vmem:[%s2489_s15 + $0xd4] sm:$0xf] %v1601_v12  ;;  %v1605_v14 = vld [vmem:[%s2493_s20 + $0xdc] sm:$0xf]  ;;  %v1607_v15 = vld [vmem:[%s2493_s20 + $0xe0] sm:$0xf] }
 0x1d7   : >> { %1604 = vst [vmem:[%s2489_s15 + $0xd8] sm:$0xf] %v1603_v13  ;;  %1606 = vst [vmem:[%s2489_s15 + $0xdc] sm:$0xf] %v1605_v14  ;;  %v1609_v16 = vld [vmem:[%s2493_s20 + $0xe4] sm:$0xf] }
 0x1d8   : >> { %1608 = vst [vmem:[%s2489_s15 + $0xe0] sm:$0xf] %v1607_v15  ;;  %v1611_v17 = vld [vmem:[%s2493_s20 + $0xe8] sm:$0xf]  ;;  %v1613_v19 = vld [vmem:[%s2493_s20 + $0xec] sm:$0xf] }
 0x1d9   : >> { %1610 = vst [vmem:[%s2489_s15 + $0xe4] sm:$0xf] %v1609_v16  ;;  %1612 = vst [vmem:[%s2489_s15 + $0xe8] sm:$0xf] %v1611_v17  ;;  %v1615_v20 = vld [vmem:[%s2493_s20 + $0xf0] sm:$0xf] }
 0x1da   : >> { %1614 = vst [vmem:[%s2489_s15 + $0xec] sm:$0xf] %v1613_v19  ;;  %v1617_v21 = vld [vmem:[%s2493_s20 + $0xf4] sm:$0xf]  ;;  %v1619_v22 = vld [vmem:[%s2493_s20 + $0xf8] sm:$0xf] }
 0x1db   : >> { %1616 = vst [vmem:[%s2489_s15 + $0xf0] sm:$0xf] %v1615_v20  ;;  %1618 = vst [vmem:[%s2489_s15 + $0xf4] sm:$0xf] %v1617_v21  ;;  %v1621_v23 = vld [vmem:[%s2493_s20 + $0xfc] sm:$0xf] }
 0x1dc   : >> { %1620 = vst [vmem:[%s2489_s15 + $0xf8] sm:$0xf] %v1619_v22  ;;  %1622 = vst [vmem:[%s2489_s15 + $0xfc] sm:$0xf] %v1621_v23  ;;  %s3168_s4 = smov (%p1624_p11, %s1623_s4), 0  ;;  %s1489_s30 = sadd.s32 1, %s2501_s30  }
 0x1dd   : >> { %s2120_s5 = sshll.u32 %s3168_s4, 8  ;;  %p1488_p12 = scmp.ge.s32.totalorder %s1489_s30, %s2968_s29 }
 0x1de   : >> { %s1628_s20 = scalar_lea.vmem %s2765_s12, %s2120_s5 [#allocation2]   ;;  %s1629_s15 = scalar_lea.vmem %s2962_s27, %s2120_s5  }
 0x1df   : >> { %s3161_s25 = smov %s3168_s4  ;;  %1491 = sbr.rel (!%p1488_p12) target bundleno = 434 (0x1b2), region = 118 }
 0x1e6 PF: > { %s3136_s6 = sand.u32 63, %s3166_s9   ;;  %s2196_s7 = sshll.u32 %s2968_s29, 8 }
 0x1e7   : > { %s1634_s8 = scalar_lea.vmem %s2765_s12, %s2196_s7 [#allocation2]   ;;  %s1636_s10 = scalar_lea.vmem %s2962_s27, %s2196_s7  }
 0x1e8   : > { %p2125_p13 = scmp.le.s32.totalorder %s3136_s6, 0 }
 0x1e9   : > { %s2503_s11 = smov (!%p2125_p13), %s1636_s10   ;;  %s2507_s14 = smov (!%p2125_p13), %s1634_s8  }
 0x1ea   : > { %1898 = sbr.rel (%p2125_p13) target bundleno = 507 (0x1fb), region = 123  ;;  %s2511_s17 = smov (!%p2125_p13), 0  }
 0x1eb   : > { %s2515_s18 = smov (!%p2125_p13), 0  }
 0x1f1 LB: >> { %v1646_v18 = vld [vmem:[%s2509_s14] sm:$0xf]  ;;  %s1648_s21 = sadd.s32 1, %s2513_s17  ;;  %s1640_s18 = sadd.s32 1, %s2517_s18   ;;  %s2517_s18 = sphi %s2515_s18, %s1640_s18   ;;  %s2513_s17 = sphi %s2511_s17, %s2512_s17   ;;  %s2509_s14 = sphi %s2507_s14, %s1653_s14   ;;  %s2505_s11 = sphi %s2503_s11, %s1654_s11  }
 0x1f2   : >> { %1647 = vst [vmem:[%s2505_s11] sm:$0xf] %v1646_v18  ;;  %p1649_p0 = scmp.ge.s32.totalorder %s1648_s21, %s3136_s6  ;;  %p1639_p1 = scmp.ge.s32.totalorder %s1640_s18, %s3136_s6 }
 0x1f4   : >> { %s3170_s21 = smov (%p1649_p0, %s1648_s21), 0  ;;  %1642 = sbr.rel (!%p1639_p1) target bundleno = 497 (0x1f1), region = 129 }
 0x1f5   : >> { %s2126_s22 = sshll.u32 %s3170_s21, 2  ;;  %s2512_s17 = smov %s3170_s21  }
 0x1f6   : >> { %s1653_s14 = scalar_lea.vmem %s1634_s8, %s2126_s22 [#allocation2]   ;;  %s1654_s11 = scalar_lea.vmem %s1636_s10, %s2126_s22  }
 0x1fb PF: > { %p10_p2 = scmp.ge.s32.totalorder %s2555_s16, 5   ;;  %s3162_s12 = smov %s2481_s13 }
 0x1fc   : > { %s3163_s13 = smov %s2563_s19  ;;  %s3164_s14 = smov %s2555_s16 }
 0x1fd   :  { %12 = sbr.rel (!%p10_p2) target bundleno = 2 (0x2), region = 140 }

// kernel: vae_forward.13
= control target key start
LH: loop header
LB: loop body
LE: loop exit
PB: predicated region body
PF: predicated region fallthrough
CT: control target
= control target key end

     0   :  { %s3271_s12 = smov 0   ;;  %s3273_s13 = smov 0   ;;  %s4096_s0 = inlined_call_operand.vmem [shape: bf16[1568,360], index: 0, kind: input, shape index: {}]   ;;  %s4097_s1 = inlined_call_operand.vmem [shape: bf16[360,16], index: 1, kind: input, shape index: {}]   ;;  %s4098_s2 = inlined_call_operand.vmem [shape: f32[1,16], index: 2, kind: input, shape index: {}]   ;;  %s4099_s3 = inlined_call_operand.vmem [shape: f32[1568,16], index: 3, kind: output, shape index: {}]  }
   0x1   :  { %s3275_s14 = smov 0  }
   0x2 LB: > { %s3284_s15 = sadd.s32 4294967295, %s3216_s14   ;;  %s3286_s16 = sadd.s32 1, %s3216_s14   ;;  %s3216_s14 = sphi %s3275_s14, %s4108_s14   ;;  %s3212_s13 = sphi %s3273_s13, %s4107_s13   ;;  %s3208_s12 = sphi %s3271_s12, %s4106_s12  }
   0x3   : > { %s85_s17 = ssub.s32 %s3216_s14, %s3286_s16  ;;  %s88_s18 = sadd.s32 1, %s3212_s13 }
   0x4   : > { %p86_p0 = scmp.eq.s32.totalorder %s85_s17, 0  ;;  %p98_p1 = scmp.ne.s32.totalorder %s3212_s13, %s3208_s12 }
   0x5   : > { %p99_p2 = scmp.eq.s32.totalorder %s3284_s15, 3  ;;  %p2466_p3 = scmp.ge.s32.totalorder %s3216_s14, 1 }
   0x6   : > { %s3294_s19 = scalar_select %p86_p0, %s3212_s13, %s88_s18  }
   0x7   : > { %p3296_p4 = por %p99_p2, %p98_p1  ;;  %p149_p5 = scmp.lt.s32.totalorder %s3216_s14, 5 }
   0x9   : > { %p150_p6 = pnand %p2466_p3, %p149_p5 }
   0xa   : > { %v2882_v0 = vld [vmem:[%s4097_s1] sm:$0xff] (!%p150_p6)   ;;  %v3250_v1 = vmov (!%p150_p6), 0   ;;  %s3306_s23 = sshll.u32 (!%p150_p6), %s3284_s15, 6  ;;  %v2883_v2 = vld [vmem:[%s4097_s1 + $0x8] sm:$0xff] (!%p150_p6)   ;;  %v2884_v3 = vld [vmem:[%s4097_s1 + $0x10] sm:$0xff] (!%p150_p6)   ;;  %vm1093_vm0 = vcmask (!%p150_p6), 1043456  }
   0xb   : > { %153 = sbr.rel (%p150_p6) target bundleno = 570 (0x23a), region = 32  ;;  %1097 = vmatprep.subr.bf16.mxu0 (!%p150_p6), %v3250_v1  ;;  %2759 = vmatprep.subr.bf16.mxu1 (!%p150_p6), %v3250_v1  ;;  %p184_p7 = scmp.lt.s32.totalorder (!%p150_p6), %s3306_s23, 195  ;;  %v2885_v4 = vld [vmem:[%s4097_s1 + $0x18] sm:$0xff] (!%p150_p6)   ;;  %v2886_v5 = vld [vmem:[%s4097_s1 + $0x20] sm:$0xff] (!%p150_p6)   ;;  %v2887_v7 = vld [vmem:[%s4097_s1 + $0x28] sm:$0xff] (!%p150_p6)   ;;  %vm996_vm1 = vcmask (!%p150_p6), 850944  }
   0xc   : > { %1098 = vmatpush1.bf16.msra.mxu0 (!%p150_p6), %v2882_v0  ;;  %2775 = vmatpush1.bf16.msra.mxu1 (!%p150_p6), %v2882_v0  ;;  %v2888_v9 = vld [vmem:[%s4097_s1 + $0x30] sm:$0xff] (!%p150_p6)   ;;  %v2889_v10 = vld [vmem:[%s4097_s1 + $0x38] sm:$0xff] (!%p150_p6)   ;;  %v2890_v11 = vld [vmem:[%s4097_s1 + $0x40] sm:$0xff] (!%p150_p6)   ;;  %s175_s8 = sand.u32 (!%p150_p6), 1, %s3208_s12   ;;  %vm1931_vm2 = vcmask (!%p150_p6), 130048  }
   0xd   : > { %1099 = vmatprep.subr.bf16.mxu0 (!%p150_p6), %v3250_v1  ;;  %2760 = vmatprep.subr.bf16.mxu1 (!%p150_p6), %v3250_v1  ;;  %v2891_v12 = vld [vmem:[%s4097_s1 + $0x48] sm:$0xff] (!%p150_p6)   ;;  %v2892_v13 = vld [vmem:[%s4097_s1 + $0x50] sm:$0xff] (!%p150_p6)   ;;  %v2893_v14 = vld [vmem:[%s4097_s1 + $0x58] sm:$0xff] (!%p150_p6)   ;;  %s3627_s10 = sshll.u32 (!%p150_p6), %s175_s8, 9 }
   0xe   : > { %v2894_v15 = vld [vmem:[%s4097_s1 + $0x60] sm:$0xff] (!%p150_p6)   ;;  %v2895_v16 = vld [vmem:[%s4097_s1 + $0x68] sm:$0xff] (!%p150_p6)   ;;  %v2896_v17 = vld [vmem:[%s4097_s1 + $0x70] sm:$0xff] (!%p150_p6)   ;;  %s3642_s12 = scalar_lea.vmem (!%p150_p6), [#allocation2], %s3627_s10  }
   0xf   : > { %v2897_v18 = vld [vmem:[%s4097_s1 + $0x78] sm:$0xff] (!%p150_p6)   ;;  %v2904_v19 = vld [vmem:[%s4097_s1 + $0x80] sm:$0xff] (!%p150_p6)   ;;  %v2911_v24 = vld [vmem:[%s4097_s1 + $0x88] sm:$0xff] (!%p150_p6)  }
  0x10   : > { %1100 = vmatpush1.bf16.msra.mxu0 (!%p150_p6), %v2883_v2  ;;  %2776 = vmatpush1.bf16.msra.mxu1 (!%p150_p6), %v2883_v2  ;;  %v2918_v25 = vld [vmem:[%s4097_s1 + $0x90] sm:$0xff] (!%p150_p6)   ;;  %v2925_v30 = vld [vmem:[%s4097_s1 + $0x98] sm:$0xff] (!%p150_p6)   ;;  %v2932_v33 = vld [vmem:[%s4097_s1 + $0xa0] sm:$0xff] (!%p150_p6)  }
  0x11   : > { %1101 = vmatprep.subr.bf16.mxu0 (!%p150_p6), %v3250_v1  ;;  %2761 = vmatprep.subr.bf16.mxu1 (!%p150_p6), %v3250_v1  ;;  %v2939_v36 = vld [vmem:[%s4097_s1 + $0xa8] sm:$0xff] (!%p150_p6)   ;;  %v2950_v37 = vld [vmem:[%s4097_s1 + $0xb0] ss:$0 sps:$4 sm:$0xff] (!%p150_p6)  }
  0x12   : > { %s185_s28 = scalar_select %p184_p7, %s3306_s23, 195  ;;  %v1095_v42 = vsel %vm1093_vm0, %v2950_v37, 0 }
  0x13   : > { %s2004_s17 = ssub.s32 (%p3296_p4), 196, %s3306_s23  ;;  %s2639_s18 = sshll.u32 (%p3296_p4), %s3284_s15, 9 }
  0x14   : > { %1102 = vmatpush1.bf16.msra.mxu0 %v2884_v3  ;;  %2777 = vmatpush1.bf16.msra.mxu1 %v2884_v3  ;;  %s2792_s4 = smul.u32 12, %s185_s28  ;;  %p2005_p8 = scmp.lt.s32.totalorder (%p3296_p4), %s2004_s17, 64 }
  0x15   : > { %1103 = vmatprep.subr.bf16.mxu0 %v3250_v1  ;;  %2762 = vmatprep.subr.bf16.mxu1 %v3250_v1  ;;  %s3897_s24 = scalar_lea.vmem (%p3296_p4), %s4099_s3, %s2639_s18  }
  0x16   : > { %s3331_s9 = scalar_lea.vmem %s4096_s0, %s2792_s4 }
  0x17   : > { %v2900_v6 = vld [vmem:[%s3331_s9 + $0x4] ss:$12 sps:$4 sm:$0xff]   ;;  %v2898_v20 = vld [vmem:[%s3331_s9] ss:$12 sps:$4 sm:$0xff]   ;;  %v2905_v22 = vld [vmem:[%s3331_s9 + $0x1c] ss:$12 sps:$4 sm:$0xff]  }
  0x18   : > { %1104 = vmatpush1.bf16.msra.mxu0 %v2885_v4  ;;  %2778 = vmatpush1.bf16.msra.mxu1 %v2885_v4  ;;  %v2903_v8 = vld [vmem:[%s3331_s9 + $0x244] ss:$12 sps:$4 sm:$0xff]   ;;  %v2901_v21 = vld [vmem:[%s3331_s9 + $0x240] ss:$12 sps:$4 sm:$0xff]   ;;  %v2907_v23 = vld [vmem:[%s3331_s9 + $0x25c] ss:$12 sps:$4 sm:$0xff]  }
  0x19   : > { %1105 = vmatprep.subr.bf16.mxu0 %v3250_v1  ;;  %2763 = vmatprep.subr.bf16.mxu1 %v3250_v1  ;;  %v2909_v26 = vld [vmem:[%s3331_s9 + $0x18] ss:$12 sps:$4 sm:$0xff]   ;;  %v2912_v28 = vld [vmem:[%s3331_s9 + $0x34] ss:$12 sps:$4 sm:$0xff]   ;;  %v2916_v31 = vld [vmem:[%s3331_s9 + $0x30] ss:$12 sps:$4 sm:$0xff]  }
  0x1a   : > { %1129 = vmatprep.mubr.bf16.mxu0 %v2900_v6  ;;  %1321 = vmatprep.mubr.bf16.mxu1 %v2903_v8  ;;  %v2910_v27 = vld [vmem:[%s3331_s9 + $0x258] ss:$12 sps:$4 sm:$0xff]   ;;  %v2914_v29 = vld [vmem:[%s3331_s9 + $0x274] ss:$12 sps:$4 sm:$0xff]   ;;  %v2917_v32 = vld [vmem:[%s3331_s9 + $0x270] ss:$12 sps:$4 sm:$0xff]  }
  0x1b   : > { %v2919_v34 = vld [vmem:[%s3331_s9 + $0x4c] ss:$12 sps:$4 sm:$0xff]   ;;  %v2923_v38 = vld [vmem:[%s3331_s9 + $0x48] ss:$12 sps:$4 sm:$0xff]   ;;  %v2926_v40 = vld [vmem:[%s3331_s9 + $0x64] ss:$12 sps:$4 sm:$0xff]  }
  0x1c   : > { %1106 = vmatpush1.bf16.msra.mxu0 %v2886_v5  ;;  %2779 = vmatpush1.bf16.msra.mxu1 %v2886_v5  ;;  %v2921_v35 = vld [vmem:[%s3331_s9 + $0x28c] ss:$12 sps:$4 sm:$0xff]   ;;  %v2924_v39 = vld [vmem:[%s3331_s9 + $0x288] ss:$12 sps:$4 sm:$0xff]   ;;  %v2928_v41 = vld [vmem:[%s3331_s9 + $0x2a4] ss:$12 sps:$4 sm:$0xff]  }
  0x1d   : > { %1107 = vmatprep.subr.bf16.mxu0 %v3250_v1  ;;  %2764 = vmatprep.subr.bf16.mxu1 %v3250_v1  ;;  %v2930_v43 = vld [vmem:[%s3331_s9 + $0x60] ss:$12 sps:$4 sm:$0xff]   ;;  %v2933_v45 = vld [vmem:[%s3331_s9 + $0x7c] ss:$12 sps:$4 sm:$0xff]   ;;  %v2937_v47 = vld [vmem:[%s3331_s9 + $0x78] ss:$12 sps:$4 sm:$0xff]  }
  0x1e   : > { %v2931_v44 = vld [vmem:[%s3331_s9 + $0x2a0] ss:$12 sps:$4 sm:$0xff]   ;;  %v2935_v46 = vld [vmem:[%s3331_s9 + $0x2bc] ss:$12 sps:$4 sm:$0xff]   ;;  %v2938_v48 = vld [vmem:[%s3331_s9 + $0x2b8] ss:$12 sps:$4 sm:$0xff]  }
  0x1f   : > { %v2940_v49 = vld [vmem:[%s3331_s9 + $0x94] ss:$12 sps:$4 sm:$0xff]   ;;  %v2944_v51 = vld [vmem:[%s3331_s9 + $0x90] ss:$12 sps:$4 sm:$0xff]   ;;  %v2946_v53 = vld [vmem:[%s3331_s9 + $0xac] ss:$12 sps:$4 sm:$0xff]  }
  0x20   : > { %1108 = vmatpush1.bf16.msra.mxu0 %v2887_v7  ;;  %2780 = vmatpush1.bf16.msra.mxu1 %v2887_v7  ;;  %v2942_v50 = vld [vmem:[%s3331_s9 + $0x2d4] ss:$12 sps:$4 sm:$0xff]   ;;  %v2945_v52 = vld [vmem:[%s3331_s9 + $0x2d0] ss:$12 sps:$4 sm:$0xff]   ;;  %v2948_v54 = vld [vmem:[%s3331_s9 + $0x2ec] ss:$12 sps:$4 sm:$0xff]  }
  0x21   : > { %1109 = vmatprep.subr.bf16.mxu0 %v3250_v1  ;;  %2765 = vmatprep.subr.bf16.mxu1 %v3250_v1  ;;  %v2951_v55 = vld [vmem:[%s3331_s9 + $0xa8] ss:$12 sps:$4 sm:$0xff]   ;;  %v2953_v57 = vld [vmem:[%s3331_s9 + $0xc4] ss:$12 sps:$4 sm:$0xff]   ;;  %v2956_v59 = vld [vmem:[%s3331_s9 + $0xc0] ss:$12 sps:$4 sm:$0xff]  }
  0x22   : > { %v2952_v56 = vld [vmem:[%s3331_s9 + $0x2e8] ss:$12 sps:$4 sm:$0xff]   ;;  %v2957_v60 = vld [vmem:[%s3331_s9 + $0x20] ss:$12 sps:$4 sm:$0xff]   ;;  %v2960_v62 = vld [vmem:[%s3331_s9 + $0x38] ss:$12 sps:$4 sm:$0xff]  }
  0x23   : > { %v2955_v58 = vld [vmem:[%s3331_s9 + $0x8] ss:$12 sps:$4 sm:$0xff]   ;;  %v2961_v63 = vld [vmem:[%s3331_s9 + $0xd8] ss:$12 sps:$4 sm:$0xff]   ;;  %v2962_v0 = vld [vmem:[%s3331_s9 + $0x50] ss:$12 sps:$4 sm:$0xff]  }
  0x24   : > { %1110 = vmatpush1.bf16.msra.mxu0 %v2888_v9  ;;  %2781 = vmatpush1.bf16.msra.mxu1 %v2888_v9  ;;  %v2958_v61 = vld [vmem:[%s3331_s9 + $0xdc] ss:$12 sps:$4 sm:$0xff]   ;;  %v2967_v4 = vld [vmem:[%s3331_s9 + $0x80] ss:$12 sps:$4 sm:$0xff]   ;;  %v2970_v6 = vld [vmem:[%s3331_s9 + $0x98] ss:$12 sps:$4 sm:$0xff]  }
  0x25   : > { %1111 = vmatprep.subr.bf16.mxu0 %v3250_v1  ;;  %2766 = vmatprep.subr.bf16.mxu1 %v3250_v1  ;;  %v2965_v2 = vld [vmem:[%s3331_s9 + $0x68] ss:$12 sps:$4 sm:$0xff]   ;;  %v2966_v3 = vld [vmem:[%s3331_s9 + $0xf0] ss:$12 sps:$4 sm:$0xff]   ;;  %v2968_v5 = vld [vmem:[%s3331_s9 + $0x10c] ss:$12 sps:$4 sm:$0xff]  }
  0x26   : > { %v2971_v7 = vld [vmem:[%s3331_s9 + $0x108] ss:$12 sps:$4 sm:$0xff]   ;;  %v2972_v8 = vld [vmem:[%s3331_s9 + $0xb0] ss:$12 sps:$4 sm:$0xff]  }
  0x27   : > { %v2973_v9 = vld [vmem:[%s3331_s9 + $0x124] ss:$12 sps:$4 sm:$0xff]  }
  0x28   : > { %1112 = vmatpush1.bf16.msra.mxu0 %v2889_v10  ;;  %2782 = vmatpush1.bf16.msra.mxu1 %v2889_v10  ;;  %v2975_v10 = vld [vmem:[%s3331_s9 + $0xc8] ss:$12 sps:$4 sm:$0xff]  }
  0x29   : > { %1113 = vmatprep.subr.bf16.mxu0 %v3250_v1  ;;  %2767 = vmatprep.subr.bf16.mxu1 %v3250_v1 }
  0x2c   : > { %1114 = vmatpush1.bf16.msra.mxu0 %v2890_v11  ;;  %2783 = vmatpush1.bf16.msra.mxu1 %v2890_v11  ;;  %v2976_v11 = vld [vmem:[%s3331_s9 + $0x120] ss:$12 sps:$4 sm:$0xff]  }
  0x2d   : > { %1115 = vmatprep.subr.bf16.mxu0 %v3250_v1  ;;  %2768 = vmatprep.subr.bf16.mxu1 %v3250_v1 }
  0x30   : > { %1116 = vmatpush1.bf16.msra.mxu0 %v2891_v12  ;;  %2784 = vmatpush1.bf16.msra.mxu1 %v2891_v12  ;;  %v2977_v12 = vld [vmem:[%s3331_s9 + $0xe0] ss:$12 sps:$4 sm:$0xff]  }
  0x31   : > { %1117 = vmatprep.subr.bf16.mxu0 %v3250_v1  ;;  %2769 = vmatprep.subr.bf16.mxu1 %v3250_v1 }
  0x34   : > { %1118 = vmatpush1.bf16.msra.mxu0 %v2892_v13  ;;  %2785 = vmatpush1.bf16.msra.mxu1 %v2892_v13  ;;  %v2978_v13 = vld [vmem:[%s3331_s9 + $0x13c] ss:$12 sps:$4 sm:$0xff]  }
  0x35   : > { %1119 = vmatprep.subr.bf16.mxu0 %v3250_v1  ;;  %2770 = vmatprep.subr.bf16.mxu1 %v3250_v1 }
  0x38   : > { %1120 = vmatpush1.bf16.msra.mxu0 %v2893_v14  ;;  %2786 = vmatpush1.bf16.msra.mxu1 %v2893_v14  ;;  %v2980_v14 = vld [vmem:[%s3331_s9 + $0xf8] ss:$12 sps:$4 sm:$0xff]  }
  0x39   : > { %1121 = vmatprep.subr.bf16.mxu0 %v3250_v1  ;;  %2771 = vmatprep.subr.bf16.mxu1 %v3250_v1 }
  0x3c   : > { %1122 = vmatpush1.bf16.msra.mxu0 %v2894_v15  ;;  %2787 = vmatpush1.bf16.msra.mxu1 %v2894_v15  ;;  %v2981_v15 = vld [vmem:[%s3331_s9 + $0x138] ss:$12 sps:$4 sm:$0xff]  }
  0x3d   : > { %1123 = vmatprep.subr.bf16.mxu0 %v3250_v1  ;;  %2772 = vmatprep.subr.bf16.mxu1 %v3250_v1 }
  0x40   : > { %1124 = vmatpush1.bf16.msra.mxu0 %v2895_v16  ;;  %2788 = vmatpush1.bf16.msra.mxu1 %v2895_v16  ;;  %v2982_v16 = vld [vmem:[%s3331_s9 + $0x110] ss:$12 sps:$4 sm:$0xff]  }
  0x41   : > { %1125 = vmatprep.subr.bf16.mxu0 %v3250_v1  ;;  %2773 = vmatprep.subr.bf16.mxu1 %v3250_v1 }
  0x44   : > { %1126 = vmatpush1.bf16.msra.mxu0 %v2896_v17  ;;  %2789 = vmatpush1.bf16.msra.mxu1 %v2896_v17  ;;  %v2983_v17 = vld [vmem:[%s3331_s9 + $0x154] ss:$12 sps:$4 sm:$0xff]  }
  0x45   : > { %1127 = vmatprep.subr.bf16.mxu0 %v3250_v1  ;;  %2774 = vmatprep.subr.bf16.mxu1 %v3250_v1  ;;  %v2963_v1 = vld [vmem:[%s3331_s9 + $0xf4] ss:$12 sps:$4 sm:$0xff]  }
  0x48   : > { %1128 = vmatpush1.bf16.msra.mxu0 %v2897_v18  ;;  %2790 = vmatpush1.bf16.msra.mxu1 %v2897_v18  ;;  %v2985_v18 = vld [vmem:[%s3331_s9 + $0x128] ss:$12 sps:$4 sm:$0xff]  }
  0x49   : > { %2681 = vmatprep.subr.bf16.mxu1 %v2904_v19 }
  0x4b   : > { %1130 = vmatmul.mubr.bf16.vlgmr.msra.gmra.mrb[0].mxu0 %v2898_v20  ;;  %1322 = vmatmul.mubr.bf16.vlgmr.msra.gmra.mrb[0].mxu1 %v2901_v21  ;;  %v2987_v20 = vld [vmem:[%s3331_s9 + $0x140] ss:$12 sps:$4 sm:$0xff]  }
  0x4c   : > { %2682 = vmatpush3.bf16.msra.mxu1 %v2904_v19  ;;  %1137 = vmatprep.mubr.bf16.mxu0 %v2905_v22  ;;  %v2986_v19 = vld [vmem:[%s3331_s9 + $0x150] ss:$12 sps:$4 sm:$0xff]   ;;  %v2988_v21 = vld [vmem:[%s3331_s9 + $0x16c] ss:$12 sps:$4 sm:$0xff]  }
  0x4d   : > { %1329 = vmatprep.mubr.bf16.mxu1 %v2907_v23  ;;  %2683 = vmatprep.subr.bf16.mxu1 %v2911_v24  ;;  %v2990_v22 = vld [vmem:[%s3331_s9 + $0x158] ss:$12 sps:$4 sm:$0xff]   ;;  %v2991_v23 = vld [vmem:[%s3331_s9 + $0x168] ss:$12 sps:$4 sm:$0xff]  }
  0x50   : > { %2684 = vmatpush3.bf16.msra.mxu1 %v2911_v24  ;;  %v2992_v24 = vld [vmem:[%s3331_s9 + $0x170] ss:$12 sps:$4 sm:$0xff]  }
  0x51   : > { %2685 = vmatprep.subr.bf16.mxu1 %v2918_v25 }
  0x53   : > { %1138 = vmatmul.mubr.bf16.gmra.mrb[4].mxu0 %v2909_v26  ;;  %1330 = vmatmul.mubr.bf16.gmra.mrb[4].mxu1 %v2910_v27  ;;  %v2995_v26 = vld [vmem:[%s3331_s9 + $0x188] ss:$12 sps:$4 sm:$0xff]   ;;  %v2996_v27 = vld [vmem:[%s3331_s9 + $0x180] ss:$12 sps:$4 sm:$0xff]  }
  0x54   : > { %1145 = vmatprep.mubr.bf16.mxu0 %v2912_v28  ;;  %1337 = vmatprep.mubr.bf16.mxu1 %v2914_v29  ;;  %v2997_v28 = vld [vmem:[%s3331_s9 + $0x1a0] ss:$12 sps:$4 sm:$0xff]   ;;  %v2998_v29 = vld [vmem:[%s3331_s9 + $0x19c] ss:$12 sps:$4 sm:$0xff]  }
  0x55   : > { %2686 = vmatpush3.bf16.msra.mxu1 %v2918_v25  ;;  %v2993_v25 = vld [vmem:[%s3331_s9 + $0x184] ss:$12 sps:$4 sm:$0xff]  }
  0x56   : > { %2687 = vmatprep.subr.bf16.mxu1 %v2925_v30 }
  0x59   : > { %2688 = vmatpush3.bf16.msra.mxu1 %v2925_v30  ;;  %v3000_v30 = vld [vmem:[%s3331_s9 + $0x1b8] ss:$12 sps:$4 sm:$0xff]  }
  0x5a   : > { %2689 = vmatprep.subr.bf16.mxu1 %v2932_v33 }
  0x5b   : > { %1146 = vmatmul.mubr.bf16.gmra.mrb[8].mxu0 %v2916_v31  ;;  %1338 = vmatmul.mubr.bf16.gmra.mrb[8].mxu1 %v2917_v32  ;;  %v3001_v31 = vld [vmem:[%s3331_s9 + $0x198] ss:$12 sps:$4 sm:$0xff]   ;;  %v3002_v32 = vld [vmem:[%s3331_s9 + $0x1d0] ss:$12 sps:$4 sm:$0xff]  }
  0x5c   : > { %1153 = vmatprep.mubr.bf16.mxu0 %v2919_v34  ;;  %1345 = vmatprep.mubr.bf16.mxu1 %v2921_v35  ;;  %v3005_v34 = vld [vmem:[%s3331_s9 + $0x1e8] ss:$12 sps:$4 sm:$0xff]   ;;  %v3006_v35 = vld [vmem:[%s3331_s9 + $0x1b0] ss:$12 sps:$4 sm:$0xff]  }
  0x5d   : > { %2690 = vmatpush3.bf16.msra.mxu1 %v2932_v33  ;;  %v3003_v33 = vld [vmem:[%s3331_s9 + $0x1b4] ss:$12 sps:$4 sm:$0xff]  }
  0x5e   : > { %2691 = vmatprep.subr.bf16.mxu1 %v2939_v36 }
  0x61   : > { %2692 = vmatpush3.bf16.msra.mxu1 %v2939_v36  ;;  %v3007_v36 = vld [vmem:[%s3331_s9 + $0x200] ss:$12 sps:$4 sm:$0xff]  }
  0x62   : > { %2791 = vmatprep.subr.msk.bf16.mxu1 %vm1093_vm0, %v2950_v37  ;;  %v3008_v37 = vld [vmem:[%s3331_s9 + $0x1cc] ss:$12 sps:$4 sm:$0xff]  }
  0x63   : > { %1154 = vmatmul.mubr.bf16.gmra.mrb[12].mxu0 %v2923_v38  ;;  %1346 = vmatmul.mubr.bf16.gmra.mrb[12].mxu1 %v2924_v39  ;;  %v3010_v38 = vld [vmem:[%s3331_s9 + $0x218] ss:$12 sps:$4 sm:$0xff]   ;;  %v3011_v39 = vld [vmem:[%s3331_s9 + $0x1c8] ss:$12 sps:$4 sm:$0xff]  }
  0x64   : > { %1161 = vmatprep.mubr.bf16.mxu0 %v2926_v40  ;;  %1353 = vmatprep.mubr.bf16.mxu1 %v2928_v41  ;;  %v3012_v40 = vld [vmem:[%s3331_s9 + $0x230] ss:$12 sps:$4 sm:$0xff]  }
  0x65   : > { %2694 = vmatpush3.bf16.msra.mxu1 %v1095_v42  ;;  %v3013_v41 = vld [vmem:[%s3331_s9 + $0x1e4] ss:$12 sps:$4 sm:$0xff]   ;;  %v3015_v42 = vld [vmem:[%s3331_s9 + $0x248] ss:$12 sps:$4 sm:$0xff]  }
  0x6b   : > { %1162 = vmatmul.mubr.bf16.gmra.mrb[16].mxu0 %v2930_v43  ;;  %1354 = vmatmul.mubr.bf16.gmra.mrb[16].mxu1 %v2931_v44  ;;  %v3016_v43 = vld [vmem:[%s3331_s9 + $0x1e0] ss:$12 sps:$4 sm:$0xff]  }
  0x6c   : > { %1169 = vmatprep.mubr.bf16.mxu0 %v2933_v45  ;;  %1361 = vmatprep.mubr.bf16.mxu1 %v2935_v46  ;;  %v3017_v44 = vld [vmem:[%s3331_s9 + $0x260] ss:$12 sps:$4 sm:$0xff]   ;;  %v3018_v45 = vld [vmem:[%s3331_s9 + $0x1fc] ss:$12 sps:$4 sm:$0xff]   ;;  %v3020_v46 = vld [vmem:[%s3331_s9 + $0x278] ss:$12 sps:$4 sm:$0xff]  }
  0x73   : > { %1170 = vmatmul.mubr.bf16.gmra.mrb[20].mxu0 %v2937_v47  ;;  %1362 = vmatmul.mubr.bf16.gmra.mrb[20].mxu1 %v2938_v48  ;;  %v3021_v47 = vld [vmem:[%s3331_s9 + $0x1f8] ss:$12 sps:$4 sm:$0xff]   ;;  %v3022_v48 = vld [vmem:[%s3331_s9 + $0x290] ss:$12 sps:$4 sm:$0xff]  }
  0x74   : > { %1177 = vmatprep.mubr.bf16.mxu0 %v2940_v49  ;;  %1369 = vmatprep.mubr.bf16.mxu1 %v2942_v50  ;;  %v3023_v49 = vld [vmem:[%s3331_s9 + $0x214] ss:$12 sps:$4 sm:$0xff]  }
  0x75   : > { %v3025_v50 = vld [vmem:[%s3331_s9 + $0x2a8] ss:$12 sps:$4 sm:$0xff]  }
  0x7b   : > { %1178 = vmatmul.mubr.bf16.gmra.mrb[24].mxu0 %v2944_v51  ;;  %1370 = vmatmul.mubr.bf16.gmra.mrb[24].mxu1 %v2945_v52  ;;  %v3026_v51 = vld [vmem:[%s3331_s9 + $0x210] ss:$12 sps:$4 sm:$0xff]   ;;  %v3027_v52 = vld [vmem:[%s3331_s9 + $0x2c0] ss:$12 sps:$4 sm:$0xff]  }
  0x7c   : > { %1185 = vmatprep.mubr.bf16.mxu0 %v2946_v53  ;;  %1377 = vmatprep.mubr.bf16.mxu1 %v2948_v54  ;;  %v3028_v53 = vld [vmem:[%s3331_s9 + $0x22c] ss:$12 sps:$4 sm:$0xff]  }
  0x7d   : > { %v3030_v54 = vld [vmem:[%s3331_s9 + $0x2d8] ss:$12 sps:$4 sm:$0xff]  }
  0x83   : > { %1186 = vmatmul.mubr.bf16.gmra.mrb[28].mxu0 %v2951_v55  ;;  %1378 = vmatmul.mubr.bf16.gmra.mrb[28].mxu1 %v2952_v56  ;;  %v3031_v55 = vld [vmem:[%s3331_s9 + $0x228] ss:$12 sps:$4 sm:$0xff]   ;;  %v3032_v56 = vld [vmem:[%s3331_s9 + $0x2f0] ss:$12 sps:$4 sm:$0xff]  }
  0x84   : > { %1193 = vmatprep.mubr.bf16.mxu0 %v2953_v57  ;;  %2695 = vmatprep.mubr.msk.bf16.mxu1 %vm996_vm1, %v2955_v58 }
  0x8b   : > { %1194 = vmatmul.mubr.bf16.gmra.mrb[32].mxu0 %v2956_v59  ;;  %2696 = vmatmul.mubr.msk.bf16.vlgmr.msra.gmra.mrb[32].mxu1 %vm996_vm1, %v2957_v60 }
  0x8c   : > { %1201 = vmatprep.mubr.bf16.mxu0 %v2958_v61  ;;  %2699 = vmatprep.mubr.msk.bf16.mxu1 %vm996_vm1, %v2960_v62 }
  0x93   : > { %1202 = vmatmul.mubr.bf16.gmra.mrb[36].mxu0 %v2961_v63  ;;  %2700 = vmatmul.mubr.msk.bf16.gmra.mrb[36].mxu1 %vm996_vm1, %v2962_v0 }
  0x94   : > { %1209 = vmatprep.mubr.bf16.mxu0 %v2963_v1  ;;  %2703 = vmatprep.mubr.msk.bf16.mxu1 %vm996_vm1, %v2965_v2 }
  0x9b   : > { %1210 = vmatmul.mubr.bf16.gmra.mrb[40].mxu0 %v2966_v3  ;;  %2704 = vmatmul.mubr.msk.bf16.gmra.mrb[40].mxu1 %vm996_vm1, %v2967_v4 }
  0x9c   : > { %1217 = vmatprep.mubr.bf16.mxu0 %v2968_v5  ;;  %2707 = vmatprep.mubr.msk.bf16.mxu1 %vm996_vm1, %v2970_v6 }
  0xa3   : > { %1218 = vmatmul.mubr.bf16.gmra.mrb[44].mxu0 %v2971_v7  ;;  %2708 = vmatmul.mubr.msk.bf16.gmra.mrb[44].mxu1 %vm996_vm1, %v2972_v8 }
  0xa4   : > { %1225 = vmatprep.mubr.bf16.mxu0 %v2973_v9  ;;  %2711 = vmatprep.mubr.msk.bf16.mxu1 %vm996_vm1, %v2975_v10 }
  0xab   : > { %1226 = vmatmul.mubr.bf16.gmra.mrb[48].mxu0 %v2976_v11  ;;  %2712 = vmatmul.mubr.msk.bf16.gmra.mrb[48].mxu1 %vm996_vm1, %v2977_v12 }
  0xac   : > { %1233 = vmatprep.mubr.bf16.mxu0 %v2978_v13  ;;  %2715 = vmatprep.mubr.msk.bf16.mxu1 %vm996_vm1, %v2980_v14 }
  0xb3   : > { %1234 = vmatmul.mubr.bf16.gmra.mrb[52].mxu0 %v2981_v15  ;;  %2716 = vmatmul.mubr.msk.bf16.gmra.mrb[52].mxu1 %vm996_vm1, %v2982_v16 }
  0xb4   : > { %1241 = vmatprep.mubr.bf16.mxu0 %v2983_v17  ;;  %2719 = vmatprep.mubr.msk.bf16.mxu1 %vm996_vm1, %v2985_v18 }
  0xbb   : > { %1242 = vmatmul.mubr.bf16.gmra.mrb[56].mxu0 %v2986_v19  ;;  %2720 = vmatmul.mubr.msk.bf16.gmra.mrb[56].mxu1 %vm996_vm1, %v2987_v20 }
  0xbc   : > { %1249 = vmatprep.mubr.bf16.mxu0 %v2988_v21  ;;  %2723 = vmatprep.mubr.msk.bf16.mxu1 %vm996_vm1, %v2990_v22 }
  0xc3   : > { %1250 = vmatmul.mubr.bf16.gmra.mrb[60].mxu0 %v2991_v23  ;;  %2724 = vmatmul.mubr.msk.bf16.gmra.mrb[60].mxu1 %vm996_vm1, %v2992_v24 }
  0xc4   : > { %1257 = vmatprep.mubr.bf16.mxu0 %v2993_v25  ;;  %2727 = vmatprep.mubr.msk.bf16.mxu1 %vm996_vm1, %v2995_v26 }
  0xcb   : > { %1258 = vmatmul.mubr.bf16.gmra.mrb[64].mxu0 %v2996_v27  ;;  %2728 = vmatmul.mubr.msk.bf16.gmra.mrb[64].mxu1 %vm996_vm1, %v2997_v28 }
  0xcc   : > { %1265 = vmatprep.mubr.bf16.mxu0 %v2998_v29  ;;  %2731 = vmatprep.mubr.msk.bf16.mxu1 %vm996_vm1, %v3000_v30 }
  0xd3   : > { %1266 = vmatmul.mubr.bf16.gmra.mrb[68].mxu0 %v3001_v31  ;;  %2732 = vmatmul.mubr.msk.bf16.gmra.mrb[68].mxu1 %vm996_vm1, %v3002_v32 }
  0xd4   : > { %1273 = vmatprep.mubr.bf16.mxu0 %v3003_v33  ;;  %2735 = vmatprep.mubr.msk.bf16.mxu1 %vm996_vm1, %v3005_v34 }
  0xdb   : > { %1274 = vmatmul.mubr.bf16.gmra.mrb[72].mxu0 %v3006_v35  ;;  %2736 = vmatmul.mubr.msk.bf16.gmra.mrb[72].mxu1 %vm996_vm1, %v3007_v36 }
  0xdc   : > { %1281 = vmatprep.mubr.bf16.mxu0 %v3008_v37  ;;  %2739 = vmatprep.mubr.msk.bf16.mxu1 %vm996_vm1, %v3010_v38 }
  0xe3   : > { %1282 = vmatmul.mubr.bf16.gmra.mrb[76].mxu0 %v3011_v39  ;;  %2740 = vmatmul.mubr.msk.bf16.gmra.mrb[76].mxu1 %vm996_vm1, %v3012_v40 }
  0xe4   : > { %1289 = vmatprep.mubr.bf16.mxu0 %v3013_v41  ;;  %2743 = vmatprep.mubr.msk.bf16.mxu1 %vm996_vm1, %v3015_v42 }
  0xeb   : > { %1290 = vmatmul.mubr.bf16.gmra.mrb[80].mxu0 %v3016_v43  ;;  %2744 = vmatmul.mubr.msk.bf16.gmra.mrb[80].mxu1 %vm996_vm1, %v3017_v44 }
  0xec   : > { %1297 = vmatprep.mubr.bf16.mxu0 %v3018_v45  ;;  %2747 = vmatprep.mubr.msk.bf16.mxu1 %vm996_vm1, %v3020_v46 }
  0xf3   : > { %1298 = vmatmul.mubr.bf16.gmra.mrb[84].mxu0 %v3021_v47  ;;  %2748 = vmatmul.mubr.msk.bf16.gmra.mrb[84].mxu1 %vm996_vm1, %v3022_v48 }
  0xf4   : > { %1305 = vmatprep.mubr.bf16.mxu0 %v3023_v49  ;;  %2751 = vmatprep.mubr.msk.bf16.mxu1 %vm996_vm1, %v3025_v50 }
  0xfb   : > { %1306 = vmatmul.mubr.bf16.gmra.mrb[88].mxu0 %v3026_v51  ;;  %2752 = vmatmul.mubr.msk.bf16.gmra.mrb[88].mxu1 %vm996_vm1, %v3027_v52 }
  0xfc   : > { %1313 = vmatprep.mubr.bf16.mxu0 %v3028_v53  ;;  %2755 = vmatprep.mubr.msk.bf16.mxu1 %vm996_vm1, %v3030_v54 }
 0x103   : > { %1314 = vmatmul.mubr.bf16.gmra.mrb[92].mxu0 %v3031_v55  ;;  %2756 = vmatmul.mubr.msk.bf16.gmra.mrb[92].mxu1 %vm996_vm1, %v3032_v56 }
 0x11e   : > { %v3539_v57 = vpop.f32.mrb[0].mxu0  ;;  %v3541_v58 = vpop.f32.mrb[0].mxu1 }
 0x11f   : > { %v1133_v59 = vpop.f32.mrb[1].mxu0  ;;  %v1325_v60 = vpop.f32.mrb[1].mxu1 }
 0x120   : > { %v3543_v61 = vpop.f32.mrb[2].mxu0  ;;  %v3545_v62 = vpop.f32.mrb[2].mxu1  ;;  %v3602_v59 = vld [vmem:[%s4098_s2] ss:$0 sm:$0xff] }
 0x121   : > { %v1136_v63 = vpop.f32.mrb[3].mxu0  ;;  %v1328_v0 = vpop.f32.mrb[3].mxu1 }
 0x122   : > { %v1132_v63 = vadd.f32 %v3602_v59, %v3539_v57 }
 0x126   : > { %v1139_v1 = vpop.f32.mrb[4].mxu0  ;;  %v3547_v2 = vpop.f32.mrb[4].mxu1 }
 0x127   : > { %v1141_v3 = vpop.f32.mrb[5].mxu0  ;;  %v1333_v4 = vpop.f32.mrb[5].mxu1  ;;  %v1140_v60 = vadd.f32 %v3602_v59, %v1139_v1 }
 0x128   : > { %v1142_v5 = vpop.f32.mrb[6].mxu0  ;;  %v3549_v6 = vpop.f32.mrb[6].mxu1 }
 0x129   : > { %v1144_v7 = vpop.f32.mrb[7].mxu0  ;;  %v1336_v8 = vpop.f32.mrb[7].mxu1  ;;  %v1143_v4 = vadd.f32 %v3602_v59, %v1142_v5 }
 0x12e   : > { %v3551_v9 = vpop.f32.mrb[8].mxu0  ;;  %v3553_v10 = vpop.f32.mrb[8].mxu1 }
 0x12f   : > { %v1149_v11 = vpop.f32.mrb[9].mxu0  ;;  %v1341_v12 = vpop.f32.mrb[9].mxu1 }
 0x130   : > { %v3555_v13 = vpop.f32.mrb[10].mxu0  ;;  %v3557_v14 = vpop.f32.mrb[10].mxu1  ;;  %v1135_v12 = vadd.f32 %v3602_v59, %v3543_v61  ;;  %v1148_v61 = vadd.f32 %v3602_v59, %v3551_v9 }
 0x131   : > { %v1152_v15 = vpop.f32.mrb[11].mxu0  ;;  %v1344_v16 = vpop.f32.mrb[11].mxu1 }
 0x136   : > { %v3559_v17 = vpop.f32.mrb[12].mxu0  ;;  %v3561_v18 = vpop.f32.mrb[12].mxu1 }
 0x137   : > { %v1157_v19 = vpop.f32.mrb[13].mxu0  ;;  %v1349_v20 = vpop.f32.mrb[13].mxu1 }
 0x138   : > { %v3563_v21 = vpop.f32.mrb[14].mxu0  ;;  %v3565_v22 = vpop.f32.mrb[14].mxu1 }
 0x139   : > { %v1160_v23 = vpop.f32.mrb[15].mxu0  ;;  %v1352_v24 = vpop.f32.mrb[15].mxu1 }
 0x13e   : > { %v3567_v25 = vpop.f32.mrb[16].mxu0  ;;  %v3569_v26 = vpop.f32.mrb[16].mxu1 }
 0x13f   : > { %v1165_v27 = vpop.f32.mrb[17].mxu0  ;;  %v1357_v28 = vpop.f32.mrb[17].mxu1 }
 0x140   : > { %v3571_v29 = vpop.f32.mrb[18].mxu0  ;;  %v3573_v30 = vpop.f32.mrb[18].mxu1 }
 0x141   : > { %v1168_v31 = vpop.f32.mrb[19].mxu0  ;;  %v1360_v32 = vpop.f32.mrb[19].mxu1 }
 0x142   : > { %v1156_v31 = vadd.f32 %v3602_v59, %v3559_v17 }
 0x146   : > { %v3575_v33 = vpop.f32.mrb[20].mxu0  ;;  %v3577_v34 = vpop.f32.mrb[20].mxu1 }
 0x147   : > { %v1173_v35 = vpop.f32.mrb[21].mxu0  ;;  %v1365_v36 = vpop.f32.mrb[21].mxu1 }
 0x148   : > { %v3579_v37 = vpop.f32.mrb[22].mxu0  ;;  %v3581_v38 = vpop.f32.mrb[22].mxu1  ;;  %v1159_v36 = vadd.f32 %v3602_v59, %v3563_v21 }
 0x149   : > { %v1176_v39 = vpop.f32.mrb[23].mxu0  ;;  %v1368_v40 = vpop.f32.mrb[23].mxu1 }
 0x14e   : > { %v3583_v41 = vpop.f32.mrb[24].mxu0  ;;  %v3585_v42 = vpop.f32.mrb[24].mxu1 }
 0x14f   : > { %v1181_v43 = vpop.f32.mrb[25].mxu0  ;;  %v1373_v44 = vpop.f32.mrb[25].mxu1 }
 0x150   : > { %v3587_v45 = vpop.f32.mrb[26].mxu0  ;;  %v3589_v46 = vpop.f32.mrb[26].mxu1  ;;  %v1151_v44 = vadd.f32 %v3602_v59, %v3555_v13  ;;  %v1172_v13 = vadd.f32 %v3602_v59, %v3575_v33 }
 0x151   : > { %v1184_v47 = vpop.f32.mrb[27].mxu0  ;;  %v1376_v48 = vpop.f32.mrb[27].mxu1 }
 0x156   : > { %v3591_v49 = vpop.f32.mrb[28].mxu0  ;;  %v3593_v50 = vpop.f32.mrb[28].mxu1 }
 0x157   : > { %v1189_v51 = vpop.f32.mrb[29].mxu0  ;;  %v1381_v52 = vpop.f32.mrb[29].mxu1 }
 0x158   : > { %v3595_v53 = vpop.f32.mrb[30].mxu0  ;;  %v3597_v54 = vpop.f32.mrb[30].mxu1 }
 0x159   : > { %v1192_v55 = vpop.f32.mrb[31].mxu0  ;;  %v1384_v56 = vpop.f32.mrb[31].mxu1 }
 0x15e   : > { %v3607_v0 = vpop.f32.mrb[32].mxu0  ;;  %v2697_v3 = vpop.f32.mrb[32].mxu1 }
 0x15f   : > { %v1429_v7 = vadd.f32 %v2697_v3, %v1140_v60  ;;  %v1197_v8 = vpop.f32.mrb[33].mxu0  ;;  %v1420_v11 = vpop.f32.mrb[33].mxu1 }
 0x160   : > { %v1421_v15 = vadd.f32 %v1420_v11, %v1132_v63  ;;  %v3612_v16 = vpop.f32.mrb[34].mxu0  ;;  %v2698_v19 = vpop.f32.mrb[34].mxu1 }
 0x161   : > { %v1677_v20 = vmul.f32 0.5, %v1429_v7  ;;  %v1432_v1 = vadd.f32 %v2698_v19, %v1143_v4  ;;  %v1200_v23 = vpop.f32.mrb[35].mxu0  ;;  %v1423_v24 = vpop.f32.mrb[35].mxu1  ;;  %v1164_v7 = vadd.f32 %v3602_v59, %v3567_v25  ;;  %v1167_v19 = vadd.f32 %v3602_v59, %v3571_v29 }
 0x162   : > { %v1675_v57 = vmul.f32 0.5, %v1421_v15  ;;  %v1424_v27 = vadd.f32 %v1423_v24, %v1135_v12 }
 0x163   : > { %3033 = vtanh.f32 %v1677_v20  ;;  %v1678_v28 = vmul.f32 0.5, %v1432_v1 }
 0x164   : > { %3035 = vtanh.f32 %v1675_v57  ;;  %v1676_v5 = vmul.f32 0.5, %v1424_v27  ;;  %v1175_v57 = vadd.f32 %v3602_v59, %v3579_v37 }
 0x165   : > { %3037 = vtanh.f32 %v1678_v28 }
 0x166   : > { %3039 = vtanh.f32 %v1676_v5  ;;  %v3618_v32 = vpop.f32.mrb[36].mxu0  ;;  %v2701_v35 = vpop.f32.mrb[36].mxu1 }
 0x167   : > { %v1445_v39 = vadd.f32 %v2701_v35, %v1156_v31  ;;  %v1205_v40 = vpop.f32.mrb[37].mxu0  ;;  %v1436_v43 = vpop.f32.mrb[37].mxu1 }
 0x168   : > { %v1437_v47 = vadd.f32 %v1436_v43, %v1148_v61  ;;  %v3624_v48 = vpop.f32.mrb[38].mxu0  ;;  %v2702_v17 = vpop.f32.mrb[38].mxu1 }
 0x169   : > { %v1681_v51 = vmul.f32 0.5, %v1445_v39  ;;  %v1448_v9 = vadd.f32 %v2702_v17, %v1159_v36  ;;  %v1208_v52 = vpop.f32.mrb[39].mxu0  ;;  %v1439_v55 = vpop.f32.mrb[39].mxu1 }
 0x16a   : > { %v1679_v56 = vmul.f32 0.5, %v1437_v47  ;;  %v1440_v60 = vadd.f32 %v1439_v55, %v1151_v44  ;;  %v1188_v52 = vadd.f32 %v3602_v59, %v3591_v49 }
 0x16b   : > { %3041 = vtanh.f32 %v1681_v51  ;;  %v1682_v63 = vmul.f32 0.5, %v1448_v9 }
 0x16c   : > { %3043 = vtanh.f32 %v1679_v56  ;;  %v1680_v21 = vmul.f32 0.5, %v1440_v60  ;;  %v1180_v56 = vadd.f32 %v3602_v59, %v3583_v41 }
 0x16d   : > { %v3034_v3 = vpop.eup %3033  ;;  %3045 = vtanh.f32 %v1682_v63 }
 0x16e   : > { %v3036_v4 = vpop.eup %3035  ;;  %v1805_v8 = vadd.f32 1.0, %v3034_v3  ;;  %3047 = vtanh.f32 %v1680_v21  ;;  %v3633_v11 = vpop.f32.mrb[40].mxu0 }
 0x16f   : > { %v2705_v12 = vpop.f32.mrb[40].mxu1  ;;  %v3038_v15 = vpop.eup %3037  ;;  %v1803_v20 = vadd.f32 1.0, %v3036_v4 }
 0x170   : > { %v1461_v1 = vadd.f32 %v2705_v12, %v1172_v13  ;;  %v1213_v23 = vpop.f32.mrb[41].mxu0  ;;  %v1452_v33 = vpop.f32.mrb[41].mxu1  ;;  %v1869_v25 = vmul.f32 0.5, %v1805_v8  ;;  %v1806_v27 = vadd.f32 1.0, %v3038_v15  ;;  %v1183_v13 = vadd.f32 %v3602_v59, %v3587_v45 }
 0x171   : > { %v3040_v24 = vpop.eup %3039  ;;  %v1453_v28 = vadd.f32 %v1452_v33, %v1164_v7  ;;  %v3639_v5 = vpop.f32.mrb[42].mxu0  ;;  %v1867_v61 = vmul.f32 0.5, %v1803_v20  ;;  %v1191_v15 = vadd.f32 %v3602_v59, %v3595_v53 }
 0x172   : > { %v2706_v31 = vpop.f32.mrb[42].mxu1  ;;  %v1804_v35 = vadd.f32 1.0, %v3040_v24  ;;  %v1685_v36 = vmul.f32 0.5, %v1461_v1  ;;  %v1216_v29 = vpop.f32.mrb[43].mxu0  ;;  %1934 = vst.msk [vmem:[%s3642_s12 + $0x10] sm:$0xff] %vm1931_vm2, %v1869_v25  ;;  %v1870_v37 = vmul.f32 0.5, %v1806_v27 }
 0x173   : > { %v1455_v39 = vpop.f32.mrb[43].mxu1  ;;  %v1683_v40 = vmul.f32 0.5, %v1453_v28  ;;  %v1464_v43 = vadd.f32 %v2706_v31, %v1175_v57  ;;  %1932 = vst.msk [vmem:[%s3642_s12] sm:$0xff] %vm1931_vm2, %v1867_v61 }
 0x174   : > { %v1456_v44 = vadd.f32 %v1455_v39, %v1167_v19  ;;  %v1868_v47 = vmul.f32 0.5, %v1804_v35  ;;  %3049 = vtanh.f32 %v1685_v36  ;;  %1935 = vst.msk [vmem:[%s3642_s12 + $0x18] sm:$0xff] %vm1931_vm2, %v1870_v37  ;;  %v1204_v39 = vadd.f32 %v3602_v59, %v3618_v32 }
 0x175   : > { %3051 = vtanh.f32 %v1683_v40  ;;  %v1686_v17 = vmul.f32 0.5, %v1464_v43  ;;  %v3042_v9 = vpop.eup %3041  ;;  %v1196_v40 = vadd.f32 %v3602_v59, %v3607_v0  ;;  %v1199_v32 = vadd.f32 %v3602_v59, %v3612_v16 }
 0x176   : > { %v1684_v51 = vmul.f32 0.5, %v1456_v44  ;;  %1933 = vst.msk [vmem:[%s3642_s12 + $0x8] sm:$0xff] %vm1931_vm2, %v1868_v47  ;;  %v3044_v55 = vpop.eup %3043  ;;  %v1809_v60 = vadd.f32 1.0, %v3042_v9  ;;  %v3656_v63 = vpop.f32.mrb[44].mxu0 }
 0x177   : > { %3053 = vtanh.f32 %v1686_v17  ;;  %v2709_v21 = vpop.f32.mrb[44].mxu1  ;;  %v3046_v3 = vpop.eup %3045  ;;  %v1807_v4 = vadd.f32 1.0, %v3044_v55 }
 0x178   : > { %3055 = vtanh.f32 %v1684_v51  ;;  %v1477_v7 = vadd.f32 %v2709_v21, %v1188_v52  ;;  %v1221_v49 = vpop.f32.mrb[45].mxu0  ;;  %v1468_v8 = vpop.f32.mrb[45].mxu1  ;;  %v1873_v41 = vmul.f32 0.5, %v1809_v60  ;;  %v1810_v19 = vadd.f32 1.0, %v3046_v3 }
 0x179   : > { %v3048_v12 = vpop.eup %3047  ;;  %v1469_v20 = vadd.f32 %v1468_v8, %v1180_v56  ;;  %v3662_v1 = vpop.f32.mrb[46].mxu0  ;;  %v1871_v33 = vmul.f32 0.5, %v1807_v4  ;;  %v1207_v56 = vadd.f32 %v3602_v59, %v3624_v48 }
 0x17a   : > { %v2710_v23 = vpop.f32.mrb[46].mxu1  ;;  %v1808_v45 = vadd.f32 1.0, %v3048_v12  ;;  %v1689_v24 = vmul.f32 0.5, %v1477_v7  ;;  %v1224_v57 = vpop.f32.mrb[47].mxu0  ;;  %1938 = vst.msk [vmem:[%s3642_s12 + $0x30] sm:$0xff] %vm1931_vm2, %v1873_v41  ;;  %v1874_v27 = vmul.f32 0.5, %v1810_v19 }
 0x17b   : > { %v1471_v25 = vpop.f32.mrb[47].mxu1  ;;  %v1687_v28 = vmul.f32 0.5, %v1469_v20  ;;  %v1480_v31 = vadd.f32 %v2710_v23, %v1191_v15  ;;  %1936 = vst.msk [vmem:[%s3642_s12 + $0x20] sm:$0xff] %vm1931_vm2, %v1871_v33 }
 0x17c   : > { %v1472_v53 = vadd.f32 %v1471_v25, %v1183_v13  ;;  %v1872_v61 = vmul.f32 0.5, %v1808_v45  ;;  %3057 = vtanh.f32 %v1689_v24  ;;  %1939 = vst.msk [vmem:[%s3642_s12 + $0x38] sm:$0xff] %vm1931_vm2, %v1874_v27  ;;  %v1220_v24 = vadd.f32 %v3602_v59, %v3656_v63 }
 0x17d   : > { %3059 = vtanh.f32 %v1687_v28  ;;  %v1690_v35 = vmul.f32 0.5, %v1480_v31  ;;  %v1212_v25 = vadd.f32 %v3602_v59, %v3633_v11  ;;  %v1215_v63 = vadd.f32 %v3602_v59, %v3639_v5 }
 0x17e   : > { %v1688_v36 = vmul.f32 0.5, %v1472_v53  ;;  %v3050_v29 = vpop.eup %3049  ;;  %1937 = vst.msk [vmem:[%s3642_s12 + $0x28] sm:$0xff] %vm1931_vm2, %v1872_v61  ;;  %v3676_v44 = vpop.f32.mrb[48].mxu0  ;;  %v1223_v11 = vadd.f32 %v3602_v59, %v3662_v1 }
 0x17f   : > { %v3052_v37 = vpop.eup %3051  ;;  %v1813_v43 = vadd.f32 1.0, %v3050_v29  ;;  %3061 = vtanh.f32 %v1690_v35  ;;  %v2713_v47 = vpop.f32.mrb[48].mxu1 }
 0x180   : > { %v1811_v17 = vadd.f32 1.0, %v3052_v37  ;;  %3063 = vtanh.f32 %v1688_v36  ;;  %v1493_v51 = vadd.f32 %v2713_v47, %v1204_v39  ;;  %v1229_v9 = vpop.f32.mrb[49].mxu0  ;;  %v1484_v52 = vpop.f32.mrb[49].mxu1 }
 0x181   : > { %v3054_v55 = vpop.eup %3053  ;;  %v1877_v0 = vmul.f32 0.5, %v1813_v43  ;;  %v1485_v60 = vadd.f32 %v1484_v52, %v1196_v40  ;;  %v3682_v21 = vpop.f32.mrb[50].mxu0 }
 0x182   : > { %v2714_v3 = vpop.f32.mrb[50].mxu1  ;;  %v3056_v13 = vpop.eup %3055  ;;  %v1875_v4 = vmul.f32 0.5, %v1811_v17  ;;  %v1814_v7 = vadd.f32 1.0, %v3054_v55  ;;  %v1693_v49 = vmul.f32 0.5, %v1493_v51 }
 0x183   : > { %v1232_v8 = vpop.f32.mrb[51].mxu0  ;;  %v1487_v12 = vpop.f32.mrb[51].mxu1  ;;  %1942 = vst.msk [vmem:[%s3642_s12 + $0x50] sm:$0xff] %vm1931_vm2, %v1877_v0  ;;  %v1812_v15 = vadd.f32 1.0, %v3056_v13  ;;  %v1691_v16 = vmul.f32 0.5, %v1485_v60  ;;  %v1496_v41 = vadd.f32 %v2714_v3, %v1207_v56 }
 0x184   : > { %v1488_v48 = vadd.f32 %v1487_v12, %v1199_v32  ;;  %1940 = vst.msk [vmem:[%s3642_s12 + $0x40] sm:$0xff] %vm1931_vm2, %v1875_v4  ;;  %v1878_v19 = vmul.f32 0.5, %v1814_v7  ;;  %3065 = vtanh.f32 %v1693_v49  ;;  %v1228_v8 = vadd.f32 %v3602_v59, %v3676_v44 }
 0x185   : > { %v1876_v20 = vmul.f32 0.5, %v1812_v15  ;;  %3067 = vtanh.f32 %v1691_v16  ;;  %v1694_v23 = vmul.f32 0.5, %v1496_v41 }
 0x186   : > { %v1692_v33 = vmul.f32 0.5, %v1488_v48  ;;  %v3058_v45 = vpop.eup %3057  ;;  %1943 = vst.msk [vmem:[%s3642_s12 + $0x58] sm:$0xff] %vm1931_vm2, %v1878_v19  ;;  %v1235_v28 = vpop.f32.mrb[52].mxu0 }
 0x187   : > { %v3060_v57 = vpop.eup %3059  ;;  %1941 = vst.msk [vmem:[%s3642_s12 + $0x48] sm:$0xff] %vm1931_vm2, %v1876_v20  ;;  %v1817_v27 = vadd.f32 1.0, %v3058_v45  ;;  %3069 = vtanh.f32 %v1694_v23  ;;  %v2717_v31 = vpop.f32.mrb[52].mxu1  ;;  %v1236_v7 = vadd.f32 %v3602_v59, %v1235_v28  ;;  %v1231_v45 = vadd.f32 %v3602_v59, %v3682_v21 }
 0x188   : > { %v1815_v53 = vadd.f32 1.0, %v3060_v57  ;;  %3071 = vtanh.f32 %v1692_v33  ;;  %v1509_v61 = vadd.f32 %v2717_v31, %v1220_v24  ;;  %v1237_v35 = vpop.f32.mrb[53].mxu0  ;;  %v1500_v36 = vpop.f32.mrb[53].mxu1 }
 0x189   : > { %v3062_v29 = vpop.eup %3061  ;;  %v1881_v39 = vmul.f32 0.5, %v1817_v27  ;;  %v1501_v37 = vadd.f32 %v1500_v36, %v1212_v25  ;;  %v1238_v40 = vpop.f32.mrb[54].mxu0 }
 0x18a   : > { %v2718_v43 = vpop.f32.mrb[54].mxu1  ;;  %v3064_v47 = vpop.eup %3063  ;;  %v1879_v17 = vmul.f32 0.5, %v1815_v53  ;;  %v1818_v51 = vadd.f32 1.0, %v3062_v29  ;;  %v1697_v9 = vmul.f32 0.5, %v1509_v61  ;;  %v1239_v24 = vadd.f32 %v3602_v59, %v1238_v40 }
 0x18b   : > { %v1240_v52 = vpop.f32.mrb[55].mxu0  ;;  %v1503_v55 = vpop.f32.mrb[55].mxu1  ;;  %1946 = vst.msk [vmem:[%s3642_s12 + $0x70] sm:$0xff] %vm1931_vm2, %v1881_v39  ;;  %v1816_v32 = vadd.f32 1.0, %v3064_v47  ;;  %v1695_v5 = vmul.f32 0.5, %v1501_v37  ;;  %v1512_v56 = vadd.f32 %v2718_v43, %v1223_v11 }
 0x18c   : > { %v1504_v0 = vadd.f32 %v1503_v55, %v1215_v63  ;;  %1944 = vst.msk [vmem:[%s3642_s12 + $0x60] sm:$0xff] %vm1931_vm2, %v1879_v17  ;;  %v1882_v1 = vmul.f32 0.5, %v1818_v51  ;;  %3073 = vtanh.f32 %v1697_v9 }
 0x18d   : > { %v1880_v60 = vmul.f32 0.5, %v1816_v32  ;;  %3075 = vtanh.f32 %v1695_v5  ;;  %v1698_v3 = vmul.f32 0.5, %v1512_v56 }
 0x18e   : > { %v1696_v13 = vmul.f32 0.5, %v1504_v0  ;;  %v3066_v4 = vpop.eup %3065  ;;  %1947 = vst.msk [vmem:[%s3642_s12 + $0x78] sm:$0xff] %vm1931_vm2, %v1882_v1  ;;  %v1243_v15 = vpop.f32.mrb[56].mxu0 }
 0x18f   : > { %v3068_v49 = vpop.eup %3067  ;;  %1945 = vst.msk [vmem:[%s3642_s12 + $0x68] sm:$0xff] %vm1931_vm2, %v1880_v60  ;;  %v1821_v12 = vadd.f32 1.0, %v3066_v4  ;;  %3077 = vtanh.f32 %v1698_v3  ;;  %v2721_v16 = vpop.f32.mrb[56].mxu1  ;;  %v1244_v51 = vadd.f32 %v3602_v59, %v1243_v15 }
 0x190   : > { %v1819_v41 = vadd.f32 1.0, %v3068_v49  ;;  %3079 = vtanh.f32 %v1696_v13  ;;  %v1525_v48 = vadd.f32 %v2721_v16, %v1236_v7  ;;  %v1245_v19 = vpop.f32.mrb[57].mxu0  ;;  %v1516_v20 = vpop.f32.mrb[57].mxu1 }
 0x191   : > { %v3070_v23 = vpop.eup %3069  ;;  %v1885_v33 = vmul.f32 0.5, %v1821_v12  ;;  %v1517_v57 = vadd.f32 %v1516_v20, %v1228_v8  ;;  %v1246_v44 = vpop.f32.mrb[58].mxu0 }
 0x192   : > { %v2722_v25 = vpop.f32.mrb[58].mxu1  ;;  %v3072_v27 = vpop.eup %3071  ;;  %v1883_v28 = vmul.f32 0.5, %v1819_v41  ;;  %v1822_v31 = vadd.f32 1.0, %v3070_v23  ;;  %v1701_v53 = vmul.f32 0.5, %v1525_v48  ;;  %v1247_v60 = vadd.f32 %v3602_v59, %v1246_v44 }
 0x193   : > { %v1248_v61 = vpop.f32.mrb[59].mxu0  ;;  %v1519_v35 = vpop.f32.mrb[59].mxu1  ;;  %1950 = vst.msk [vmem:[%s3642_s12 + $0x90] sm:$0xff] %vm1931_vm2, %v1885_v33  ;;  %v1820_v36 = vadd.f32 1.0, %v3072_v27  ;;  %v1699_v29 = vmul.f32 0.5, %v1517_v57  ;;  %v1528_v63 = vadd.f32 %v2722_v25, %v1239_v24 }
 0x194   : > { %v1520_v21 = vadd.f32 %v1519_v35, %v1231_v45  ;;  %1948 = vst.msk [vmem:[%s3642_s12 + $0x80] sm:$0xff] %vm1931_vm2, %v1883_v28  ;;  %v1886_v39 = vmul.f32 0.5, %v1822_v31  ;;  %3081 = vtanh.f32 %v1701_v53 }
 0x195   : > { %v1884_v11 = vmul.f32 0.5, %v1820_v36  ;;  %3083 = vtanh.f32 %v1699_v29  ;;  %v1702_v37 = vmul.f32 0.5, %v1528_v63 }
 0x196   : > { %v1700_v40 = vmul.f32 0.5, %v1520_v21  ;;  %v3074_v43 = vpop.eup %3073  ;;  %1951 = vst.msk [vmem:[%s3642_s12 + $0x98] sm:$0xff] %vm1931_vm2, %v1886_v39  ;;  %v1251_v9 = vpop.f32.mrb[60].mxu0 }
 0x197   : > { %v3076_v47 = vpop.eup %3075  ;;  %1949 = vst.msk [vmem:[%s3642_s12 + $0x88] sm:$0xff] %vm1931_vm2, %v1884_v11  ;;  %v1825_v17 = vadd.f32 1.0, %v3074_v43  ;;  %3085 = vtanh.f32 %v1702_v37  ;;  %v2725_v52 = vpop.f32.mrb[60].mxu1  ;;  %v1252_v32 = vadd.f32 %v3602_v59, %v1251_v9 }
 0x198   : > { %v1823_v55 = vadd.f32 1.0, %v3076_v47  ;;  %3087 = vtanh.f32 %v1700_v40  ;;  %v1253_v5 = vpop.f32.mrb[61].mxu0  ;;  %v1532_v56 = vpop.f32.mrb[61].mxu1 }
 0x199   : > { %v3078_v0 = vpop.eup %3077  ;;  %v1889_v1 = vmul.f32 0.5, %v1825_v17  ;;  %v1533_v3 = vadd.f32 %v1532_v56, %v1244_v51  ;;  %v1254_v13 = vpop.f32.mrb[62].mxu0  ;;  %v1541_v12 = vadd.f32 %v2725_v52, %v1252_v32 }
 0x19a   : > { %v2726_v4 = vpop.f32.mrb[62].mxu1  ;;  %v3080_v7 = vpop.eup %3079  ;;  %v1887_v49 = vmul.f32 0.5, %v1823_v55  ;;  %v1826_v8 = vadd.f32 1.0, %v3078_v0  ;;  %v1255_v15 = vadd.f32 %v3602_v59, %v1254_v13 }
 0x19b   : > { %v1256_v16 = vpop.f32.mrb[63].mxu0  ;;  %v1535_v41 = vpop.f32.mrb[63].mxu1  ;;  %1954 = vst.msk [vmem:[%s3642_s12 + $0xb0] sm:$0xff] %vm1931_vm2, %v1889_v1  ;;  %v1824_v48 = vadd.f32 1.0, %v3080_v7  ;;  %v1703_v19 = vmul.f32 0.5, %v1533_v3  ;;  %v1705_v33 = vmul.f32 0.5, %v1541_v12 }
 0x19c   : > { %v1536_v20 = vadd.f32 %v1535_v41, %v1247_v60  ;;  %1952 = vst.msk [vmem:[%s3642_s12 + $0xa0] sm:$0xff] %vm1931_vm2, %v1887_v49  ;;  %v1890_v23 = vmul.f32 0.5, %v1826_v8  ;;  %v1544_v45 = vadd.f32 %v2726_v4, %v1255_v15 }
 0x19d   : > { %v1888_v24 = vmul.f32 0.5, %v1824_v48  ;;  %3089 = vtanh.f32 %v1703_v19 }
 0x19e   : > { %v1704_v57 = vmul.f32 0.5, %v1536_v20  ;;  %v3082_v44 = vpop.eup %3081  ;;  %1955 = vst.msk [vmem:[%s3642_s12 + $0xb8] sm:$0xff] %vm1931_vm2, %v1890_v23  ;;  %3091 = vtanh.f32 %v1705_v33  ;;  %v1706_v25 = vmul.f32 0.5, %v1544_v45  ;;  %v1259_v31 = vpop.f32.mrb[64].mxu0 }
 0x19f   : > { %v3084_v27 = vpop.eup %3083  ;;  %1953 = vst.msk [vmem:[%s3642_s12 + $0xa8] sm:$0xff] %vm1931_vm2, %v1888_v24  ;;  %v1829_v28 = vadd.f32 1.0, %v3082_v44  ;;  %v2729_v53 = vpop.f32.mrb[64].mxu1  ;;  %v1260_v35 = vadd.f32 %v3602_v59, %v1259_v31 }
 0x1a0   : > { %3093 = vtanh.f32 %v1704_v57  ;;  %v1827_v61 = vadd.f32 1.0, %v3084_v27  ;;  %v1261_v36 = vpop.f32.mrb[65].mxu0  ;;  %v1548_v29 = vpop.f32.mrb[65].mxu1 }
 0x1a1   : > { %3095 = vtanh.f32 %v1706_v25  ;;  %v3086_v63 = vpop.eup %3085  ;;  %v1893_v21 = vmul.f32 0.5, %v1829_v28  ;;  %v1262_v39 = vpop.f32.mrb[66].mxu0  ;;  %v1549_v47 = vadd.f32 %v1548_v29, %v1260_v35 }
 0x1a2   : > { %v2730_v11 = vpop.f32.mrb[66].mxu1  ;;  %v3088_v37 = vpop.eup %3087  ;;  %v1891_v40 = vmul.f32 0.5, %v1827_v61  ;;  %v1830_v43 = vadd.f32 1.0, %v3086_v63  ;;  %v1263_v17 = vadd.f32 %v3602_v59, %v1262_v39 }
 0x1a3   : > { %v1264_v51 = vpop.f32.mrb[67].mxu0  ;;  %v1551_v9 = vpop.f32.mrb[67].mxu1  ;;  %1958 = vst.msk [vmem:[%s3642_s12 + $0xd0] sm:$0xff] %vm1931_vm2, %v1893_v21  ;;  %v1828_v52 = vadd.f32 1.0, %v3088_v37  ;;  %v1707_v32 = vmul.f32 0.5, %v1549_v47 }
 0x1a4   : > { %1956 = vst.msk [vmem:[%s3642_s12 + $0xc0] sm:$0xff] %vm1931_vm2, %v1891_v40  ;;  %v1894_v55 = vmul.f32 0.5, %v1830_v43  ;;  %v1552_v5 = vadd.f32 %v1551_v9, %v1263_v17 }
 0x1a5   : > { %v1892_v56 = vmul.f32 0.5, %v1828_v52  ;;  %3097 = vtanh.f32 %v1707_v32 }
 0x1a6   : > { %1959 = vst.msk [vmem:[%s3642_s12 + $0xd8] sm:$0xff] %vm1931_vm2, %v1894_v55  ;;  %v1708_v0 = vmul.f32 0.5, %v1552_v5  ;;  %v1267_v60 = vpop.f32.mrb[68].mxu0  ;;  %v3744_v3 = vpop.f32.mrb[68].mxu1 }
 0x1a7   : > { %v3090_v1 = vpop.eup %3089  ;;  %1957 = vst.msk [vmem:[%s3642_s12 + $0xc8] sm:$0xff] %vm1931_vm2, %v1892_v56  ;;  %v1268_v7 = vadd.f32 %v3602_v59, %v1267_v60  ;;  %v1269_v49 = vpop.f32.mrb[69].mxu0 }
 0x1a8   : > { %v3092_v13 = vpop.eup %3091  ;;  %v1831_v4 = vadd.f32 1.0, %v3090_v1  ;;  %3099 = vtanh.f32 %v1708_v0  ;;  %v1564_v8 = vpop.f32.mrb[69].mxu1 }
 0x1a9   : > { %v1833_v15 = vadd.f32 1.0, %v3092_v13  ;;  %v1270_v16 = vpop.f32.mrb[70].mxu0  ;;  %v2734_v41 = vpop.f32.mrb[70].mxu1  ;;  %v1557_v23 = vadd.f32 %v2729_v53, %v1268_v7 }
 0x1aa   : > { %v3094_v12 = vpop.eup %3093  ;;  %v1895_v19 = vmul.f32 0.5, %v1831_v4  ;;  %v1271_v33 = vadd.f32 %v3602_v59, %v1270_v16  ;;  %v1272_v45 = vpop.f32.mrb[71].mxu0 }
 0x1ab   : > { %v3096_v48 = vpop.eup %3095  ;;  %v1832_v20 = vadd.f32 1.0, %v3094_v12  ;;  %v1567_v24 = vpop.f32.mrb[71].mxu1  ;;  %v1897_v57 = vmul.f32 0.5, %v1833_v15  ;;  %v1709_v27 = vmul.f32 0.5, %v1557_v23 }
 0x1ac   : > { %v1834_v44 = vadd.f32 1.0, %v3096_v48  ;;  %1960 = vst.msk [vmem:[%s3642_s12 + $0xe0] sm:$0xff] %vm1931_vm2, %v1895_v19  ;;  %v1560_v28 = vadd.f32 %v2730_v11, %v1271_v33 }
 0x1ad   : > { %v1896_v25 = vmul.f32 0.5, %v1832_v20  ;;  %1962 = vst.msk [vmem:[%s3642_s12 + $0xf0] sm:$0xff] %vm1931_vm2, %v1897_v57  ;;  %3101 = vtanh.f32 %v1709_v27 }
 0x1ae   : > { %v1898_v31 = vmul.f32 0.5, %v1834_v44  ;;  %v1710_v61 = vmul.f32 0.5, %v1560_v28  ;;  %v1275_v53 = vpop.f32.mrb[72].mxu0  ;;  %v3756_v35 = vpop.f32.mrb[72].mxu1  ;;  %v1332_v44 = vadd.f32 %v3602_v59, %v3547_v2  ;;  %v1327_v2 = vadd.f32 %v3602_v59, %v3545_v62 }
 0x1af   : > { %1961 = vst.msk [vmem:[%s3642_s12 + $0xe8] sm:$0xff] %vm1931_vm2, %v1896_v25  ;;  %v3098_v36 = vpop.eup %3097  ;;  %v1276_v29 = vadd.f32 %v3602_v59, %v1275_v53  ;;  %v1277_v63 = vpop.f32.mrb[73].mxu0 }
 0x1b0   : > { %1963 = vst.msk [vmem:[%s3642_s12 + $0xf8] sm:$0xff] %vm1931_vm2, %v1898_v31  ;;  %3103 = vtanh.f32 %v1710_v61  ;;  %v1580_v21 = vpop.f32.mrb[73].mxu1  ;;  %v1835_v39 = vadd.f32 1.0, %v3098_v36  ;;  %v1278_v11 = vpop.f32.mrb[74].mxu0  ;;  %v1335_v61 = vadd.f32 %v3602_v59, %v3549_v6 }
 0x1b1   : > { %v3759_v37 = vpop.f32.mrb[74].mxu1  ;;  %v1565_v43 = vadd.f32 %v1564_v8, %v1276_v29  ;;  %v1279_v47 = vadd.f32 %v3602_v59, %v1278_v11  ;;  %v1280_v17 = vpop.f32.mrb[75].mxu0 }
 0x1b2   : > { %v3100_v40 = vpop.eup %3099  ;;  %v3762_v51 = vpop.f32.mrb[75].mxu1  ;;  %v1899_v9 = vmul.f32 0.5, %v1835_v39 }
 0x1b3   : > { %v1836_v52 = vadd.f32 1.0, %v3100_v40  ;;  %v1711_v55 = vmul.f32 0.5, %v1565_v43  ;;  %v1568_v32 = vadd.f32 %v1567_v24, %v1279_v47 }
 0x1b4   : > { %1964 = vst.msk [vmem:[%s3642_s12 + $0x100] sm:$0xff] %vm1931_vm2, %v1899_v9 }
 0x1b5   : > { %v1900_v5 = vmul.f32 0.5, %v1836_v52  ;;  %3105 = vtanh.f32 %v1711_v55  ;;  %v1712_v56 = vmul.f32 0.5, %v1568_v32 }
 0x1b6   : > { %v1283_v0 = vpop.f32.mrb[76].mxu0  ;;  %v3768_v1 = vpop.f32.mrb[76].mxu1 }
 0x1b7   : > { %1965 = vst.msk [vmem:[%s3642_s12 + $0x108] sm:$0xff] %vm1931_vm2, %v1900_v5  ;;  %v3102_v60 = vpop.eup %3101  ;;  %3107 = vtanh.f32 %v1712_v56  ;;  %v1284_v13 = vadd.f32 %v3602_v59, %v1283_v0  ;;  %v1285_v4 = vpop.f32.mrb[77].mxu0 }
 0x1b8   : > { %v3771_v7 = vpop.f32.mrb[77].mxu1  ;;  %v1837_v49 = vadd.f32 1.0, %v3102_v60  ;;  %v1286_v8 = vpop.f32.mrb[78].mxu0  ;;  %v1348_v4 = vadd.f32 %v3602_v59, %v3561_v18 }
 0x1b9   : > { %v3773_v12 = vpop.f32.mrb[78].mxu1  ;;  %v1573_v16 = vadd.f32 %v3744_v3, %v1284_v13  ;;  %v1287_v48 = vadd.f32 %v3602_v59, %v1286_v8  ;;  %v1288_v19 = vpop.f32.mrb[79].mxu0  ;;  %v1324_v3 = vadd.f32 %v3602_v59, %v3541_v58  ;;  %v1340_v8 = vadd.f32 %v3602_v59, %v3553_v10 }
 0x1ba   : > { %v3104_v15 = vpop.eup %3103  ;;  %v3777_v20 = vpop.f32.mrb[79].mxu1  ;;  %v1901_v23 = vmul.f32 0.5, %v1837_v49  ;;  %v1351_v19 = vadd.f32 %v3602_v59, %v3565_v22  ;;  %v1356_v10 = vadd.f32 %v3602_v59, %v3569_v26 }
 0x1bb   : > { %v1838_v33 = vadd.f32 1.0, %v3104_v15  ;;  %v1713_v45 = vmul.f32 0.5, %v1573_v16  ;;  %v1576_v24 = vadd.f32 %v2734_v41, %v1287_v48  ;;  %v1343_v15 = vadd.f32 %v3602_v59, %v3557_v14 }
 0x1bc   : > { %1966 = vst.msk [vmem:[%s3642_s12 + $0x110] sm:$0xff] %vm1931_vm2, %v1901_v23 }
 0x1bd   : > { %v1902_v57 = vmul.f32 0.5, %v1838_v33  ;;  %3109 = vtanh.f32 %v1713_v45  ;;  %v1714_v25 = vmul.f32 0.5, %v1576_v24 }
 0x1be   : > { %v1291_v27 = vpop.f32.mrb[80].mxu0  ;;  %v2745_v28 = vpop.f32.mrb[80].mxu1 }
 0x1bf   : > { %1967 = vst.msk [vmem:[%s3642_s12 + $0x118] sm:$0xff] %vm1931_vm2, %v1902_v57  ;;  %v3106_v31 = vpop.eup %3105  ;;  %3111 = vtanh.f32 %v1714_v25  ;;  %v1292_v41 = vadd.f32 %v3602_v59, %v1291_v27  ;;  %v1621_v53 = vadd.f32 %v2745_v28, %v1332_v44  ;;  %v1293_v36 = vpop.f32.mrb[81].mxu0 }
 0x1c0   : > { %v1612_v29 = vpop.f32.mrb[81].mxu1  ;;  %v1839_v63 = vadd.f32 1.0, %v3106_v31  ;;  %v1294_v58 = vpop.f32.mrb[82].mxu0 }
 0x1c1   : > { %v1613_v39 = vadd.f32 %v1612_v29, %v1324_v3  ;;  %v2746_v11 = vpop.f32.mrb[82].mxu1  ;;  %v3108_v40 = vpop.eup %3107  ;;  %v1581_v43 = vadd.f32 %v1580_v21, %v1292_v41  ;;  %v1725_v47 = vmul.f32 0.5, %v1621_v53  ;;  %v1295_v17 = vadd.f32 %v3602_v59, %v1294_v58 }
 0x1c2   : > { %v1624_v6 = vadd.f32 %v2746_v11, %v1335_v61  ;;  %v1296_v9 = vpop.f32.mrb[83].mxu0  ;;  %v1615_v52 = vpop.f32.mrb[83].mxu1  ;;  %v1903_v55 = vmul.f32 0.5, %v1839_v63  ;;  %v1840_v32 = vadd.f32 1.0, %v3108_v40  ;;  %v1364_v40 = vadd.f32 %v3602_v59, %v3577_v34 }
 0x1c3   : > { %v1723_v5 = vmul.f32 0.5, %v1613_v39  ;;  %v1616_v56 = vadd.f32 %v1615_v52, %v1327_v2  ;;  %v1715_v0 = vmul.f32 0.5, %v1581_v43  ;;  %3113 = vtanh.f32 %v1725_v47 }
 0x1c4   : > { %v1584_v62 = vadd.f32 %v3762_v51, %v1295_v17  ;;  %v1726_v60 = vmul.f32 0.5, %v1624_v6  ;;  %1968 = vst.msk [vmem:[%s3642_s12 + $0x120] sm:$0xff] %vm1931_vm2, %v1903_v55  ;;  %v1904_v13 = vmul.f32 0.5, %v1840_v32  ;;  %v1359_v39 = vadd.f32 %v3602_v59, %v3573_v30 }
 0x1c5   : > { %3115 = vtanh.f32 %v1723_v5  ;;  %v1724_v21 = vmul.f32 0.5, %v1616_v56  ;;  %v1367_v43 = vadd.f32 %v3602_v59, %v3581_v38  ;;  %v3826_v30 = vadd.f32 %v3602_v59, %v3589_v46 }
 0x1c6   : > { %3117 = vtanh.f32 %v1715_v0  ;;  %v1716_v49 = vmul.f32 0.5, %v1584_v62  ;;  %1969 = vst.msk [vmem:[%s3642_s12 + $0x128] sm:$0xff] %vm1931_vm2, %v1904_v13  ;;  %v1299_v51 = vpop.f32.mrb[84].mxu0  ;;  %v2749_v16 = vpop.f32.mrb[84].mxu1 }
 0x1c7   : > { %3119 = vtanh.f32 %v1726_v60  ;;  %v3110_v48 = vpop.eup %3109  ;;  %v1300_v18 = vadd.f32 %v3602_v59, %v1299_v51  ;;  %v1637_v23 = vadd.f32 %v2749_v16, %v1348_v4  ;;  %v1301_v33 = vpop.f32.mrb[85].mxu0 }
 0x1c8   : > { %3121 = vtanh.f32 %v1716_v49  ;;  %v1628_v45 = vpop.f32.mrb[85].mxu1  ;;  %v1841_v24 = vadd.f32 1.0, %v3110_v48  ;;  %v1302_v57 = vpop.f32.mrb[86].mxu0 }
 0x1c9   : > { %3123 = vtanh.f32 %v1724_v21  ;;  %v1629_v14 = vadd.f32 %v1628_v45, %v1340_v8  ;;  %v2750_v44 = vpop.f32.mrb[86].mxu1  ;;  %v3112_v25 = vpop.eup %3111  ;;  %v1589_v3 = vadd.f32 %v3756_v35, %v1300_v18  ;;  %v1729_v27 = vmul.f32 0.5, %v1637_v23  ;;  %v3161_v23 = vld [vmem:[%s4098_s2] ss:$0 sm:$0xff] }
 0x1ca   : > { %v1303_v22 = vadd.f32 %v3602_v59, %v1302_v57  ;;  %v1640_v28 = vadd.f32 %v2750_v44, %v1351_v19  ;;  %v1304_v31 = vpop.f32.mrb[87].mxu0  ;;  %v1631_v61 = vpop.f32.mrb[87].mxu1  ;;  %v1905_v41 = vmul.f32 0.5, %v1841_v24  ;;  %v1842_v53 = vadd.f32 1.0, %v3112_v25 }
 0x1cb   : > { %v1727_v36 = vmul.f32 0.5, %v1629_v14  ;;  %v1632_v29 = vadd.f32 %v1631_v61, %v1343_v15  ;;  %v1717_v26 = vmul.f32 0.5, %v1589_v3  ;;  %3125 = vtanh.f32 %v1729_v27 }
 0x1cc   : > { %v1592_v2 = vadd.f32 %v3759_v37, %v1303_v22  ;;  %v1730_v63 = vmul.f32 0.5, %v1640_v28  ;;  %1970 = vst.msk [vmem:[%s3642_s12 + $0x130] sm:$0xff] %vm1931_vm2, %v1905_v41  ;;  %v1906_v35 = vmul.f32 0.5, %v1842_v53  ;;  %v3822_v37 = vadd.f32 %v3602_v59, %v3585_v42 }
 0x1cd   : > { %3127 = vtanh.f32 %v1727_v36  ;;  %v1728_v58 = vmul.f32 0.5, %v1632_v29  ;;  %v3114_v11 = vpop.eup %3113  ;;  %v1380_v25 = vadd.f32 %v3161_v23, %v3593_v50  ;;  %v1383_v28 = vadd.f32 %v3161_v23, %v3597_v54 }
 0x1ce   : > { %3129 = vtanh.f32 %v1717_v26  ;;  %v1718_v47 = vmul.f32 0.5, %v1592_v2  ;;  %1971 = vst.msk [vmem:[%s3642_s12 + $0x138] sm:$0xff] %vm1931_vm2, %v1906_v35  ;;  %v1853_v6 = vadd.f32 1.0, %v3114_v11  ;;  %v1307_v9 = vpop.f32.mrb[88].mxu0  ;;  %v2753_v34 = vpop.f32.mrb[88].mxu1 }
 0x1cf   : > { %v3116_v17 = vpop.eup %3115  ;;  %3131 = vtanh.f32 %v1730_v63  ;;  %v1308_v38 = vadd.f32 %v3602_v59, %v1307_v9  ;;  %v1653_v32 = vadd.f32 %v2753_v34, %v1364_v40  ;;  %v1309_v5 = vpop.f32.mrb[89].mxu0 }
 0x1d0   : > { %v3118_v52 = vpop.eup %3117  ;;  %v1851_v55 = vadd.f32 1.0, %v3116_v17  ;;  %3133 = vtanh.f32 %v1718_v47  ;;  %v1644_v56 = vpop.f32.mrb[89].mxu1  ;;  %v1917_v62 = vmul.f32 0.5, %v1853_v6 }
 0x1d1   : > { %v3120_v42 = vpop.eup %3119  ;;  %v1843_v0 = vadd.f32 1.0, %v3118_v52  ;;  %3135 = vtanh.f32 %v1728_v58  ;;  %v1645_v46 = vadd.f32 %v1644_v56, %v1356_v10  ;;  %v1310_v60 = vpop.f32.mrb[90].mxu0  ;;  %v1597_v8 = vadd.f32 %v3771_v7, %v1308_v38 }
 0x1d2   : > { %v2754_v13 = vpop.f32.mrb[90].mxu1  ;;  %v3122_v21 = vpop.eup %3121  ;;  %v1915_v4 = vmul.f32 0.5, %v1851_v55  ;;  %v1854_v49 = vadd.f32 1.0, %v3120_v42  ;;  %v1733_v15 = vmul.f32 0.5, %v1653_v32  ;;  %1982 = vst.msk [vmem:[%s3642_s12 + $0x190] sm:$0xff] %vm1931_vm2, %v1917_v62  ;;  %v1311_v33 = vadd.f32 %v3161_v23, %v1310_v60 }
 0x1d3   : > { %v1312_v59 = vpop.f32.mrb[91].mxu0  ;;  %v1647_v51 = vpop.f32.mrb[91].mxu1  ;;  %v1907_v48 = vmul.f32 0.5, %v1843_v0  ;;  %v1844_v19 = vadd.f32 1.0, %v3122_v21  ;;  %v1731_v18 = vmul.f32 0.5, %v1645_v46  ;;  %v1719_v10 = vmul.f32 0.5, %v1597_v8 }
 0x1d4   : > { %v3124_v16 = vpop.eup %3123  ;;  %1980 = vst.msk [vmem:[%s3642_s12 + $0x180] sm:$0xff] %vm1931_vm2, %v1915_v4  ;;  %v1918_v45 = vmul.f32 0.5, %v1854_v49  ;;  %3137 = vtanh.f32 %v1733_v15  ;;  %v1600_v14 = vadd.f32 %v3777_v20, %v1311_v33  ;;  %v1656_v57 = vadd.f32 %v2754_v13, %v1367_v43 }
 0x1d5   : > { %v1852_v7 = vadd.f32 1.0, %v3124_v16  ;;  %1972 = vst.msk [vmem:[%s3642_s12 + $0x140] sm:$0xff] %vm1931_vm2, %v1907_v48  ;;  %v1908_v24 = vmul.f32 0.5, %v1844_v19  ;;  %3139 = vtanh.f32 %v1731_v18  ;;  %v3126_v44 = vpop.eup %3125  ;;  %v1648_v27 = vadd.f32 %v1647_v51, %v1359_v39 }
 0x1d6   : > { %1983 = vst.msk [vmem:[%s3642_s12 + $0x198] sm:$0xff] %vm1931_vm2, %v1918_v45  ;;  %3141 = vtanh.f32 %v1719_v10  ;;  %v1857_v31 = vadd.f32 1.0, %v3126_v44  ;;  %v1720_v61 = vmul.f32 0.5, %v1600_v14  ;;  %v1734_v41 = vmul.f32 0.5, %v1656_v57  ;;  %v1315_v53 = vpop.f32.mrb[92].mxu0  ;;  %v2757_v20 = vpop.f32.mrb[92].mxu1 }
 0x1d7   : > { %v1916_v3 = vmul.f32 0.5, %v1852_v7  ;;  %v3128_v22 = vpop.eup %3127  ;;  %1973 = vst.msk [vmem:[%s3642_s12 + $0x148] sm:$0xff] %vm1931_vm2, %v1908_v24  ;;  %v1732_v50 = vmul.f32 0.5, %v1648_v27  ;;  %v1316_v26 = vadd.f32 %v3161_v23, %v1315_v53  ;;  %v1669_v2 = vadd.f32 %v2757_v20, %v1380_v25  ;;  %v1317_v63 = vpop.f32.mrb[93].mxu0 }
 0x1d8   : > { %v3130_v36 = vpop.eup %3129  ;;  %v1855_v29 = vadd.f32 1.0, %v3128_v22  ;;  %v1660_v35 = vpop.f32.mrb[93].mxu1  ;;  %v1921_v54 = vmul.f32 0.5, %v1857_v31  ;;  %3143 = vtanh.f32 %v1720_v61 }
 0x1d9   : > { %1981 = vst.msk [vmem:[%s3642_s12 + $0x188] sm:$0xff] %vm1931_vm2, %v1916_v3  ;;  %v3132_v39 = vpop.eup %3131  ;;  %v1845_v58 = vadd.f32 1.0, %v3130_v36  ;;  %v1661_v11 = vadd.f32 %v1660_v35, %v3822_v37  ;;  %v1318_v40 = vpop.f32.mrb[94].mxu0  ;;  %3145 = vtanh.f32 %v1734_v41  ;;  %v1605_v9 = vadd.f32 %v3768_v1, %v1316_v26 }
 0x1da   : > { %v2758_v43 = vpop.f32.mrb[94].mxu1  ;;  %v3134_v47 = vpop.eup %3133  ;;  %v1919_v17 = vmul.f32 0.5, %v1855_v29  ;;  %v1858_v6 = vadd.f32 1.0, %v3132_v39  ;;  %1986 = vst.msk [vmem:[%s3642_s12 + $0x1b0] sm:$0xff] %vm1931_vm2, %v1921_v54  ;;  %3147 = vtanh.f32 %v1732_v50  ;;  %v1737_v37 = vmul.f32 0.5, %v1669_v2 }
 0x1db   : > { %v1320_v34 = vpop.f32.mrb[95].mxu0  ;;  %v1663_v52 = vpop.f32.mrb[95].mxu1  ;;  %v1909_v38 = vmul.f32 0.5, %v1845_v58  ;;  %v1846_v32 = vadd.f32 1.0, %v3134_v47  ;;  %v1721_v42 = vmul.f32 0.5, %v1605_v9  ;;  %v1735_v0 = vmul.f32 0.5, %v1661_v11 }
 0x1dc   : > { %v3136_v55 = vpop.eup %3135  ;;  %1984 = vst.msk [vmem:[%s3642_s12 + $0x1a0] sm:$0xff] %vm1931_vm2, %v1919_v17  ;;  %v1922_v5 = vmul.f32 0.5, %v1858_v6  ;;  %3149 = vtanh.f32 %v1737_v37  ;;  %v1319_v62 = vadd.f32 %v3161_v23, %v1318_v40  ;;  %v1672_v46 = vadd.f32 %v2758_v43, %v1383_v28 }
 0x1dd   : > { %v1856_v56 = vadd.f32 1.0, %v3136_v55  ;;  %1974 = vst.msk [vmem:[%s3642_s12 + $0x150] sm:$0xff] %vm1931_vm2, %v1909_v38  ;;  %v1910_v1 = vmul.f32 0.5, %v1846_v32  ;;  %3151 = vtanh.f32 %v1721_v42  ;;  %v1664_v21 = vadd.f32 %v1663_v52, %v3826_v30 }
 0x1de   : > { %v3138_v60 = vpop.eup %3137  ;;  %1987 = vst.msk [vmem:[%s3642_s12 + $0x1b8] sm:$0xff] %vm1931_vm2, %v1922_v5  ;;  %3153 = vtanh.f32 %v1735_v0  ;;  %v1608_v8 = vadd.f32 %v3773_v12, %v1319_v62  ;;  %v1738_v15 = vmul.f32 0.5, %v1672_v46 }
 0x1df   : > { %v1920_v13 = vmul.f32 0.5, %v1856_v56  ;;  %v3140_v4 = vpop.eup %3139  ;;  %1975 = vst.msk [vmem:[%s3642_s12 + $0x158] sm:$0xff] %vm1931_vm2, %v1910_v1  ;;  %v1861_v49 = vadd.f32 1.0, %v3138_v60  ;;  %v1736_v16 = vmul.f32 0.5, %v1664_v21 }
 0x1e0   : > { %v3142_v59 = vpop.eup %3141  ;;  %v1859_v51 = vadd.f32 1.0, %v3140_v4  ;;  %v1722_v18 = vmul.f32 0.5, %v1608_v8  ;;  %3155 = vtanh.f32 %v1738_v15 }
 0x1e1   : > { %1985 = vst.msk [vmem:[%s3642_s12 + $0x1a8] sm:$0xff] %vm1931_vm2, %v1920_v13  ;;  %v1847_v48 = vadd.f32 1.0, %v3142_v59  ;;  %v1925_v19 = vmul.f32 0.5, %v1861_v49  ;;  %3157 = vtanh.f32 %v1736_v16 }
 0x1e2   : > { %v1923_v30 = vmul.f32 0.5, %v1859_v51  ;;  %v3144_v23 = vpop.eup %3143  ;;  %3159 = vtanh.f32 %v1722_v18 }
 0x1e3   : > { %v1911_v33 = vmul.f32 0.5, %v1847_v48  ;;  %1990 = vst.msk [vmem:[%s3642_s12 + $0x1d0] sm:$0xff] %vm1931_vm2, %v1925_v19  ;;  %v3146_v12 = vpop.eup %3145  ;;  %v1848_v45 = vadd.f32 1.0, %v3144_v23 }
 0x1e4   : > { %1988 = vst.msk [vmem:[%s3642_s12 + $0x1c0] sm:$0xff] %vm1931_vm2, %v1923_v30  ;;  %v3148_v7 = vpop.eup %3147  ;;  %v1862_v10 = vadd.f32 1.0, %v3146_v12 }
 0x1e5   : > { %1976 = vst.msk [vmem:[%s3642_s12 + $0x160] sm:$0xff] %vm1931_vm2, %v1911_v33  ;;  %v1912_v24 = vmul.f32 0.5, %v1848_v45  ;;  %v1860_v14 = vadd.f32 1.0, %v3148_v7 }
 0x1e6   : > { %v3150_v57 = vpop.eup %3149  ;;  %v1926_v44 = vmul.f32 0.5, %v1862_v10 }
 0x1e7   : > { %v3152_v25 = vpop.eup %3151  ;;  %1977 = vst.msk [vmem:[%s3642_s12 + $0x168] sm:$0xff] %vm1931_vm2, %v1912_v24  ;;  %v1924_v3 = vmul.f32 0.5, %v1860_v14  ;;  %v1865_v27 = vadd.f32 1.0, %v3150_v57 }
 0x1e8   : > { %v3154_v22 = vpop.eup %3153  ;;  %1991 = vst.msk [vmem:[%s3642_s12 + $0x1d8] sm:$0xff] %vm1931_vm2, %v1926_v44  ;;  %v1849_v28 = vadd.f32 1.0, %v3152_v25 }
 0x1e9   : > { %1989 = vst.msk [vmem:[%s3642_s12 + $0x1c8] sm:$0xff] %vm1931_vm2, %v1924_v3  ;;  %v1929_v31 = vmul.f32 0.5, %v1865_v27  ;;  %v1863_v61 = vadd.f32 1.0, %v3154_v22 }
 0x1ea   : > { %v3156_v41 = vpop.eup %3155  ;;  %v1913_v53 = vmul.f32 0.5, %v1849_v28 }
 0x1eb   : > { %v3158_v20 = vpop.eup %3157  ;;  %1994 = vst.msk [vmem:[%s3642_s12 + $0x1f0] sm:$0xff] %vm1931_vm2, %v1929_v31  ;;  %v1927_v36 = vmul.f32 0.5, %v1863_v61  ;;  %v1866_v29 = vadd.f32 1.0, %v3156_v41  ;;  %2002 = sbr.rel (!%p3296_p4) target bundleno = 570 (0x23a), region = 36 }
 0x1ec   : > { %v3160_v50 = vpop.eup %3159  ;;  %1978 = vst.msk [vmem:[%s3642_s12 + $0x170] sm:$0xff] %vm1931_vm2, %v1913_v53  ;;  %v1864_v26 = vadd.f32 1.0, %v3158_v20 }
 0x1ed   : > { %1992 = vst.msk [vmem:[%s3642_s12 + $0x1e0] sm:$0xff] %vm1931_vm2, %v1927_v36  ;;  %v1850_v2 = vadd.f32 1.0, %v3160_v50  ;;  %v1930_v63 = vmul.f32 0.5, %v1866_v29 }
 0x1ee   : > { %v1928_v35 = vmul.f32 0.5, %v1864_v26 }
 0x1ef   : > { %v1914_v39 = vmul.f32 0.5, %v1850_v2  ;;  %1995 = vst.msk [vmem:[%s3642_s12 + $0x1f8] sm:$0xff] %vm1931_vm2, %v1930_v63 }
 0x1f0   : > { %1993 = vst.msk [vmem:[%s3642_s12 + $0x1e8] sm:$0xff] %vm1931_vm2, %v1928_v35 }
 0x1f1   : > { %1979 = vst.msk [vmem:[%s3642_s12 + $0x178] sm:$0xff] %vm1931_vm2, %v1914_v39 }
 0x1f2   : > { %s4110_s17 = smov (!%p2005_p8, %s2004_s17), 64 }
 0x1f3   : > { %s2624_s25 = sshll.u32 %s4110_s17, 7 }
 0x1f4   : > { %p2627_p9 = scmp.eq.s32.totalorder %s2624_s25, 0 }
 0x1f5   : > { %s3903_s26 = sshrl.u32 (!%p2627_p9), %s4110_s17, 6 }
 0x1f6   : > { %2013 = sbr.rel (%p2627_p9) target bundleno = 570 (0x23a), region = 40  ;;  %p2628_p10 = scmp.le.s32.totalorder (!%p2627_p9), %s3903_s26, 0 }
 0x1fd   : > { %2419 = sbr.rel (%p2628_p10) target bundleno = 549 (0x225), region = 116  ;;  %s4101_s15 = smov (!%p2628_p10), %s3897_s24 }
 0x1fe   : > { %s4102_s20 = smov (!%p2628_p10), %s3642_s12  ;;  %s3912_s23 = smov (!%p2628_p10), 0  }
 0x1ff   : > { %s3914_s27 = smov (!%p2628_p10), 0  }
 0x204 LB: >> { %v2201_v58 = vld [vmem:[%s3224_s20] sm:$0xff]  ;;  %v2203_v54 = vld [vmem:[%s3224_s20 + $0x8] sm:$0xff]  ;;  %v2205_v11 = vld [vmem:[%s3224_s20 + $0x10] sm:$0xff]  ;;  %s2329_s28 = sadd.s32 1, %s3228_s23  ;;  %s2195_s27 = sadd.s32 1, %s3232_s27   ;;  %s3232_s27 = sphi %s3914_s27, %s2195_s27   ;;  %s3228_s23 = sphi %s3912_s23, %s4105_s23   ;;  %s3224_s20 = sphi %s4102_s20, %s4104_s20   ;;  %s3220_s15 = sphi %s4101_s15, %s4103_s15  }
 0x205   : >> { %2202 = vst [vmem:[%s3220_s15] sm:$0xff] %v2201_v58  ;;  %2204 = vst [vmem:[%s3220_s15 + $0x8] sm:$0xff] %v2203_v54  ;;  %v2207_v40 = vld [vmem:[%s3224_s20 + $0x18] sm:$0xff]  ;;  %v2209_v43 = vld [vmem:[%s3224_s20 + $0x20] sm:$0xff]  ;;  %p2330_p11 = scmp.ge.s32.totalorder %s2329_s28, %s3903_s26  ;;  %p2194_p12 = scmp.ge.s32.totalorder %s2195_s27, %s3903_s26 }
 0x206   : >> { %2206 = vst [vmem:[%s3220_s15 + $0x10] sm:$0xff] %v2205_v11  ;;  %v2211_v47 = vld [vmem:[%s3224_s20 + $0x28] sm:$0xff]  ;;  %2208 = vst [vmem:[%s3220_s15 + $0x18] sm:$0xff] %v2207_v40  ;;  %v2213_v17 = vld [vmem:[%s3224_s20 + $0x30] sm:$0xff] }
 0x207   : >> { %2210 = vst [vmem:[%s3220_s15 + $0x20] sm:$0xff] %v2209_v43  ;;  %2212 = vst [vmem:[%s3220_s15 + $0x28] sm:$0xff] %v2211_v47  ;;  %v2215_v6 = vld [vmem:[%s3224_s20 + $0x38] sm:$0xff]  ;;  %v2217_v9 = vld [vmem:[%s3224_s20 + $0x40] sm:$0xff]  ;;  %s4112_s28 = smov (%p2330_p11, %s2329_s28), 0 }
 0x208   : >> { %2214 = vst [vmem:[%s3220_s15 + $0x30] sm:$0xff] %v2213_v17  ;;  %2216 = vst [vmem:[%s3220_s15 + $0x38] sm:$0xff] %v2215_v6  ;;  %v2219_v34 = vld [vmem:[%s3224_s20 + $0x48] sm:$0xff]  ;;  %v2221_v52 = vld [vmem:[%s3224_s20 + $0x50] sm:$0xff]  ;;  %s2629_s29 = sshll.u32 %s4112_s28, 9  ;;  %s4105_s23 = smov %s4112_s28 }
 0x209   : >> { %2218 = vst [vmem:[%s3220_s15 + $0x40] sm:$0xff] %v2217_v9  ;;  %v2223_v55 = vld [vmem:[%s3224_s20 + $0x58] sm:$0xff]  ;;  %2220 = vst [vmem:[%s3220_s15 + $0x48] sm:$0xff] %v2219_v34  ;;  %v2225_v38 = vld [vmem:[%s3224_s20 + $0x60] sm:$0xff]  ;;  %s3970_s30 = scalar_lea.vmem %s3642_s12, %s2629_s29 [#allocation2]   ;;  %s3973_s4 = scalar_lea.vmem %s3897_s24, %s2629_s29  }
 0x20a   : >> { %2222 = vst [vmem:[%s3220_s15 + $0x50] sm:$0xff] %v2221_v52  ;;  %2224 = vst [vmem:[%s3220_s15 + $0x58] sm:$0xff] %v2223_v55  ;;  %v2227_v32 = vld [vmem:[%s3224_s20 + $0x68] sm:$0xff]  ;;  %v2229_v37 = vld [vmem:[%s3224_s20 + $0x70] sm:$0xff] }
 0x20b   : >> { %2226 = vst [vmem:[%s3220_s15 + $0x60] sm:$0xff] %v2225_v38  ;;  %2228 = vst [vmem:[%s3220_s15 + $0x68] sm:$0xff] %v2227_v32  ;;  %v2231_v5 = vld [vmem:[%s3224_s20 + $0x78] sm:$0xff]  ;;  %v2233_v56 = vld [vmem:[%s3224_s20 + $0x80] sm:$0xff] }
 0x20c   : >> { %2230 = vst [vmem:[%s3220_s15 + $0x70] sm:$0xff] %v2229_v37  ;;  %v2235_v42 = vld [vmem:[%s3224_s20 + $0x88] sm:$0xff]  ;;  %2232 = vst [vmem:[%s3220_s15 + $0x78] sm:$0xff] %v2231_v5  ;;  %v2237_v0 = vld [vmem:[%s3224_s20 + $0x90] sm:$0xff] }
 0x20d   : >> { %2234 = vst [vmem:[%s3220_s15 + $0x80] sm:$0xff] %v2233_v56  ;;  %2236 = vst [vmem:[%s3220_s15 + $0x88] sm:$0xff] %v2235_v42  ;;  %v2239_v1 = vld [vmem:[%s3224_s20 + $0x98] sm:$0xff]  ;;  %v2241_v62 = vld [vmem:[%s3224_s20 + $0xa0] sm:$0xff] }
 0x20e   : >> { %2238 = vst [vmem:[%s3220_s15 + $0x90] sm:$0xff] %v2237_v0  ;;  %2240 = vst [vmem:[%s3220_s15 + $0x98] sm:$0xff] %v2239_v1  ;;  %v2243_v46 = vld [vmem:[%s3224_s20 + $0xa8] sm:$0xff]  ;;  %v2245_v60 = vld [vmem:[%s3224_s20 + $0xb0] sm:$0xff] }
 0x20f   : >> { %2242 = vst [vmem:[%s3220_s15 + $0xa0] sm:$0xff] %v2241_v62  ;;  %v2247_v13 = vld [vmem:[%s3224_s20 + $0xb8] sm:$0xff]  ;;  %2244 = vst [vmem:[%s3220_s15 + $0xa8] sm:$0xff] %v2243_v46  ;;  %v2249_v21 = vld [vmem:[%s3224_s20 + $0xc0] sm:$0xff] }
 0x210   : >> { %2246 = vst [vmem:[%s3220_s15 + $0xb0] sm:$0xff] %v2245_v60  ;;  %2248 = vst [vmem:[%s3220_s15 + $0xb8] sm:$0xff] %v2247_v13  ;;  %v2251_v4 = vld [vmem:[%s3224_s20 + $0xc8] sm:$0xff]  ;;  %v2253_v49 = vld [vmem:[%s3224_s20 + $0xd0] sm:$0xff] }
 0x211   : >> { %2250 = vst [vmem:[%s3220_s15 + $0xc0] sm:$0xff] %v2249_v21  ;;  %2252 = vst [vmem:[%s3220_s15 + $0xc8] sm:$0xff] %v2251_v4  ;;  %v2255_v8 = vld [vmem:[%s3224_s20 + $0xd8] sm:$0xff]  ;;  %v2257_v15 = vld [vmem:[%s3224_s20 + $0xe0] sm:$0xff] }
 0x212   : >> { %2254 = vst [vmem:[%s3220_s15 + $0xd0] sm:$0xff] %v2253_v49  ;;  %v2259_v59 = vld [vmem:[%s3224_s20 + $0xe8] sm:$0xff]  ;;  %2256 = vst [vmem:[%s3220_s15 + $0xd8] sm:$0xff] %v2255_v8  ;;  %v2261_v51 = vld [vmem:[%s3224_s20 + $0xf0] sm:$0xff] }
 0x213   : >> { %2258 = vst [vmem:[%s3220_s15 + $0xe0] sm:$0xff] %v2257_v15  ;;  %2260 = vst [vmem:[%s3220_s15 + $0xe8] sm:$0xff] %v2259_v59  ;;  %v2263_v16 = vld [vmem:[%s3224_s20 + $0xf8] sm:$0xff]  ;;  %v2265_v48 = vld [vmem:[%s3224_s20 + $0x100] sm:$0xff] }
 0x214   : >> { %2262 = vst [vmem:[%s3220_s15 + $0xf0] sm:$0xff] %v2261_v51  ;;  %2264 = vst [vmem:[%s3220_s15 + $0xf8] sm:$0xff] %v2263_v16  ;;  %v2267_v19 = vld [vmem:[%s3224_s20 + $0x108] sm:$0xff]  ;;  %v2269_v18 = vld [vmem:[%s3224_s20 + $0x110] sm:$0xff] }
 0x215   : >> { %2266 = vst [vmem:[%s3220_s15 + $0x100] sm:$0xff] %v2265_v48  ;;  %v2271_v30 = vld [vmem:[%s3224_s20 + $0x118] sm:$0xff]  ;;  %2268 = vst [vmem:[%s3220_s15 + $0x108] sm:$0xff] %v2267_v19  ;;  %v2273_v23 = vld [vmem:[%s3224_s20 + $0x120] sm:$0xff] }
 0x216   : >> { %2270 = vst [vmem:[%s3220_s15 + $0x110] sm:$0xff] %v2269_v18  ;;  %2272 = vst [vmem:[%s3220_s15 + $0x118] sm:$0xff] %v2271_v30  ;;  %v2275_v33 = vld [vmem:[%s3224_s20 + $0x128] sm:$0xff]  ;;  %v2277_v12 = vld [vmem:[%s3224_s20 + $0x130] sm:$0xff] }
 0x217   : >> { %2274 = vst [vmem:[%s3220_s15 + $0x120] sm:$0xff] %v2273_v23  ;;  %2276 = vst [vmem:[%s3220_s15 + $0x128] sm:$0xff] %v2275_v33  ;;  %v2279_v45 = vld [vmem:[%s3224_s20 + $0x138] sm:$0xff]  ;;  %v2281_v7 = vld [vmem:[%s3224_s20 + $0x140] sm:$0xff] }
 0x218   : >> { %2278 = vst [vmem:[%s3220_s15 + $0x130] sm:$0xff] %v2277_v12  ;;  %v2283_v10 = vld [vmem:[%s3224_s20 + $0x148] sm:$0xff]  ;;  %2280 = vst [vmem:[%s3220_s15 + $0x138] sm:$0xff] %v2279_v45  ;;  %v2285_v24 = vld [vmem:[%s3224_s20 + $0x150] sm:$0xff] }
 0x219   : >> { %2282 = vst [vmem:[%s3220_s15 + $0x140] sm:$0xff] %v2281_v7  ;;  %2284 = vst [vmem:[%s3220_s15 + $0x148] sm:$0xff] %v2283_v10  ;;  %v2287_v14 = vld [vmem:[%s3224_s20 + $0x158] sm:$0xff]  ;;  %v2289_v57 = vld [vmem:[%s3224_s20 + $0x160] sm:$0xff] }
 0x21a   : >> { %2286 = vst [vmem:[%s3220_s15 + $0x150] sm:$0xff] %v2285_v24  ;;  %2288 = vst [vmem:[%s3220_s15 + $0x158] sm:$0xff] %v2287_v14  ;;  %v2291_v44 = vld [vmem:[%s3224_s20 + $0x168] sm:$0xff]  ;;  %v2293_v25 = vld [vmem:[%s3224_s20 + $0x170] sm:$0xff] }
 0x21b   : >> { %2290 = vst [vmem:[%s3220_s15 + $0x160] sm:$0xff] %v2289_v57  ;;  %v2295_v3 = vld [vmem:[%s3224_s20 + $0x178] sm:$0xff]  ;;  %2292 = vst [vmem:[%s3220_s15 + $0x168] sm:$0xff] %v2291_v44  ;;  %v2297_v27 = vld [vmem:[%s3224_s20 + $0x180] sm:$0xff] }
 0x21c   : >> { %2294 = vst [vmem:[%s3220_s15 + $0x170] sm:$0xff] %v2293_v25  ;;  %2296 = vst [vmem:[%s3220_s15 + $0x178] sm:$0xff] %v2295_v3  ;;  %v2299_v22 = vld [vmem:[%s3224_s20 + $0x188] sm:$0xff]  ;;  %v2301_v28 = vld [vmem:[%s3224_s20 + $0x190] sm:$0xff] }
 0x21d   : >> { %2298 = vst [vmem:[%s3220_s15 + $0x180] sm:$0xff] %v2297_v27  ;;  %2300 = vst [vmem:[%s3220_s15 + $0x188] sm:$0xff] %v2299_v22  ;;  %v2303_v31 = vld [vmem:[%s3224_s20 + $0x198] sm:$0xff]  ;;  %v2305_v61 = vld [vmem:[%s3224_s20 + $0x1a0] sm:$0xff] }
 0x21e   : >> { %2302 = vst [vmem:[%s3220_s15 + $0x190] sm:$0xff] %v2301_v28  ;;  %v2307_v41 = vld [vmem:[%s3224_s20 + $0x1a8] sm:$0xff]  ;;  %2304 = vst [vmem:[%s3220_s15 + $0x198] sm:$0xff] %v2303_v31  ;;  %v2309_v53 = vld [vmem:[%s3224_s20 + $0x1b0] sm:$0xff]  ;;  %2197 = sbr.rel (!%p2194_p12) target bundleno = 516 (0x204), region = 122 }
 0x21f   : >> { %2306 = vst [vmem:[%s3220_s15 + $0x1a0] sm:$0xff] %v2305_v61  ;;  %2308 = vst [vmem:[%s3220_s15 + $0x1a8] sm:$0xff] %v2307_v41  ;;  %v2311_v20 = vld [vmem:[%s3224_s20 + $0x1b8] sm:$0xff]  ;;  %v2313_v36 = vld [vmem:[%s3224_s20 + $0x1c0] sm:$0xff] }
 0x220   : >> { %2310 = vst [vmem:[%s3220_s15 + $0x1b0] sm:$0xff] %v2309_v53  ;;  %2312 = vst [vmem:[%s3220_s15 + $0x1b8] sm:$0xff] %v2311_v20  ;;  %v2315_v29 = vld [vmem:[%s3224_s20 + $0x1c8] sm:$0xff]  ;;  %v2317_v50 = vld [vmem:[%s3224_s20 + $0x1d0] sm:$0xff] }
 0x221   : >> { %2314 = vst [vmem:[%s3220_s15 + $0x1c0] sm:$0xff] %v2313_v36  ;;  %v2319_v26 = vld [vmem:[%s3224_s20 + $0x1d8] sm:$0xff]  ;;  %2316 = vst [vmem:[%s3220_s15 + $0x1c8] sm:$0xff] %v2315_v29  ;;  %v2321_v2 = vld [vmem:[%s3224_s20 + $0x1e0] sm:$0xff] }
 0x222   : >> { %2318 = vst [vmem:[%s3220_s15 + $0x1d0] sm:$0xff] %v2317_v50  ;;  %2320 = vst [vmem:[%s3220_s15 + $0x1d8] sm:$0xff] %v2319_v26  ;;  %v2323_v63 = vld [vmem:[%s3224_s20 + $0x1e8] sm:$0xff]  ;;  %v2325_v35 = vld [vmem:[%s3224_s20 + $0x1f0] sm:$0xff] }
 0x223   : >> { %2322 = vst [vmem:[%s3220_s15 + $0x1e0] sm:$0xff] %v2321_v2  ;;  %2324 = vst [vmem:[%s3220_s15 + $0x1e8] sm:$0xff] %v2323_v63  ;;  %v2327_v39 = vld [vmem:[%s3224_s20 + $0x1f8] sm:$0xff]  ;;  %s4104_s20 = smov %s3970_s30 }
 0x224   : >> { %2326 = vst [vmem:[%s3220_s15 + $0x1f0] sm:$0xff] %v2325_v35  ;;  %2328 = vst [vmem:[%s3220_s15 + $0x1f8] sm:$0xff] %v2327_v39  ;;  %s4103_s15 = smov %s3973_s4 }
 0x225 PF: > { %s4078_s5 = sand.u32 63, %s4110_s17   ;;  %s2640_s6 = sshll.u32 %s3903_s26, 9 }
 0x226   : > { %s2340_s9 = scalar_lea.vmem %s3642_s12, %s2640_s6 [#allocation2]   ;;  %s2342_s7 = scalar_lea.vmem %s3897_s24, %s2640_s6  }
 0x227   : > { %p2634_p13 = scmp.le.s32.totalorder %s4078_s5, 0 }
 0x228   : > { %s3234_s8 = smov (!%p2634_p13), %s2342_s7   ;;  %s3238_s10 = smov (!%p2634_p13), %s2340_s9  }
 0x229   : > { %2433 = sbr.rel (%p2634_p13) target bundleno = 570 (0x23a), region = 127  ;;  %s3242_s11 = smov (!%p2634_p13), 0  }
 0x22a   : > { %s3246_s14 = smov (!%p2634_p13), 0  }
 0x230 LB: >> { %v2352_v58 = vld [vmem:[%s3240_s10] sm:$0xff]  ;;  %s2354_s17 = sadd.s32 1, %s3244_s11  ;;  %s2346_s14 = sadd.s32 1, %s3248_s14   ;;  %s3248_s14 = sphi %s3246_s14, %s2346_s14   ;;  %s3244_s11 = sphi %s3242_s11, %s3243_s11   ;;  %s3240_s10 = sphi %s3238_s10, %s2359_s10   ;;  %s3236_s8 = sphi %s3234_s8, %s2360_s8  }
 0x231   : >> { %2353 = vst [vmem:[%s3236_s8] sm:$0xff] %v2352_v58  ;;  %p2355_p0 = scmp.ge.s32.totalorder %s2354_s17, %s4078_s5  ;;  %p2345_p1 = scmp.ge.s32.totalorder %s2346_s14, %s4078_s5 }
 0x233   : >> { %s4114_s17 = smov (%p2355_p0, %s2354_s17), 0  ;;  %2348 = sbr.rel (!%p2345_p1) target bundleno = 560 (0x230), region = 133 }
 0x234   : >> { %s2635_s12 = sshll.u32 %s4114_s17, 3  ;;  %s3243_s11 = smov %s4114_s17  }
 0x235   : >> { %s2359_s10 = scalar_lea.vmem %s2340_s9, %s2635_s12 [#allocation2]   ;;  %s2360_s8 = scalar_lea.vmem %s2342_s7, %s2635_s12  }
 0x23a PF: > { %p10_p2 = scmp.ge.s32.totalorder %s3286_s16, 6   ;;  %s4106_s12 = smov %s3212_s13 }
 0x23b   : > { %s4107_s13 = smov %s3294_s19  ;;  %s4108_s14 = smov %s3286_s16 }
 0x23c   :  { %12 = sbr.rel (!%p10_p2) target bundleno = 2 (0x2), region = 144 }

</bundles_post_ra>
